<compile_context>
chip_gen: v7x
topology: tpu7x:2x2x1
jax: 0.10.0
libtpu: 0.0.40
codegen_flags: <defaults>
</compile_context>

<pallas_src>
import functools

import jax
import jax.numpy as jnp
from jax.experimental import pallas as pl
from jax.experimental.pallas import tpu as pltpu


# ----------------------------------------------------------------------------
# Fused Pallas kernel: y = x @ w (-> f32) ; BatchNorm over rows ; affine ; ReLU
# Each grid step owns a full-M, tn-column slab, so per-column batch statistics
# are computed entirely inside the block.
# ----------------------------------------------------------------------------
def _matmul_bn_relu_kernel(x_ref, w_ref, g_ref, b_ref, o_ref, *, rows):
    # int8 (or bf16) weight tile -> bf16 for the MXU. The per-column int8
    # scale is absorbed exactly by the batch-norm below (no dequant needed).
    w = w_ref[...].astype(jnp.bfloat16)
    y = jnp.dot(x_ref[...], w, preferred_element_type=jnp.float32)

    inv_n = 1.0 / rows                                   # true (unpadded) rows
    row_ids = jax.lax.broadcasted_iota(jnp.int32, y.shape, 0)
    valid = row_ids < rows                               # padded rows masked

    # Padded x rows are zero => padded y rows are zero => plain sum / rows
    # gives the mean over real rows only.
    mean = jnp.sum(y, axis=0, keepdims=True) * inv_n
    # Centered two-pass variance (numerically safe; biased, matches torch BN).
    centered = jnp.where(valid, y - mean, 0.0)
    var = jnp.sum(centered * centered, axis=0, keepdims=True) * inv_n

    # Fold BN into one scale/shift, then ReLU.
    scale = g_ref[...] * jax.lax.rsqrt(var + 1e-5)
    shift = b_ref[...] - mean * scale
    out = jnp.maximum(y * scale + shift, 0.0)
    # Zero padded output rows so a padded activation can safely feed the next
    # layer's batch statistics.
    o_ref[...] = jnp.where(valid, out, 0.0).astype(o_ref.dtype)


def _pick_tile_n(K, N, itemsize, budget_bytes=4 * 1024 * 1024):
    """Largest divisor of N (multiple of 128) whose (K, tn) weight tile stays
    within `budget_bytes` (pipeline double-buffers it).  Prefer tn <= N//2 so
    the single 'parallel' grid axis has >= 2 steps (feeds both v7x TCs);
    the extra step is negligible on single-TC v5e/v6e."""
    if N % 128 != 0:
        return N
    cands = [c for c in range(128, N + 1, 128) if N % c == 0]
    fits = [c for c in cands if K * c * itemsize <= budget_bytes]
    if not fits:
        return 128
    split = [c for c in fits if c <= N // 2]
    return max(split) if split else max(fits)


def matmul_bn_relu(x, w, gamma, beta, *, rows=None, out_dtype=jnp.float32,
                   keep_padded=False):
    """relu(batchnorm(x @ w)) with training-mode (biased) batch statistics.

    x: (M_in, K) float (rows beyond `rows` must be zero); w: (K, N) bf16/int8;
    gamma/beta: (N,) f32.  Rows are padded to a multiple of 16; padded rows
    are excluded from the stats and zeroed in the output.  If keep_padded,
    the padded (M, N) activation is returned (padded rows are exact zeros)."""
    M_in, K = x.shape
    K2, N = w.shape
    assert K == K2
    if rows is None:
        rows = M_in
    M = max(16, ((M_in + 15) // 16) * 16)        # bf16 sublane tile (16, 128)

    xb = x.astype(jnp.bfloat16)
    if M != M_in:
        xb = jnp.pad(xb, ((0, M - M_in), (0, 0)))
    wq = w if w.dtype == jnp.int8 else w.astype(jnp.bfloat16)
    g2 = gamma.reshape(1, N).astype(jnp.float32)
    b2 = beta.reshape(1, N).astype(jnp.float32)

    tn = _pick_tile_n(K, N, jnp.dtype(wq.dtype).itemsize)
    assert N % tn == 0

    kernel = functools.partial(_matmul_bn_relu_kernel, rows=rows)
    out = pl.pallas_call(
        kernel,
        out_shape=jax.ShapeDtypeStruct((M, N), out_dtype),
        grid_spec=pltpu.PrefetchScalarGridSpec(
            num_scalar_prefetch=0,
            grid=(N // tn,),
            in_specs=[
                pl.BlockSpec((M, K), lambda j: (0, 0)),   # x resident across N
                pl.BlockSpec((K, tn), lambda j: (0, j)),  # streamed weight slab
                pl.BlockSpec((1, tn), lambda j: (0, j)),  # gamma
                pl.BlockSpec((1, tn), lambda j: (0, j)),  # beta
            ],
            out_specs=pl.BlockSpec((M, tn), lambda j: (0, j)),
        ),
        compiler_params=pltpu.CompilerParams(
            dimension_semantics=("parallel",),            # shards N over TCs (v7x)
            vmem_limit_bytes=32 * 1024 * 1024,
        ),
    )(xb, wq, g2, b2)
    if keep_padded:
        return out
    return out[:rows] if M != rows else out


# ----------------------------------------------------------------------------
# Glue: im2col / ConvTranspose weight rewrite (pure layout plumbing)
# ----------------------------------------------------------------------------
def im2col_valid(x_nhwc, k):
    """Valid-window patches. Returns ((B*OH*OW, k*k*C), (B, OH, OW))."""
    B, H, W, C = x_nhwc.shape
    OH, OW = H - k + 1, W - k + 1
    cols = [x_nhwc[:, a:a + OH, b:b + OW, :] for a in range(k) for b in range(k)]
    patches = jnp.stack(cols, axis=3)            # (B, OH, OW, k*k, C)
    return patches.reshape(B * OH * OW, k * k * C), (B, OH, OW)


def convT_weight_to_matmul(w_t):
    """PyTorch ConvTranspose2d weight (Cin, Cout, k, k), stride=1, padding=k-1
    ==> equivalent valid-conv weight as a (k*k*Cin, Cout) matmul matrix, with
    the (kh, kw, cin) ordering matching `im2col_valid`."""
    Cin, Cout, k, _ = w_t.shape
    w_flip = w_t[:, :, ::-1, ::-1]                       # spatial flip
    return jnp.transpose(w_flip, (2, 3, 0, 1)).reshape(k * k * Cin, Cout)


def _quantize_per_col_int8(w):
    """Per-column symmetric int8 quantization.  The per-column scale is NOT
    stored: the following BatchNorm normalizes each output column by its own
    batch mean/std, which cancels any per-column weight scale (eps term is
    negligible), so the kernel needs no dequantization multiply."""
    absmax = jnp.max(jnp.abs(w), axis=0, keepdims=True)
    scale = jnp.maximum(absmax, 1e-12) / 127.0
    return jnp.clip(jnp.round(w / scale), -127.0, 127.0).astype(jnp.int8)


# ----------------------------------------------------------------------------
# Parameters (deterministic synthetic init; shapes follow the torch __init__)
# Linear/ConvT biases are omitted: BN cancels them exactly.
# ----------------------------------------------------------------------------
def init_params(key, input_dim, input_size, class_num):
    s16 = input_size // 16
    fc2_out = 128 * s16 * s16            # == 512 * (input_size // 32)**2
    ks = jax.random.split(key, 16)

    def nrm(k, shape, scale=0.02, dtype=jnp.float32):
        return (scale * jax.random.normal(k, shape, dtype=jnp.float32)).astype(dtype)

    dc1_w = nrm(ks[9], (512, 256, 2, 2))    # ConvTranspose2d(512,256,2,1,1)
    dc2_w = nrm(ks[13], (256, 128, 3, 3))   # ConvTranspose2d(256,128,3,1,2)

    return dict(
        emb=nrm(ks[0], (class_num, input_dim), 1.0),
        fc1_w=nrm(ks[1], (input_dim, 1024), dtype=jnp.bfloat16),
        bn1_g=1.0 + nrm(ks[3], (1024,)),
        bn1_b=nrm(ks[4], (1024,)),
        # fc2 weight: dominant HBM stream -> per-column int8 (scale absorbed by BN2)
        fc2_w=_quantize_per_col_int8(nrm(ks[5], (1024, fc2_out))),
        bn2_g=1.0 + nrm(ks[7], (fc2_out,)),
        bn2_b=nrm(ks[8], (fc2_out,)),
        dc1_wm=convT_weight_to_matmul(dc1_w).astype(jnp.bfloat16),
        bn3_g=1.0 + nrm(ks[11], (256,)),
        bn3_b=nrm(ks[12], (256,)),
        dc2_wm=convT_weight_to_matmul(dc2_w).astype(jnp.bfloat16),
        bn4_g=1.0 + nrm(ks[15], (128,)),
        bn4_b=jnp.zeros((128,), jnp.float32),
    )


# ----------------------------------------------------------------------------
# Forward pass
# ----------------------------------------------------------------------------
def generator_fea_deconv_forward(params, z, label, *, input_size):
    s32 = input_size // 32
    B = z.shape[0]

    # x = label_emb(label) * input   (tiny gather + elementwise: JAX glue)
    x = jnp.take(params["emb"], label, axis=0) * z                     # (B, D)

    # fc: Linear -> BN1d -> ReLU -> Linear -> BN1d -> ReLU  (fused kernels)
    # fc1 keeps its row padding (padded rows are zeroed in-kernel), so fc2
    # consumes it directly without a slice/re-pad round trip.
    h = matmul_bn_relu(x, params["fc1_w"], params["bn1_g"], params["bn1_b"],
                       out_dtype=jnp.bfloat16, keep_padded=True)
    h = matmul_bn_relu(h, params["fc2_w"], params["bn2_g"], params["bn2_b"],
                       rows=B, out_dtype=jnp.bfloat16)

    # x.view(-1, 512, s32, s32) (NCHW), then go to NHWC for the conv path
    x = h.reshape(B, 512, s32, s32).transpose(0, 2, 3, 1)              # NHWC

    # deconv1: ConvTranspose2d(512,256,k=2,s=1,p=1) == valid conv, k=2
    patches, (_, oh1, ow1) = im2col_valid(x, 2)
    y = matmul_bn_relu(patches, params["dc1_wm"],
                       params["bn3_g"], params["bn3_b"], out_dtype=jnp.bfloat16)
    x = y.reshape(B, oh1, ow1, 256)

    # deconv2: ConvTranspose2d(256,128,k=3,s=1,p=2) == valid conv, k=3
    patches, (_, oh2, ow2) = im2col_valid(x, 3)
    y = matmul_bn_relu(patches, params["dc2_wm"],
                       params["bn4_g"], params["bn4_b"], out_dtype=jnp.float32)
    x = y.reshape(B, oh2, ow2, 128)

    # torch flattens NCHW: transpose back then view(B, -1)
    return x.transpose(0, 3, 1, 2).reshape(B, -1)


# ----------------------------------------------------------------------------
if __name__ == "__main__":
    INPUT_DIM = 32
    INPUT_SIZE = 160          # >= 128 and divisible by 32 so both deconvs are valid
    CLASS_NUM = 10
    BATCH = 4

    key = jax.random.PRNGKey(0)
    kp, kz, kl = jax.random.split(key, 3)

    params = init_params(kp, INPUT_DIM, INPUT_SIZE, CLASS_NUM)
    z = jax.random.normal(kz, (BATCH, INPUT_DIM), dtype=jnp.float32)
    label = jax.random.randint(kl, (BATCH,), 0, CLASS_NUM, dtype=jnp.int32)

    fwd = jax.jit(functools.partial(generator_fea_deconv_forward,
                                    input_size=INPUT_SIZE))
    out = fwd(params, z, label)
    out = jax.block_until_ready(out)

    expected_feat = 128 * (INPUT_SIZE // 32 - 3) ** 2   # (B, 128*h2*w2)
    assert out.shape == (BATCH, expected_feat), out.shape
    assert bool(jnp.all(jnp.isfinite(out)))
    print("KERNEL_OK")
</pallas_src>

<mosaic_0001>
module attributes {stable_mosaic.version = 11 : i64} {
  func.func @_matmul_bn_relu_kernel(%arg0: i32, %arg1: memref<16x32xbf16, #tpu.memory_space<vmem>>, %arg2: memref<32x512xbf16, #tpu.memory_space<vmem>>, %arg3: memref<1x512xf32, #tpu.memory_space<vmem>>, %arg4: memref<1x512xf32, #tpu.memory_space<vmem>>, %arg5: memref<16x512xbf16, #tpu.memory_space<vmem>>) attributes {dimension_semantics = [#tpu.dimension_semantics<parallel>], iteration_bounds = array<i64: 2>, scalar_prefetch = 0 : i64, scratch_operands = 0 : i64, tpu.core_type = #tpu.core_type<tc>, window_params = [{pipeline_mode = #tpu.pipeline_mode<synchronous>, transform_indices = @transform_0, window_bounds = array<i64: 16, 32>}, {transform_indices = @transform_1, window_bounds = array<i64: 32, 512>}, {transform_indices = @transform_2, window_bounds = array<i64: 1, 512>}, {transform_indices = @transform_3, window_bounds = array<i64: 1, 512>}, {transform_indices = @transform_4, window_bounds = array<i64: 16, 512>}]} {
    %c0 = arith.constant 0 : index
    %c0_0 = arith.constant 0 : index
    %0 = vector.load %arg2[%c0, %c0_0] : memref<32x512xbf16, #tpu.memory_space<vmem>>, vector<32x512xbf16>
    %c0_1 = arith.constant 0 : index
    %c0_2 = arith.constant 0 : index
    %1 = vector.load %arg1[%c0_1, %c0_2] : memref<16x32xbf16, #tpu.memory_space<vmem>>, vector<16x32xbf16>
    %cst = arith.constant dense<0.000000e+00> : vector<16x512xf32>
    %2 = tpu.matmul %1, %0, %cst {dimension_numbers = #tpu.dot_dimension_numbers<[1], [0], [0], [1], [0, 0, 1, 1], [], []>} : vector<16x32xbf16>, vector<32x512xbf16>, vector<16x512xf32> -> vector<16x512xf32>
    %3 = tpu.iota {dimensions = array<i32: 0>} : vector<16x512xi32>
    %c4_i32 = arith.constant 4 : i32
    %4 = vector.broadcast %c4_i32 : i32 to vector<16x512xi32>
    %5 = arith.cmpi slt, %3, %4 : vector<16x512xi32>
    %cst_3 = arith.constant dense<0.000000e+00> : vector<512xf32>
    %6 = vector.multi_reduction <add>, %2, %cst_3 [0] : vector<16x512xf32> to vector<512xf32>
    %7 = vector.shape_cast %6 : vector<512xf32> to vector<1x512xf32>
    %cst_4 = arith.constant 2.500000e-01 : f32
    %8 = vector.broadcast %cst_4 : f32 to vector<1x512xf32>
    %9 = arith.mulf %7, %8 : vector<1x512xf32>
    %10 = vector.broadcast %9 : vector<1x512xf32> to vector<16x512xf32>
    %11 = arith.subf %2, %10 : vector<16x512xf32>
    %cst_5 = arith.constant 0.000000e+00 : f32
    %12 = vector.broadcast %cst_5 : f32 to vector<16x512xf32>
    %13 = arith.select %5, %11, %12 : vector<16x512xi1>, vector<16x512xf32>
    %14 = arith.mulf %13, %13 : vector<16x512xf32>
    %cst_6 = arith.constant dense<0.000000e+00> : vector<512xf32>
    %15 = vector.multi_reduction <add>, %14, %cst_6 [0] : vector<16x512xf32> to vector<512xf32>
    %16 = vector.shape_cast %15 : vector<512xf32> to vector<1x512xf32>
    %cst_7 = arith.constant 2.500000e-01 : f32
    %17 = vector.broadcast %cst_7 : f32 to vector<1x512xf32>
    %18 = arith.mulf %16, %17 : vector<1x512xf32>
    %c0_8 = arith.constant 0 : index
    %c0_9 = arith.constant 0 : index
    %19 = vector.load %arg3[%c0_8, %c0_9] : memref<1x512xf32, #tpu.memory_space<vmem>>, vector<1x512xf32>
    %cst_10 = arith.constant 9.99999974E-6 : f32
    %20 = vector.broadcast %cst_10 : f32 to vector<1x512xf32>
    %21 = arith.addf %18, %20 : vector<1x512xf32>
    %22 = math.rsqrt %21 : vector<1x512xf32>
    %23 = arith.mulf %19, %22 : vector<1x512xf32>
    %c0_11 = arith.constant 0 : index
    %c0_12 = arith.constant 0 : index
    %24 = vector.load %arg4[%c0_11, %c0_12] : memref<1x512xf32, #tpu.memory_space<vmem>>, vector<1x512xf32>
    %25 = arith.mulf %9, %23 : vector<1x512xf32>
    %26 = arith.subf %24, %25 : vector<1x512xf32>
    %27 = vector.broadcast %23 : vector<1x512xf32> to vector<16x512xf32>
    %28 = arith.mulf %2, %27 : vector<16x512xf32>
    %29 = vector.broadcast %26 : vector<1x512xf32> to vector<16x512xf32>
    %30 = arith.addf %28, %29 : vector<16x512xf32>
    %cst_13 = arith.constant 0.000000e+00 : f32
    %31 = vector.broadcast %cst_13 : f32 to vector<16x512xf32>
    %32 = arith.maximumf %30, %31 : vector<16x512xf32>
    %cst_14 = arith.constant 0.000000e+00 : f32
    %33 = vector.broadcast %cst_14 : f32 to vector<16x512xf32>
    %34 = arith.select %5, %32, %33 : vector<16x512xi1>, vector<16x512xf32>
    %35 = arith.truncf %34 : vector<16x512xf32> to vector<16x512xbf16>
    %c0_15 = arith.constant 0 : index
    %c0_16 = arith.constant 0 : index
    %36 = vector.load %arg5[%c0_15, %c0_16] : memref<16x512xbf16, #tpu.memory_space<vmem>>, vector<16x512xbf16>
    tpu.vector_store %arg5[%c0_15, %c0_16], %35 {strides = array<i32>} : memref<16x512xbf16, #tpu.memory_space<vmem>>, vector<16x512xbf16>,
    return
  }
  func.func @transform_0(%arg0: i32) -> (i32, i32) {
    %c0_i32 = arith.constant 0 : i32
    %c0_i32_0 = arith.constant 0 : i32
    %c0_i32_1 = arith.constant 0 : i32
    return %c0_i32, %c0_i32_0 : i32, i32
  }
  func.func @transform_1(%arg0: i32) -> (i32, i32) {
    %c0_i32 = arith.constant 0 : i32
    %c0_i32_0 = arith.constant 0 : i32
    return %c0_i32, %arg0 : i32, i32
  }
  func.func @transform_2(%arg0: i32) -> (i32, i32) {
    %c0_i32 = arith.constant 0 : i32
    %c0_i32_0 = arith.constant 0 : i32
    return %c0_i32, %arg0 : i32, i32
  }
  func.func @transform_3(%arg0: i32) -> (i32, i32) {
    %c0_i32 = arith.constant 0 : i32
    %c0_i32_0 = arith.constant 0 : i32
    return %c0_i32, %arg0 : i32, i32
  }
  func.func @transform_4(%arg0: i32) -> (i32, i32) {
    %c0_i32 = arith.constant 0 : i32
    %c0_i32_0 = arith.constant 0 : i32
    return %c0_i32, %arg0 : i32, i32
  }
}

module attributes {stable_mosaic.version = 11 : i64} {
  func.func @_matmul_bn_relu_kernel(%arg0: i32, %arg1: memref<16x1024xbf16, #tpu.memory_space<vmem>>, %arg2: memref<1024x3200xi8, #tpu.memory_space<vmem>>, %arg3: memref<1x3200xf32, #tpu.memory_space<vmem>>, %arg4: memref<1x3200xf32, #tpu.memory_space<vmem>>, %arg5: memref<16x3200xbf16, #tpu.memory_space<vmem>>) attributes {dimension_semantics = [#tpu.dimension_semantics<parallel>], iteration_bounds = array<i64: 4>, scalar_prefetch = 0 : i64, scratch_operands = 0 : i64, tpu.core_type = #tpu.core_type<tc>, window_params = [{pipeline_mode = #tpu.pipeline_mode<synchronous>, transform_indices = @transform_0, window_bounds = array<i64: 16, 1024>}, {transform_indices = @transform_1, window_bounds = array<i64: 1024, 3200>}, {transform_indices = @transform_2, window_bounds = array<i64: 1, 3200>}, {transform_indices = @transform_3, window_bounds = array<i64: 1, 3200>}, {transform_indices = @transform_4, window_bounds = array<i64: 16, 3200>}]} {
    %c0 = arith.constant 0 : index
    %c0_0 = arith.constant 0 : index
    %0 = vector.load %arg2[%c0, %c0_0] : memref<1024x3200xi8, #tpu.memory_space<vmem>>, vector<1024x3200xi8>
    %1 = arith.sitofp %0 : vector<1024x3200xi8> to vector<1024x3200xbf16>
    %c0_1 = arith.constant 0 : index
    %c0_2 = arith.constant 0 : index
    %2 = vector.load %arg1[%c0_1, %c0_2] : memref<16x1024xbf16, #tpu.memory_space<vmem>>, vector<16x1024xbf16>
    %cst = arith.constant dense<0.000000e+00> : vector<16x3200xf32>
    %3 = tpu.matmul %2, %1, %cst {dimension_numbers = #tpu.dot_dimension_numbers<[1], [0], [0], [1], [0, 0, 1, 1], [], []>} : vector<16x1024xbf16>, vector<1024x3200xbf16>, vector<16x3200xf32> -> vector<16x3200xf32>
    %4 = tpu.iota {dimensions = array<i32: 0>} : vector<16x3200xi32>
    %c4_i32 = arith.constant 4 : i32
    %5 = vector.broadcast %c4_i32 : i32 to vector<16x3200xi32>
    %6 = arith.cmpi slt, %4, %5 : vector<16x3200xi32>
    %cst_3 = arith.constant dense<0.000000e+00> : vector<3200xf32>
    %7 = vector.multi_reduction <add>, %3, %cst_3 [0] : vector<16x3200xf32> to vector<3200xf32>
    %8 = vector.shape_cast %7 : vector<3200xf32> to vector<1x3200xf32>
    %cst_4 = arith.constant 2.500000e-01 : f32
    %9 = vector.broadcast %cst_4 : f32 to vector<1x3200xf32>
    %10 = arith.mulf %8, %9 : vector<1x3200xf32>
    %11 = vector.broadcast %10 : vector<1x3200xf32> to vector<16x3200xf32>
    %12 = arith.subf %3, %11 : vector<16x3200xf32>
    %cst_5 = arith.constant 0.000000e+00 : f32
    %13 = vector.broadcast %cst_5 : f32 to vector<16x3200xf32>
    %14 = arith.select %6, %12, %13 : vector<16x3200xi1>, vector<16x3200xf32>
    %15 = arith.mulf %14, %14 : vector<16x3200xf32>
    %cst_6 = arith.constant dense<0.000000e+00> : vector<3200xf32>
    %16 = vector.multi_reduction <add>, %15, %cst_6 [0] : vector<16x3200xf32> to vector<3200xf32>
    %17 = vector.shape_cast %16 : vector<3200xf32> to vector<1x3200xf32>
    %cst_7 = arith.constant 2.500000e-01 : f32
    %18 = vector.broadcast %cst_7 : f32 to vector<1x3200xf32>
    %19 = arith.mulf %17, %18 : vector<1x3200xf32>
    %c0_8 = arith.constant 0 : index
    %c0_9 = arith.constant 0 : index
    %20 = vector.load %arg3[%c0_8, %c0_9] : memref<1x3200xf32, #tpu.memory_space<vmem>>, vector<1x3200xf32>
    %cst_10 = arith.constant 9.99999974E-6 : f32
    %21 = vector.broadcast %cst_10 : f32 to vector<1x3200xf32>
    %22 = arith.addf %19, %21 : vector<1x3200xf32>
    %23 = math.rsqrt %22 : vector<1x3200xf32>
    %24 = arith.mulf %20, %23 : vector<1x3200xf32>
    %c0_11 = arith.constant 0 : index
    %c0_12 = arith.constant 0 : index
    %25 = vector.load %arg4[%c0_11, %c0_12] : memref<1x3200xf32, #tpu.memory_space<vmem>>, vector<1x3200xf32>
    %26 = arith.mulf %10, %24 : vector<1x3200xf32>
    %27 = arith.subf %25, %26 : vector<1x3200xf32>
    %28 = vector.broadcast %24 : vector<1x3200xf32> to vector<16x3200xf32>
    %29 = arith.mulf %3, %28 : vector<16x3200xf32>
    %30 = vector.broadcast %27 : vector<1x3200xf32> to vector<16x3200xf32>
    %31 = arith.addf %29, %30 : vector<16x3200xf32>
    %cst_13 = arith.constant 0.000000e+00 : f32
    %32 = vector.broadcast %cst_13 : f32 to vector<16x3200xf32>
    %33 = arith.maximumf %31, %32 : vector<16x3200xf32>
    %cst_14 = arith.constant 0.000000e+00 : f32
    %34 = vector.broadcast %cst_14 : f32 to vector<16x3200xf32>
    %35 = arith.select %6, %33, %34 : vector<16x3200xi1>, vector<16x3200xf32>
    %36 = arith.truncf %35 : vector<16x3200xf32> to vector<16x3200xbf16>
    %c0_15 = arith.constant 0 : index
    %c0_16 = arith.constant 0 : index
    %37 = vector.load %arg5[%c0_15, %c0_16] : memref<16x3200xbf16, #tpu.memory_space<vmem>>, vector<16x3200xbf16>
    tpu.vector_store %arg5[%c0_15, %c0_16], %36 {strides = array<i32>} : memref<16x3200xbf16, #tpu.memory_space<vmem>>, vector<16x3200xbf16>,
    return
  }
  func.func @transform_0(%arg0: i32) -> (i32, i32) {
    %c0_i32 = arith.constant 0 : i32
    %c0_i32_0 = arith.constant 0 : i32
    %c0_i32_1 = arith.constant 0 : i32
    return %c0_i32, %c0_i32_0 : i32, i32
  }
  func.func @transform_1(%arg0: i32) -> (i32, i32) {
    %c0_i32 = arith.constant 0 : i32
    %c0_i32_0 = arith.constant 0 : i32
    return %c0_i32, %arg0 : i32, i32
  }
  func.func @transform_2(%arg0: i32) -> (i32, i32) {
    %c0_i32 = arith.constant 0 : i32
    %c0_i32_0 = arith.constant 0 : i32
    return %c0_i32, %arg0 : i32, i32
  }
  func.func @transform_3(%arg0: i32) -> (i32, i32) {
    %c0_i32 = arith.constant 0 : i32
    %c0_i32_0 = arith.constant 0 : i32
    return %c0_i32, %arg0 : i32, i32
  }
  func.func @transform_4(%arg0: i32) -> (i32, i32) {
    %c0_i32 = arith.constant 0 : i32
    %c0_i32_0 = arith.constant 0 : i32
    return %c0_i32, %arg0 : i32, i32
  }
}

module attributes {stable_mosaic.version = 11 : i64} {
  func.func @_matmul_bn_relu_kernel(%arg0: i32, %arg1: memref<64x2048xbf16, #tpu.memory_space<vmem>>, %arg2: memref<2048x128xbf16, #tpu.memory_space<vmem>>, %arg3: memref<1x128xf32, #tpu.memory_space<vmem>>, %arg4: memref<1x128xf32, #tpu.memory_space<vmem>>, %arg5: memref<64x128xbf16, #tpu.memory_space<vmem>>) attributes {dimension_semantics = [#tpu.dimension_semantics<parallel>], iteration_bounds = array<i64: 2>, scalar_prefetch = 0 : i64, scratch_operands = 0 : i64, tpu.core_type = #tpu.core_type<tc>, window_params = [{pipeline_mode = #tpu.pipeline_mode<synchronous>, transform_indices = @transform_0, window_bounds = array<i64: 64, 2048>}, {transform_indices = @transform_1, window_bounds = array<i64: 2048, 128>}, {transform_indices = @transform_2, window_bounds = array<i64: 1, 128>}, {transform_indices = @transform_3, window_bounds = array<i64: 1, 128>}, {transform_indices = @transform_4, window_bounds = array<i64: 64, 128>}]} {
    %c0 = arith.constant 0 : index
    %c0_0 = arith.constant 0 : index
    %0 = vector.load %arg2[%c0, %c0_0] : memref<2048x128xbf16, #tpu.memory_space<vmem>>, vector<2048x128xbf16>
    %c0_1 = arith.constant 0 : index
    %c0_2 = arith.constant 0 : index
    %1 = vector.load %arg1[%c0_1, %c0_2] : memref<64x2048xbf16, #tpu.memory_space<vmem>>, vector<64x2048xbf16>
    %cst = arith.constant dense<0.000000e+00> : vector<64x128xf32>
    %2 = tpu.matmul %1, %0, %cst {dimension_numbers = #tpu.dot_dimension_numbers<[1], [0], [0], [1], [0, 0, 1, 1], [], []>} : vector<64x2048xbf16>, vector<2048x128xbf16>, vector<64x128xf32> -> vector<64x128xf32>
    %3 = tpu.iota {dimensions = array<i32: 0>} : vector<64x128xi32>
    %c64_i32 = arith.constant 64 : i32
    %4 = vector.broadcast %c64_i32 : i32 to vector<64x128xi32>
    %5 = arith.cmpi slt, %3, %4 : vector<64x128xi32>
    %cst_3 = arith.constant dense<0.000000e+00> : vector<128xf32>
    %6 = vector.multi_reduction <add>, %2, %cst_3 [0] : vector<64x128xf32> to vector<128xf32>
    %7 = vector.shape_cast %6 : vector<128xf32> to vector<1x128xf32>
    %cst_4 = arith.constant 1.562500e-02 : f32
    %8 = vector.broadcast %cst_4 : f32 to vector<1x128xf32>
    %9 = arith.mulf %7, %8 : vector<1x128xf32>
    %10 = vector.broadcast %9 : vector<1x128xf32> to vector<64x128xf32>
    %11 = arith.subf %2, %10 : vector<64x128xf32>
    %cst_5 = arith.constant 0.000000e+00 : f32
    %12 = vector.broadcast %cst_5 : f32 to vector<64x128xf32>
    %13 = arith.select %5, %11, %12 : vector<64x128xi1>, vector<64x128xf32>
    %14 = arith.mulf %13, %13 : vector<64x128xf32>
    %cst_6 = arith.constant dense<0.000000e+00> : vector<128xf32>
    %15 = vector.multi_reduction <add>, %14, %cst_6 [0] : vector<64x128xf32> to vector<128xf32>
    %16 = vector.shape_cast %15 : vector<128xf32> to vector<1x128xf32>
    %cst_7 = arith.constant 1.562500e-02 : f32
    %17 = vector.broadcast %cst_7 : f32 to vector<1x128xf32>
    %18 = arith.mulf %16, %17 : vector<1x128xf32>
    %c0_8 = arith.constant 0 : index
    %c0_9 = arith.constant 0 : index
    %19 = vector.load %arg3[%c0_8, %c0_9] : memref<1x128xf32, #tpu.memory_space<vmem>>, vector<1x128xf32>
    %cst_10 = arith.constant 9.99999974E-6 : f32
    %20 = vector.broadcast %cst_10 : f32 to vector<1x128xf32>
    %21 = arith.addf %18, %20 : vector<1x128xf32>
    %22 = math.rsqrt %21 : vector<1x128xf32>
    %23 = arith.mulf %19, %22 : vector<1x128xf32>
    %c0_11 = arith.constant 0 : index
    %c0_12 = arith.constant 0 : index
    %24 = vector.load %arg4[%c0_11, %c0_12] : memref<1x128xf32, #tpu.memory_space<vmem>>, vector<1x128xf32>
    %25 = arith.mulf %9, %23 : vector<1x128xf32>
    %26 = arith.subf %24, %25 : vector<1x128xf32>
    %27 = vector.broadcast %23 : vector<1x128xf32> to vector<64x128xf32>
    %28 = arith.mulf %2, %27 : vector<64x128xf32>
    %29 = vector.broadcast %26 : vector<1x128xf32> to vector<64x128xf32>
    %30 = arith.addf %28, %29 : vector<64x128xf32>
    %cst_13 = arith.constant 0.000000e+00 : f32
    %31 = vector.broadcast %cst_13 : f32 to vector<64x128xf32>
    %32 = arith.maximumf %30, %31 : vector<64x128xf32>
    %cst_14 = arith.constant 0.000000e+00 : f32
    %33 = vector.broadcast %cst_14 : f32 to vector<64x128xf32>
    %34 = arith.select %5, %32, %33 : vector<64x128xi1>, vector<64x128xf32>
    %35 = arith.truncf %34 : vector<64x128xf32> to vector<64x128xbf16>
    %c0_15 = arith.constant 0 : index
    %c0_16 = arith.constant 0 : index
    %36 = vector.load %arg5[%c0_15, %c0_16] : memref<64x128xbf16, #tpu.memory_space<vmem>>, vector<64x128xbf16>
    tpu.vector_store %arg5[%c0_15, %c0_16], %35 {strides = array<i32>} : memref<64x128xbf16, #tpu.memory_space<vmem>>, vector<64x128xbf16>,
    return
  }
  func.func @transform_0(%arg0: i32) -> (i32, i32) {
    %c0_i32 = arith.constant 0 : i32
    %c0_i32_0 = arith.constant 0 : i32
    %c0_i32_1 = arith.constant 0 : i32
    return %c0_i32, %c0_i32_0 : i32, i32
  }
  func.func @transform_1(%arg0: i32) -> (i32, i32) {
    %c0_i32 = arith.constant 0 : i32
    %c0_i32_0 = arith.constant 0 : i32
    return %c0_i32, %arg0 : i32, i32
  }
  func.func @transform_2(%arg0: i32) -> (i32, i32) {
    %c0_i32 = arith.constant 0 : i32
    %c0_i32_0 = arith.constant 0 : i32
    return %c0_i32, %arg0 : i32, i32
  }
  func.func @transform_3(%arg0: i32) -> (i32, i32) {
    %c0_i32 = arith.constant 0 : i32
    %c0_i32_0 = arith.constant 0 : i32
    return %c0_i32, %arg0 : i32, i32
  }
  func.func @transform_4(%arg0: i32) -> (i32, i32) {
    %c0_i32 = arith.constant 0 : i32
    %c0_i32_0 = arith.constant 0 : i32
    return %c0_i32, %arg0 : i32, i32
  }
}

module attributes {stable_mosaic.version = 11 : i64} {
  func.func @_matmul_bn_relu_kernel(%arg0: i32, %arg1: memref<16x2304xbf16, #tpu.memory_space<vmem>>, %arg2: memref<2304x128xbf16, #tpu.memory_space<vmem>>, %arg3: memref<1x128xf32, #tpu.memory_space<vmem>>, %arg4: memref<1x128xf32, #tpu.memory_space<vmem>>, %arg5: memref<16x128xf32, #tpu.memory_space<vmem>>) attributes {dimension_semantics = [#tpu.dimension_semantics<parallel>], iteration_bounds = array<i64: 1>, scalar_prefetch = 0 : i64, scratch_operands = 0 : i64, tpu.core_type = #tpu.core_type<tc>, window_params = [{pipeline_mode = #tpu.pipeline_mode<synchronous>, transform_indices = @transform_0, window_bounds = array<i64: 16, 2304>}, {transform_indices = @transform_1, window_bounds = array<i64: 2304, 128>}, {transform_indices = @transform_2, window_bounds = array<i64: 1, 128>}, {transform_indices = @transform_3, window_bounds = array<i64: 1, 128>}, {transform_indices = @transform_4, window_bounds = array<i64: 16, 128>}]} {
    %c0 = arith.constant 0 : index
    %c0_0 = arith.constant 0 : index
    %0 = vector.load %arg2[%c0, %c0_0] : memref<2304x128xbf16, #tpu.memory_space<vmem>>, vector<2304x128xbf16>
    %c0_1 = arith.constant 0 : index
    %c0_2 = arith.constant 0 : index
    %1 = vector.load %arg1[%c0_1, %c0_2] : memref<16x2304xbf16, #tpu.memory_space<vmem>>, vector<16x2304xbf16>
    %cst = arith.constant dense<0.000000e+00> : vector<16x128xf32>
    %2 = tpu.matmul %1, %0, %cst {dimension_numbers = #tpu.dot_dimension_numbers<[1], [0], [0], [1], [0, 0, 1, 1], [], []>} : vector<16x2304xbf16>, vector<2304x128xbf16>, vector<16x128xf32> -> vector<16x128xf32>
    %3 = tpu.iota {dimensions = array<i32: 0>} : vector<16x128xi32>
    %c16_i32 = arith.constant 16 : i32
    %4 = vector.broadcast %c16_i32 : i32 to vector<16x128xi32>
    %5 = arith.cmpi slt, %3, %4 : vector<16x128xi32>
    %cst_3 = arith.constant dense<0.000000e+00> : vector<128xf32>
    %6 = vector.multi_reduction <add>, %2, %cst_3 [0] : vector<16x128xf32> to vector<128xf32>
    %7 = vector.shape_cast %6 : vector<128xf32> to vector<1x128xf32>
    %cst_4 = arith.constant 6.250000e-02 : f32
    %8 = vector.broadcast %cst_4 : f32 to vector<1x128xf32>
    %9 = arith.mulf %7, %8 : vector<1x128xf32>
    %10 = vector.broadcast %9 : vector<1x128xf32> to vector<16x128xf32>
    %11 = arith.subf %2, %10 : vector<16x128xf32>
    %cst_5 = arith.constant 0.000000e+00 : f32
    %12 = vector.broadcast %cst_5 : f32 to vector<16x128xf32>
    %13 = arith.select %5, %11, %12 : vector<16x128xi1>, vector<16x128xf32>
    %14 = arith.mulf %13, %13 : vector<16x128xf32>
    %cst_6 = arith.constant dense<0.000000e+00> : vector<128xf32>
    %15 = vector.multi_reduction <add>, %14, %cst_6 [0] : vector<16x128xf32> to vector<128xf32>
    %16 = vector.shape_cast %15 : vector<128xf32> to vector<1x128xf32>
    %cst_7 = arith.constant 6.250000e-02 : f32
    %17 = vector.broadcast %cst_7 : f32 to vector<1x128xf32>
    %18 = arith.mulf %16, %17 : vector<1x128xf32>
    %c0_8 = arith.constant 0 : index
    %c0_9 = arith.constant 0 : index
    %19 = vector.load %arg3[%c0_8, %c0_9] : memref<1x128xf32, #tpu.memory_space<vmem>>, vector<1x128xf32>
    %cst_10 = arith.constant 9.99999974E-6 : f32
    %20 = vector.broadcast %cst_10 : f32 to vector<1x128xf32>
    %21 = arith.addf %18, %20 : vector<1x128xf32>
    %22 = math.rsqrt %21 : vector<1x128xf32>
    %23 = arith.mulf %19, %22 : vector<1x128xf32>
    %c0_11 = arith.constant 0 : index
    %c0_12 = arith.constant 0 : index
    %24 = vector.load %arg4[%c0_11, %c0_12] : memref<1x128xf32, #tpu.memory_space<vmem>>, vector<1x128xf32>
    %25 = arith.mulf %9, %23 : vector<1x128xf32>
    %26 = arith.subf %24, %25 : vector<1x128xf32>
    %27 = vector.broadcast %23 : vector<1x128xf32> to vector<16x128xf32>
    %28 = arith.mulf %2, %27 : vector<16x128xf32>
    %29 = vector.broadcast %26 : vector<1x128xf32> to vector<16x128xf32>
    %30 = arith.addf %28, %29 : vector<16x128xf32>
    %cst_13 = arith.constant 0.000000e+00 : f32
    %31 = vector.broadcast %cst_13 : f32 to vector<16x128xf32>
    %32 = arith.maximumf %30, %31 : vector<16x128xf32>
    %cst_14 = arith.constant 0.000000e+00 : f32
    %33 = vector.broadcast %cst_14 : f32 to vector<16x128xf32>
    %34 = arith.select %5, %32, %33 : vector<16x128xi1>, vector<16x128xf32>
    %c0_15 = arith.constant 0 : index
    %c0_16 = arith.constant 0 : index
    %35 = vector.load %arg5[%c0_15, %c0_16] : memref<16x128xf32, #tpu.memory_space<vmem>>, vector<16x128xf32>
    tpu.vector_store %arg5[%c0_15, %c0_16], %34 {strides = array<i32>} : memref<16x128xf32, #tpu.memory_space<vmem>>, vector<16x128xf32>,
    return
  }
  func.func @transform_0(%arg0: i32) -> (i32, i32) {
    %c0_i32 = arith.constant 0 : i32
    %c0_i32_0 = arith.constant 0 : i32
    %c0_i32_1 = arith.constant 0 : i32
    return %c0_i32, %c0_i32_0 : i32, i32
  }
  func.func @transform_1(%arg0: i32) -> (i32, i32) {
    %c0_i32 = arith.constant 0 : i32
    %c0_i32_0 = arith.constant 0 : i32
    return %c0_i32, %arg0 : i32, i32
  }
  func.func @transform_2(%arg0: i32) -> (i32, i32) {
    %c0_i32 = arith.constant 0 : i32
    %c0_i32_0 = arith.constant 0 : i32
    return %c0_i32, %arg0 : i32, i32
  }
  func.func @transform_3(%arg0: i32) -> (i32, i32) {
    %c0_i32 = arith.constant 0 : i32
    %c0_i32_0 = arith.constant 0 : i32
    return %c0_i32, %arg0 : i32, i32
  }
  func.func @transform_4(%arg0: i32) -> (i32, i32) {
    %c0_i32 = arith.constant 0 : i32
    %c0_i32_0 = arith.constant 0 : i32
    return %c0_i32, %arg0 : i32, i32
  }
}

</mosaic_0001>

<bundles_post_ra>
// kernel: generator_fea_deconv_forward.4
= control target key start
LH: loop header
LB: loop body
LE: loop exit
PB: predicated region body
PF: predicated region fallthrough
CT: control target
= control target key end

     0   :  { %s1411_s0 = inlined_call_operand.vmem [shape: bf16[16,32], index: 0, kind: input, shape index: {}]   ;;  %s1412_s1 = inlined_call_operand.hbm [shape: bf16[32,1024], index: 1, kind: input, shape index: {}]   ;;  %s1413_s2 = inlined_call_operand.hbm [shape: f32[1,1024], index: 2, kind: input, shape index: {}]   ;;  %s1414_s3 = inlined_call_operand.hbm [shape: f32[1,1024], index: 3, kind: input, shape index: {}]   ;;  %s1415_s4 = inlined_call_operand.vmem [shape: bf16[16,1024], index: 4, kind: output, shape index: {}]  }
   0x1   :  { %1418 = sst [smem:[#allocation10_spill]] %s1412_s1 }
   0x2   :  { %9 = vsyncpa [#allocation3], 0 }
   0x3   :  { %11 = vsyncpa [#allocation3 + $0x1], 0 }
   0x4   :  { %12 = vsyncpa [#allocation5], 0 }
   0x5   :  { %14 = vsyncpa [#allocation5 + $0x1], 0  ;;  %s1127_s15 = smov 0   ;;  %s1129_s16 = smov 0  }
   0x6   :  { %s1131_s17 = smov 0   ;;  %s1133_s18 = smov 0  }
   0x7 LB: > { %s1146_s19 = sadd.s32 4294967295, %s1091_s18   ;;  %s1149_s20 = sadd.s32 1, %s1091_s18   ;;  %s1091_s18 = sphi %s1133_s18, %s1432_s18   ;;  %s1087_s17 = sphi %s1131_s17, %s1431_s17   ;;  %s1083_s16 = sphi %s1129_s16, %s1430_s16   ;;  %s1079_s15 = sphi %s1127_s15, %s1429_s15  }
   0x8   : > { %s45_s21 = ssub.s32 %s1091_s18, %s1149_s20  ;;  %s48_s22 = sadd.s32 1, %s1087_s17 }
   0x9   : > { %p46_p0 = scmp.eq.s32.totalorder %s45_s21, 0  ;;  %p55_p1 = scmp.ne.s32.totalorder %s1087_s17, %s1083_s16 }
   0xa   : > { %p56_p2 = scmp.eq.s32.totalorder %s1091_s18, 0  ;;  %p61_p3 = scmp.ne.s32.totalorder %s1083_s16, %s1079_s15 }
   0xb   : > { %s1159_s23 = scalar_select %p46_p0, %s1087_s17, %s48_s22  }
   0xc   : > { %p57_p4 = por %p56_p2, %p55_p1  ;;  %p62_p5 = scmp.eq.s32.totalorder %s1146_s19, 0 }
   0xd   : > { %p137_p6 = scmp.eq.s32.totalorder %s1146_s19, 1  ;;  %p903_p8 = scmp.lt.s32.totalorder %s1091_s18, 2 }
   0xe   : > { %p1163_p7 = por %p62_p5, %p61_p3  ;;  %s1173_s26 = sand.u32 1, %s1087_s17  }
   0xf   : > { %p1168_p9 = por %p137_p6, %p55_p1  ;;  %s845_s27 = sshll.u32 %s1173_s26, 6 }
  0x10   : > { %s1419_s24 = scalar_select %p1163_p7, 1, 0 }
  0x11   : > { %s1420_s25 = scalar_select %p1168_p9, 1, 0 }
  0x12   : > { %p1176_p10 = pnand %p903_p8, %p57_p4  ;;  %s170_s29 = scalar_lea.vmem [#allocation2], %s845_s27 }
  0x13   : > { %s177_s30 = sshll.u32 %s170_s29, 4  ;;  %s187_s5 = sand.u32 1, %s1091_s18   ;;  %s1181_s30 = int_to_ptr.vmem [resolvable:$true] %s177_s30 }
  0x14   : > { %s1421_s28 = scalar_select %p1176_p10, 1, 0 }
  0x15   : > { %s848_s6 = sshll.u32 %s1173_s26, 2  ;;  %s880_s7 = sshll.u32 %s1091_s18, 6 }
  0x16   : > { %s1190_s10 = scalar_lea.hbm %s1413_s2, %s880_s7  ;;  %s191_s11 = scalar_lea.vmem [#allocation4], %s848_s6 }
  0x17   : > { %s199_s12 = sshll.u32 %s191_s11, 4  ;;  %s1196_s13 = scalar_lea.sflag [#allocation5], %s187_s5  ;;  %s1194_s12 = int_to_ptr.vmem [resolvable:$true] %s199_s12 }
  0x18   : > { %s963_s14 = scalar_lea.hbm %s1190_s10, 64  ;;  %p1202_p12 = pneg %p1176_p10 }
  0x19   : > { %p964_p11 = scmp.ne.s32.totalorder %s1190_s10, %s963_s14  ;;  %s968_s27 = scalar_lea.hbm %s1413_s2, 128 }
  0x1a   : > { %p969_p1 = scmp.lt.u32.totalorder %s1190_s10, %s1413_s2  ;;  %p970_p2 = scmp.lt.u32.totalorder %s968_s27, %s963_s14 }
  0x1b   : > { %p966_p13 = pnand %p1202_p12, %p964_p11  ;;  %p972_p4 = scmp.lt.u32.totalorder %s963_s14, %s1190_s10 }
  0x1c   : > { %p971_p3 = por %p970_p2, %p969_p1 }
  0x1d   : > { %p967_p0 = pneg %p966_p13 }
  0x1e   : > { %p973_p5 = por %p972_p4, %p971_p3 }
  0x20   : > { %p974_p6 = pnand %p973_p5, %p967_p0 }
  0x22   : > { %977 = shalt.err (!%p974_p6)
}
  0x23   : > { %s978_s5 = scalar_lea.vmem %s1194_s12, 64  ;;  %s1093_s9 = smov [#allocation4]  }
  0x24   : > { %p979_p8 = scmp.ne.s32.totalorder %s1194_s12, %s978_s5  ;;  %s983_s11 = sshll.u32 %s1093_s9, 4  ;;  %s984_s11 = int_to_ptr.vmem [resolvable:$false] %s983_s11 }
  0x25   : > { %s985_s21 = scalar_lea.vmem %s984_s11, 128  ;;  %p986_p9 = scmp.lt.s32.totalorder %s1194_s12, %s984_s11 }
  0x26   : > { %p981_p11 = pnand %p979_p8, %p1202_p12  ;;  %p987_p7 = scmp.lt.s32.totalorder %s985_s21, %s978_s5 }
  0x28   : > { %p982_p13 = pneg %p981_p11  ;;  %p988_p1 = por %p987_p7, %p986_p9 }
  0x2a   : > { %p989_p2 = pnand %p988_p1, %p982_p13 }
  0x2c   : > { %992 = shalt.err (!%p989_p2)
}
  0x2d   : > { %899 = dma.hbm_to_vmem [thread:$0]  (!%p1176_p10), %s1190_s10, 64, %s1194_s12, %s1196_s13  }
  0x2e   : > { %s1231_s27 = scalar_lea.hbm %s1414_s3, %s880_s7  ;;  %p854_p7 = scmp.ge.s32.totalorder %s1091_s18, 1 }
  0x2f   : > { %p223_p9 = scmp.lt.s32.totalorder %s1091_s18, 3  ;;  %s879_s29 = sshll.u32 %s1091_s18, 8 }
  0x30   : > { %s1423_s1 = sld [smem:[#allocation10_spill]]  ;;  %s1247_s12 = scalar_lea.vmem [#allocation6], %s848_s6 }
  0x31   : > { %p1241_p0 = pnand %p854_p7, %p223_p9  ;;  %s218_s7 = sshll.u32 %s1247_s12, 4  ;;  %s219_s7 = int_to_ptr.vmem [resolvable:$true] %s218_s7 }
  0x32   : > { %s167_s11 = scalar_lea.sflag [#allocation3], %s1173_s26 }
  0x33   : > { %s1424_s10 = scalar_select %p1241_p0, 1, 0 }
  0x36   : > { %s1239_s9 = scalar_lea.hbm %s1423_s1, %s879_s29  ;;  %s998_s22 = scalar_lea.hbm %s1423_s1, 2048 }
  0x37   : > { %s993_s18 = scalar_lea.hbm %s1239_s9, 1024  ;;  %p999_p6 = scmp.lt.u32.totalorder %s1239_s9, %s1423_s1 }
  0x38   : > { %p994_p3 = scmp.ne.s32.totalorder %s1239_s9, %s993_s18  ;;  %p1000_p8 = scmp.lt.u32.totalorder %s998_s22, %s993_s18 }
  0x39   : > { %p1002_p13 = scmp.lt.u32.totalorder %s993_s18, %s1239_s9 }
  0x3a   : > { %p996_p4 = pnand %p994_p3, %p1202_p12  ;;  %p1001_p11 = por %p1000_p8, %p999_p6 }
  0x3c   : > { %p997_p5 = pneg %p996_p4  ;;  %p1003_p1 = por %p1002_p13, %p1001_p11 }
  0x3e   : > { %p1004_p2 = pnand %p1003_p1, %p997_p5 }
  0x40   : > { %1007 = shalt.err (!%p1004_p2)
}
  0x41   : > { %s1008_s6 = scalar_lea.vmem %s1181_s30, 1024  ;;  %s1094_s5 = smov [#allocation2]  }
  0x42   : > { %p1009_p7 = scmp.ne.s32.totalorder %s1181_s30, %s1008_s6  ;;  %s1013_s21 = sshll.u32 %s1094_s5, 4  ;;  %s1014_s21 = int_to_ptr.vmem [resolvable:$false] %s1013_s21 }
  0x43   : > { %s1015_s14 = scalar_lea.vmem %s1014_s21, 2048  ;;  %p1016_p4 = scmp.lt.s32.totalorder %s1181_s30, %s1014_s21 }
  0x44   : > { %p1011_p9 = pnand %p1009_p7, %p1202_p12  ;;  %p1017_p0 = scmp.lt.s32.totalorder %s1015_s14, %s1008_s6 }
  0x46   : > { %p1012_p3 = pneg %p1011_p9  ;;  %p1018_p6 = por %p1017_p0, %p1016_p4 }
  0x48   : > { %p1019_p8 = pnand %p1018_p6, %p1012_p3 }
  0x4a   : > { %1022 = shalt.err (!%p1019_p8)
}
  0x4b   : > { %s1095_s18 = smov 512   ;;  %s1096_s22 = smov 256  }
  0x4c   : > { %s1097_s29 = smov 16   ;;  %s1023_s8 = scalar_lea.hbm %s1231_s27, 64 }
  0x4d   : > { %896 = dma.hbm_to_vmem [thread:$0]  (!%p1176_p10), %s1239_s9, 1024, %s1181_s30, %s167_s11, %s1095_s18, %s1096_s22, %s1097_s29  }
  0x4e   : > { %p1024_p0 = scmp.ne.s32.totalorder %s1231_s27, %s1023_s8  ;;  %s1028_s21 = scalar_lea.hbm %s1414_s3, 128 }
  0x4f   : > { %p1029_p13 = scmp.lt.u32.totalorder %s1231_s27, %s1414_s3  ;;  %p1030_p1 = scmp.lt.u32.totalorder %s1028_s21, %s1023_s8 }
  0x50   : > { %p1026_p5 = pnand %p1024_p0, %p1202_p12  ;;  %p1032_p7 = scmp.lt.u32.totalorder %s1023_s8, %s1231_s27 }
  0x51   : > { %p1031_p2 = por %p1030_p1, %p1029_p13 }
  0x52   : > { %p1027_p11 = pneg %p1026_p5 }
  0x53   : > { %p1033_p9 = por %p1032_p7, %p1031_p2 }
  0x55   : > { %p1034_p3 = pnand %p1033_p9, %p1027_p11 }
  0x57   : > { %1037 = shalt.err (!%p1034_p3)
}
  0x58   : > { %s1038_s26 = scalar_lea.vmem %s219_s7, 64  ;;  %s1098_s30 = smov [#allocation6]  }
  0x59   : > { %p1039_p4 = scmp.ne.s32.totalorder %s219_s7, %s1038_s26  ;;  %s1043_s9 = sshll.u32 %s1098_s30, 4  ;;  %s1044_s9 = int_to_ptr.vmem [resolvable:$false] %s1043_s9 }
  0x5a   : > { %s1045_s12 = scalar_lea.vmem %s1044_s9, 128  ;;  %p1046_p0 = scmp.lt.s32.totalorder %s219_s7, %s1044_s9 }
  0x5b   : > { %p1041_p6 = pnand %p1039_p4, %p1202_p12  ;;  %p1047_p5 = scmp.lt.s32.totalorder %s1045_s12, %s1038_s26 }
  0x5d   : > { %p1042_p8 = pneg %p1041_p6  ;;  %p1048_p10 = por %p1047_p5, %p1046_p0 }
  0x5f   : > { %p1049_p1 = pnand %p1048_p10, %p1042_p8 }
  0x61   : > { %1052 = shalt.err (!%p1049_p1)
}
  0x62   : > { %p1425_p13 = scmp.ne.s32.totalorder %s1421_s28, 0  ;;  %p1426_p11 = scmp.ne.s32.totalorder %s1424_s10, 0 }
  0x63   : > { %s1297_s1 = sand.u32 (!%p1426_p11), 1, %s1083_s16   ;;  %p1427_p12 = scmp.ne.s32.totalorder (!%p1426_p11), %s1419_s24, 0 }
  0x64   : > { %902 = dma.hbm_to_vmem [thread:$0]  (!%p1425_p13), %s1231_s27, 64, %s219_s7, %s1196_s13  }
  0x65   : > { %227 = sbr.rel (%p1426_p11) target bundleno = 429 (0x1ad), region = 36  ;;  %s855_s15 = sshll.u32 (!%p1426_p11), %s1297_s1, 6 }
  0x66   : > { %s230_s11 = scalar_lea.sflag (!%p1426_p11), [#allocation3], %s1297_s1  ;;  %s233_s18 = scalar_lea.vmem (!%p1426_p11), [#allocation2], %s855_s15 }
  0x6c   : > { %1070 = dma.done.wait (%p1427_p12), %s230_s11, 1024  }
  0x6d   : > { %1072 = vsyncadd (%p1427_p12), %s230_s11, 4294966272  ;;  %s238_s28 = sand.u32 1, %s1146_s19   ;;  %s856_s13 = sshll.u32 %s1297_s1, 2 }
  0x6e   : > { %s239_s27 = scalar_lea.sflag [#allocation5], %s238_s28  ;;  %s1309_s10 = scalar_lea.vmem [#allocation4], %s856_s13 }
  0x6f   : > { %1074 = dma.done.wait (%p1427_p12), %s239_s27, 128  }
  0x70   : > { %1076 = vsyncadd (%p1427_p12), %s239_s27, 4294967168  ;;  %v1099_v0 = vmov 0   ;;  %v942_v1 = vld [vmem:[%s233_s18 + $0x4] ss:$16 sps:$4 sm:$0xff]   ;;  %v944_v2 = vld [vmem:[%s233_s18 + $0xc] ss:$16 sps:$4 sm:$0xff]   ;;  %v435_v33 = vlaneseq }
  0x71   : > { %381 = vmatprep.mubr.bf16.mxu0 %v1099_v0  ;;  %424 = vmatprep.mubr.bf16.mxu1 %v1099_v0  ;;  %v946_v3 = vld [vmem:[%s233_s18] ss:$16 sps:$4 sm:$0xff]   ;;  %v947_v4 = vld [vmem:[%s233_s18 + $0x8] ss:$16 sps:$4 sm:$0xff]   ;;  %v948_v5 = vld [vmem:[%s233_s18 + $0x24] ss:$16 sps:$4 sm:$0xff]  }
  0x72   : > { %349 = vmatprep.subr.bf16.mxu0 %v942_v1  ;;  %392 = vmatprep.subr.bf16.mxu1 %v944_v2  ;;  %v950_v6 = vld [vmem:[%s233_s18 + $0x2c] ss:$16 sps:$4 sm:$0xff]   ;;  %v952_v7 = vld [vmem:[%s233_s18 + $0x20] ss:$16 sps:$4 sm:$0xff]   ;;  %v953_v8 = vld [vmem:[%s233_s18 + $0x28] ss:$16 sps:$4 sm:$0xff]  }
  0x73   : > { %350 = vmatpush1.bf16.msra.mxu0 %v946_v3  ;;  %393 = vmatpush1.bf16.msra.mxu1 %v947_v4  ;;  %v954_v9 = vld [vmem:[%s1411_s0] sm:$0xff]   ;;  %vm345_vm0 = vcmask 261120   ;;  %s858_s22 = sshll.u32 %s1297_s1, 5  ;;  %v1100_v10 = vmov 0.0|0.0   ;;  %v1335_v42 = vshrl.u32 %v435_v33, 7  ;;  %s251_s8 = scalar_lea.vmem [#allocation6], %s856_s13 }
  0x74   : > { %351 = vmatprep.subr.bf16.mxu0 %v948_v5  ;;  %394 = vmatprep.subr.bf16.mxu1 %v950_v6  ;;  %s1319_s29 = scalar_lea.vmem [#allocation7], %s858_s22  ;;  %p1428_p10 = scmp.ne.s32.totalorder %s1420_s25, 0 }
  0x75   : > { %702 = vst [vmem:[%s1319_s29 + $0x10] sm:$0xff] %v1100_v10  ;;  %703 = vst [vmem:[%s1319_s29 + $0x18] sm:$0xff] %v1100_v10  ;;  %vm438_vm1 = vcmp.lt.s32.totalorder %v1335_v42, 4  ;;  %s886_s6 = sshll.u32 (%p1428_p10), %s1146_s19, 4 }
  0x76   : > { %s713_s14 = scalar_lea.vmem (%p1428_p10), %s1415_s4, %s886_s6 }
  0x77   : > { %352 = vmatpush1.bf16.msra.mxu0 %v952_v7  ;;  %395 = vmatpush1.bf16.msra.mxu1 %v953_v8 }
  0x7a   : > { %868 = vmatmul.mubr.msk.bf16.vlgmr.msra.gmra.mrb[0].mxu0 %vm345_vm0, %v954_v9  ;;  %869 = vmatmul.mubr.msk.bf16.vlgmr.msra.gmra.mrb[0].mxu1 %vm345_vm0, %v954_v9 }
 0x14d   : > { %v1323_v11 = vpop.f32.mrb[0].mxu0  ;;  %v1325_v12 = vpop.f32.mrb[0].mxu1 }
 0x14e   : > { %v1327_v13 = vpop.f32.mrb[1].mxu0  ;;  %v1329_v14 = vpop.f32.mrb[1].mxu1 }
 0x14f   : > { %v387_v15 = vpop.f32.mrb[2].mxu0  ;;  %v430_v16 = vpop.f32.mrb[2].mxu1 }
 0x150   : > { %v440_v17 = vadd.f32 %v387_v15, %v1323_v11  ;;  %v454_v18 = vadd.f32 %v430_v16, %v1325_v12  ;;  %v389_v19 = vpop.f32.mrb[3].mxu0  ;;  %v432_v20 = vpop.f32.mrb[3].mxu1 }
 0x151   : > { %v447_v21 = vadd.f32 %v389_v19, %v1327_v13  ;;  %v461_v22 = vadd.f32 %v432_v20, %v1329_v14 }
 0x152   : > { %v441_v23 = vrot.slane %v440_v17, 4  ;;  %v455_v24 = vrot.slane %v454_v18, 4 }
 0x153   : > { %v448_v25 = vrot.slane %v447_v21, 4  ;;  %v462_v26 = vrot.slane %v461_v22, 4 }
 0x154   : > { %v442_v27 = vadd.f32 %v441_v23, %v440_v17  ;;  %v456_v28 = vadd.f32 %v455_v24, %v454_v18 }
 0x155   : > { %v449_v29 = vadd.f32 %v448_v25, %v447_v21  ;;  %v463_v30 = vadd.f32 %v462_v26, %v461_v22 }
 0x156   : > { %v443_v31 = vrot.slane %v442_v27, 2  ;;  %v457_v32 = vrot.slane %v456_v28, 2 }
 0x157   : > { %v450_v34 = vrot.slane %v449_v29, 2  ;;  %v464_v35 = vrot.slane %v463_v30, 2 }
 0x158   : > { %v444_v36 = vadd.f32 %v443_v31, %v442_v27  ;;  %v458_v37 = vadd.f32 %v457_v32, %v456_v28 }
 0x159   : > { %v451_v38 = vadd.f32 %v450_v34, %v449_v29  ;;  %v465_v39 = vadd.f32 %v464_v35, %v463_v30 }
 0x15a   : > { %v445_v40 = vrot.slane %v444_v36, 1  ;;  %v459_v41 = vrot.slane %v458_v37, 1 }
 0x15b   : > { %v452_v43 = vrot.slane %v451_v38, 1  ;;  %v466_v44 = vrot.slane %v465_v39, 1 }
 0x15c   : > { %v446_v45 = vadd.f32 %v445_v40, %v444_v36  ;;  %v460_v46 = vadd.f32 %v459_v41, %v458_v37  ;;  %v1101_v37 = vmov 1966171168  }
 0x15d   : > { %v453_v47 = vadd.f32 %v452_v43, %v451_v38  ;;  %v467_v48 = vadd.f32 %v466_v44, %v465_v39  ;;  %v544_v38 = vunpack.c.l.s4 %v1101_v37 }
 0x15e   : > { %v1337_v49 = vmul.f32 0.25, %v446_v45  ;;  %v1339_v50 = vmul.f32 0.25, %v460_v46 }
 0x15f   : > { %v1342_v51 = vmul.f32 0.25, %v453_v47  ;;  %v1344_v52 = vmul.f32 0.25, %v467_v48  ;;  %v545_v39 = vunpack.c.0.s8 %v544_v38 }
 0x160   : > { %v472_v53 = vsub.f32 %v1323_v11, %v1337_v49  ;;  %v474_v54 = vsub.f32 %v1325_v12, %v1339_v50 }
 0x161   : > { %v473_v55 = vsub.f32 %v1327_v13, %v1342_v51  ;;  %v475_v56 = vsub.f32 %v1329_v14, %v1344_v52  ;;  %v548_v43 = vsub.s32 %v545_v39, %v1335_v42 }
 0x162   : > { %v480_v57 = vsel %vm438_vm1, %v472_v53, 0.0  ;;  %v482_v58 = vsel %vm438_vm1, %v474_v54, 0.0 }
 0x163   : > { %v488_v59 = vmul.f32 %v480_v57, %v480_v57  ;;  %v490_v60 = vmul.f32 %v482_v58, %v482_v58  ;;  %v481_v61 = vsel %vm438_vm1, %v473_v55, 0.0  ;;  %v483_v62 = vsel %vm438_vm1, %v475_v56, 0.0  ;;  %v528_v55 = vld [vmem:[%s1309_s10] sm:$0xf] }
 0x164   : > { %v489_v63 = vmul.f32 %v481_v61, %v481_v61  ;;  %v491_v0 = vmul.f32 %v483_v62, %v483_v62  ;;  %v571_v56 = vsub.s32 0, %v1335_v42  ;;  %v575_v58 = vsub.s32 1, %v1335_v42 }
 0x165   : > { %v497_v1 = vrot.slane %v488_v59, 4  ;;  %v511_v2 = vrot.slane %v490_v60, 4 }
 0x166   : > { %v504_v3 = vrot.slane %v489_v63, 4  ;;  %v518_v4 = vrot.slane %v491_v0, 4 }
 0x167   : > { %v498_v5 = vadd.f32 %v497_v1, %v488_v59  ;;  %v512_v6 = vadd.f32 %v511_v2, %v490_v60  ;;  %v579_v59 = vsub.s32 2, %v1335_v42  ;;  %v583_v60 = vsub.s32 3, %v1335_v42  ;;  %v732_v42 = vld [vmem:[%s1319_s29 + $0x18] sm:$0xff] (%p1428_p10) }
 0x168   : > { %v505_v7 = vadd.f32 %v504_v3, %v489_v63  ;;  %v519_v8 = vadd.f32 %v518_v4, %v491_v0  ;;  %733 = vst [vmem:[%s713_s14 + $0x28] sm:$0xff] (%p1428_p10), %v732_v42 }
 0x169   : > { %v499_v9 = vrot.slane %v498_v5, 2  ;;  %v513_v10 = vrot.slane %v512_v6, 2 }
 0x16a   : > { %v506_v15 = vrot.slane %v505_v7, 2  ;;  %v520_v16 = vrot.slane %v519_v8, 2 }
 0x16b   : > { %v500_v17 = vadd.f32 %v499_v9, %v498_v5  ;;  %v514_v18 = vadd.f32 %v513_v10, %v512_v6 }
 0x16c   : > { %v507_v19 = vadd.f32 %v506_v15, %v505_v7  ;;  %v521_v20 = vadd.f32 %v520_v16, %v519_v8 }
 0x16d   : > { %v501_v21 = vrot.slane %v500_v17, 1  ;;  %v515_v22 = vrot.slane %v514_v18, 1 }
 0x16e   : > { %v508_v23 = vrot.slane %v507_v19, 1  ;;  %v522_v24 = vrot.slane %v521_v20, 1 }
 0x16f   : > { %v502_v25 = vadd.f32 %v501_v21, %v500_v17  ;;  %v516_v26 = vadd.f32 %v515_v22, %v514_v18 }
 0x170   : > { %v509_v27 = vadd.f32 %v508_v23, %v507_v19  ;;  %v523_v28 = vadd.f32 %v522_v24, %v521_v20 }
 0x171   : > { %v524_v29 = vmul.f32 0.25, %v502_v25  ;;  %v526_v30 = vmul.f32 0.25, %v516_v26 }
 0x172   : > { %v525_v31 = vmul.f32 0.25, %v509_v27  ;;  %v527_v32 = vmul.f32 0.25, %v523_v28 }
 0x173   : > { %v529_v33 = vadd.f32 1e-05, %v524_v29  ;;  %v531_v34 = vadd.f32 1e-05, %v526_v30 }
 0x174   : > { %v530_v35 = vadd.f32 1e-05, %v525_v31  ;;  %v532_v36 = vadd.f32 1e-05, %v527_v32 }
 0x175   : > { %955 = vrsqrt.f32 %v529_v33 }
 0x176   : > { %957 = vrsqrt.f32 %v531_v34  ;;  %v730_v34 = vld [vmem:[%s1319_s29 + $0x10] sm:$0xff] (%p1428_p10) }
 0x177   : > { %959 = vrsqrt.f32 %v530_v35  ;;  %731 = vst [vmem:[%s713_s14 + $0x20] sm:$0xff] (%p1428_p10), %v730_v34 }
 0x178   : > { %961 = vrsqrt.f32 %v532_v36 }
 0x17f   : > { %v956_v40 = vpop.eup %955 }
 0x180   : > { %v958_v41 = vpop.eup %957 }
 0x181   : > { %v960_v44 = vpop.eup %959 }
 0x182   : > { %v962_v45 = vpop.eup %961  ;;  %v541_v46 = vcombine.low %v956_v40, %v960_v44 }
 0x183   : > { %v542_v47 = vcombine.low %v958_v41, %v962_v45 }
 0x184   : > { %v549_v48 = vrot.slane %v541_v46, %v548_v43 }
 0x185   : > { %v556_v53 = vrot.slane %v542_v47, %v548_v43 }
 0x187   : > { %v557_v54 = vcombine.low %v549_v48, %v556_v53 }
 0x189   : > { %v564_v57 = vrot.slane %v557_v54, %v548_v43 }
 0x18b   : > { %v566_v61 = vmul.f32 %v564_v57, %v528_v55 }
 0x18d   : > { %v572_v62 = vrot.slane %v566_v61, %v571_v56  ;;  %v576_v63 = vrot.slane %v566_v61, %v575_v58  ;;  %v580_v0 = vrot.slane %v566_v61, %v579_v59  ;;  %v584_v1 = vrot.slane %v566_v61, %v583_v60 }
 0x18f   : > { %v589_v2 = vmul.f32 %v572_v62, %v1337_v49  ;;  %v590_v3 = vmul.f32 %v576_v63, %v1342_v51  ;;  %v591_v4 = vmul.f32 %v580_v0, %v1339_v50  ;;  %v592_v5 = vmul.f32 %v584_v1, %v1344_v52  ;;  %v567_v49 = vld [vmem:[%s251_s8] sm:$0xf] }
 0x190   : > { %v623_v6 = vmul.f32 %v572_v62, %v1323_v11  ;;  %v624_v7 = vmul.f32 %v576_v63, %v1327_v13  ;;  %v625_v8 = vmul.f32 %v580_v0, %v1325_v12  ;;  %v626_v9 = vmul.f32 %v584_v1, %v1329_v14 }
 0x191   : > { %v597_v10 = vcombine.low %v589_v2, %v590_v3  ;;  %v598_v15 = vcombine.low %v591_v4, %v592_v5 }
 0x193   : > { %v605_v16 = vrot.slane %v597_v10, %v548_v43  ;;  %v612_v17 = vrot.slane %v598_v15, %v548_v43 }
 0x195   : > { %v613_v18 = vcombine.low %v605_v16, %v612_v17 }
 0x197   : > { %v620_v51 = vrot.slane %v613_v18, %v548_v43 }
 0x199   : > { %v622_v50 = vsub.f32 %v567_v49, %v620_v51 }
 0x19b   : > { %v635_v19 = vrot.slane %v622_v50, %v571_v56  ;;  %v639_v52 = vrot.slane %v622_v50, %v575_v58  ;;  %v643_v20 = vrot.slane %v622_v50, %v579_v59  ;;  %v647_v11 = vrot.slane %v622_v50, %v583_v60 }
 0x19d   : > { %v652_v13 = vadd.f32 %v635_v19, %v623_v6  ;;  %v653_v12 = vadd.f32 %v639_v52, %v624_v7  ;;  %v654_v21 = vadd.f32 %v643_v20, %v625_v8  ;;  %v655_v14 = vadd.f32 %v647_v11, %v626_v9 }
 0x19e   : > { %710 = sbr.rel (!%p1428_p10) target bundleno = 429 (0x1ad), region = 52 }
 0x19f   : > { %v660_v22 = vmax.f32 %v652_v13, 0.0  ;;  %v661_v23 = vmax.f32 %v653_v12, 0.0  ;;  %v662_v24 = vmax.f32 %v654_v21, 0.0  ;;  %v663_v25 = vmax.f32 %v655_v14, 0.0 }
 0x1a1   : > { %v668_v26 = vsel %vm438_vm1, %v660_v22, 0.0  ;;  %v669_v27 = vsel %vm438_vm1, %v661_v23, 0.0  ;;  %v670_v28 = vsel %vm438_vm1, %v662_v24, 0.0  ;;  %v671_v29 = vsel %vm438_vm1, %v663_v25, 0.0 }
 0x1a2   : > { %v882_v30 = vpack.c.bf16 %v669_v27, %v668_v26  ;;  %v883_v31 = vpack.c.bf16 %v671_v29, %v670_v28 }
 0x1a4   : > { %700 = vst [vmem:[%s1319_s29] sm:$0xff] %v882_v30  ;;  %701 = vst [vmem:[%s1319_s29 + $0x8] sm:$0xff] %v883_v31 }
 0x1ab   : > { %v726_v32 = vld [vmem:[%s1319_s29] sm:$0xff]  ;;  %v728_v33 = vld [vmem:[%s1319_s29 + $0x8] sm:$0xff] }
 0x1ac   : > { %727 = vst [vmem:[%s713_s14] sm:$0xff] %v726_v32  ;;  %729 = vst [vmem:[%s713_s14 + $0x8] sm:$0xff] %v728_v33 }
 0x1ad PF: > { %p17_p2 = scmp.ge.s32.totalorder %s1149_s20, 4   ;;  %s1429_s15 = smov %s1083_s16 }
 0x1ae   : > { %s1430_s16 = smov %s1087_s17  ;;  %s1431_s17 = smov %s1159_s23 }
 0x1af   : > { %s1432_s18 = smov %s1149_s20  ;;  %19 = sbr.rel (!%p17_p2) target bundleno = 7 (0x7), region = 123 }
 0x1b6   :  { %749 = vsyncpa [#allocation3], 1 }
 0x1b7   :  { %751 = vsyncpa [#allocation3 + $0x1], 1 }
 0x1b8   :  { %752 = vsyncpa [#allocation5], 1 }
 0x1b9   :  { %754 = vsyncpa [#allocation5 + $0x1], 1 }

// kernel: generator_fea_deconv_forward.5
= control target key start
LH: loop header
LB: loop body
LE: loop exit
PB: predicated region body
PF: predicated region fallthrough
CT: control target
= control target key end

     0   :  { %9 = vsyncpa [#allocation3], 0  ;;  %s9081_s0 = inlined_call_operand.vmem [shape: bf16[16,1024], index: 0, kind: input, shape index: {}]   ;;  %s9082_s1 = inlined_call_operand.hbm [shape: s8[1024,12800], index: 1, kind: input, shape index: {}]   ;;  %s9083_s2 = inlined_call_operand.vmem [shape: f32[1,12800], index: 2, kind: input, shape index: {}]   ;;  %s9084_s3 = inlined_call_operand.vmem [shape: f32[1,12800], index: 3, kind: input, shape index: {}]   ;;  %s9085_s4 = inlined_call_operand.vmem [shape: bf16[16,12800], index: 4, kind: output, shape index: {}]  }
   0x1   :  { %11 = vsyncpa [#allocation3 + $0x1], 0  ;;  %s7261_s15 = smov 0   ;;  %s7263_s16 = smov 0  }
   0x2   :  { %s7265_s17 = smov 0   ;;  %s7267_s18 = smov 0  }
   0x3 LB: > { %s7280_s19 = sadd.s32 4294967295, %s7228_s18   ;;  %s7283_s20 = sadd.s32 1, %s7228_s18   ;;  %s7228_s18 = sphi %s7267_s18, %s9103_s18   ;;  %s7224_s17 = sphi %s7265_s17, %s9102_s17   ;;  %s7220_s16 = sphi %s7263_s16, %s9101_s16   ;;  %s7216_s15 = sphi %s7261_s15, %s9100_s15  }
   0x4   : > { %s42_s21 = ssub.s32 %s7228_s18, %s7283_s20  ;;  %s45_s22 = sadd.s32 1, %s7224_s17 }
   0x5   : > { %p43_p0 = scmp.eq.s32.totalorder %s42_s21, 0  ;;  %p52_p1 = scmp.ne.s32.totalorder %s7224_s17, %s7220_s16 }
   0x6   : > { %p53_p2 = scmp.eq.s32.totalorder %s7228_s18, 0  ;;  %p58_p3 = scmp.ne.s32.totalorder %s7220_s16, %s7216_s15 }
   0x7   : > { %s7293_s23 = scalar_select %p43_p0, %s7224_s17, %s45_s22  }
   0x8   : > { %p54_p4 = por %p53_p2, %p52_p1  ;;  %p59_p5 = scmp.eq.s32.totalorder %s7280_s19, 0 }
   0x9   : > { %p134_p6 = scmp.eq.s32.totalorder %s7280_s19, 3  ;;  %p7076_p8 = scmp.lt.s32.totalorder %s7228_s18, 4 }
   0xa   : > { %p7297_p7 = por %p59_p5, %p58_p3  ;;  %s163_s26 = sand.u32 1, %s7224_s17  }
   0xb   : > { %p7302_p9 = por %p134_p6, %p52_p1  ;;  %s7067_s27 = smul.u32 6400, %s163_s26 }
   0xc   : > { %s6807_s28 = smul.u32 3200, %s7228_s18  ;;  %p7308_p10 = pnand %p7076_p8, %p54_p4 }
   0xd   : > { %s9091_s25 = scalar_select %p7302_p9, 1, 0 }
   0xe   : > { %s7315_s6 = scalar_lea.hbm %s9082_s1, %s6807_s28  ;;  %s167_s7 = scalar_lea.vmem [#allocation2], %s7067_s27 }
   0xf   : > { %s174_s8 = sshll.u32 %s167_s7, 4  ;;  %s7319_s9 = scalar_lea.sflag [#allocation3], %s163_s26  ;;  %s7317_s8 = int_to_ptr.vmem [resolvable:$true] %s174_s8 }
  0x10   : > { %s7164_s10 = scalar_lea.hbm %s7315_s6, 102400  ;;  %p7166_p12 = pneg %p7308_p10 }
  0x11   : > { %p7165_p11 = scmp.ne.s32.totalorder %s7315_s6, %s7164_s10  ;;  %s7169_s13 = scalar_lea.hbm %s9082_s1, 409600 }
  0x12   : > { %p7170_p1 = scmp.lt.u32.totalorder %s7315_s6, %s9082_s1  ;;  %p7171_p2 = scmp.lt.u32.totalorder %s7169_s13, %s7164_s10 }
  0x13   : > { %p7167_p13 = pnand %p7166_p12, %p7165_p11  ;;  %p7173_p4 = scmp.lt.u32.totalorder %s7164_s10, %s7315_s6 }
  0x14   : > { %p7172_p3 = por %p7171_p2, %p7170_p1 }
  0x15   : > { %p7168_p0 = pneg %p7167_p13 }
  0x16   : > { %p7174_p5 = por %p7173_p4, %p7172_p3 }
  0x18   : > { %p7175_p6 = pnand %p7174_p5, %p7168_p0 }
  0x1a   : > { %7178 = shalt.err (!%p7175_p6)
}
  0x1b   : > { %s7179_s21 = scalar_lea.vmem %s7317_s8, 102400  ;;  %s7230_s22 = smov [#allocation2]  }
  0x1c   : > { %p7180_p8 = scmp.ne.s32.totalorder %s7317_s8, %s7179_s21  ;;  %s7184_s26 = sshll.u32 %s7230_s22, 4  ;;  %s7185_s26 = int_to_ptr.vmem [resolvable:$false] %s7184_s26 }
  0x1d   : > { %s7186_s27 = scalar_lea.vmem %s7185_s26, 204800  ;;  %p7187_p9 = scmp.lt.s32.totalorder %s7317_s8, %s7185_s26 }
  0x1e   : > { %p7182_p11 = pnand %p7180_p8, %p7166_p12  ;;  %p7188_p1 = scmp.lt.s32.totalorder %s7186_s27, %s7179_s21 }
  0x20   : > { %p7183_p13 = pneg %p7182_p11  ;;  %p7189_p2 = por %p7188_p1, %p7187_p9 }
  0x22   : > { %p7190_p3 = pnand %p7189_p2, %p7183_p13 }
  0x24   : > { %7193 = shalt.err (!%p7190_p3)
}
  0x25   : > { %s7231_s28 = smov 12800   ;;  %s7232_s30 = smov 3200  }
  0x26   : > { %s7233_s5 = smov 200   ;;  %p6765_p12 = scmp.ge.s32.totalorder %s7228_s18, 1 }
  0x27   : > { %7075 = dma.hbm_to_vmem [thread:$0]  (!%p7308_p10), %s7315_s6, 102400, %s7317_s8, %s7319_s9, %s7231_s28, %s7232_s30, %s7233_s5  }
  0x28   : > { %p198_p0 = scmp.lt.s32.totalorder %s7228_s18, 5 }
  0x2a   : > { %p199_p4 = pnand %p6765_p12, %p198_p0 }
  0x2c   : > { %202 = sbr.rel (%p199_p4) target bundleno = 1976 (0x7b8), region = 36 }
  0x33   : > { %s7350_s7 = sand.u32 1, %s7220_s16  }
  0x34   : > { %s7068_s10 = smul.u32 6400, %s7350_s7  ;;  %s205_s11 = scalar_lea.sflag [#allocation3], %s7350_s7 }
  0x36   : > { %s7354_s12 = scalar_lea.vmem [#allocation2], %s7068_s10 }
  0x37   : > { %7211 = dma.done.wait (%p7297_p7), %s205_s11, 102400  }
  0x38   : > { %7213 = vsyncadd (%p7297_p7), %s205_s11, 4294864896  ;;  %v254_v0 = vld [vmem:[%s7354_s12 + $0x8] sm:$0xff]  ;;  %v256_v1 = vld [vmem:[%s7354_s12 + $0x18] sm:$0xff]  ;;  %s7069_s10 = smul.u32 200, %s7350_s7  ;;  %p9099_p9 = scmp.ne.s32.totalorder %s9091_s25, 0 }
  0x39   : > { %v253_v2 = vld [vmem:[%s7354_s12] sm:$0xff]  ;;  %v1054_v3 = vunpack.c.l.s8.bf16 %v254_v0  ;;  %v1079_v4 = vunpack.c.h.s8.bf16 %v254_v0  ;;  %v1056_v5 = vunpack.c.l.s8.bf16 %v256_v1  ;;  %v1081_v6 = vunpack.c.h.s8.bf16 %v256_v1  ;;  %v255_v7 = vld [vmem:[%s7354_s12 + $0x10] sm:$0xff]  ;;  %v278_v16 = vld [vmem:[%s7354_s12 + $0xc8] sm:$0xff]  ;;  %s241_s7 = smul.u32 25, %s7280_s19 }
  0x3a   : > { %v1053_v8 = vunpack.c.l.s8.bf16 %v253_v2  ;;  %v1055_v9 = vunpack.c.l.s8.bf16 %v255_v7  ;;  %v279_v10 = vld [vmem:[%s7354_s12 + $0xd0] sm:$0xff]  ;;  %v281_v11 = vld [vmem:[%s7354_s12 + $0xe0] sm:$0xff]  ;;  %v1078_v12 = vunpack.c.h.s8.bf16 %v253_v2  ;;  %v1080_v13 = vunpack.c.h.s8.bf16 %v255_v7  ;;  %v280_v17 = vld [vmem:[%s7354_s12 + $0xd8] sm:$0xff]  ;;  %s7875_s11 = scalar_lea.vmem [#allocation4], %s7069_s10 }
  0x3b   : > { %2701 = vmatprep.subr.bf16.mxu0 %v1054_v3  ;;  %2873 = vmatprep.subr.bf16.mxu1 %v1056_v5  ;;  %v1104_v14 = vunpack.c.l.s8.bf16 %v279_v10  ;;  %v1106_v15 = vunpack.c.l.s8.bf16 %v281_v11  ;;  %v1103_v18 = vunpack.c.l.s8.bf16 %v278_v16  ;;  %v1105_v19 = vunpack.c.l.s8.bf16 %v280_v17  ;;  %v304_v22 = vld [vmem:[%s7354_s12 + $0x198] sm:$0xff]  ;;  %v306_v23 = vld [vmem:[%s7354_s12 + $0x1a8] sm:$0xff]  ;;  %v303_v28 = vld [vmem:[%s7354_s12 + $0x190] sm:$0xff]  ;;  %p7977_p7 = scmp.lt.s32.totalorder %s241_s7, 99 }
  0x3c   : > { %2702 = vmatpush1.bf16.msra.mxu0 %v1053_v8  ;;  %2874 = vmatpush1.bf16.msra.mxu1 %v1055_v9  ;;  %v1129_v20 = vunpack.c.h.s8.bf16 %v279_v10  ;;  %v1131_v21 = vunpack.c.h.s8.bf16 %v281_v11  ;;  %v1128_v24 = vunpack.c.h.s8.bf16 %v278_v16  ;;  %v1130_v25 = vunpack.c.h.s8.bf16 %v280_v17  ;;  %v305_v29 = vld [vmem:[%s7354_s12 + $0x1a0] sm:$0xff]  ;;  %v331_v38 = vld [vmem:[%s7354_s12 + $0x270] sm:$0xff]  ;;  %v328_v43 = vld [vmem:[%s7354_s12 + $0x258] sm:$0xff] }
  0x3d   : > { %2703 = vmatprep.subr.bf16.mxu0 %v1079_v4  ;;  %2875 = vmatprep.subr.bf16.mxu1 %v1081_v6  ;;  %v1154_v26 = vunpack.c.l.s8.bf16 %v304_v22  ;;  %v1156_v27 = vunpack.c.l.s8.bf16 %v306_v23  ;;  %v7375_v30 = vld [vmem:[%s9081_s0] sm:$0xff]  ;;  %v1153_v32 = vunpack.c.l.s8.bf16 %v303_v28  ;;  %v1155_v33 = vunpack.c.l.s8.bf16 %v305_v29  ;;  %v330_v44 = vld [vmem:[%s7354_s12 + $0x268] sm:$0xff]  ;;  %v356_v50 = vld [vmem:[%s7354_s12 + $0x338] sm:$0xff]  ;;  %s9105_s7 = smov (!%p7977_p7, %s241_s7), 99 }
  0x3e   : > { %v7380_v31 = vld [vmem:[%s9081_s0 + $0x20] sm:$0xff]  ;;  %v1179_v34 = vunpack.c.h.s8.bf16 %v304_v22  ;;  %v1181_v35 = vunpack.c.h.s8.bf16 %v306_v23  ;;  %v1178_v39 = vunpack.c.h.s8.bf16 %v303_v28  ;;  %v1180_v40 = vunpack.c.h.s8.bf16 %v305_v29  ;;  %v354_v49 = vld [vmem:[%s7354_s12 + $0x328] sm:$0xff]  ;;  %v355_v56 = vld [vmem:[%s7354_s12 + $0x330] sm:$0xff]  ;;  %s7995_s6 = scalar_lea.vmem %s9083_s2, %s9105_s7  ;;  %s8105_s13 = scalar_lea.vmem %s9084_s3, %s9105_s7 }
  0x3f   : > { %v7384_v36 = vcombine.high %v7375_v30, %v7380_v31  ;;  %v329_v37 = vld [vmem:[%s7354_s12 + $0x260] sm:$0xff]  ;;  %v1206_v42 = vunpack.c.l.s8.bf16 %v331_v38  ;;  %v1203_v45 = vunpack.c.l.s8.bf16 %v328_v43  ;;  %v1205_v46 = vunpack.c.l.s8.bf16 %v330_v44  ;;  %v379_v61 = vld [vmem:[%s7354_s12 + $0x3f0] sm:$0xff]  ;;  %v378_v3 = vld [vmem:[%s7354_s12 + $0x3e8] sm:$0xff] }
  0x40   : > { %2704 = vmatpush1.bf16.msra.mxu0 %v1078_v12  ;;  %2876 = vmatpush1.bf16.msra.mxu1 %v1080_v13  ;;  %v1204_v41 = vunpack.c.l.s8.bf16 %v329_v37  ;;  %v1229_v47 = vunpack.c.h.s8.bf16 %v329_v37  ;;  %v1231_v48 = vunpack.c.h.s8.bf16 %v331_v38  ;;  %v1228_v51 = vunpack.c.h.s8.bf16 %v328_v43  ;;  %v353_v55 = vld [vmem:[%s7354_s12 + $0x320] sm:$0xff]  ;;  %v380_v4 = vld [vmem:[%s7354_s12 + $0x3f8] sm:$0xff]  ;;  %v406_v10 = vld [vmem:[%s7354_s12 + $0x4c8] sm:$0xff] }
  0x41   : > { %2705 = vmatprep.subr.bf16.mxu0 %v1104_v14  ;;  %2877 = vmatprep.subr.bf16.mxu1 %v1106_v15  ;;  %v1230_v52 = vunpack.c.h.s8.bf16 %v330_v44  ;;  %v1254_v53 = vunpack.c.l.s8.bf16 %v354_v49  ;;  %v1256_v54 = vunpack.c.l.s8.bf16 %v356_v50  ;;  %v1253_v57 = vunpack.c.l.s8.bf16 %v353_v55  ;;  %v381_v62 = vld [vmem:[%s7354_s12 + $0x400] sm:$0xff]  ;;  %v404_v9 = vld [vmem:[%s7354_s12 + $0x4b8] sm:$0xff]  ;;  %v403_v15 = vld [vmem:[%s7354_s12 + $0x4b0] sm:$0xff] }
  0x42   : > { %2733 = vmatprep.mubr.bf16.mxu0 %v7384_v36  ;;  %2905 = vmatprep.mubr.bf16.mxu1 %v7384_v36  ;;  %v1255_v58 = vunpack.c.l.s8.bf16 %v355_v56  ;;  %v1279_v59 = vunpack.c.h.s8.bf16 %v354_v49  ;;  %v1281_v60 = vunpack.c.h.s8.bf16 %v356_v50  ;;  %v1278_v63 = vunpack.c.h.s8.bf16 %v353_v55  ;;  %v405_v16 = vld [vmem:[%s7354_s12 + $0x4c0] sm:$0xff]  ;;  %v431_v22 = vld [vmem:[%s7354_s12 + $0x590] sm:$0xff]  ;;  %v430_v28 = vld [vmem:[%s7354_s12 + $0x588] sm:$0xff] }
  0x43   : > { %v1280_v0 = vunpack.c.h.s8.bf16 %v355_v56  ;;  %v1304_v1 = vunpack.c.l.s8.bf16 %v379_v61  ;;  %v1306_v2 = vunpack.c.l.s8.bf16 %v381_v62  ;;  %v1303_v5 = vunpack.c.l.s8.bf16 %v378_v3  ;;  %v456_v37 = vld [vmem:[%s7354_s12 + $0x658] sm:$0xff]  ;;  %v455_v43 = vld [vmem:[%s7354_s12 + $0x650] sm:$0xff]  ;;  %v481_v50 = vld [vmem:[%s7354_s12 + $0x720] sm:$0xff] }
  0x44   : > { %2706 = vmatpush1.bf16.msra.mxu0 %v1103_v18  ;;  %2878 = vmatpush1.bf16.msra.mxu1 %v1105_v19  ;;  %v1305_v6 = vunpack.c.l.s8.bf16 %v380_v4  ;;  %v1329_v7 = vunpack.c.h.s8.bf16 %v379_v61  ;;  %v1331_v8 = vunpack.c.h.s8.bf16 %v381_v62  ;;  %v1328_v11 = vunpack.c.h.s8.bf16 %v378_v3  ;;  %v478_v56 = vld [vmem:[%s7354_s12 + $0x708] sm:$0xff]  ;;  %v504_v62 = vld [vmem:[%s7354_s12 + $0x7d8] sm:$0xff] }
  0x45   : > { %2707 = vmatprep.subr.bf16.mxu0 %v1129_v20  ;;  %2879 = vmatprep.subr.bf16.mxu1 %v1131_v21  ;;  %v1330_v12 = vunpack.c.h.s8.bf16 %v380_v4  ;;  %v1354_v13 = vunpack.c.l.s8.bf16 %v404_v9  ;;  %v1356_v14 = vunpack.c.l.s8.bf16 %v406_v10  ;;  %v1353_v17 = vunpack.c.l.s8.bf16 %v403_v15  ;;  %v429_v21 = vld [vmem:[%s7354_s12 + $0x580] sm:$0xff]  ;;  %v503_v4 = vld [vmem:[%s7354_s12 + $0x7d0] sm:$0xff] }
  0x46   : > { %v1355_v18 = vunpack.c.l.s8.bf16 %v405_v16  ;;  %v1379_v19 = vunpack.c.h.s8.bf16 %v404_v9  ;;  %v1381_v20 = vunpack.c.h.s8.bf16 %v406_v10  ;;  %v1378_v23 = vunpack.c.h.s8.bf16 %v403_v15  ;;  %v529_v10 = vld [vmem:[%s7354_s12 + $0x8a0] sm:$0xff] }
  0x47   : > { %v7414_v44 = vcombine.low %v7375_v30, %v7380_v31  ;;  %v1481_v30 = vunpack.c.h.s8.bf16 %v456_v37  ;;  %v479_v31 = vld [vmem:[%s7354_s12 + $0x710] sm:$0xff]  ;;  %v1506_v55 = vunpack.c.l.s8.bf16 %v481_v50  ;;  %v1531_v61 = vunpack.c.h.s8.bf16 %v481_v50  ;;  %v604_v50 = vld [vmem:[%s7354_s12 + $0xaf8] sm:$0xff] }
  0x48   : > { %2708 = vmatpush1.bf16.msra.mxu0 %v1128_v24  ;;  %2880 = vmatpush1.bf16.msra.mxu1 %v1130_v25  ;;  %v1380_v24 = vunpack.c.h.s8.bf16 %v405_v16  ;;  %v1404_v25 = vunpack.c.l.s8.bf16 %v429_v21  ;;  %v528_v16 = vld [vmem:[%s7354_s12 + $0x898] sm:$0xff] }
  0x49   : > { %2709 = vmatprep.subr.bf16.mxu0 %v1154_v26  ;;  %2881 = vmatprep.subr.bf16.mxu1 %v1156_v27  ;;  %v1406_v26 = vunpack.c.l.s8.bf16 %v431_v22  ;;  %v428_v27 = vld [vmem:[%s7354_s12 + $0x578] sm:$0xff] }
  0x4a   : > { %v1403_v29 = vunpack.c.l.s8.bf16 %v428_v27  ;;  %v1428_v38 = vunpack.c.h.s8.bf16 %v428_v27 }
  0x4c   : > { %2710 = vmatpush1.bf16.msra.mxu0 %v1153_v32  ;;  %2882 = vmatpush1.bf16.msra.mxu1 %v1155_v33  ;;  %v1405_v32 = vunpack.c.l.s8.bf16 %v430_v28  ;;  %v1429_v33 = vunpack.c.h.s8.bf16 %v429_v21 }
  0x4d   : > { %2711 = vmatprep.subr.bf16.mxu0 %v1179_v34  ;;  %2883 = vmatprep.subr.bf16.mxu1 %v1181_v35  ;;  %v1431_v34 = vunpack.c.h.s8.bf16 %v431_v22  ;;  %v454_v35 = vld [vmem:[%s7354_s12 + $0x648] sm:$0xff] }
  0x4e   : > { %v1479_v49 = vunpack.c.h.s8.bf16 %v454_v35  ;;  %v554_v22 = vld [vmem:[%s7354_s12 + $0x968] sm:$0xff] }
  0x50   : > { %2712 = vmatpush1.bf16.msra.mxu0 %v1178_v39  ;;  %2884 = vmatpush1.bf16.msra.mxu1 %v1180_v40  ;;  %v1430_v39 = vunpack.c.h.s8.bf16 %v430_v28  ;;  %v1454_v40 = vunpack.c.l.s8.bf16 %v454_v35  ;;  %v553_v28 = vld [vmem:[%s7354_s12 + $0x960] sm:$0xff] }
  0x51   : > { %2713 = vmatprep.subr.bf16.mxu0 %v1204_v41  ;;  %2885 = vmatprep.subr.bf16.mxu1 %v1206_v42  ;;  %v1456_v41 = vunpack.c.l.s8.bf16 %v456_v37  ;;  %v453_v42 = vld [vmem:[%s7354_s12 + $0x640] sm:$0xff]  ;;  %v579_v37 = vld [vmem:[%s7354_s12 + $0xa30] sm:$0xff] }
  0x54   : > { %2714 = vmatpush1.bf16.msra.mxu0 %v1203_v45  ;;  %2886 = vmatpush1.bf16.msra.mxu1 %v1205_v46  ;;  %v7419_v45 = vld [vmem:[%s9081_s0 + $0x8] sm:$0xff] }
  0x55   : > { %2715 = vmatprep.subr.bf16.mxu0 %v1229_v47  ;;  %2887 = vmatprep.subr.bf16.mxu1 %v1231_v48  ;;  %v7424_v46 = vld [vmem:[%s9081_s0 + $0x28] sm:$0xff]  ;;  %v1453_v47 = vunpack.c.l.s8.bf16 %v453_v42  ;;  %v1455_v48 = vunpack.c.l.s8.bf16 %v455_v43 }
  0x58   : > { %2716 = vmatpush1.bf16.msra.mxu0 %v1228_v51  ;;  %2888 = vmatpush1.bf16.msra.mxu1 %v1230_v52  ;;  %v7430_v51 = vcombine.high %v7419_v45, %v7424_v46  ;;  %v1478_v52 = vunpack.c.h.s8.bf16 %v453_v42 }
  0x59   : > { %2717 = vmatprep.subr.bf16.mxu0 %v1254_v53  ;;  %2889 = vmatprep.subr.bf16.mxu1 %v1256_v54  ;;  %v1480_v53 = vunpack.c.h.s8.bf16 %v455_v43  ;;  %v1504_v54 = vunpack.c.l.s8.bf16 %v479_v31  ;;  %v578_v43 = vld [vmem:[%s7354_s12 + $0xa28] sm:$0xff] }
  0x5c   : > { %2718 = vmatpush1.bf16.msra.mxu0 %v1253_v57  ;;  %2890 = vmatpush1.bf16.msra.mxu1 %v1255_v58  ;;  %v480_v57 = vld [vmem:[%s7354_s12 + $0x718] sm:$0xff]  ;;  %v1503_v58 = vunpack.c.l.s8.bf16 %v478_v56 }
  0x5d   : > { %2719 = vmatprep.subr.bf16.mxu0 %v1279_v59  ;;  %2891 = vmatprep.subr.bf16.mxu1 %v1281_v60  ;;  %v1505_v59 = vunpack.c.l.s8.bf16 %v480_v57  ;;  %v1529_v60 = vunpack.c.h.s8.bf16 %v479_v31 }
  0x60   : > { %2720 = vmatpush1.bf16.msra.mxu0 %v1278_v63  ;;  %2892 = vmatpush1.bf16.msra.mxu1 %v1280_v0  ;;  %v506_v63 = vld [vmem:[%s7354_s12 + $0x7e8] sm:$0xff]  ;;  %v1528_v0 = vunpack.c.h.s8.bf16 %v478_v56 }
  0x61   : > { %2721 = vmatprep.subr.bf16.mxu0 %v1304_v1  ;;  %2893 = vmatprep.subr.bf16.mxu1 %v1306_v2  ;;  %v1530_v1 = vunpack.c.h.s8.bf16 %v480_v57  ;;  %v1554_v2 = vunpack.c.l.s8.bf16 %v504_v62  ;;  %v1556_v3 = vunpack.c.l.s8.bf16 %v506_v63  ;;  %v1581_v9 = vunpack.c.h.s8.bf16 %v506_v63  ;;  %v603_v57 = vld [vmem:[%s7354_s12 + $0xaf0] sm:$0xff]  ;;  %v629_v63 = vld [vmem:[%s7354_s12 + $0xbc0] sm:$0xff] }
  0x64   : > { %2722 = vmatpush1.bf16.msra.mxu0 %v1303_v5  ;;  %2894 = vmatpush1.bf16.msra.mxu1 %v1305_v6  ;;  %v505_v5 = vld [vmem:[%s7354_s12 + $0x7e0] sm:$0xff]  ;;  %v1553_v6 = vunpack.c.l.s8.bf16 %v503_v4 }
  0x65   : > { %2723 = vmatprep.subr.bf16.mxu0 %v1329_v7  ;;  %2895 = vmatprep.subr.bf16.mxu1 %v1331_v8  ;;  %v1555_v7 = vunpack.c.l.s8.bf16 %v505_v5  ;;  %v1579_v8 = vunpack.c.h.s8.bf16 %v504_v62 }
  0x68   : > { %2724 = vmatpush1.bf16.msra.mxu0 %v1328_v11  ;;  %2896 = vmatpush1.bf16.msra.mxu1 %v1330_v12  ;;  %v531_v11 = vld [vmem:[%s7354_s12 + $0x8b0] sm:$0xff]  ;;  %v1578_v12 = vunpack.c.h.s8.bf16 %v503_v4 }
  0x69   : > { %2725 = vmatprep.subr.bf16.mxu0 %v1354_v13  ;;  %2897 = vmatprep.subr.bf16.mxu1 %v1356_v14  ;;  %v1580_v13 = vunpack.c.h.s8.bf16 %v505_v5  ;;  %v1604_v14 = vunpack.c.l.s8.bf16 %v529_v10  ;;  %v1606_v15 = vunpack.c.l.s8.bf16 %v531_v11  ;;  %v1631_v21 = vunpack.c.h.s8.bf16 %v531_v11  ;;  %v628_v5 = vld [vmem:[%s7354_s12 + $0xbb8] sm:$0xff]  ;;  %v654_v11 = vld [vmem:[%s7354_s12 + $0xc88] sm:$0xff] }
  0x6c   : > { %2726 = vmatpush1.bf16.msra.mxu0 %v1353_v17  ;;  %2898 = vmatpush1.bf16.msra.mxu1 %v1355_v18  ;;  %v530_v17 = vld [vmem:[%s7354_s12 + $0x8a8] sm:$0xff]  ;;  %v1603_v18 = vunpack.c.l.s8.bf16 %v528_v16 }
  0x6d   : > { %2727 = vmatprep.subr.bf16.mxu0 %v1379_v19  ;;  %2899 = vmatprep.subr.bf16.mxu1 %v1381_v20  ;;  %v1605_v19 = vunpack.c.l.s8.bf16 %v530_v17  ;;  %v1629_v20 = vunpack.c.h.s8.bf16 %v529_v10 }
  0x70   : > { %2728 = vmatpush1.bf16.msra.mxu0 %v1378_v23  ;;  %2900 = vmatpush1.bf16.msra.mxu1 %v1380_v24  ;;  %v556_v23 = vld [vmem:[%s7354_s12 + $0x978] sm:$0xff]  ;;  %v1628_v24 = vunpack.c.h.s8.bf16 %v528_v16 }
  0x71   : > { %2729 = vmatprep.subr.bf16.mxu0 %v1404_v25  ;;  %2901 = vmatprep.subr.bf16.mxu1 %v1406_v26  ;;  %v1630_v25 = vunpack.c.h.s8.bf16 %v530_v17  ;;  %v1654_v26 = vunpack.c.l.s8.bf16 %v554_v22  ;;  %v1656_v27 = vunpack.c.l.s8.bf16 %v556_v23  ;;  %v1681_v35 = vunpack.c.h.s8.bf16 %v556_v23  ;;  %v653_v17 = vld [vmem:[%s7354_s12 + $0xc80] sm:$0xff] }
  0x74   : > { %2730 = vmatpush1.bf16.msra.mxu0 %v1403_v29  ;;  %2902 = vmatpush1.bf16.msra.mxu1 %v1405_v32  ;;  %v555_v29 = vld [vmem:[%s7354_s12 + $0x970] sm:$0xff]  ;;  %v1653_v32 = vunpack.c.l.s8.bf16 %v553_v28 }
  0x75   : > { %2731 = vmatprep.subr.bf16.mxu0 %v1429_v33  ;;  %2903 = vmatprep.subr.bf16.mxu1 %v1431_v34  ;;  %v1655_v33 = vunpack.c.l.s8.bf16 %v555_v29  ;;  %v1679_v34 = vunpack.c.h.s8.bf16 %v554_v22  ;;  %v1853_v22 = vunpack.c.l.s8.bf16 %v653_v17 }
  0x78   : > { %2732 = vmatpush1.bf16.msra.mxu0 %v1428_v38  ;;  %2904 = vmatpush1.bf16.msra.mxu1 %v1430_v39  ;;  %v581_v38 = vld [vmem:[%s7354_s12 + $0xa40] sm:$0xff]  ;;  %v1678_v39 = vunpack.c.h.s8.bf16 %v553_v28 }
  0x79   : > { %2744 = vmatprep.subr.bf16.mxu0 %v1454_v40  ;;  %2916 = vmatprep.subr.bf16.mxu1 %v1456_v41  ;;  %v1680_v40 = vunpack.c.h.s8.bf16 %v555_v29  ;;  %v1704_v41 = vunpack.c.l.s8.bf16 %v579_v37  ;;  %v1706_v42 = vunpack.c.l.s8.bf16 %v581_v38  ;;  %v1731_v31 = vunpack.c.h.s8.bf16 %v581_v38 }
  0x7b   : > { %2734 = vmatmul.mubr.bf16.vlgmr.msra.gmra.mrb[0].mxu0 %v7414_v44  ;;  %2906 = vmatmul.mubr.bf16.vlgmr.msra.gmra.mrb[0].mxu1 %v7414_v44 }
  0x7c   : > { %2745 = vmatpush1.bf16.msra.mxu0 %v1453_v47  ;;  %2917 = vmatpush1.bf16.msra.mxu1 %v1455_v48  ;;  %v580_v47 = vld [vmem:[%s7354_s12 + $0xa38] sm:$0xff]  ;;  %v1703_v48 = vunpack.c.l.s8.bf16 %v578_v43 }
  0x7d   : > { %2746 = vmatprep.subr.bf16.mxu0 %v1479_v49  ;;  %2918 = vmatprep.subr.bf16.mxu1 %v1481_v30  ;;  %v1705_v49 = vunpack.c.l.s8.bf16 %v580_v47  ;;  %v1729_v30 = vunpack.c.h.s8.bf16 %v579_v37 }
  0x7e   : > { %2776 = vmatprep.mubr.bf16.mxu0 %v7430_v51  ;;  %2948 = vmatprep.mubr.bf16.mxu1 %v7430_v51 }
  0x80   : > { %2747 = vmatpush1.bf16.msra.mxu0 %v1478_v52  ;;  %2919 = vmatpush1.bf16.msra.mxu1 %v1480_v53  ;;  %v606_v52 = vld [vmem:[%s7354_s12 + $0xb08] sm:$0xff]  ;;  %v1728_v53 = vunpack.c.h.s8.bf16 %v578_v43 }
  0x81   : > { %2748 = vmatprep.subr.bf16.mxu0 %v1504_v54  ;;  %2920 = vmatprep.subr.bf16.mxu1 %v1506_v55  ;;  %v1730_v54 = vunpack.c.h.s8.bf16 %v580_v47  ;;  %v1754_v55 = vunpack.c.l.s8.bf16 %v604_v50  ;;  %v1756_v56 = vunpack.c.l.s8.bf16 %v606_v52  ;;  %v1781_v62 = vunpack.c.h.s8.bf16 %v606_v52 }
  0x84   : > { %2749 = vmatpush1.bf16.msra.mxu0 %v1503_v58  ;;  %2921 = vmatpush1.bf16.msra.mxu1 %v1505_v59  ;;  %v605_v58 = vld [vmem:[%s7354_s12 + $0xb00] sm:$0xff]  ;;  %v1753_v59 = vunpack.c.l.s8.bf16 %v603_v57 }
  0x85   : > { %2750 = vmatprep.subr.bf16.mxu0 %v1529_v60  ;;  %2922 = vmatprep.subr.bf16.mxu1 %v1531_v61  ;;  %v1755_v60 = vunpack.c.l.s8.bf16 %v605_v58  ;;  %v1779_v61 = vunpack.c.h.s8.bf16 %v604_v50 }
  0x88   : > { %2751 = vmatpush1.bf16.msra.mxu0 %v1528_v0  ;;  %2923 = vmatpush1.bf16.msra.mxu1 %v1530_v1  ;;  %v631_v0 = vld [vmem:[%s7354_s12 + $0xbd0] sm:$0xff]  ;;  %v1778_v1 = vunpack.c.h.s8.bf16 %v603_v57 }
  0x89   : > { %2752 = vmatprep.subr.bf16.mxu0 %v1554_v2  ;;  %2924 = vmatprep.subr.bf16.mxu1 %v1556_v3  ;;  %v1780_v2 = vunpack.c.h.s8.bf16 %v605_v58  ;;  %v1804_v3 = vunpack.c.l.s8.bf16 %v629_v63  ;;  %v1806_v4 = vunpack.c.l.s8.bf16 %v631_v0  ;;  %v1831_v10 = vunpack.c.h.s8.bf16 %v631_v0 }
  0x8c   : > { %2753 = vmatpush1.bf16.msra.mxu0 %v1553_v6  ;;  %2925 = vmatpush1.bf16.msra.mxu1 %v1555_v7  ;;  %v630_v6 = vld [vmem:[%s7354_s12 + $0xbc8] sm:$0xff]  ;;  %v1803_v7 = vunpack.c.l.s8.bf16 %v628_v5 }
  0x8d   : > { %2754 = vmatprep.subr.bf16.mxu0 %v1579_v8  ;;  %2926 = vmatprep.subr.bf16.mxu1 %v1581_v9  ;;  %v1805_v8 = vunpack.c.l.s8.bf16 %v630_v6  ;;  %v1829_v9 = vunpack.c.h.s8.bf16 %v629_v63 }
  0x90   : > { %2755 = vmatpush1.bf16.msra.mxu0 %v1578_v12  ;;  %2927 = vmatpush1.bf16.msra.mxu1 %v1580_v13  ;;  %v656_v12 = vld [vmem:[%s7354_s12 + $0xc98] sm:$0xff]  ;;  %v1828_v13 = vunpack.c.h.s8.bf16 %v628_v5 }
  0x91   : > { %2756 = vmatprep.subr.bf16.mxu0 %v1604_v14  ;;  %2928 = vmatprep.subr.bf16.mxu1 %v1606_v15  ;;  %v1830_v14 = vunpack.c.h.s8.bf16 %v630_v6  ;;  %v1854_v15 = vunpack.c.l.s8.bf16 %v654_v11  ;;  %v1856_v16 = vunpack.c.l.s8.bf16 %v656_v12 }
  0x94   : > { %2757 = vmatpush1.bf16.msra.mxu0 %v1603_v18  ;;  %2929 = vmatpush1.bf16.msra.mxu1 %v1605_v19  ;;  %v655_v18 = vld [vmem:[%s7354_s12 + $0xc90] sm:$0xff]  ;;  %v7468_v19 = vcombine.low %v7419_v45, %v7424_v46  ;;  %v1881_v45 = vunpack.c.h.s8.bf16 %v656_v12 }
  0x95   : > { %2758 = vmatprep.subr.bf16.mxu0 %v1629_v20  ;;  %2930 = vmatprep.subr.bf16.mxu1 %v1631_v21  ;;  %v7473_v20 = vld [vmem:[%s9081_s0 + $0x10] sm:$0xff]  ;;  %v1855_v23 = vunpack.c.l.s8.bf16 %v655_v18  ;;  %v1880_v28 = vunpack.c.h.s8.bf16 %v655_v18 }
  0x96   : > { %v7478_v21 = vld [vmem:[%s9081_s0 + $0x30] sm:$0xff] }
  0x97   : > { %v679_v46 = vld [vmem:[%s7354_s12 + $0xd50] sm:$0xff] }
  0x98   : > { %2759 = vmatpush1.bf16.msra.mxu0 %v1628_v24  ;;  %2931 = vmatpush1.bf16.msra.mxu1 %v1630_v25  ;;  %v1879_v24 = vunpack.c.h.s8.bf16 %v654_v11  ;;  %v681_v25 = vld [vmem:[%s7354_s12 + $0xd60] sm:$0xff]  ;;  %v1904_v29 = vunpack.c.l.s8.bf16 %v679_v46  ;;  %v1929_v38 = vunpack.c.h.s8.bf16 %v679_v46 }
  0x99   : > { %2760 = vmatprep.subr.bf16.mxu0 %v1654_v26  ;;  %2932 = vmatprep.subr.bf16.mxu1 %v1656_v27  ;;  %v7484_v26 = vcombine.high %v7473_v20, %v7478_v21  ;;  %v1878_v27 = vunpack.c.h.s8.bf16 %v653_v17 }
  0x9c   : > { %2761 = vmatpush1.bf16.msra.mxu0 %v1653_v32  ;;  %2933 = vmatpush1.bf16.msra.mxu1 %v1655_v33  ;;  %v1906_v32 = vunpack.c.l.s8.bf16 %v681_v25  ;;  %v678_v33 = vld [vmem:[%s7354_s12 + $0xd48] sm:$0xff] }
  0x9d   : > { %2762 = vmatprep.subr.bf16.mxu0 %v1679_v34  ;;  %2934 = vmatprep.subr.bf16.mxu1 %v1681_v35  ;;  %v680_v34 = vld [vmem:[%s7354_s12 + $0xd58] sm:$0xff]  ;;  %v1903_v35 = vunpack.c.l.s8.bf16 %v678_v33 }
  0x9e   : > { %v1905_v37 = vunpack.c.l.s8.bf16 %v680_v34  ;;  %v1930_v43 = vunpack.c.h.s8.bf16 %v680_v34 }
  0xa0   : > { %2763 = vmatpush1.bf16.msra.mxu0 %v1678_v39  ;;  %2935 = vmatpush1.bf16.msra.mxu1 %v1680_v40  ;;  %v1931_v39 = vunpack.c.h.s8.bf16 %v681_v25  ;;  %v704_v40 = vld [vmem:[%s7354_s12 + $0xe18] sm:$0xff] }
  0xa1   : > { %2764 = vmatprep.subr.bf16.mxu0 %v1704_v41  ;;  %2936 = vmatprep.subr.bf16.mxu1 %v1706_v42  ;;  %v706_v41 = vld [vmem:[%s7354_s12 + $0xe28] sm:$0xff]  ;;  %v1928_v42 = vunpack.c.h.s8.bf16 %v678_v33  ;;  %v1954_v47 = vunpack.c.l.s8.bf16 %v704_v40  ;;  %v1979_v52 = vunpack.c.h.s8.bf16 %v704_v40 }
  0xa4   : > { %2765 = vmatpush1.bf16.msra.mxu0 %v1703_v48  ;;  %2937 = vmatpush1.bf16.msra.mxu1 %v1705_v49  ;;  %v1956_v48 = vunpack.c.l.s8.bf16 %v706_v41  ;;  %v703_v49 = vld [vmem:[%s7354_s12 + $0xe10] sm:$0xff] }
  0xa5   : > { %2766 = vmatprep.subr.bf16.mxu0 %v1729_v30  ;;  %2938 = vmatprep.subr.bf16.mxu1 %v1731_v31  ;;  %v705_v30 = vld [vmem:[%s7354_s12 + $0xe20] sm:$0xff]  ;;  %v1953_v31 = vunpack.c.l.s8.bf16 %v703_v49 }
  0xa6   : > { %v1955_v50 = vunpack.c.l.s8.bf16 %v705_v30  ;;  %v1980_v57 = vunpack.c.h.s8.bf16 %v705_v30 }
  0xa8   : > { %2767 = vmatpush1.bf16.msra.mxu0 %v1728_v53  ;;  %2939 = vmatpush1.bf16.msra.mxu1 %v1730_v54  ;;  %v1981_v53 = vunpack.c.h.s8.bf16 %v706_v41  ;;  %v729_v54 = vld [vmem:[%s7354_s12 + $0xee0] sm:$0xff] }
  0xa9   : > { %2768 = vmatprep.subr.bf16.mxu0 %v1754_v55  ;;  %2940 = vmatprep.subr.bf16.mxu1 %v1756_v56  ;;  %v731_v55 = vld [vmem:[%s7354_s12 + $0xef0] sm:$0xff]  ;;  %v1978_v56 = vunpack.c.h.s8.bf16 %v703_v49  ;;  %v2004_v58 = vunpack.c.l.s8.bf16 %v729_v54  ;;  %v2029_v0 = vunpack.c.h.s8.bf16 %v729_v54 }
  0xac   : > { %2769 = vmatpush1.bf16.msra.mxu0 %v1753_v59  ;;  %2941 = vmatpush1.bf16.msra.mxu1 %v1755_v60  ;;  %v2006_v59 = vunpack.c.l.s8.bf16 %v731_v55  ;;  %v728_v60 = vld [vmem:[%s7354_s12 + $0xed8] sm:$0xff] }
  0xad   : > { %2770 = vmatprep.subr.bf16.mxu0 %v1779_v61  ;;  %2942 = vmatprep.subr.bf16.mxu1 %v1781_v62  ;;  %v730_v61 = vld [vmem:[%s7354_s12 + $0xee8] sm:$0xff]  ;;  %v2003_v62 = vunpack.c.l.s8.bf16 %v728_v60 }
  0xae   : > { %v2005_v63 = vunpack.c.l.s8.bf16 %v730_v61  ;;  %v2030_v5 = vunpack.c.h.s8.bf16 %v730_v61 }
  0xb0   : > { %2771 = vmatpush1.bf16.msra.mxu0 %v1778_v1  ;;  %2943 = vmatpush1.bf16.msra.mxu1 %v1780_v2  ;;  %v2031_v1 = vunpack.c.h.s8.bf16 %v731_v55  ;;  %v754_v2 = vld [vmem:[%s7354_s12 + $0xfa8] sm:$0xff] }
  0xb1   : > { %2772 = vmatprep.subr.bf16.mxu0 %v1804_v3  ;;  %2944 = vmatprep.subr.bf16.mxu1 %v1806_v4  ;;  %v756_v3 = vld [vmem:[%s7354_s12 + $0xfb8] sm:$0xff]  ;;  %v2028_v4 = vunpack.c.h.s8.bf16 %v728_v60  ;;  %v2054_v6 = vunpack.c.l.s8.bf16 %v754_v2  ;;  %v2079_v12 = vunpack.c.h.s8.bf16 %v754_v2 }
  0xb2   : > { %v7527_v2 = vld [vmem:[%s9081_s0 + $0x18] sm:$0xff] }
  0xb4   : > { %2773 = vmatpush1.bf16.msra.mxu0 %v1803_v7  ;;  %2945 = vmatpush1.bf16.msra.mxu1 %v1805_v8  ;;  %v2056_v7 = vunpack.c.l.s8.bf16 %v756_v3  ;;  %v753_v8 = vld [vmem:[%s7354_s12 + $0xfa0] sm:$0xff] }
  0xb5   : > { %2774 = vmatprep.subr.bf16.mxu0 %v1829_v9  ;;  %2946 = vmatprep.subr.bf16.mxu1 %v1831_v10  ;;  %v755_v9 = vld [vmem:[%s7354_s12 + $0xfb0] sm:$0xff]  ;;  %v2053_v10 = vunpack.c.l.s8.bf16 %v753_v8 }
  0xb6   : > { %v2055_v11 = vunpack.c.l.s8.bf16 %v755_v9  ;;  %v2080_v17 = vunpack.c.h.s8.bf16 %v755_v9 }
  0xb8   : > { %2775 = vmatpush1.bf16.msra.mxu0 %v1828_v13  ;;  %2947 = vmatpush1.bf16.msra.mxu1 %v1830_v14  ;;  %v2081_v13 = vunpack.c.h.s8.bf16 %v756_v3  ;;  %v779_v14 = vld [vmem:[%s7354_s12 + $0x1070] sm:$0xff]  ;;  %v7532_v3 = vld [vmem:[%s9081_s0 + $0x38] sm:$0xff] }
  0xb9   : > { %2787 = vmatprep.subr.bf16.mxu0 %v1854_v15  ;;  %2959 = vmatprep.subr.bf16.mxu1 %v1856_v16  ;;  %v781_v15 = vld [vmem:[%s7354_s12 + $0x1080] sm:$0xff]  ;;  %v2078_v16 = vunpack.c.h.s8.bf16 %v753_v8  ;;  %v2104_v18 = vunpack.c.l.s8.bf16 %v779_v14  ;;  %v2129_v25 = vunpack.c.h.s8.bf16 %v779_v14  ;;  %v7538_v8 = vcombine.high %v7527_v2, %v7532_v3  ;;  %v880_v14 = vld [vmem:[%s7354_s12 + $0x1398] sm:$0xff] }
  0xbb   : > { %2777 = vmatmul.mubr.bf16.vlgmr.msra.gmra.mrb[0].mxu0 %v7468_v19  ;;  %2949 = vmatmul.mubr.bf16.vlgmr.msra.gmra.mrb[0].mxu1 %v7468_v19  ;;  %9094 = vst [vmem:[#allocation7_spill] sm:$0xff] %v7538_v8 }
  0xbc   : > { %2788 = vmatpush1.bf16.msra.mxu0 %v1853_v22  ;;  %2960 = vmatpush1.bf16.msra.mxu1 %v1855_v23  ;;  %v2106_v22 = vunpack.c.l.s8.bf16 %v781_v15  ;;  %v778_v23 = vld [vmem:[%s7354_s12 + $0x1068] sm:$0xff] }
  0xbd   : > { %2789 = vmatprep.subr.bf16.mxu0 %v1879_v24  ;;  %2961 = vmatprep.subr.bf16.mxu1 %v1881_v45  ;;  %v780_v24 = vld [vmem:[%s7354_s12 + $0x1078] sm:$0xff]  ;;  %v2103_v45 = vunpack.c.l.s8.bf16 %v778_v23 }
  0xbe   : > { %2819 = vmatprep.mubr.bf16.mxu0 %v7484_v26  ;;  %2991 = vmatprep.mubr.bf16.mxu1 %v7484_v26  ;;  %v2105_v46 = vunpack.c.l.s8.bf16 %v780_v24  ;;  %v2130_v33 = vunpack.c.h.s8.bf16 %v780_v24 }
  0xc0   : > { %2790 = vmatpush1.bf16.msra.mxu0 %v1878_v27  ;;  %2962 = vmatpush1.bf16.msra.mxu1 %v1880_v28  ;;  %v2131_v27 = vunpack.c.h.s8.bf16 %v781_v15  ;;  %v804_v28 = vld [vmem:[%s7354_s12 + $0x1138] sm:$0xff] }
  0xc1   : > { %2791 = vmatprep.subr.bf16.mxu0 %v1904_v29  ;;  %2963 = vmatprep.subr.bf16.mxu1 %v1906_v32  ;;  %v806_v29 = vld [vmem:[%s7354_s12 + $0x1148] sm:$0xff]  ;;  %v2128_v32 = vunpack.c.h.s8.bf16 %v778_v23  ;;  %v2154_v34 = vunpack.c.l.s8.bf16 %v804_v28  ;;  %v2179_v41 = vunpack.c.h.s8.bf16 %v804_v28  ;;  %v905_v28 = vld [vmem:[%s7354_s12 + $0x1460] sm:$0xff] }
  0xc2   : > { %v906_v23 = vld [vmem:[%s7354_s12 + $0x1468] sm:$0xff] }
  0xc4   : > { %2792 = vmatpush1.bf16.msra.mxu0 %v1903_v35  ;;  %2964 = vmatpush1.bf16.msra.mxu1 %v1905_v37  ;;  %v2156_v35 = vunpack.c.l.s8.bf16 %v806_v29  ;;  %v803_v37 = vld [vmem:[%s7354_s12 + $0x1130] sm:$0xff] }
  0xc5   : > { %2793 = vmatprep.subr.bf16.mxu0 %v1929_v38  ;;  %2965 = vmatprep.subr.bf16.mxu1 %v1931_v39  ;;  %v805_v38 = vld [vmem:[%s7354_s12 + $0x1140] sm:$0xff]  ;;  %v2153_v39 = vunpack.c.l.s8.bf16 %v803_v37 }
  0xc6   : > { %v2155_v40 = vunpack.c.l.s8.bf16 %v805_v38  ;;  %v2180_v49 = vunpack.c.h.s8.bf16 %v805_v38 }
  0xc8   : > { %2794 = vmatpush1.bf16.msra.mxu0 %v1928_v42  ;;  %2966 = vmatpush1.bf16.msra.mxu1 %v1930_v43  ;;  %v2181_v42 = vunpack.c.h.s8.bf16 %v806_v29  ;;  %v829_v43 = vld [vmem:[%s7354_s12 + $0x1200] sm:$0xff] }
  0xc9   : > { %2795 = vmatprep.subr.bf16.mxu0 %v1954_v47  ;;  %2967 = vmatprep.subr.bf16.mxu1 %v1956_v48  ;;  %v831_v47 = vld [vmem:[%s7354_s12 + $0x1210] sm:$0xff]  ;;  %v2178_v48 = vunpack.c.h.s8.bf16 %v803_v37  ;;  %v2204_v30 = vunpack.c.l.s8.bf16 %v829_v43  ;;  %v2229_v55 = vunpack.c.h.s8.bf16 %v829_v43  ;;  %v930_v43 = vld [vmem:[%s7354_s12 + $0x1528] sm:$0xff] }
  0xca   : > { %v931_v37 = vld [vmem:[%s7354_s12 + $0x1530] sm:$0xff] }
  0xcc   : > { %2796 = vmatpush1.bf16.msra.mxu0 %v1953_v31  ;;  %2968 = vmatpush1.bf16.msra.mxu1 %v1955_v50  ;;  %v2206_v31 = vunpack.c.l.s8.bf16 %v831_v47  ;;  %v828_v50 = vld [vmem:[%s7354_s12 + $0x11f8] sm:$0xff] }
  0xcd   : > { %2797 = vmatprep.subr.bf16.mxu0 %v1979_v52  ;;  %2969 = vmatprep.subr.bf16.mxu1 %v1981_v53  ;;  %v830_v52 = vld [vmem:[%s7354_s12 + $0x1208] sm:$0xff]  ;;  %v2203_v53 = vunpack.c.l.s8.bf16 %v828_v50 }
  0xce   : > { %v2205_v54 = vunpack.c.l.s8.bf16 %v830_v52  ;;  %v2230_v60 = vunpack.c.h.s8.bf16 %v830_v52 }
  0xd0   : > { %2798 = vmatpush1.bf16.msra.mxu0 %v1978_v56  ;;  %2970 = vmatpush1.bf16.msra.mxu1 %v1980_v57  ;;  %v2231_v56 = vunpack.c.h.s8.bf16 %v831_v47  ;;  %v854_v57 = vld [vmem:[%s7354_s12 + $0x12c8] sm:$0xff] }
  0xd1   : > { %2799 = vmatprep.subr.bf16.mxu0 %v2004_v58  ;;  %2971 = vmatprep.subr.bf16.mxu1 %v2006_v59  ;;  %v856_v58 = vld [vmem:[%s7354_s12 + $0x12d8] sm:$0xff]  ;;  %v2228_v59 = vunpack.c.h.s8.bf16 %v828_v50  ;;  %v2254_v61 = vunpack.c.l.s8.bf16 %v854_v57 }
  0xd2   : > { %v956_v50 = vld [vmem:[%s7354_s12 + $0x15f8] sm:$0xff] }
  0xd4   : > { %2800 = vmatpush1.bf16.msra.mxu0 %v2003_v62  ;;  %2972 = vmatpush1.bf16.msra.mxu1 %v2005_v63  ;;  %v2256_v62 = vunpack.c.l.s8.bf16 %v856_v58  ;;  %v853_v63 = vld [vmem:[%s7354_s12 + $0x12c0] sm:$0xff] }
  0xd5   : > { %2801 = vmatprep.subr.bf16.mxu0 %v2029_v0  ;;  %2973 = vmatprep.subr.bf16.mxu1 %v2031_v1  ;;  %v855_v0 = vld [vmem:[%s7354_s12 + $0x12d0] sm:$0xff]  ;;  %v7522_v1 = vcombine.low %v7473_v20, %v7478_v21  ;;  %v2281_v20 = vunpack.c.h.s8.bf16 %v856_v58  ;;  %v2278_v9 = vunpack.c.h.s8.bf16 %v853_v63 }
  0xd6   : > { %v879_v21 = vld [vmem:[%s7354_s12 + $0x1390] sm:$0xff] }
  0xd7   : > { %9093 = vst [vmem:[#allocation6_spill] sm:$0xff] %v7522_v1 }
  0xd8   : > { %2802 = vmatpush1.bf16.msra.mxu0 %v2028_v4  ;;  %2974 = vmatpush1.bf16.msra.mxu1 %v2030_v5  ;;  %v2253_v4 = vunpack.c.l.s8.bf16 %v853_v63  ;;  %v2255_v5 = vunpack.c.l.s8.bf16 %v855_v0  ;;  %v981_v63 = vld [vmem:[%s7354_s12 + $0x16c0] sm:$0xff] }
  0xd9   : > { %2803 = vmatprep.subr.bf16.mxu0 %v2054_v6  ;;  %2975 = vmatprep.subr.bf16.mxu1 %v2056_v7  ;;  %v2279_v6 = vunpack.c.h.s8.bf16 %v854_v57  ;;  %v881_v7 = vld [vmem:[%s7354_s12 + $0x13a0] sm:$0xff]  ;;  %v955_v57 = vld [vmem:[%s7354_s12 + $0x15f0] sm:$0xff] }
  0xdc   : > { %2804 = vmatpush1.bf16.msra.mxu0 %v2053_v10  ;;  %2976 = vmatpush1.bf16.msra.mxu1 %v2055_v11  ;;  %v2280_v10 = vunpack.c.h.s8.bf16 %v855_v0  ;;  %v2304_v11 = vunpack.c.l.s8.bf16 %v879_v21 }
  0xdd   : > { %2805 = vmatprep.subr.bf16.mxu0 %v2079_v12  ;;  %2977 = vmatprep.subr.bf16.mxu1 %v2081_v13  ;;  %v2306_v12 = vunpack.c.l.s8.bf16 %v881_v7  ;;  %v878_v13 = vld [vmem:[%s7354_s12 + $0x1388] sm:$0xff] }
  0xde   : > { %v2303_v15 = vunpack.c.l.s8.bf16 %v878_v13  ;;  %v2328_v24 = vunpack.c.h.s8.bf16 %v878_v13  ;;  %v1006_v13 = vld [vmem:[%s7354_s12 + $0x1788] sm:$0xff] }
  0xe0   : > { %2806 = vmatpush1.bf16.msra.mxu0 %v2078_v16  ;;  %2978 = vmatpush1.bf16.msra.mxu1 %v2080_v17  ;;  %v2305_v16 = vunpack.c.l.s8.bf16 %v880_v14  ;;  %v2329_v17 = vunpack.c.h.s8.bf16 %v879_v21  ;;  %v980_v21 = vld [vmem:[%s7354_s12 + $0x16b8] sm:$0xff] }
  0xe1   : > { %2807 = vmatprep.subr.bf16.mxu0 %v2104_v18  ;;  %2979 = vmatprep.subr.bf16.mxu1 %v2106_v22  ;;  %v2331_v18 = vunpack.c.h.s8.bf16 %v881_v7  ;;  %v904_v22 = vld [vmem:[%s7354_s12 + $0x1458] sm:$0xff] }
  0xe4   : > { %2808 = vmatpush1.bf16.msra.mxu0 %v2103_v45  ;;  %2980 = vmatpush1.bf16.msra.mxu1 %v2105_v46  ;;  %v2330_v45 = vunpack.c.h.s8.bf16 %v880_v14  ;;  %v2354_v46 = vunpack.c.l.s8.bf16 %v904_v22 }
  0xe5   : > { %2809 = vmatprep.subr.bf16.mxu0 %v2129_v25  ;;  %2981 = vmatprep.subr.bf16.mxu1 %v2131_v27  ;;  %v2356_v25 = vunpack.c.l.s8.bf16 %v906_v23  ;;  %v903_v27 = vld [vmem:[%s7354_s12 + $0x1450] sm:$0xff] }
  0xe6   : > { %v2353_v29 = vunpack.c.l.s8.bf16 %v903_v27  ;;  %v2378_v38 = vunpack.c.h.s8.bf16 %v903_v27  ;;  %v1031_v27 = vld [vmem:[%s7354_s12 + $0x1850] sm:$0xff] }
  0xe8   : > { %2810 = vmatpush1.bf16.msra.mxu0 %v2128_v32  ;;  %2982 = vmatpush1.bf16.msra.mxu1 %v2130_v33  ;;  %v2355_v32 = vunpack.c.l.s8.bf16 %v905_v28  ;;  %v2379_v33 = vunpack.c.h.s8.bf16 %v904_v22  ;;  %v1005_v22 = vld [vmem:[%s7354_s12 + $0x1780] sm:$0xff] }
  0xe9   : > { %2811 = vmatprep.subr.bf16.mxu0 %v2154_v34  ;;  %2983 = vmatprep.subr.bf16.mxu1 %v2156_v35  ;;  %v2381_v34 = vunpack.c.h.s8.bf16 %v906_v23  ;;  %v929_v35 = vld [vmem:[%s7354_s12 + $0x1520] sm:$0xff] }
  0xec   : > { %2812 = vmatpush1.bf16.msra.mxu0 %v2153_v39  ;;  %2984 = vmatpush1.bf16.msra.mxu1 %v2155_v40  ;;  %v2380_v39 = vunpack.c.h.s8.bf16 %v905_v28  ;;  %v2404_v40 = vunpack.c.l.s8.bf16 %v929_v35 }
  0xed   : > { %2813 = vmatprep.subr.bf16.mxu0 %v2179_v41  ;;  %2985 = vmatprep.subr.bf16.mxu1 %v2181_v42  ;;  %v2406_v41 = vunpack.c.l.s8.bf16 %v931_v37  ;;  %v928_v42 = vld [vmem:[%s7354_s12 + $0x1518] sm:$0xff] }
  0xee   : > { %v2403_v47 = vunpack.c.l.s8.bf16 %v928_v42  ;;  %v2428_v52 = vunpack.c.h.s8.bf16 %v928_v42  ;;  %v260_v42 = vld [vmem:[%s7354_s12 + $0x38] sm:$0xff] }
  0xf0   : > { %2814 = vmatpush1.bf16.msra.mxu0 %v2178_v48  ;;  %2986 = vmatpush1.bf16.msra.mxu1 %v2180_v49  ;;  %v2405_v48 = vunpack.c.l.s8.bf16 %v930_v43  ;;  %v2429_v49 = vunpack.c.h.s8.bf16 %v929_v35  ;;  %v1030_v35 = vld [vmem:[%s7354_s12 + $0x1848] sm:$0xff] }
  0xf1   : > { %2815 = vmatprep.subr.bf16.mxu0 %v2204_v30  ;;  %2987 = vmatprep.subr.bf16.mxu1 %v2206_v31  ;;  %v2431_v30 = vunpack.c.h.s8.bf16 %v931_v37  ;;  %v954_v31 = vld [vmem:[%s7354_s12 + $0x15e8] sm:$0xff] }
  0xf4   : > { %2816 = vmatpush1.bf16.msra.mxu0 %v2203_v53  ;;  %2988 = vmatpush1.bf16.msra.mxu1 %v2205_v54  ;;  %v2430_v53 = vunpack.c.h.s8.bf16 %v930_v43  ;;  %v2454_v54 = vunpack.c.l.s8.bf16 %v954_v31 }
  0xf5   : > { %2817 = vmatprep.subr.bf16.mxu0 %v2229_v55  ;;  %2989 = vmatprep.subr.bf16.mxu1 %v2231_v56  ;;  %v2456_v55 = vunpack.c.l.s8.bf16 %v956_v50  ;;  %v953_v56 = vld [vmem:[%s7354_s12 + $0x15e0] sm:$0xff] }
  0xf6   : > { %v2453_v58 = vunpack.c.l.s8.bf16 %v953_v56  ;;  %v2478_v0 = vunpack.c.h.s8.bf16 %v953_v56  ;;  %v283_v56 = vld [vmem:[%s7354_s12 + $0xf0] sm:$0xff] }
  0xf8   : > { %2818 = vmatpush1.bf16.msra.mxu0 %v2228_v59  ;;  %2990 = vmatpush1.bf16.msra.mxu1 %v2230_v60  ;;  %v2455_v59 = vunpack.c.l.s8.bf16 %v955_v57  ;;  %v2479_v60 = vunpack.c.h.s8.bf16 %v954_v31  ;;  %v259_v31 = vld [vmem:[%s7354_s12 + $0x30] sm:$0xff] }
  0xf9   : > { %2830 = vmatprep.subr.bf16.mxu0 %v2254_v61  ;;  %3002 = vmatprep.subr.bf16.mxu1 %v2256_v62  ;;  %v2481_v61 = vunpack.c.h.s8.bf16 %v956_v50  ;;  %v979_v62 = vld [vmem:[%s7354_s12 + $0x16b0] sm:$0xff]  ;;  %v7576_v50 = vcombine.low %v7527_v2, %v7532_v3  ;;  %v1084_v3 = vunpack.c.h.s8.bf16 %v259_v31 }
  0xfb   : > { %2820 = vmatmul.mubr.bf16.vlgmr.msra.gmra.mrb[0].mxu0 %v7522_v1  ;;  %2992 = vmatmul.mubr.bf16.vlgmr.msra.gmra.mrb[0].mxu1 %v7522_v1 }
  0xfc   : > { %2831 = vmatpush1.bf16.msra.mxu0 %v2253_v4  ;;  %3003 = vmatpush1.bf16.msra.mxu1 %v2255_v5  ;;  %v2480_v4 = vunpack.c.h.s8.bf16 %v955_v57  ;;  %v2504_v5 = vunpack.c.l.s8.bf16 %v979_v62  ;;  %v285_v57 = vld [vmem:[%s7354_s12 + $0x100] sm:$0xff] }
  0xfd   : > { %2832 = vmatprep.subr.bf16.mxu0 %v2279_v6  ;;  %3004 = vmatprep.subr.bf16.mxu1 %v2281_v20  ;;  %v2506_v6 = vunpack.c.l.s8.bf16 %v981_v63  ;;  %v978_v20 = vld [vmem:[%s7354_s12 + $0x16a8] sm:$0xff] }
  0xfe   : > { %2862 = vmatprep.mubr.bf16.mxu0 %v7538_v8  ;;  %3034 = vmatprep.mubr.bf16.mxu1 %v7538_v8  ;;  %v2503_v7 = vunpack.c.l.s8.bf16 %v978_v20  ;;  %v2528_v14 = vunpack.c.h.s8.bf16 %v978_v20 }
 0x100   : > { %2833 = vmatpush1.bf16.msra.mxu0 %v2278_v9  ;;  %3005 = vmatpush1.bf16.msra.mxu1 %v2280_v10  ;;  %v2505_v9 = vunpack.c.l.s8.bf16 %v980_v21  ;;  %v2529_v10 = vunpack.c.h.s8.bf16 %v979_v62 }
 0x101   : > { %2834 = vmatprep.subr.bf16.mxu0 %v2304_v11  ;;  %3006 = vmatprep.subr.bf16.mxu1 %v2306_v12  ;;  %v2531_v11 = vunpack.c.h.s8.bf16 %v981_v63  ;;  %v1004_v12 = vld [vmem:[%s7354_s12 + $0x1778] sm:$0xff] }
 0x104   : > { %2835 = vmatpush1.bf16.msra.mxu0 %v2303_v15  ;;  %3007 = vmatpush1.bf16.msra.mxu1 %v2305_v16  ;;  %v2530_v15 = vunpack.c.h.s8.bf16 %v980_v21  ;;  %v2554_v16 = vunpack.c.l.s8.bf16 %v1004_v12 }
 0x105   : > { %2836 = vmatprep.subr.bf16.mxu0 %v2329_v17  ;;  %3008 = vmatprep.subr.bf16.mxu1 %v2331_v18  ;;  %v2556_v17 = vunpack.c.l.s8.bf16 %v1006_v13  ;;  %v1003_v18 = vld [vmem:[%s7354_s12 + $0x1770] sm:$0xff] }
 0x106   : > { %v2553_v23 = vunpack.c.l.s8.bf16 %v1003_v18  ;;  %v2578_v28 = vunpack.c.h.s8.bf16 %v1003_v18 }
 0x108   : > { %2837 = vmatpush1.bf16.msra.mxu0 %v2328_v24  ;;  %3009 = vmatpush1.bf16.msra.mxu1 %v2330_v45  ;;  %v2555_v24 = vunpack.c.l.s8.bf16 %v1005_v22  ;;  %v2579_v45 = vunpack.c.h.s8.bf16 %v1004_v12 }
 0x109   : > { %2838 = vmatprep.subr.bf16.mxu0 %v2354_v46  ;;  %3010 = vmatprep.subr.bf16.mxu1 %v2356_v25  ;;  %v2581_v46 = vunpack.c.h.s8.bf16 %v1006_v13  ;;  %v1029_v25 = vld [vmem:[%s7354_s12 + $0x1840] sm:$0xff] }
 0x10c   : > { %2839 = vmatpush1.bf16.msra.mxu0 %v2353_v29  ;;  %3011 = vmatpush1.bf16.msra.mxu1 %v2355_v32  ;;  %v2580_v29 = vunpack.c.h.s8.bf16 %v1005_v22  ;;  %v2604_v32 = vunpack.c.l.s8.bf16 %v1029_v25 }
 0x10d   : > { %2840 = vmatprep.subr.bf16.mxu0 %v2379_v33  ;;  %3012 = vmatprep.subr.bf16.mxu1 %v2381_v34  ;;  %v2606_v33 = vunpack.c.l.s8.bf16 %v1031_v27  ;;  %v1028_v34 = vld [vmem:[%s7354_s12 + $0x1838] sm:$0xff] }
 0x10e   : > { %v2603_v37 = vunpack.c.l.s8.bf16 %v1028_v34  ;;  %v2628_v43 = vunpack.c.h.s8.bf16 %v1028_v34 }
 0x110   : > { %2841 = vmatpush1.bf16.msra.mxu0 %v2378_v38  ;;  %3013 = vmatpush1.bf16.msra.mxu1 %v2380_v39  ;;  %v2605_v38 = vunpack.c.l.s8.bf16 %v1030_v35  ;;  %v2629_v39 = vunpack.c.h.s8.bf16 %v1029_v25 }
 0x111   : > { %2842 = vmatprep.subr.bf16.mxu0 %v2404_v40  ;;  %3014 = vmatprep.subr.bf16.mxu1 %v2406_v41  ;;  %v2631_v40 = vunpack.c.h.s8.bf16 %v1031_v27  ;;  %v258_v41 = vld [vmem:[%s7354_s12 + $0x28] sm:$0xff] }
 0x114   : > { %2843 = vmatpush1.bf16.msra.mxu0 %v2403_v47  ;;  %3015 = vmatpush1.bf16.msra.mxu1 %v2405_v48  ;;  %v2630_v47 = vunpack.c.h.s8.bf16 %v1030_v35  ;;  %v1058_v48 = vunpack.c.l.s8.bf16 %v258_v41 }
 0x115   : > { %2844 = vmatprep.subr.bf16.mxu0 %v2429_v49  ;;  %3016 = vmatprep.subr.bf16.mxu1 %v2431_v30  ;;  %v1060_v49 = vunpack.c.l.s8.bf16 %v260_v42  ;;  %v257_v30 = vld [vmem:[%s7354_s12 + $0x20] sm:$0xff] }
 0x116   : > { %v1082_v2 = vunpack.c.h.s8.bf16 %v257_v30 }
 0x118   : > { %2845 = vmatpush1.bf16.msra.mxu0 %v2428_v52  ;;  %3017 = vmatpush1.bf16.msra.mxu1 %v2430_v53  ;;  %v1057_v52 = vunpack.c.l.s8.bf16 %v257_v30  ;;  %v1059_v53 = vunpack.c.l.s8.bf16 %v259_v31 }
 0x119   : > { %2846 = vmatprep.subr.bf16.mxu0 %v2454_v54  ;;  %3018 = vmatprep.subr.bf16.mxu1 %v2456_v55  ;;  %v1083_v54 = vunpack.c.h.s8.bf16 %v258_v41  ;;  %v1085_v55 = vunpack.c.h.s8.bf16 %v260_v42 }
 0x11c   : > { %2847 = vmatpush1.bf16.msra.mxu0 %v2453_v58  ;;  %3019 = vmatpush1.bf16.msra.mxu1 %v2455_v59  ;;  %v1108_v58 = vunpack.c.l.s8.bf16 %v283_v56  ;;  %v1110_v59 = vunpack.c.l.s8.bf16 %v285_v57 }
 0x11d   : > { %2848 = vmatprep.subr.bf16.mxu0 %v2479_v60  ;;  %3020 = vmatprep.subr.bf16.mxu1 %v2481_v61  ;;  %v282_v60 = vld [vmem:[%s7354_s12 + $0xe8] sm:$0xff]  ;;  %v284_v61 = vld [vmem:[%s7354_s12 + $0xf8] sm:$0xff] }
 0x11e   : > { %v1107_v62 = vunpack.c.l.s8.bf16 %v282_v60  ;;  %v1109_v63 = vunpack.c.l.s8.bf16 %v284_v61  ;;  %v1132_v20 = vunpack.c.h.s8.bf16 %v282_v60  ;;  %v1134_v21 = vunpack.c.h.s8.bf16 %v284_v61 }
 0x120   : > { %2849 = vmatpush1.bf16.msra.mxu0 %v2478_v0  ;;  %3021 = vmatpush1.bf16.msra.mxu1 %v2480_v4  ;;  %v1133_v0 = vunpack.c.h.s8.bf16 %v283_v56  ;;  %v1135_v4 = vunpack.c.h.s8.bf16 %v285_v57 }
 0x121   : > { %2850 = vmatprep.subr.bf16.mxu0 %v2504_v5  ;;  %3022 = vmatprep.subr.bf16.mxu1 %v2506_v6  ;;  %v308_v5 = vld [vmem:[%s7354_s12 + $0x1b8] sm:$0xff]  ;;  %v310_v6 = vld [vmem:[%s7354_s12 + $0x1c8] sm:$0xff] }
 0x124   : > { %2851 = vmatpush1.bf16.msra.mxu0 %v2503_v7  ;;  %3023 = vmatpush1.bf16.msra.mxu1 %v2505_v9  ;;  %v1158_v7 = vunpack.c.l.s8.bf16 %v308_v5  ;;  %v1160_v9 = vunpack.c.l.s8.bf16 %v310_v6 }
 0x125   : > { %2852 = vmatprep.subr.bf16.mxu0 %v2529_v10  ;;  %3024 = vmatprep.subr.bf16.mxu1 %v2531_v11  ;;  %v307_v10 = vld [vmem:[%s7354_s12 + $0x1b0] sm:$0xff]  ;;  %v309_v11 = vld [vmem:[%s7354_s12 + $0x1c0] sm:$0xff] }
 0x126   : > { %v1157_v12 = vunpack.c.l.s8.bf16 %v307_v10  ;;  %v1159_v13 = vunpack.c.l.s8.bf16 %v309_v11  ;;  %v1182_v18 = vunpack.c.h.s8.bf16 %v307_v10  ;;  %v1184_v22 = vunpack.c.h.s8.bf16 %v309_v11 }
 0x128   : > { %2853 = vmatpush1.bf16.msra.mxu0 %v2528_v14  ;;  %3025 = vmatpush1.bf16.msra.mxu1 %v2530_v15  ;;  %v1183_v14 = vunpack.c.h.s8.bf16 %v308_v5  ;;  %v1185_v15 = vunpack.c.h.s8.bf16 %v310_v6 }
 0x129   : > { %2854 = vmatprep.subr.bf16.mxu0 %v2554_v16  ;;  %3026 = vmatprep.subr.bf16.mxu1 %v2556_v17  ;;  %v333_v16 = vld [vmem:[%s7354_s12 + $0x280] sm:$0xff]  ;;  %v335_v17 = vld [vmem:[%s7354_s12 + $0x290] sm:$0xff] }
 0x12c   : > { %2855 = vmatpush1.bf16.msra.mxu0 %v2553_v23  ;;  %3027 = vmatpush1.bf16.msra.mxu1 %v2555_v24  ;;  %v1208_v23 = vunpack.c.l.s8.bf16 %v333_v16  ;;  %v1210_v24 = vunpack.c.l.s8.bf16 %v335_v17 }
 0x12d   : > { %2856 = vmatprep.subr.bf16.mxu0 %v2579_v45  ;;  %3028 = vmatprep.subr.bf16.mxu1 %v2581_v46  ;;  %v332_v45 = vld [vmem:[%s7354_s12 + $0x278] sm:$0xff]  ;;  %v334_v46 = vld [vmem:[%s7354_s12 + $0x288] sm:$0xff] }
 0x12e   : > { %v1207_v25 = vunpack.c.l.s8.bf16 %v332_v45  ;;  %v1209_v27 = vunpack.c.l.s8.bf16 %v334_v46  ;;  %v1232_v34 = vunpack.c.h.s8.bf16 %v332_v45  ;;  %v1234_v35 = vunpack.c.h.s8.bf16 %v334_v46 }
 0x130   : > { %2857 = vmatpush1.bf16.msra.mxu0 %v2578_v28  ;;  %3029 = vmatpush1.bf16.msra.mxu1 %v2580_v29  ;;  %v1233_v28 = vunpack.c.h.s8.bf16 %v333_v16  ;;  %v1235_v29 = vunpack.c.h.s8.bf16 %v335_v17 }
 0x131   : > { %2858 = vmatprep.subr.bf16.mxu0 %v2604_v32  ;;  %3030 = vmatprep.subr.bf16.mxu1 %v2606_v33  ;;  %v358_v32 = vld [vmem:[%s7354_s12 + $0x348] sm:$0xff]  ;;  %v360_v33 = vld [vmem:[%s7354_s12 + $0x358] sm:$0xff] }
 0x134   : > { %2859 = vmatpush1.bf16.msra.mxu0 %v2603_v37  ;;  %3031 = vmatpush1.bf16.msra.mxu1 %v2605_v38  ;;  %v1258_v37 = vunpack.c.l.s8.bf16 %v358_v32  ;;  %v1260_v38 = vunpack.c.l.s8.bf16 %v360_v33 }
 0x135   : > { %2860 = vmatprep.subr.bf16.mxu0 %v2629_v39  ;;  %3032 = vmatprep.subr.bf16.mxu1 %v2631_v40  ;;  %v357_v39 = vld [vmem:[%s7354_s12 + $0x340] sm:$0xff]  ;;  %v359_v40 = vld [vmem:[%s7354_s12 + $0x350] sm:$0xff] }
 0x136   : > { %v1257_v41 = vunpack.c.l.s8.bf16 %v357_v39  ;;  %v1259_v42 = vunpack.c.l.s8.bf16 %v359_v40  ;;  %v1282_v30 = vunpack.c.h.s8.bf16 %v357_v39  ;;  %v1284_v31 = vunpack.c.h.s8.bf16 %v359_v40 }
 0x138   : > { %2861 = vmatpush1.bf16.msra.mxu0 %v2628_v43  ;;  %3033 = vmatpush1.bf16.msra.mxu1 %v2630_v47  ;;  %v1283_v43 = vunpack.c.h.s8.bf16 %v358_v32  ;;  %v1285_v47 = vunpack.c.h.s8.bf16 %v360_v33 }
 0x139   : > { %3045 = vmatprep.subr.bf16.mxu0 %v1058_v48  ;;  %3217 = vmatprep.subr.bf16.mxu1 %v1060_v49  ;;  %v383_v48 = vld [vmem:[%s7354_s12 + $0x410] sm:$0xff]  ;;  %v385_v49 = vld [vmem:[%s7354_s12 + $0x420] sm:$0xff] }
 0x13b   : > { %2863 = vmatmul.mubr.bf16.vlgmr.msra.gmra.mrb[0].mxu0 %v7576_v50  ;;  %3035 = vmatmul.mubr.bf16.vlgmr.msra.gmra.mrb[0].mxu1 %v7576_v50 }
 0x13c   : > { %3046 = vmatpush1.bf16.msra.mxu0 %v1057_v52  ;;  %3218 = vmatpush1.bf16.msra.mxu1 %v1059_v53  ;;  %v1308_v52 = vunpack.c.l.s8.bf16 %v383_v48  ;;  %v1310_v53 = vunpack.c.l.s8.bf16 %v385_v49 }
 0x13d   : > { %3047 = vmatprep.subr.bf16.mxu0 %v1083_v54  ;;  %3219 = vmatprep.subr.bf16.mxu1 %v1085_v55  ;;  %v382_v54 = vld [vmem:[%s7354_s12 + $0x408] sm:$0xff]  ;;  %v384_v55 = vld [vmem:[%s7354_s12 + $0x418] sm:$0xff] }
 0x13e   : > { %3077 = vmatprep.mubr.bf16.mxu0 %v7384_v36  ;;  %3249 = vmatprep.mubr.bf16.mxu1 %v7384_v36  ;;  %v1307_v56 = vunpack.c.l.s8.bf16 %v382_v54  ;;  %v1309_v57 = vunpack.c.l.s8.bf16 %v384_v55  ;;  %v1332_v60 = vunpack.c.h.s8.bf16 %v382_v54  ;;  %v1334_v61 = vunpack.c.h.s8.bf16 %v384_v55 }
 0x140   : > { %3048 = vmatpush1.bf16.msra.mxu0 %v1082_v2  ;;  %3220 = vmatpush1.bf16.msra.mxu1 %v1084_v3  ;;  %v1333_v2 = vunpack.c.h.s8.bf16 %v383_v48  ;;  %v1335_v3 = vunpack.c.h.s8.bf16 %v385_v49 }
 0x141   : > { %3049 = vmatprep.subr.bf16.mxu0 %v1108_v58  ;;  %3221 = vmatprep.subr.bf16.mxu1 %v1110_v59  ;;  %v408_v58 = vld [vmem:[%s7354_s12 + $0x4d8] sm:$0xff]  ;;  %v410_v59 = vld [vmem:[%s7354_s12 + $0x4e8] sm:$0xff] }
 0x144   : > { %3050 = vmatpush1.bf16.msra.mxu0 %v1107_v62  ;;  %3222 = vmatpush1.bf16.msra.mxu1 %v1109_v63  ;;  %v1358_v62 = vunpack.c.l.s8.bf16 %v408_v58  ;;  %v1360_v63 = vunpack.c.l.s8.bf16 %v410_v59 }
 0x145   : > { %3051 = vmatprep.subr.bf16.mxu0 %v1133_v0  ;;  %3223 = vmatprep.subr.bf16.mxu1 %v1135_v4  ;;  %v407_v0 = vld [vmem:[%s7354_s12 + $0x4d0] sm:$0xff]  ;;  %v409_v4 = vld [vmem:[%s7354_s12 + $0x4e0] sm:$0xff] }
 0x146   : > { %v1357_v5 = vunpack.c.l.s8.bf16 %v407_v0  ;;  %v1359_v6 = vunpack.c.l.s8.bf16 %v409_v4  ;;  %v1382_v10 = vunpack.c.h.s8.bf16 %v407_v0  ;;  %v1384_v11 = vunpack.c.h.s8.bf16 %v409_v4 }
 0x148   : > { %3052 = vmatpush1.bf16.msra.mxu0 %v1132_v20  ;;  %3224 = vmatpush1.bf16.msra.mxu1 %v1134_v21  ;;  %v1383_v20 = vunpack.c.h.s8.bf16 %v408_v58  ;;  %v1385_v21 = vunpack.c.h.s8.bf16 %v410_v59 }
 0x149   : > { %3053 = vmatprep.subr.bf16.mxu0 %v1158_v7  ;;  %3225 = vmatprep.subr.bf16.mxu1 %v1160_v9  ;;  %v433_v7 = vld [vmem:[%s7354_s12 + $0x5a0] sm:$0xff]  ;;  %v435_v9 = vld [vmem:[%s7354_s12 + $0x5b0] sm:$0xff] }
 0x14c   : > { %3054 = vmatpush1.bf16.msra.mxu0 %v1157_v12  ;;  %3226 = vmatpush1.bf16.msra.mxu1 %v1159_v13  ;;  %v1408_v12 = vunpack.c.l.s8.bf16 %v433_v7  ;;  %v1410_v13 = vunpack.c.l.s8.bf16 %v435_v9 }
 0x14d   : > { %3055 = vmatprep.subr.bf16.mxu0 %v1183_v14  ;;  %3227 = vmatprep.subr.bf16.mxu1 %v1185_v15  ;;  %v432_v14 = vld [vmem:[%s7354_s12 + $0x598] sm:$0xff]  ;;  %v434_v15 = vld [vmem:[%s7354_s12 + $0x5a8] sm:$0xff] }
 0x14e   : > { %v1407_v16 = vunpack.c.l.s8.bf16 %v432_v14  ;;  %v1409_v17 = vunpack.c.l.s8.bf16 %v434_v15  ;;  %v1432_v45 = vunpack.c.h.s8.bf16 %v432_v14  ;;  %v1434_v46 = vunpack.c.h.s8.bf16 %v434_v15 }
 0x150   : > { %3056 = vmatpush1.bf16.msra.mxu0 %v1182_v18  ;;  %3228 = vmatpush1.bf16.msra.mxu1 %v1184_v22  ;;  %v1433_v18 = vunpack.c.h.s8.bf16 %v433_v7  ;;  %v1435_v22 = vunpack.c.h.s8.bf16 %v435_v9 }
 0x151   : > { %3057 = vmatprep.subr.bf16.mxu0 %v1208_v23  ;;  %3229 = vmatprep.subr.bf16.mxu1 %v1210_v24  ;;  %v458_v23 = vld [vmem:[%s7354_s12 + $0x668] sm:$0xff]  ;;  %v460_v24 = vld [vmem:[%s7354_s12 + $0x678] sm:$0xff] }
 0x154   : > { %3058 = vmatpush1.bf16.msra.mxu0 %v1207_v25  ;;  %3230 = vmatpush1.bf16.msra.mxu1 %v1209_v27  ;;  %v1458_v25 = vunpack.c.l.s8.bf16 %v458_v23  ;;  %v1460_v27 = vunpack.c.l.s8.bf16 %v460_v24 }
 0x155   : > { %3059 = vmatprep.subr.bf16.mxu0 %v1233_v28  ;;  %3231 = vmatprep.subr.bf16.mxu1 %v1235_v29  ;;  %v457_v28 = vld [vmem:[%s7354_s12 + $0x660] sm:$0xff]  ;;  %v459_v29 = vld [vmem:[%s7354_s12 + $0x670] sm:$0xff] }
 0x156   : > { %v1457_v32 = vunpack.c.l.s8.bf16 %v457_v28  ;;  %v1459_v33 = vunpack.c.l.s8.bf16 %v459_v29  ;;  %v1482_v39 = vunpack.c.h.s8.bf16 %v457_v28  ;;  %v1484_v40 = vunpack.c.h.s8.bf16 %v459_v29 }
 0x158   : > { %3060 = vmatpush1.bf16.msra.mxu0 %v1232_v34  ;;  %3232 = vmatpush1.bf16.msra.mxu1 %v1234_v35  ;;  %v1483_v34 = vunpack.c.h.s8.bf16 %v458_v23  ;;  %v1485_v35 = vunpack.c.h.s8.bf16 %v460_v24 }
 0x159   : > { %3061 = vmatprep.subr.bf16.mxu0 %v1258_v37  ;;  %3233 = vmatprep.subr.bf16.mxu1 %v1260_v38  ;;  %v483_v37 = vld [vmem:[%s7354_s12 + $0x730] sm:$0xff]  ;;  %v485_v38 = vld [vmem:[%s7354_s12 + $0x740] sm:$0xff] }
 0x15c   : > { %3062 = vmatpush1.bf16.msra.mxu0 %v1257_v41  ;;  %3234 = vmatpush1.bf16.msra.mxu1 %v1259_v42  ;;  %v1508_v41 = vunpack.c.l.s8.bf16 %v483_v37  ;;  %v1510_v42 = vunpack.c.l.s8.bf16 %v485_v38 }
 0x15d   : > { %3063 = vmatprep.subr.bf16.mxu0 %v1283_v43  ;;  %3235 = vmatprep.subr.bf16.mxu1 %v1285_v47  ;;  %v482_v43 = vld [vmem:[%s7354_s12 + $0x728] sm:$0xff]  ;;  %v484_v47 = vld [vmem:[%s7354_s12 + $0x738] sm:$0xff] }
 0x15e   : > { %v1507_v48 = vunpack.c.l.s8.bf16 %v482_v43  ;;  %v1509_v49 = vunpack.c.l.s8.bf16 %v484_v47  ;;  %v1532_v54 = vunpack.c.h.s8.bf16 %v482_v43  ;;  %v1534_v55 = vunpack.c.h.s8.bf16 %v484_v47 }
 0x160   : > { %3064 = vmatpush1.bf16.msra.mxu0 %v1282_v30  ;;  %3236 = vmatpush1.bf16.msra.mxu1 %v1284_v31  ;;  %v1533_v30 = vunpack.c.h.s8.bf16 %v483_v37  ;;  %v1535_v31 = vunpack.c.h.s8.bf16 %v485_v38 }
 0x161   : > { %3065 = vmatprep.subr.bf16.mxu0 %v1308_v52  ;;  %3237 = vmatprep.subr.bf16.mxu1 %v1310_v53  ;;  %v508_v52 = vld [vmem:[%s7354_s12 + $0x7f8] sm:$0xff]  ;;  %v510_v53 = vld [vmem:[%s7354_s12 + $0x808] sm:$0xff] }
 0x164   : > { %3066 = vmatpush1.bf16.msra.mxu0 %v1307_v56  ;;  %3238 = vmatpush1.bf16.msra.mxu1 %v1309_v57  ;;  %v1558_v56 = vunpack.c.l.s8.bf16 %v508_v52  ;;  %v1560_v57 = vunpack.c.l.s8.bf16 %v510_v53 }
 0x165   : > { %3067 = vmatprep.subr.bf16.mxu0 %v1333_v2  ;;  %3239 = vmatprep.subr.bf16.mxu1 %v1335_v3  ;;  %v507_v2 = vld [vmem:[%s7354_s12 + $0x7f0] sm:$0xff]  ;;  %v509_v3 = vld [vmem:[%s7354_s12 + $0x800] sm:$0xff] }
 0x166   : > { %v1557_v58 = vunpack.c.l.s8.bf16 %v507_v2  ;;  %v1559_v59 = vunpack.c.l.s8.bf16 %v509_v3  ;;  %v1582_v0 = vunpack.c.h.s8.bf16 %v507_v2  ;;  %v1584_v4 = vunpack.c.h.s8.bf16 %v509_v3 }
 0x168   : > { %3068 = vmatpush1.bf16.msra.mxu0 %v1332_v60  ;;  %3240 = vmatpush1.bf16.msra.mxu1 %v1334_v61  ;;  %v1583_v60 = vunpack.c.h.s8.bf16 %v508_v52  ;;  %v1585_v61 = vunpack.c.h.s8.bf16 %v510_v53 }
 0x169   : > { %3069 = vmatprep.subr.bf16.mxu0 %v1358_v62  ;;  %3241 = vmatprep.subr.bf16.mxu1 %v1360_v63  ;;  %v533_v62 = vld [vmem:[%s7354_s12 + $0x8c0] sm:$0xff]  ;;  %v535_v63 = vld [vmem:[%s7354_s12 + $0x8d0] sm:$0xff] }
 0x16c   : > { %3070 = vmatpush1.bf16.msra.mxu0 %v1357_v5  ;;  %3242 = vmatpush1.bf16.msra.mxu1 %v1359_v6  ;;  %v1608_v5 = vunpack.c.l.s8.bf16 %v533_v62  ;;  %v1610_v6 = vunpack.c.l.s8.bf16 %v535_v63 }
 0x16d   : > { %3071 = vmatprep.subr.bf16.mxu0 %v1383_v20  ;;  %3243 = vmatprep.subr.bf16.mxu1 %v1385_v21  ;;  %v532_v20 = vld [vmem:[%s7354_s12 + $0x8b8] sm:$0xff]  ;;  %v534_v21 = vld [vmem:[%s7354_s12 + $0x8c8] sm:$0xff] }
 0x16e   : > { %v1607_v7 = vunpack.c.l.s8.bf16 %v532_v20  ;;  %v1609_v9 = vunpack.c.l.s8.bf16 %v534_v21  ;;  %v1632_v14 = vunpack.c.h.s8.bf16 %v532_v20  ;;  %v1634_v15 = vunpack.c.h.s8.bf16 %v534_v21 }
 0x170   : > { %3072 = vmatpush1.bf16.msra.mxu0 %v1382_v10  ;;  %3244 = vmatpush1.bf16.msra.mxu1 %v1384_v11  ;;  %v1633_v10 = vunpack.c.h.s8.bf16 %v533_v62  ;;  %v1635_v11 = vunpack.c.h.s8.bf16 %v535_v63 }
 0x171   : > { %3073 = vmatprep.subr.bf16.mxu0 %v1408_v12  ;;  %3245 = vmatprep.subr.bf16.mxu1 %v1410_v13  ;;  %v558_v12 = vld [vmem:[%s7354_s12 + $0x988] sm:$0xff]  ;;  %v560_v13 = vld [vmem:[%s7354_s12 + $0x998] sm:$0xff] }
 0x174   : > { %3074 = vmatpush1.bf16.msra.mxu0 %v1407_v16  ;;  %3246 = vmatpush1.bf16.msra.mxu1 %v1409_v17  ;;  %v1658_v16 = vunpack.c.l.s8.bf16 %v558_v12  ;;  %v1660_v17 = vunpack.c.l.s8.bf16 %v560_v13 }
 0x175   : > { %3075 = vmatprep.subr.bf16.mxu0 %v1433_v18  ;;  %3247 = vmatprep.subr.bf16.mxu1 %v1435_v22  ;;  %v557_v18 = vld [vmem:[%s7354_s12 + $0x980] sm:$0xff]  ;;  %v559_v22 = vld [vmem:[%s7354_s12 + $0x990] sm:$0xff] }
 0x176   : > { %v1657_v23 = vunpack.c.l.s8.bf16 %v557_v18  ;;  %v1659_v24 = vunpack.c.l.s8.bf16 %v559_v22  ;;  %v1682_v28 = vunpack.c.h.s8.bf16 %v557_v18  ;;  %v1684_v29 = vunpack.c.h.s8.bf16 %v559_v22 }
 0x178   : > { %3076 = vmatpush1.bf16.msra.mxu0 %v1432_v45  ;;  %3248 = vmatpush1.bf16.msra.mxu1 %v1434_v46  ;;  %v1683_v45 = vunpack.c.h.s8.bf16 %v558_v12  ;;  %v1685_v46 = vunpack.c.h.s8.bf16 %v560_v13 }
 0x179   : > { %3088 = vmatprep.subr.bf16.mxu0 %v1458_v25  ;;  %3260 = vmatprep.subr.bf16.mxu1 %v1460_v27  ;;  %v583_v25 = vld [vmem:[%s7354_s12 + $0xa50] sm:$0xff]  ;;  %v585_v27 = vld [vmem:[%s7354_s12 + $0xa60] sm:$0xff] }
 0x17b   : > { %3078 = vmatmul.mubr.bf16.vlgmr.msra.gmra.mrb[4].mxu0 %v7414_v44  ;;  %3250 = vmatmul.mubr.bf16.vlgmr.msra.gmra.mrb[4].mxu1 %v7414_v44 }
 0x17c   : > { %3089 = vmatpush1.bf16.msra.mxu0 %v1457_v32  ;;  %3261 = vmatpush1.bf16.msra.mxu1 %v1459_v33  ;;  %v1708_v32 = vunpack.c.l.s8.bf16 %v583_v25  ;;  %v1710_v33 = vunpack.c.l.s8.bf16 %v585_v27 }
 0x17d   : > { %3090 = vmatprep.subr.bf16.mxu0 %v1483_v34  ;;  %3262 = vmatprep.subr.bf16.mxu1 %v1485_v35  ;;  %v582_v34 = vld [vmem:[%s7354_s12 + $0xa48] sm:$0xff]  ;;  %v584_v35 = vld [vmem:[%s7354_s12 + $0xa58] sm:$0xff] }
 0x17e   : > { %3120 = vmatprep.mubr.bf16.mxu0 %v7430_v51  ;;  %3292 = vmatprep.mubr.bf16.mxu1 %v7430_v51  ;;  %v1707_v37 = vunpack.c.l.s8.bf16 %v582_v34  ;;  %v1709_v38 = vunpack.c.l.s8.bf16 %v584_v35  ;;  %v1732_v43 = vunpack.c.h.s8.bf16 %v582_v34  ;;  %v1734_v47 = vunpack.c.h.s8.bf16 %v584_v35 }
 0x180   : > { %3091 = vmatpush1.bf16.msra.mxu0 %v1482_v39  ;;  %3263 = vmatpush1.bf16.msra.mxu1 %v1484_v40  ;;  %v1733_v39 = vunpack.c.h.s8.bf16 %v583_v25  ;;  %v1735_v40 = vunpack.c.h.s8.bf16 %v585_v27 }
 0x181   : > { %3092 = vmatprep.subr.bf16.mxu0 %v1508_v41  ;;  %3264 = vmatprep.subr.bf16.mxu1 %v1510_v42  ;;  %v608_v41 = vld [vmem:[%s7354_s12 + $0xb18] sm:$0xff]  ;;  %v610_v42 = vld [vmem:[%s7354_s12 + $0xb28] sm:$0xff] }
 0x184   : > { %3093 = vmatpush1.bf16.msra.mxu0 %v1507_v48  ;;  %3265 = vmatpush1.bf16.msra.mxu1 %v1509_v49  ;;  %v1758_v48 = vunpack.c.l.s8.bf16 %v608_v41  ;;  %v1760_v49 = vunpack.c.l.s8.bf16 %v610_v42 }
 0x185   : > { %3094 = vmatprep.subr.bf16.mxu0 %v1533_v30  ;;  %3266 = vmatprep.subr.bf16.mxu1 %v1535_v31  ;;  %v607_v30 = vld [vmem:[%s7354_s12 + $0xb10] sm:$0xff]  ;;  %v609_v31 = vld [vmem:[%s7354_s12 + $0xb20] sm:$0xff] }
 0x186   : > { %v1757_v52 = vunpack.c.l.s8.bf16 %v607_v30  ;;  %v1759_v53 = vunpack.c.l.s8.bf16 %v609_v31  ;;  %v1782_v2 = vunpack.c.h.s8.bf16 %v607_v30  ;;  %v1784_v3 = vunpack.c.h.s8.bf16 %v609_v31 }
 0x188   : > { %3095 = vmatpush1.bf16.msra.mxu0 %v1532_v54  ;;  %3267 = vmatpush1.bf16.msra.mxu1 %v1534_v55  ;;  %v1783_v54 = vunpack.c.h.s8.bf16 %v608_v41  ;;  %v1785_v55 = vunpack.c.h.s8.bf16 %v610_v42 }
 0x189   : > { %3096 = vmatprep.subr.bf16.mxu0 %v1558_v56  ;;  %3268 = vmatprep.subr.bf16.mxu1 %v1560_v57  ;;  %v633_v56 = vld [vmem:[%s7354_s12 + $0xbe0] sm:$0xff]  ;;  %v635_v57 = vld [vmem:[%s7354_s12 + $0xbf0] sm:$0xff] }
 0x18c   : > { %3097 = vmatpush1.bf16.msra.mxu0 %v1557_v58  ;;  %3269 = vmatpush1.bf16.msra.mxu1 %v1559_v59  ;;  %v1808_v58 = vunpack.c.l.s8.bf16 %v633_v56  ;;  %v1810_v59 = vunpack.c.l.s8.bf16 %v635_v57 }
 0x18d   : > { %3098 = vmatprep.subr.bf16.mxu0 %v1583_v60  ;;  %3270 = vmatprep.subr.bf16.mxu1 %v1585_v61  ;;  %v632_v60 = vld [vmem:[%s7354_s12 + $0xbd8] sm:$0xff]  ;;  %v634_v61 = vld [vmem:[%s7354_s12 + $0xbe8] sm:$0xff] }
 0x18e   : > { %v1807_v62 = vunpack.c.l.s8.bf16 %v632_v60  ;;  %v1809_v63 = vunpack.c.l.s8.bf16 %v634_v61  ;;  %v1832_v20 = vunpack.c.h.s8.bf16 %v632_v60  ;;  %v1834_v21 = vunpack.c.h.s8.bf16 %v634_v61 }
 0x190   : > { %3099 = vmatpush1.bf16.msra.mxu0 %v1582_v0  ;;  %3271 = vmatpush1.bf16.msra.mxu1 %v1584_v4  ;;  %v1833_v0 = vunpack.c.h.s8.bf16 %v633_v56  ;;  %v1835_v4 = vunpack.c.h.s8.bf16 %v635_v57 }
 0x191   : > { %3100 = vmatprep.subr.bf16.mxu0 %v1608_v5  ;;  %3272 = vmatprep.subr.bf16.mxu1 %v1610_v6  ;;  %v658_v5 = vld [vmem:[%s7354_s12 + $0xca8] sm:$0xff]  ;;  %v660_v6 = vld [vmem:[%s7354_s12 + $0xcb8] sm:$0xff] }
 0x194   : > { %3101 = vmatpush1.bf16.msra.mxu0 %v1607_v7  ;;  %3273 = vmatpush1.bf16.msra.mxu1 %v1609_v9  ;;  %v1858_v7 = vunpack.c.l.s8.bf16 %v658_v5  ;;  %v1860_v9 = vunpack.c.l.s8.bf16 %v660_v6 }
 0x195   : > { %3102 = vmatprep.subr.bf16.mxu0 %v1633_v10  ;;  %3274 = vmatprep.subr.bf16.mxu1 %v1635_v11  ;;  %v657_v10 = vld [vmem:[%s7354_s12 + $0xca0] sm:$0xff]  ;;  %v659_v11 = vld [vmem:[%s7354_s12 + $0xcb0] sm:$0xff] }
 0x196   : > { %v1857_v12 = vunpack.c.l.s8.bf16 %v657_v10  ;;  %v1859_v13 = vunpack.c.l.s8.bf16 %v659_v11  ;;  %v1882_v18 = vunpack.c.h.s8.bf16 %v657_v10  ;;  %v1884_v22 = vunpack.c.h.s8.bf16 %v659_v11 }
 0x198   : > { %3103 = vmatpush1.bf16.msra.mxu0 %v1632_v14  ;;  %3275 = vmatpush1.bf16.msra.mxu1 %v1634_v15  ;;  %v1883_v14 = vunpack.c.h.s8.bf16 %v658_v5  ;;  %v1885_v15 = vunpack.c.h.s8.bf16 %v660_v6 }
 0x199   : > { %3104 = vmatprep.subr.bf16.mxu0 %v1658_v16  ;;  %3276 = vmatprep.subr.bf16.mxu1 %v1660_v17  ;;  %v683_v16 = vld [vmem:[%s7354_s12 + $0xd70] sm:$0xff]  ;;  %v685_v17 = vld [vmem:[%s7354_s12 + $0xd80] sm:$0xff] }
 0x19c   : > { %3105 = vmatpush1.bf16.msra.mxu0 %v1657_v23  ;;  %3277 = vmatpush1.bf16.msra.mxu1 %v1659_v24  ;;  %v1908_v23 = vunpack.c.l.s8.bf16 %v683_v16  ;;  %v1910_v24 = vunpack.c.l.s8.bf16 %v685_v17 }
 0x19d   : > { %3106 = vmatprep.subr.bf16.mxu0 %v1683_v45  ;;  %3278 = vmatprep.subr.bf16.mxu1 %v1685_v46  ;;  %v682_v45 = vld [vmem:[%s7354_s12 + $0xd68] sm:$0xff]  ;;  %v684_v46 = vld [vmem:[%s7354_s12 + $0xd78] sm:$0xff] }
 0x19e   : > { %v1907_v25 = vunpack.c.l.s8.bf16 %v682_v45  ;;  %v1909_v27 = vunpack.c.l.s8.bf16 %v684_v46  ;;  %v1932_v34 = vunpack.c.h.s8.bf16 %v682_v45  ;;  %v1934_v35 = vunpack.c.h.s8.bf16 %v684_v46 }
 0x1a0   : > { %3107 = vmatpush1.bf16.msra.mxu0 %v1682_v28  ;;  %3279 = vmatpush1.bf16.msra.mxu1 %v1684_v29  ;;  %v1933_v28 = vunpack.c.h.s8.bf16 %v683_v16  ;;  %v1935_v29 = vunpack.c.h.s8.bf16 %v685_v17 }
 0x1a1   : > { %3108 = vmatprep.subr.bf16.mxu0 %v1708_v32  ;;  %3280 = vmatprep.subr.bf16.mxu1 %v1710_v33  ;;  %v708_v32 = vld [vmem:[%s7354_s12 + $0xe38] sm:$0xff]  ;;  %v710_v33 = vld [vmem:[%s7354_s12 + $0xe48] sm:$0xff] }
 0x1a4   : > { %3109 = vmatpush1.bf16.msra.mxu0 %v1707_v37  ;;  %3281 = vmatpush1.bf16.msra.mxu1 %v1709_v38  ;;  %v1958_v37 = vunpack.c.l.s8.bf16 %v708_v32  ;;  %v1960_v38 = vunpack.c.l.s8.bf16 %v710_v33 }
 0x1a5   : > { %3110 = vmatprep.subr.bf16.mxu0 %v1733_v39  ;;  %3282 = vmatprep.subr.bf16.mxu1 %v1735_v40  ;;  %v707_v39 = vld [vmem:[%s7354_s12 + $0xe30] sm:$0xff]  ;;  %v709_v40 = vld [vmem:[%s7354_s12 + $0xe40] sm:$0xff] }
 0x1a6   : > { %v1957_v41 = vunpack.c.l.s8.bf16 %v707_v39  ;;  %v1959_v42 = vunpack.c.l.s8.bf16 %v709_v40  ;;  %v1982_v30 = vunpack.c.h.s8.bf16 %v707_v39  ;;  %v1984_v31 = vunpack.c.h.s8.bf16 %v709_v40 }
 0x1a8   : > { %3111 = vmatpush1.bf16.msra.mxu0 %v1732_v43  ;;  %3283 = vmatpush1.bf16.msra.mxu1 %v1734_v47  ;;  %v1983_v43 = vunpack.c.h.s8.bf16 %v708_v32  ;;  %v1985_v47 = vunpack.c.h.s8.bf16 %v710_v33 }
 0x1a9   : > { %3112 = vmatprep.subr.bf16.mxu0 %v1758_v48  ;;  %3284 = vmatprep.subr.bf16.mxu1 %v1760_v49  ;;  %v733_v48 = vld [vmem:[%s7354_s12 + $0xf00] sm:$0xff]  ;;  %v735_v49 = vld [vmem:[%s7354_s12 + $0xf10] sm:$0xff] }
 0x1ac   : > { %3113 = vmatpush1.bf16.msra.mxu0 %v1757_v52  ;;  %3285 = vmatpush1.bf16.msra.mxu1 %v1759_v53  ;;  %v2008_v52 = vunpack.c.l.s8.bf16 %v733_v48  ;;  %v2010_v53 = vunpack.c.l.s8.bf16 %v735_v49 }
 0x1ad   : > { %3114 = vmatprep.subr.bf16.mxu0 %v1783_v54  ;;  %3286 = vmatprep.subr.bf16.mxu1 %v1785_v55  ;;  %v732_v54 = vld [vmem:[%s7354_s12 + $0xef8] sm:$0xff]  ;;  %v734_v55 = vld [vmem:[%s7354_s12 + $0xf08] sm:$0xff] }
 0x1ae   : > { %v2007_v56 = vunpack.c.l.s8.bf16 %v732_v54  ;;  %v2009_v57 = vunpack.c.l.s8.bf16 %v734_v55  ;;  %v2032_v60 = vunpack.c.h.s8.bf16 %v732_v54  ;;  %v2034_v61 = vunpack.c.h.s8.bf16 %v734_v55 }
 0x1b0   : > { %3115 = vmatpush1.bf16.msra.mxu0 %v1782_v2  ;;  %3287 = vmatpush1.bf16.msra.mxu1 %v1784_v3  ;;  %v2033_v2 = vunpack.c.h.s8.bf16 %v733_v48  ;;  %v2035_v3 = vunpack.c.h.s8.bf16 %v735_v49 }
 0x1b1   : > { %3116 = vmatprep.subr.bf16.mxu0 %v1808_v58  ;;  %3288 = vmatprep.subr.bf16.mxu1 %v1810_v59  ;;  %v758_v58 = vld [vmem:[%s7354_s12 + $0xfc8] sm:$0xff]  ;;  %v760_v59 = vld [vmem:[%s7354_s12 + $0xfd8] sm:$0xff] }
 0x1b4   : > { %3117 = vmatpush1.bf16.msra.mxu0 %v1807_v62  ;;  %3289 = vmatpush1.bf16.msra.mxu1 %v1809_v63  ;;  %v2058_v62 = vunpack.c.l.s8.bf16 %v758_v58  ;;  %v2060_v63 = vunpack.c.l.s8.bf16 %v760_v59 }
 0x1b5   : > { %3118 = vmatprep.subr.bf16.mxu0 %v1833_v0  ;;  %3290 = vmatprep.subr.bf16.mxu1 %v1835_v4  ;;  %v757_v0 = vld [vmem:[%s7354_s12 + $0xfc0] sm:$0xff]  ;;  %v759_v4 = vld [vmem:[%s7354_s12 + $0xfd0] sm:$0xff] }
 0x1b6   : > { %v2057_v5 = vunpack.c.l.s8.bf16 %v757_v0  ;;  %v2059_v6 = vunpack.c.l.s8.bf16 %v759_v4  ;;  %v2082_v10 = vunpack.c.h.s8.bf16 %v757_v0  ;;  %v2084_v11 = vunpack.c.h.s8.bf16 %v759_v4 }
 0x1b8   : > { %3119 = vmatpush1.bf16.msra.mxu0 %v1832_v20  ;;  %3291 = vmatpush1.bf16.msra.mxu1 %v1834_v21  ;;  %v2083_v20 = vunpack.c.h.s8.bf16 %v758_v58  ;;  %v2085_v21 = vunpack.c.h.s8.bf16 %v760_v59 }
 0x1b9   : > { %3131 = vmatprep.subr.bf16.mxu0 %v1858_v7  ;;  %3303 = vmatprep.subr.bf16.mxu1 %v1860_v9  ;;  %v783_v7 = vld [vmem:[%s7354_s12 + $0x1090] sm:$0xff]  ;;  %v785_v9 = vld [vmem:[%s7354_s12 + $0x10a0] sm:$0xff] }
 0x1bb   : > { %3121 = vmatmul.mubr.bf16.vlgmr.msra.gmra.mrb[4].mxu0 %v7468_v19  ;;  %3293 = vmatmul.mubr.bf16.vlgmr.msra.gmra.mrb[4].mxu1 %v7468_v19 }
 0x1bc   : > { %3132 = vmatpush1.bf16.msra.mxu0 %v1857_v12  ;;  %3304 = vmatpush1.bf16.msra.mxu1 %v1859_v13  ;;  %v2108_v12 = vunpack.c.l.s8.bf16 %v783_v7  ;;  %v2110_v13 = vunpack.c.l.s8.bf16 %v785_v9 }
 0x1bd   : > { %3133 = vmatprep.subr.bf16.mxu0 %v1883_v14  ;;  %3305 = vmatprep.subr.bf16.mxu1 %v1885_v15  ;;  %v782_v14 = vld [vmem:[%s7354_s12 + $0x1088] sm:$0xff]  ;;  %v784_v15 = vld [vmem:[%s7354_s12 + $0x1098] sm:$0xff] }
 0x1be   : > { %3163 = vmatprep.mubr.bf16.mxu0 %v7484_v26  ;;  %3335 = vmatprep.mubr.bf16.mxu1 %v7484_v26  ;;  %v2107_v16 = vunpack.c.l.s8.bf16 %v782_v14  ;;  %v2109_v17 = vunpack.c.l.s8.bf16 %v784_v15  ;;  %v2132_v45 = vunpack.c.h.s8.bf16 %v782_v14  ;;  %v2134_v46 = vunpack.c.h.s8.bf16 %v784_v15 }
 0x1c0   : > { %3134 = vmatpush1.bf16.msra.mxu0 %v1882_v18  ;;  %3306 = vmatpush1.bf16.msra.mxu1 %v1884_v22  ;;  %v2133_v18 = vunpack.c.h.s8.bf16 %v783_v7  ;;  %v2135_v22 = vunpack.c.h.s8.bf16 %v785_v9 }
 0x1c1   : > { %3135 = vmatprep.subr.bf16.mxu0 %v1908_v23  ;;  %3307 = vmatprep.subr.bf16.mxu1 %v1910_v24  ;;  %v808_v23 = vld [vmem:[%s7354_s12 + $0x1158] sm:$0xff]  ;;  %v810_v24 = vld [vmem:[%s7354_s12 + $0x1168] sm:$0xff] }
 0x1c4   : > { %3136 = vmatpush1.bf16.msra.mxu0 %v1907_v25  ;;  %3308 = vmatpush1.bf16.msra.mxu1 %v1909_v27  ;;  %v2158_v25 = vunpack.c.l.s8.bf16 %v808_v23  ;;  %v2160_v27 = vunpack.c.l.s8.bf16 %v810_v24 }
 0x1c5   : > { %3137 = vmatprep.subr.bf16.mxu0 %v1933_v28  ;;  %3309 = vmatprep.subr.bf16.mxu1 %v1935_v29  ;;  %v807_v28 = vld [vmem:[%s7354_s12 + $0x1150] sm:$0xff]  ;;  %v809_v29 = vld [vmem:[%s7354_s12 + $0x1160] sm:$0xff] }
 0x1c6   : > { %v2157_v32 = vunpack.c.l.s8.bf16 %v807_v28  ;;  %v2159_v33 = vunpack.c.l.s8.bf16 %v809_v29  ;;  %v2182_v39 = vunpack.c.h.s8.bf16 %v807_v28  ;;  %v2184_v40 = vunpack.c.h.s8.bf16 %v809_v29 }
 0x1c8   : > { %3138 = vmatpush1.bf16.msra.mxu0 %v1932_v34  ;;  %3310 = vmatpush1.bf16.msra.mxu1 %v1934_v35  ;;  %v2183_v34 = vunpack.c.h.s8.bf16 %v808_v23  ;;  %v2185_v35 = vunpack.c.h.s8.bf16 %v810_v24 }
 0x1c9   : > { %3139 = vmatprep.subr.bf16.mxu0 %v1958_v37  ;;  %3311 = vmatprep.subr.bf16.mxu1 %v1960_v38  ;;  %v833_v37 = vld [vmem:[%s7354_s12 + $0x1220] sm:$0xff]  ;;  %v835_v38 = vld [vmem:[%s7354_s12 + $0x1230] sm:$0xff] }
 0x1cc   : > { %3140 = vmatpush1.bf16.msra.mxu0 %v1957_v41  ;;  %3312 = vmatpush1.bf16.msra.mxu1 %v1959_v42  ;;  %v2208_v41 = vunpack.c.l.s8.bf16 %v833_v37  ;;  %v2210_v42 = vunpack.c.l.s8.bf16 %v835_v38 }
 0x1cd   : > { %3141 = vmatprep.subr.bf16.mxu0 %v1983_v43  ;;  %3313 = vmatprep.subr.bf16.mxu1 %v1985_v47  ;;  %v832_v43 = vld [vmem:[%s7354_s12 + $0x1218] sm:$0xff]  ;;  %v834_v47 = vld [vmem:[%s7354_s12 + $0x1228] sm:$0xff] }
 0x1ce   : > { %v2207_v48 = vunpack.c.l.s8.bf16 %v832_v43  ;;  %v2209_v49 = vunpack.c.l.s8.bf16 %v834_v47  ;;  %v2232_v54 = vunpack.c.h.s8.bf16 %v832_v43  ;;  %v2234_v55 = vunpack.c.h.s8.bf16 %v834_v47 }
 0x1d0   : > { %3142 = vmatpush1.bf16.msra.mxu0 %v1982_v30  ;;  %3314 = vmatpush1.bf16.msra.mxu1 %v1984_v31  ;;  %v2233_v30 = vunpack.c.h.s8.bf16 %v833_v37  ;;  %v2235_v31 = vunpack.c.h.s8.bf16 %v835_v38 }
 0x1d1   : > { %3143 = vmatprep.subr.bf16.mxu0 %v2008_v52  ;;  %3315 = vmatprep.subr.bf16.mxu1 %v2010_v53  ;;  %v858_v52 = vld [vmem:[%s7354_s12 + $0x12e8] sm:$0xff]  ;;  %v860_v53 = vld [vmem:[%s7354_s12 + $0x12f8] sm:$0xff] }
 0x1d4   : > { %3144 = vmatpush1.bf16.msra.mxu0 %v2007_v56  ;;  %3316 = vmatpush1.bf16.msra.mxu1 %v2009_v57  ;;  %v2258_v56 = vunpack.c.l.s8.bf16 %v858_v52  ;;  %v2260_v57 = vunpack.c.l.s8.bf16 %v860_v53 }
 0x1d5   : > { %3145 = vmatprep.subr.bf16.mxu0 %v2033_v2  ;;  %3317 = vmatprep.subr.bf16.mxu1 %v2035_v3  ;;  %v857_v2 = vld [vmem:[%s7354_s12 + $0x12e0] sm:$0xff]  ;;  %v859_v3 = vld [vmem:[%s7354_s12 + $0x12f0] sm:$0xff] }
 0x1d6   : > { %v2257_v58 = vunpack.c.l.s8.bf16 %v857_v2  ;;  %v2259_v59 = vunpack.c.l.s8.bf16 %v859_v3  ;;  %v2282_v0 = vunpack.c.h.s8.bf16 %v857_v2  ;;  %v2284_v4 = vunpack.c.h.s8.bf16 %v859_v3 }
 0x1d8   : > { %3146 = vmatpush1.bf16.msra.mxu0 %v2032_v60  ;;  %3318 = vmatpush1.bf16.msra.mxu1 %v2034_v61  ;;  %v2283_v60 = vunpack.c.h.s8.bf16 %v858_v52  ;;  %v2285_v61 = vunpack.c.h.s8.bf16 %v860_v53 }
 0x1d9   : > { %3147 = vmatprep.subr.bf16.mxu0 %v2058_v62  ;;  %3319 = vmatprep.subr.bf16.mxu1 %v2060_v63  ;;  %v883_v62 = vld [vmem:[%s7354_s12 + $0x13b0] sm:$0xff]  ;;  %v885_v63 = vld [vmem:[%s7354_s12 + $0x13c0] sm:$0xff] }
 0x1dc   : > { %3148 = vmatpush1.bf16.msra.mxu0 %v2057_v5  ;;  %3320 = vmatpush1.bf16.msra.mxu1 %v2059_v6  ;;  %v2308_v5 = vunpack.c.l.s8.bf16 %v883_v62  ;;  %v2310_v6 = vunpack.c.l.s8.bf16 %v885_v63 }
 0x1dd   : > { %3149 = vmatprep.subr.bf16.mxu0 %v2083_v20  ;;  %3321 = vmatprep.subr.bf16.mxu1 %v2085_v21  ;;  %v882_v20 = vld [vmem:[%s7354_s12 + $0x13a8] sm:$0xff]  ;;  %v884_v21 = vld [vmem:[%s7354_s12 + $0x13b8] sm:$0xff] }
 0x1de   : > { %v2307_v7 = vunpack.c.l.s8.bf16 %v882_v20  ;;  %v2309_v9 = vunpack.c.l.s8.bf16 %v884_v21  ;;  %v2332_v14 = vunpack.c.h.s8.bf16 %v882_v20  ;;  %v2334_v15 = vunpack.c.h.s8.bf16 %v884_v21 }
 0x1e0   : > { %3150 = vmatpush1.bf16.msra.mxu0 %v2082_v10  ;;  %3322 = vmatpush1.bf16.msra.mxu1 %v2084_v11  ;;  %v2333_v10 = vunpack.c.h.s8.bf16 %v883_v62  ;;  %v2335_v11 = vunpack.c.h.s8.bf16 %v885_v63 }
 0x1e1   : > { %3151 = vmatprep.subr.bf16.mxu0 %v2108_v12  ;;  %3323 = vmatprep.subr.bf16.mxu1 %v2110_v13  ;;  %v908_v12 = vld [vmem:[%s7354_s12 + $0x1478] sm:$0xff]  ;;  %v910_v13 = vld [vmem:[%s7354_s12 + $0x1488] sm:$0xff] }
 0x1e4   : > { %3152 = vmatpush1.bf16.msra.mxu0 %v2107_v16  ;;  %3324 = vmatpush1.bf16.msra.mxu1 %v2109_v17  ;;  %v2358_v16 = vunpack.c.l.s8.bf16 %v908_v12  ;;  %v2360_v17 = vunpack.c.l.s8.bf16 %v910_v13 }
 0x1e5   : > { %3153 = vmatprep.subr.bf16.mxu0 %v2133_v18  ;;  %3325 = vmatprep.subr.bf16.mxu1 %v2135_v22  ;;  %v907_v18 = vld [vmem:[%s7354_s12 + $0x1470] sm:$0xff]  ;;  %v909_v22 = vld [vmem:[%s7354_s12 + $0x1480] sm:$0xff] }
 0x1e6   : > { %v2357_v23 = vunpack.c.l.s8.bf16 %v907_v18  ;;  %v2359_v24 = vunpack.c.l.s8.bf16 %v909_v22  ;;  %v2382_v28 = vunpack.c.h.s8.bf16 %v907_v18  ;;  %v2384_v29 = vunpack.c.h.s8.bf16 %v909_v22 }
 0x1e8   : > { %3154 = vmatpush1.bf16.msra.mxu0 %v2132_v45  ;;  %3326 = vmatpush1.bf16.msra.mxu1 %v2134_v46  ;;  %v2383_v45 = vunpack.c.h.s8.bf16 %v908_v12  ;;  %v2385_v46 = vunpack.c.h.s8.bf16 %v910_v13 }
 0x1e9   : > { %3155 = vmatprep.subr.bf16.mxu0 %v2158_v25  ;;  %3327 = vmatprep.subr.bf16.mxu1 %v2160_v27  ;;  %v933_v25 = vld [vmem:[%s7354_s12 + $0x1540] sm:$0xff]  ;;  %v935_v27 = vld [vmem:[%s7354_s12 + $0x1550] sm:$0xff] }
 0x1ea   : > { %v2433_v52 = vunpack.c.h.s8.bf16 %v933_v25  ;;  %v2435_v53 = vunpack.c.h.s8.bf16 %v935_v27 }
 0x1ec   : > { %3156 = vmatpush1.bf16.msra.mxu0 %v2157_v32  ;;  %3328 = vmatpush1.bf16.msra.mxu1 %v2159_v33  ;;  %v2408_v32 = vunpack.c.l.s8.bf16 %v933_v25  ;;  %v2410_v33 = vunpack.c.l.s8.bf16 %v935_v27 }
 0x1ed   : > { %3157 = vmatprep.subr.bf16.mxu0 %v2183_v34  ;;  %3329 = vmatprep.subr.bf16.mxu1 %v2185_v35  ;;  %v932_v34 = vld [vmem:[%s7354_s12 + $0x1538] sm:$0xff]  ;;  %v934_v35 = vld [vmem:[%s7354_s12 + $0x1548] sm:$0xff] }
 0x1ee   : > { %v2407_v43 = vunpack.c.l.s8.bf16 %v932_v34  ;;  %v2409_v47 = vunpack.c.l.s8.bf16 %v934_v35 }
 0x1f0   : > { %3158 = vmatpush1.bf16.msra.mxu0 %v2182_v39  ;;  %3330 = vmatpush1.bf16.msra.mxu1 %v2184_v40 }
 0x1f1   : > { %3159 = vmatprep.subr.bf16.mxu0 %v2208_v41  ;;  %3331 = vmatprep.subr.bf16.mxu1 %v2210_v42 }
 0x1f4   : > { %3160 = vmatpush1.bf16.msra.mxu0 %v2207_v48  ;;  %3332 = vmatpush1.bf16.msra.mxu1 %v2209_v49 }
 0x1f5   : > { %3161 = vmatprep.subr.bf16.mxu0 %v2233_v30  ;;  %3333 = vmatprep.subr.bf16.mxu1 %v2235_v31 }
 0x1f8   : > { %3162 = vmatpush1.bf16.msra.mxu0 %v2232_v54  ;;  %3334 = vmatpush1.bf16.msra.mxu1 %v2234_v55 }
 0x1f9   : > { %3174 = vmatprep.subr.bf16.mxu0 %v2258_v56  ;;  %3346 = vmatprep.subr.bf16.mxu1 %v2260_v57  ;;  %v958_v56 = vld [vmem:[%s7354_s12 + $0x1608] sm:$0xff]  ;;  %v960_v57 = vld [vmem:[%s7354_s12 + $0x1618] sm:$0xff] }
 0x1fa   : > { %v2485_v18 = vunpack.c.h.s8.bf16 %v960_v57 }
 0x1fb   : > { %3164 = vmatmul.mubr.bf16.vlgmr.msra.gmra.mrb[4].mxu0 %v7522_v1  ;;  %3336 = vmatmul.mubr.bf16.vlgmr.msra.gmra.mrb[4].mxu1 %v7522_v1 }
 0x1fc   : > { %3175 = vmatpush1.bf16.msra.mxu0 %v2257_v58  ;;  %3347 = vmatpush1.bf16.msra.mxu1 %v2259_v59 }
 0x1fd   : > { %3176 = vmatprep.subr.bf16.mxu0 %v2283_v60  ;;  %3348 = vmatprep.subr.bf16.mxu1 %v2285_v61  ;;  %v2432_v60 = vunpack.c.h.s8.bf16 %v932_v34  ;;  %v2434_v61 = vunpack.c.h.s8.bf16 %v934_v35 }
 0x1fe   : > { %3206 = vmatprep.mubr.bf16.mxu0 %v7538_v8  ;;  %3378 = vmatprep.mubr.bf16.mxu1 %v7538_v8 }
 0x200   : > { %3177 = vmatpush1.bf16.msra.mxu0 %v2282_v0  ;;  %3349 = vmatpush1.bf16.msra.mxu1 %v2284_v4  ;;  %v2458_v0 = vunpack.c.l.s8.bf16 %v958_v56  ;;  %v2460_v4 = vunpack.c.l.s8.bf16 %v960_v57 }
 0x201   : > { %3178 = vmatprep.subr.bf16.mxu0 %v2308_v5  ;;  %3350 = vmatprep.subr.bf16.mxu1 %v2310_v6  ;;  %v957_v5 = vld [vmem:[%s7354_s12 + $0x1600] sm:$0xff]  ;;  %v959_v6 = vld [vmem:[%s7354_s12 + $0x1610] sm:$0xff] }
 0x202   : > { %v2457_v13 = vunpack.c.l.s8.bf16 %v957_v5 }
 0x204   : > { %3179 = vmatpush1.bf16.msra.mxu0 %v2307_v7  ;;  %3351 = vmatpush1.bf16.msra.mxu1 %v2309_v9  ;;  %v4929_v7 = vlaneseq }
 0x205   : > { %3180 = vmatprep.subr.bf16.mxu0 %v2333_v10  ;;  %3352 = vmatprep.subr.bf16.mxu1 %v2335_v11 }
 0x208   : > { %3181 = vmatpush1.bf16.msra.mxu0 %v2332_v14  ;;  %3353 = vmatpush1.bf16.msra.mxu1 %v2334_v15  ;;  %v2459_v14 = vunpack.c.l.s8.bf16 %v959_v6 }
 0x209   : > { %3182 = vmatprep.subr.bf16.mxu0 %v2358_v16  ;;  %3354 = vmatprep.subr.bf16.mxu1 %v2360_v17  ;;  %v2483_v17 = vunpack.c.h.s8.bf16 %v958_v56 }
 0x20c   : > { %3183 = vmatpush1.bf16.msra.mxu0 %v2357_v23  ;;  %3355 = vmatpush1.bf16.msra.mxu1 %v2359_v24  ;;  %v983_v24 = vld [vmem:[%s7354_s12 + $0x16d0] sm:$0xff] }
 0x20d   : > { %3184 = vmatprep.subr.bf16.mxu0 %v2383_v45  ;;  %3356 = vmatprep.subr.bf16.mxu1 %v2385_v46  ;;  %v985_v45 = vld [vmem:[%s7354_s12 + $0x16e0] sm:$0xff]  ;;  %v7720_v46 = vshrl.u32 %v4929_v7, 7 }
 0x20e   : > { %v7702_v37 = vpop.f32.mrb[0].mxu0  ;;  %v7704_v38 = vpop.f32.mrb[0].mxu1 }
 0x20f   : > { %v7706_v39 = vpop.f32.mrb[1].mxu0  ;;  %v7708_v40 = vpop.f32.mrb[1].mxu1  ;;  %vm4932_vm0 = vcmp.lt.s32.totalorder %v7720_v46, 4 }
 0x210   : > { %v2868_v41 = vpop.f32.mrb[2].mxu0  ;;  %v3040_v42 = vpop.f32.mrb[2].mxu1  ;;  %3185 = vmatpush1.bf16.msra.mxu0 %v2382_v28  ;;  %3357 = vmatpush1.bf16.msra.mxu1 %v2384_v29 }
 0x211   : > { %v4934_v48 = vadd.f32 %v2868_v41, %v7702_v37  ;;  %v4948_v49 = vadd.f32 %v3040_v42, %v7704_v38  ;;  %v2870_v30 = vpop.f32.mrb[3].mxu0  ;;  %v3042_v31 = vpop.f32.mrb[3].mxu1  ;;  %3186 = vmatprep.subr.bf16.mxu0 %v2408_v32  ;;  %3358 = vmatprep.subr.bf16.mxu1 %v2410_v33  ;;  %v2482_v32 = vunpack.c.h.s8.bf16 %v957_v5  ;;  %v2484_v33 = vunpack.c.h.s8.bf16 %v959_v6 }
 0x212   : > { %v4941_v54 = vadd.f32 %v2870_v30, %v7706_v39  ;;  %v4955_v55 = vadd.f32 %v3042_v31, %v7708_v40  ;;  %v2508_v41 = vunpack.c.l.s8.bf16 %v983_v24  ;;  %v2510_v42 = vunpack.c.l.s8.bf16 %v985_v45 }
 0x213   : > { %v4935_v2 = vrot.slane %v4934_v48, 4  ;;  %v4949_v3 = vrot.slane %v4948_v49, 4 }
 0x214   : > { %v4942_v58 = vrot.slane %v4941_v54, 4  ;;  %v4956_v59 = vrot.slane %v4955_v55, 4  ;;  %3187 = vmatpush1.bf16.msra.mxu0 %v2407_v43  ;;  %3359 = vmatpush1.bf16.msra.mxu1 %v2409_v47  ;;  %v982_v43 = vld [vmem:[%s7354_s12 + $0x16c8] sm:$0xff]  ;;  %v984_v47 = vld [vmem:[%s7354_s12 + $0x16d8] sm:$0xff] }
 0x215   : > { %v4936_v62 = vadd.f32 %v4935_v2, %v4934_v48  ;;  %v4950_v63 = vadd.f32 %v4949_v3, %v4948_v49  ;;  %3188 = vmatprep.subr.bf16.mxu0 %v2433_v52  ;;  %3360 = vmatprep.subr.bf16.mxu1 %v2435_v53  ;;  %v2533_v2 = vunpack.c.h.s8.bf16 %v983_v24  ;;  %v2535_v3 = vunpack.c.h.s8.bf16 %v985_v45 }
 0x216   : > { %v4943_v20 = vadd.f32 %v4942_v58, %v4941_v54  ;;  %v4957_v21 = vadd.f32 %v4956_v59, %v4955_v55  ;;  %v2507_v54 = vunpack.c.l.s8.bf16 %v982_v43  ;;  %v2509_v55 = vunpack.c.l.s8.bf16 %v984_v47 }
 0x217   : > { %v4937_v9 = vrot.slane %v4936_v62, 2  ;;  %v4951_v10 = vrot.slane %v4950_v63, 2 }
 0x218   : > { %v4944_v11 = vrot.slane %v4943_v20, 2  ;;  %v4958_v12 = vrot.slane %v4957_v21, 2  ;;  %3189 = vmatpush1.bf16.msra.mxu0 %v2432_v60  ;;  %3361 = vmatpush1.bf16.msra.mxu1 %v2434_v61  ;;  %v1008_v60 = vld [vmem:[%s7354_s12 + $0x1798] sm:$0xff]  ;;  %v1010_v61 = vld [vmem:[%s7354_s12 + $0x17a8] sm:$0xff] }
 0x219   : > { %v4938_v15 = vadd.f32 %v4937_v9, %v4936_v62  ;;  %v4952_v16 = vadd.f32 %v4951_v10, %v4950_v63  ;;  %3190 = vmatprep.subr.bf16.mxu0 %v2458_v0  ;;  %3362 = vmatprep.subr.bf16.mxu1 %v2460_v4  ;;  %v2532_v0 = vunpack.c.h.s8.bf16 %v982_v43  ;;  %v2534_v4 = vunpack.c.h.s8.bf16 %v984_v47 }
 0x21a   : > { %v4945_v22 = vadd.f32 %v4944_v11, %v4943_v20  ;;  %v4959_v23 = vadd.f32 %v4958_v12, %v4957_v21  ;;  %v2558_v10 = vunpack.c.l.s8.bf16 %v1008_v60  ;;  %v2560_v11 = vunpack.c.l.s8.bf16 %v1010_v61  ;;  %v1007_v12 = vld [vmem:[%s7354_s12 + $0x1790] sm:$0xff] }
 0x21b   : > { %v4939_v25 = vrot.slane %v4938_v15, 1  ;;  %v4953_v27 = vrot.slane %v4952_v16, 1  ;;  %v2582_v47 = vunpack.c.h.s8.bf16 %v1007_v12 }
 0x21c   : > { %v4946_v28 = vrot.slane %v4945_v22, 1  ;;  %v4960_v29 = vrot.slane %v4959_v23, 1  ;;  %3191 = vmatpush1.bf16.msra.mxu0 %v2457_v13  ;;  %3363 = vmatpush1.bf16.msra.mxu1 %v2459_v14  ;;  %v1009_v13 = vld [vmem:[%s7354_s12 + $0x17a0] sm:$0xff] }
 0x21d   : > { %v4940_v34 = vadd.f32 %v4939_v25, %v4938_v15  ;;  %v4954_v35 = vadd.f32 %v4953_v27, %v4952_v16  ;;  %3192 = vmatprep.subr.bf16.mxu0 %v2483_v17  ;;  %3364 = vmatprep.subr.bf16.mxu1 %v2485_v18  ;;  %v2559_v24 = vunpack.c.l.s8.bf16 %v1009_v13  ;;  %v2583_v27 = vunpack.c.h.s8.bf16 %v1008_v60 }
 0x21e   : > { %v4947_v48 = vadd.f32 %v4946_v28, %v4945_v22  ;;  %v4961_v49 = vadd.f32 %v4960_v29, %v4959_v23  ;;  %v2557_v23 = vunpack.c.l.s8.bf16 %v1007_v12  ;;  %v2585_v28 = vunpack.c.h.s8.bf16 %v1010_v61 }
 0x21f   : > { %v7725_v30 = vmul.f32 0.25, %v4940_v34  ;;  %v7727_v31 = vmul.f32 0.25, %v4954_v35  ;;  %v1035_v34 = vld [vmem:[%s7354_s12 + $0x1870] sm:$0xff] }
 0x220   : > { %v7729_v52 = vmul.f32 0.25, %v4947_v48  ;;  %v7731_v53 = vmul.f32 0.25, %v4961_v49  ;;  %3193 = vmatpush1.bf16.msra.mxu0 %v2482_v32  ;;  %3365 = vmatpush1.bf16.msra.mxu1 %v2484_v33  ;;  %v1033_v33 = vld [vmem:[%s7354_s12 + $0x1860] sm:$0xff]  ;;  %v2584_v48 = vunpack.c.h.s8.bf16 %v1009_v13 }
 0x221   : > { %v5134_v56 = vsub.f32 %v7702_v37, %v7725_v30  ;;  %v5136_v57 = vsub.f32 %v7704_v38, %v7727_v31  ;;  %3194 = vmatprep.subr.bf16.mxu0 %v2508_v41  ;;  %3366 = vmatprep.subr.bf16.mxu1 %v2510_v42 }
 0x222   : > { %v5135_v58 = vsub.f32 %v7706_v39, %v7729_v52  ;;  %v5137_v59 = vsub.f32 %v7708_v40, %v7731_v53 }
 0x223   : > { %v5184_v62 = vsel %vm4932_vm0, %v5134_v56, 0.0  ;;  %v5186_v63 = vsel %vm4932_vm0, %v5136_v57, 0.0  ;;  %v2610_v56 = vunpack.c.l.s8.bf16 %v1035_v34  ;;  %v1032_v57 = vld [vmem:[%s7354_s12 + $0x1858] sm:$0xff] }
 0x224   : > { %v5234_v5 = vmul.f32 %v5184_v62, %v5184_v62  ;;  %v5236_v6 = vmul.f32 %v5186_v63, %v5186_v63  ;;  %v5185_v20 = vsel %vm4932_vm0, %v5135_v58, 0.0  ;;  %v5187_v21 = vsel %vm4932_vm0, %v5137_v59, 0.0  ;;  %3195 = vmatpush1.bf16.msra.mxu0 %v2507_v54  ;;  %3367 = vmatpush1.bf16.msra.mxu1 %v2509_v55 }
 0x225   : > { %v5235_v7 = vmul.f32 %v5185_v20, %v5185_v20  ;;  %v5237_v9 = vmul.f32 %v5187_v21, %v5187_v21  ;;  %3196 = vmatprep.subr.bf16.mxu0 %v2533_v2  ;;  %3368 = vmatprep.subr.bf16.mxu1 %v2535_v3  ;;  %v2608_v55 = vunpack.c.l.s8.bf16 %v1033_v33  ;;  %v1034_v2 = vld [vmem:[%s7354_s12 + $0x1868] sm:$0xff]  ;;  %v2607_v63 = vunpack.c.l.s8.bf16 %v1032_v57 }
 0x226   : > { %v5285_v14 = vrot.slane %v5234_v5, 4  ;;  %v5299_v15 = vrot.slane %v5236_v6, 4  ;;  %v2635_v20 = vunpack.c.h.s8.bf16 %v1035_v34  ;;  %v287_v34 = vld [vmem:[%s7354_s12 + $0x110] sm:$0xff] }
 0x227   : > { %v5292_v16 = vrot.slane %v5235_v7, 4  ;;  %v5306_v17 = vrot.slane %v5237_v9, 4 }
 0x228   : > { %v5286_v18 = vadd.f32 %v5285_v14, %v5234_v5  ;;  %v5300_v22 = vadd.f32 %v5299_v15, %v5236_v6  ;;  %3197 = vmatpush1.bf16.msra.mxu0 %v2532_v0  ;;  %3369 = vmatpush1.bf16.msra.mxu1 %v2534_v4  ;;  %v2609_v0 = vunpack.c.l.s8.bf16 %v1034_v2  ;;  %v2633_v6 = vunpack.c.h.s8.bf16 %v1033_v33 }
 0x229   : > { %v5293_v45 = vadd.f32 %v5292_v16, %v5235_v7  ;;  %v5307_v25 = vadd.f32 %v5306_v17, %v5237_v9  ;;  %3198 = vmatprep.subr.bf16.mxu0 %v2558_v10  ;;  %3370 = vmatprep.subr.bf16.mxu1 %v2560_v11  ;;  %v262_v9 = vld [vmem:[%s7354_s12 + $0x48] sm:$0xff]  ;;  %v264_v10 = vld [vmem:[%s7354_s12 + $0x58] sm:$0xff]  ;;  %v2632_v15 = vunpack.c.h.s8.bf16 %v1032_v57  ;;  %v2634_v16 = vunpack.c.h.s8.bf16 %v1034_v2 }
 0x22a   : > { %v5287_v29 = vrot.slane %v5286_v18, 2  ;;  %v5301_v32 = vrot.slane %v5300_v22, 2  ;;  %v1089_v33 = vunpack.c.h.s8.bf16 %v264_v10 }
 0x22b   : > { %v5294_v35 = vrot.slane %v5293_v45, 2  ;;  %v5308_v41 = vrot.slane %v5307_v25, 2 }
 0x22c   : > { %v5288_v42 = vadd.f32 %v5287_v29, %v5286_v18  ;;  %v5302_v43 = vadd.f32 %v5301_v32, %v5300_v22  ;;  %3199 = vmatpush1.bf16.msra.mxu0 %v2557_v23  ;;  %3371 = vmatpush1.bf16.msra.mxu1 %v2559_v24  ;;  %v1062_v22 = vunpack.c.l.s8.bf16 %v262_v9  ;;  %v1064_v23 = vunpack.c.l.s8.bf16 %v264_v10  ;;  %v261_v24 = vld [vmem:[%s7354_s12 + $0x40] sm:$0xff] }
 0x22d   : > { %v5295_v49 = vadd.f32 %v5294_v35, %v5293_v45  ;;  %v5309_v54 = vadd.f32 %v5308_v41, %v5307_v25  ;;  %3200 = vmatprep.subr.bf16.mxu0 %v2583_v27  ;;  %3372 = vmatprep.subr.bf16.mxu1 %v2585_v28  ;;  %v263_v45 = vld [vmem:[%s7354_s12 + $0x50] sm:$0xff]  ;;  %v1061_v25 = vunpack.c.l.s8.bf16 %v261_v24  ;;  %v7234_v28 = vmov 1966171168   ;;  %v289_v35 = vld [vmem:[%s7354_s12 + $0x120] sm:$0xff] }
 0x22e   : > { %v5289_v3 = vrot.slane %v5288_v42, 1  ;;  %v5303_v58 = vrot.slane %v5302_v43, 1  ;;  %v1063_v27 = vunpack.c.l.s8.bf16 %v263_v45  ;;  %v5568_v29 = vunpack.c.l.s4 %v7234_v28  ;;  %v313_v10 = vld [vmem:[%s7354_s12 + $0x1e0] sm:$0xff] }
 0x22f   : > { %v5296_v59 = vrot.slane %v5295_v49, 1  ;;  %v5310_v60 = vrot.slane %v5309_v54, 1  ;;  %v1087_v32 = vunpack.c.h.s8.bf16 %v262_v9  ;;  %v1086_v41 = vunpack.c.h.s8.bf16 %v261_v24  ;;  %v311_v9 = vld [vmem:[%s7354_s12 + $0x1d0] sm:$0xff] }
 0x230   : > { %v5290_v61 = vadd.f32 %v5289_v3, %v5288_v42  ;;  %v5304_v62 = vadd.f32 %v5303_v58, %v5302_v43  ;;  %3201 = vmatpush1.bf16.msra.mxu0 %v2582_v47  ;;  %3373 = vmatpush1.bf16.msra.mxu1 %v2584_v48  ;;  %v1088_v42 = vunpack.c.h.s8.bf16 %v263_v45  ;;  %v5569_v43 = vunpack.c.0.s8 %v5568_v29 }
 0x231   : > { %v5297_v4 = vadd.f32 %v5296_v59, %v5295_v49  ;;  %v5311_v5 = vadd.f32 %v5310_v60, %v5309_v54  ;;  %3202 = vmatprep.subr.bf16.mxu0 %v2608_v55  ;;  %3374 = vmatprep.subr.bf16.mxu1 %v2610_v56  ;;  %v1112_v47 = vunpack.c.l.s8.bf16 %v287_v34  ;;  %v1114_v48 = vunpack.c.l.s8.bf16 %v289_v35  ;;  %v286_v49 = vld [vmem:[%s7354_s12 + $0x108] sm:$0xff]  ;;  %v288_v54 = vld [vmem:[%s7354_s12 + $0x118] sm:$0xff] }
 0x232   : > { %v5459_v21 = vmul.f32 0.25, %v5290_v61  ;;  %v5461_v7 = vmul.f32 0.25, %v5304_v62  ;;  %v1111_v56 = vunpack.c.l.s8.bf16 %v286_v49  ;;  %v1113_v57 = vunpack.c.l.s8.bf16 %v288_v54  ;;  %v312_v61 = vld [vmem:[%s7354_s12 + $0x1d8] sm:$0xff]  ;;  %v314_v62 = vld [vmem:[%s7354_s12 + $0x1e8] sm:$0xff] }
 0x233   : > { %v5460_v11 = vmul.f32 0.25, %v5297_v4  ;;  %v5462_v12 = vmul.f32 0.25, %v5311_v5  ;;  %v7770_v3 = vsub.s32 %v5569_v43, %v7720_v46  ;;  %v1137_v58 = vunpack.c.h.s8.bf16 %v287_v34  ;;  %v362_v34 = vld [vmem:[%s7354_s12 + $0x368] sm:$0xff] }
 0x234   : > { %v5488_v13 = vadd.f32 1e-05, %v5459_v21  ;;  %v5490_v14 = vadd.f32 1e-05, %v5461_v7  ;;  %3203 = vmatpush1.bf16.msra.mxu0 %v2607_v63  ;;  %3375 = vmatpush1.bf16.msra.mxu1 %v2609_v0  ;;  %v1139_v59 = vunpack.c.h.s8.bf16 %v289_v35  ;;  %v1136_v5 = vunpack.c.h.s8.bf16 %v286_v49  ;;  %v364_v35 = vld [vmem:[%s7354_s12 + $0x378] sm:$0xff]  ;;  %v363_v49 = vld [vmem:[%s7354_s12 + $0x370] sm:$0xff] }
 0x235   : > { %v5489_v17 = vadd.f32 1e-05, %v5460_v11  ;;  %v5491_v18 = vadd.f32 1e-05, %v5462_v12  ;;  %3204 = vmatprep.subr.bf16.mxu0 %v2633_v6  ;;  %3376 = vmatprep.subr.bf16.mxu1 %v2635_v20  ;;  %v1138_v6 = vunpack.c.h.s8.bf16 %v288_v54  ;;  %v1162_v21 = vunpack.c.l.s8.bf16 %v312_v61 }
 0x236   : > { %7114 = vrsqrt.f32 %v5488_v13  ;;  %v1164_v7 = vunpack.c.l.s8.bf16 %v314_v62  ;;  %v1161_v13 = vunpack.c.l.s8.bf16 %v311_v9  ;;  %v1262_v43 = vunpack.c.l.s8.bf16 %v362_v34 }
 0x237   : > { %7116 = vrsqrt.f32 %v5490_v14  ;;  %v1163_v14 = vunpack.c.l.s8.bf16 %v313_v10 }
 0x238   : > { %7118 = vrsqrt.f32 %v5489_v17  ;;  %3205 = vmatpush1.bf16.msra.mxu0 %v2632_v15  ;;  %3377 = vmatpush1.bf16.msra.mxu1 %v2634_v16  ;;  %v1187_v15 = vunpack.c.h.s8.bf16 %v312_v61  ;;  %v1189_v16 = vunpack.c.h.s8.bf16 %v314_v62  ;;  %v337_v17 = vld [vmem:[%s7354_s12 + $0x2a0] sm:$0xff] }
 0x239   : > { %7120 = vrsqrt.f32 %v5491_v18  ;;  %3389 = vmatprep.subr.bf16.mxu0 %v1062_v22  ;;  %3561 = vmatprep.subr.bf16.mxu1 %v1064_v23  ;;  %v339_v18 = vld [vmem:[%s7354_s12 + $0x2b0] sm:$0xff]  ;;  %v1186_v22 = vunpack.c.h.s8.bf16 %v311_v9  ;;  %v1188_v23 = vunpack.c.h.s8.bf16 %v313_v10  ;;  %v1212_v24 = vunpack.c.l.s8.bf16 %v337_v17  ;;  %v414_v9 = vld [vmem:[%s7354_s12 + $0x508] sm:$0xff] }
 0x23a   : > { %v1214_v45 = vunpack.c.l.s8.bf16 %v339_v18 }
 0x23b   : > { %3207 = vmatmul.mubr.bf16.vlgmr.msra.gmra.mrb[4].mxu0 %v7576_v50  ;;  %3379 = vmatmul.mubr.bf16.vlgmr.msra.gmra.mrb[4].mxu1 %v7576_v50 }
 0x23c   : > { %3390 = vmatpush1.bf16.msra.mxu0 %v1061_v25  ;;  %3562 = vmatpush1.bf16.msra.mxu1 %v1063_v27  ;;  %v336_v25 = vld [vmem:[%s7354_s12 + $0x298] sm:$0xff]  ;;  %v338_v27 = vld [vmem:[%s7354_s12 + $0x2a8] sm:$0xff] }
 0x23d   : > { %3391 = vmatprep.subr.bf16.mxu0 %v1087_v32  ;;  %3563 = vmatprep.subr.bf16.mxu1 %v1089_v33  ;;  %v1211_v28 = vunpack.c.l.s8.bf16 %v336_v25  ;;  %v1213_v29 = vunpack.c.l.s8.bf16 %v338_v27  ;;  %v1237_v32 = vunpack.c.h.s8.bf16 %v337_v17  ;;  %v1239_v33 = vunpack.c.h.s8.bf16 %v339_v18  ;;  %v413_v17 = vld [vmem:[%s7354_s12 + $0x500] sm:$0xff] }
 0x23e   : > { %3421 = vmatprep.mubr.bf16.mxu0 %v7384_v36  ;;  %3593 = vmatprep.mubr.bf16.mxu1 %v7384_v36 }
 0x240   : > { %v7115_v55 = vpop.eup %7114  ;;  %3392 = vmatpush1.bf16.msra.mxu0 %v1086_v41  ;;  %3564 = vmatpush1.bf16.msra.mxu1 %v1088_v42  ;;  %v1236_v41 = vunpack.c.h.s8.bf16 %v336_v25  ;;  %v1238_v42 = vunpack.c.h.s8.bf16 %v338_v27  ;;  %v439_v25 = vld [vmem:[%s7354_s12 + $0x5d0] sm:$0xff] }
 0x241   : > { %v7117_v2 = vpop.eup %7116  ;;  %3393 = vmatprep.subr.bf16.mxu0 %v1112_v47  ;;  %3565 = vmatprep.subr.bf16.mxu1 %v1114_v48  ;;  %v1264_v47 = vunpack.c.l.s8.bf16 %v364_v35  ;;  %v361_v48 = vld [vmem:[%s7354_s12 + $0x360] sm:$0xff] }
 0x242   : > { %v7119_v60 = vpop.eup %7118  ;;  %v1261_v54 = vunpack.c.l.s8.bf16 %v361_v48 }
 0x243   : > { %v7121_v63 = vpop.eup %7120  ;;  %v5563_v0 = vcombine.low %v7115_v55, %v7119_v60  ;;  %v1263_v55 = vunpack.c.l.s8.bf16 %v363_v49  ;;  %v1288_v60 = vunpack.c.h.s8.bf16 %v363_v49 }
 0x244   : > { %v5564_v4 = vcombine.low %v7117_v2, %v7121_v63  ;;  %3394 = vmatpush1.bf16.msra.mxu0 %v1111_v56  ;;  %3566 = vmatpush1.bf16.msra.mxu1 %v1113_v57  ;;  %v1287_v56 = vunpack.c.h.s8.bf16 %v362_v34  ;;  %v1289_v57 = vunpack.c.h.s8.bf16 %v364_v35  ;;  %v387_v2 = vld [vmem:[%s7354_s12 + $0x430] sm:$0xff]  ;;  %v386_v63 = vld [vmem:[%s7354_s12 + $0x428] sm:$0xff] }
 0x245   : > { %v7775_v20 = vrot.slane %v5563_v0, %v7770_v3  ;;  %3395 = vmatprep.subr.bf16.mxu0 %v1137_v58  ;;  %3567 = vmatprep.subr.bf16.mxu1 %v1139_v59  ;;  %v389_v58 = vld [vmem:[%s7354_s12 + $0x440] sm:$0xff]  ;;  %v1286_v59 = vunpack.c.h.s8.bf16 %v361_v48  ;;  %v1312_v61 = vunpack.c.l.s8.bf16 %v387_v2  ;;  %v388_v0 = vld [vmem:[%s7354_s12 + $0x438] sm:$0xff]  ;;  %v1336_v10 = vunpack.c.h.s8.bf16 %v386_v63  ;;  %v438_v34 = vld [vmem:[%s7354_s12 + $0x5c8] sm:$0xff] }
 0x246   : > { %v7780_v11 = vrot.slane %v5564_v4, %v7770_v3  ;;  %v1314_v62 = vunpack.c.l.s8.bf16 %v389_v58  ;;  %v1311_v4 = vunpack.c.l.s8.bf16 %v386_v63  ;;  %v464_v48 = vld [vmem:[%s7354_s12 + $0x698] sm:$0xff]  ;;  %v489_v63 = vld [vmem:[%s7354_s12 + $0x760] sm:$0xff] }
 0x248   : > { %v5595_v12 = vcombine.low %v7775_v20, %v7780_v11  ;;  %3396 = vmatpush1.bf16.msra.mxu0 %v1136_v5  ;;  %3568 = vmatpush1.bf16.msra.mxu1 %v1138_v6  ;;  %v1313_v5 = vunpack.c.l.s8.bf16 %v388_v0  ;;  %v1337_v6 = vunpack.c.h.s8.bf16 %v387_v2  ;;  %v463_v2 = vld [vmem:[%s7354_s12 + $0x690] sm:$0xff]  ;;  %v8019_v20 = vsub.s32 2, %v7720_v46 }
 0x249   : > { %3397 = vmatprep.subr.bf16.mxu0 %v1162_v21  ;;  %3569 = vmatprep.subr.bf16.mxu1 %v1164_v7  ;;  %v1339_v21 = vunpack.c.h.s8.bf16 %v389_v58  ;;  %v412_v7 = vld [vmem:[%s7354_s12 + $0x4f8] sm:$0xff]  ;;  %v8022_v11 = vsub.s32 3, %v7720_v46 }
 0x24c   : > { %3398 = vmatpush1.bf16.msra.mxu0 %v1161_v13  ;;  %3570 = vmatpush1.bf16.msra.mxu1 %v1163_v14  ;;  %v1338_v13 = vunpack.c.h.s8.bf16 %v388_v0  ;;  %v1362_v14 = vunpack.c.l.s8.bf16 %v412_v7 }
 0x24d   : > { %3399 = vmatprep.subr.bf16.mxu0 %v1187_v15  ;;  %3571 = vmatprep.subr.bf16.mxu1 %v1189_v16  ;;  %v1364_v15 = vunpack.c.l.s8.bf16 %v414_v9  ;;  %v411_v16 = vld [vmem:[%s7354_s12 + $0x4f0] sm:$0xff] }
 0x24e   : > { %v1361_v18 = vunpack.c.l.s8.bf16 %v411_v16  ;;  %v1386_v27 = vunpack.c.h.s8.bf16 %v411_v16  ;;  %v514_v16 = vld [vmem:[%s7354_s12 + $0x828] sm:$0xff] }
 0x250   : > { %3400 = vmatpush1.bf16.msra.mxu0 %v1186_v22  ;;  %3572 = vmatpush1.bf16.msra.mxu1 %v1188_v23  ;;  %v1363_v22 = vunpack.c.l.s8.bf16 %v413_v17  ;;  %v1387_v23 = vunpack.c.h.s8.bf16 %v412_v7  ;;  %v488_v7 = vld [vmem:[%s7354_s12 + $0x758] sm:$0xff] }
 0x251   : > { %3401 = vmatprep.subr.bf16.mxu0 %v1212_v24  ;;  %3573 = vmatprep.subr.bf16.mxu1 %v1214_v45  ;;  %v1389_v24 = vunpack.c.h.s8.bf16 %v414_v9  ;;  %v437_v45 = vld [vmem:[%s7354_s12 + $0x5c0] sm:$0xff] }
 0x254   : > { %3402 = vmatpush1.bf16.msra.mxu0 %v1211_v28  ;;  %3574 = vmatpush1.bf16.msra.mxu1 %v1213_v29  ;;  %v1388_v28 = vunpack.c.h.s8.bf16 %v413_v17  ;;  %v1412_v29 = vunpack.c.l.s8.bf16 %v437_v45 }
 0x255   : > { %3403 = vmatprep.subr.bf16.mxu0 %v1237_v32  ;;  %3575 = vmatprep.subr.bf16.mxu1 %v1239_v33  ;;  %v1414_v32 = vunpack.c.l.s8.bf16 %v439_v25  ;;  %v436_v33 = vld [vmem:[%s7354_s12 + $0x5b8] sm:$0xff] }
 0x256   : > { %v1411_v35 = vunpack.c.l.s8.bf16 %v436_v33  ;;  %v1436_v49 = vunpack.c.h.s8.bf16 %v436_v33  ;;  %v539_v33 = vld [vmem:[%s7354_s12 + $0x8f0] sm:$0xff] }
 0x258   : > { %3404 = vmatpush1.bf16.msra.mxu0 %v1236_v41  ;;  %3576 = vmatpush1.bf16.msra.mxu1 %v1238_v42  ;;  %v1413_v41 = vunpack.c.l.s8.bf16 %v438_v34  ;;  %v1437_v42 = vunpack.c.h.s8.bf16 %v437_v45  ;;  %v513_v45 = vld [vmem:[%s7354_s12 + $0x820] sm:$0xff] }
 0x259   : > { %3405 = vmatprep.subr.bf16.mxu0 %v1262_v43  ;;  %3577 = vmatprep.subr.bf16.mxu1 %v1264_v47  ;;  %v1439_v43 = vunpack.c.h.s8.bf16 %v439_v25  ;;  %v462_v47 = vld [vmem:[%s7354_s12 + $0x688] sm:$0xff] }
 0x25c   : > { %3406 = vmatpush1.bf16.msra.mxu0 %v1261_v54  ;;  %3578 = vmatpush1.bf16.msra.mxu1 %v1263_v55  ;;  %v1438_v54 = vunpack.c.h.s8.bf16 %v438_v34  ;;  %v1462_v55 = vunpack.c.l.s8.bf16 %v462_v47 }
 0x25d   : > { %3407 = vmatprep.subr.bf16.mxu0 %v1287_v56  ;;  %3579 = vmatprep.subr.bf16.mxu1 %v1289_v57  ;;  %v1464_v56 = vunpack.c.l.s8.bf16 %v464_v48  ;;  %v461_v57 = vld [vmem:[%s7354_s12 + $0x680] sm:$0xff] }
 0x25e   : > { %v1461_v58 = vunpack.c.l.s8.bf16 %v461_v57  ;;  %v1486_v0 = vunpack.c.h.s8.bf16 %v461_v57  ;;  %v564_v57 = vld [vmem:[%s7354_s12 + $0x9b8] sm:$0xff] }
 0x260   : > { %3408 = vmatpush1.bf16.msra.mxu0 %v1286_v59  ;;  %3580 = vmatpush1.bf16.msra.mxu1 %v1288_v60  ;;  %v1463_v59 = vunpack.c.l.s8.bf16 %v463_v2  ;;  %v1487_v60 = vunpack.c.h.s8.bf16 %v462_v47  ;;  %v538_v47 = vld [vmem:[%s7354_s12 + $0x8e8] sm:$0xff] }
 0x261   : > { %3409 = vmatprep.subr.bf16.mxu0 %v1312_v61  ;;  %3581 = vmatprep.subr.bf16.mxu1 %v1314_v62  ;;  %v1489_v61 = vunpack.c.h.s8.bf16 %v464_v48  ;;  %v487_v62 = vld [vmem:[%s7354_s12 + $0x750] sm:$0xff] }
 0x264   : > { %3410 = vmatpush1.bf16.msra.mxu0 %v1311_v4  ;;  %3582 = vmatpush1.bf16.msra.mxu1 %v1313_v5  ;;  %v1488_v4 = vunpack.c.h.s8.bf16 %v463_v2  ;;  %v1512_v5 = vunpack.c.l.s8.bf16 %v487_v62 }
 0x265   : > { %3411 = vmatprep.subr.bf16.mxu0 %v1337_v6  ;;  %3583 = vmatprep.subr.bf16.mxu1 %v1339_v21  ;;  %v1514_v6 = vunpack.c.l.s8.bf16 %v489_v63  ;;  %v486_v21 = vld [vmem:[%s7354_s12 + $0x748] sm:$0xff] }
 0x266   : > { %v1511_v9 = vunpack.c.l.s8.bf16 %v486_v21  ;;  %v1536_v17 = vunpack.c.h.s8.bf16 %v486_v21  ;;  %v589_v21 = vld [vmem:[%s7354_s12 + $0xa80] sm:$0xff] }
 0x268   : > { %3412 = vmatpush1.bf16.msra.mxu0 %v1336_v10  ;;  %3584 = vmatpush1.bf16.msra.mxu1 %v1338_v13  ;;  %v1513_v10 = vunpack.c.l.s8.bf16 %v488_v7  ;;  %v1537_v13 = vunpack.c.h.s8.bf16 %v487_v62  ;;  %v563_v62 = vld [vmem:[%s7354_s12 + $0x9b0] sm:$0xff] }
 0x269   : > { %3413 = vmatprep.subr.bf16.mxu0 %v1362_v14  ;;  %3585 = vmatprep.subr.bf16.mxu1 %v1364_v15  ;;  %v1539_v14 = vunpack.c.h.s8.bf16 %v489_v63  ;;  %v512_v15 = vld [vmem:[%s7354_s12 + $0x818] sm:$0xff] }
 0x26c   : > { %3414 = vmatpush1.bf16.msra.mxu0 %v1361_v18  ;;  %3586 = vmatpush1.bf16.msra.mxu1 %v1363_v22  ;;  %v1538_v18 = vunpack.c.h.s8.bf16 %v488_v7  ;;  %v1562_v22 = vunpack.c.l.s8.bf16 %v512_v15 }
 0x26d   : > { %3415 = vmatprep.subr.bf16.mxu0 %v1387_v23  ;;  %3587 = vmatprep.subr.bf16.mxu1 %v1389_v24  ;;  %v1564_v23 = vunpack.c.l.s8.bf16 %v514_v16  ;;  %v511_v24 = vld [vmem:[%s7354_s12 + $0x810] sm:$0xff] }
 0x26e   : > { %v1561_v25 = vunpack.c.l.s8.bf16 %v511_v24  ;;  %v1586_v34 = vunpack.c.h.s8.bf16 %v511_v24  ;;  %v614_v24 = vld [vmem:[%s7354_s12 + $0xb48] sm:$0xff] }
 0x270   : > { %3416 = vmatpush1.bf16.msra.mxu0 %v1386_v27  ;;  %3588 = vmatpush1.bf16.msra.mxu1 %v1388_v28  ;;  %v1563_v27 = vunpack.c.l.s8.bf16 %v513_v45  ;;  %v1587_v28 = vunpack.c.h.s8.bf16 %v512_v15  ;;  %v588_v15 = vld [vmem:[%s7354_s12 + $0xa78] sm:$0xff] }
 0x271   : > { %3417 = vmatprep.subr.bf16.mxu0 %v1412_v29  ;;  %3589 = vmatprep.subr.bf16.mxu1 %v1414_v32  ;;  %v1589_v29 = vunpack.c.h.s8.bf16 %v514_v16  ;;  %v537_v32 = vld [vmem:[%s7354_s12 + $0x8e0] sm:$0xff] }
 0x274   : > { %3418 = vmatpush1.bf16.msra.mxu0 %v1411_v35  ;;  %3590 = vmatpush1.bf16.msra.mxu1 %v1413_v41  ;;  %v1588_v35 = vunpack.c.h.s8.bf16 %v513_v45  ;;  %v1612_v41 = vunpack.c.l.s8.bf16 %v537_v32 }
 0x275   : > { %3419 = vmatprep.subr.bf16.mxu0 %v1437_v42  ;;  %3591 = vmatprep.subr.bf16.mxu1 %v1439_v43  ;;  %v1614_v42 = vunpack.c.l.s8.bf16 %v539_v33  ;;  %v536_v43 = vld [vmem:[%s7354_s12 + $0x8d8] sm:$0xff] }
 0x276   : > { %v1611_v48 = vunpack.c.l.s8.bf16 %v536_v43  ;;  %v1636_v2 = vunpack.c.h.s8.bf16 %v536_v43  ;;  %v639_v43 = vld [vmem:[%s7354_s12 + $0xc10] sm:$0xff] }
 0x278   : > { %3420 = vmatpush1.bf16.msra.mxu0 %v1436_v49  ;;  %3592 = vmatpush1.bf16.msra.mxu1 %v1438_v54  ;;  %v1613_v49 = vunpack.c.l.s8.bf16 %v538_v47  ;;  %v1637_v54 = vunpack.c.h.s8.bf16 %v537_v32  ;;  %v613_v32 = vld [vmem:[%s7354_s12 + $0xb40] sm:$0xff] }
 0x279   : > { %3432 = vmatprep.subr.bf16.mxu0 %v1462_v55  ;;  %3604 = vmatprep.subr.bf16.mxu1 %v1464_v56  ;;  %v1639_v55 = vunpack.c.h.s8.bf16 %v539_v33  ;;  %v562_v56 = vld [vmem:[%s7354_s12 + $0x9a8] sm:$0xff] }
 0x27b   : > { %3422 = vmatmul.mubr.bf16.vlgmr.msra.gmra.mrb[8].mxu0 %v7414_v44  ;;  %3594 = vmatmul.mubr.bf16.vlgmr.msra.gmra.mrb[8].mxu1 %v7414_v44 }
 0x27c   : > { %3433 = vmatpush1.bf16.msra.mxu0 %v1461_v58  ;;  %3605 = vmatpush1.bf16.msra.mxu1 %v1463_v59  ;;  %v1638_v58 = vunpack.c.h.s8.bf16 %v538_v47  ;;  %v1662_v59 = vunpack.c.l.s8.bf16 %v562_v56 }
 0x27d   : > { %3434 = vmatprep.subr.bf16.mxu0 %v1487_v60  ;;  %3606 = vmatprep.subr.bf16.mxu1 %v1489_v61  ;;  %v1664_v60 = vunpack.c.l.s8.bf16 %v564_v57  ;;  %v561_v61 = vld [vmem:[%s7354_s12 + $0x9a0] sm:$0xff] }
 0x27e   : > { %3464 = vmatprep.mubr.bf16.mxu0 %v7430_v51  ;;  %3636 = vmatprep.mubr.bf16.mxu1 %v7430_v51  ;;  %v1661_v63 = vunpack.c.l.s8.bf16 %v561_v61  ;;  %v1686_v7 = vunpack.c.h.s8.bf16 %v561_v61  ;;  %v664_v61 = vld [vmem:[%s7354_s12 + $0xcd8] sm:$0xff] }
 0x280   : > { %3435 = vmatpush1.bf16.msra.mxu0 %v1486_v0  ;;  %3607 = vmatpush1.bf16.msra.mxu1 %v1488_v4  ;;  %v1663_v0 = vunpack.c.l.s8.bf16 %v563_v62  ;;  %v1687_v4 = vunpack.c.h.s8.bf16 %v562_v56  ;;  %v638_v56 = vld [vmem:[%s7354_s12 + $0xc08] sm:$0xff] }
 0x281   : > { %3436 = vmatprep.subr.bf16.mxu0 %v1512_v5  ;;  %3608 = vmatprep.subr.bf16.mxu1 %v1514_v6  ;;  %v1689_v5 = vunpack.c.h.s8.bf16 %v564_v57  ;;  %v587_v6 = vld [vmem:[%s7354_s12 + $0xa70] sm:$0xff] }
 0x284   : > { %3437 = vmatpush1.bf16.msra.mxu0 %v1511_v9  ;;  %3609 = vmatpush1.bf16.msra.mxu1 %v1513_v10  ;;  %v1688_v9 = vunpack.c.h.s8.bf16 %v563_v62  ;;  %v1712_v10 = vunpack.c.l.s8.bf16 %v587_v6 }
 0x285   : > { %3438 = vmatprep.subr.bf16.mxu0 %v1537_v13  ;;  %3610 = vmatprep.subr.bf16.mxu1 %v1539_v14  ;;  %v1714_v13 = vunpack.c.l.s8.bf16 %v589_v21  ;;  %v586_v14 = vld [vmem:[%s7354_s12 + $0xa68] sm:$0xff] }
 0x286   : > { %v1711_v16 = vunpack.c.l.s8.bf16 %v586_v14  ;;  %v1736_v45 = vunpack.c.h.s8.bf16 %v586_v14  ;;  %v689_v14 = vld [vmem:[%s7354_s12 + $0xda0] sm:$0xff] }
 0x288   : > { %3439 = vmatpush1.bf16.msra.mxu0 %v1536_v17  ;;  %3611 = vmatpush1.bf16.msra.mxu1 %v1538_v18  ;;  %v1713_v17 = vunpack.c.l.s8.bf16 %v588_v15  ;;  %v1737_v18 = vunpack.c.h.s8.bf16 %v587_v6  ;;  %v663_v6 = vld [vmem:[%s7354_s12 + $0xcd0] sm:$0xff] }
 0x289   : > { %3440 = vmatprep.subr.bf16.mxu0 %v1562_v22  ;;  %3612 = vmatprep.subr.bf16.mxu1 %v1564_v23  ;;  %v1739_v22 = vunpack.c.h.s8.bf16 %v589_v21  ;;  %v612_v23 = vld [vmem:[%s7354_s12 + $0xb38] sm:$0xff] }
 0x28c   : > { %3441 = vmatpush1.bf16.msra.mxu0 %v1561_v25  ;;  %3613 = vmatpush1.bf16.msra.mxu1 %v1563_v27  ;;  %v1738_v25 = vunpack.c.h.s8.bf16 %v588_v15  ;;  %v1762_v27 = vunpack.c.l.s8.bf16 %v612_v23 }
 0x28d   : > { %3442 = vmatprep.subr.bf16.mxu0 %v1587_v28  ;;  %3614 = vmatprep.subr.bf16.mxu1 %v1589_v29  ;;  %v1764_v28 = vunpack.c.l.s8.bf16 %v614_v24  ;;  %v611_v29 = vld [vmem:[%s7354_s12 + $0xb30] sm:$0xff] }
 0x28e   : > { %v1761_v33 = vunpack.c.l.s8.bf16 %v611_v29  ;;  %v1786_v47 = vunpack.c.h.s8.bf16 %v611_v29  ;;  %v714_v29 = vld [vmem:[%s7354_s12 + $0xe68] sm:$0xff] }
 0x290   : > { %3443 = vmatpush1.bf16.msra.mxu0 %v1586_v34  ;;  %3615 = vmatpush1.bf16.msra.mxu1 %v1588_v35  ;;  %v1763_v34 = vunpack.c.l.s8.bf16 %v613_v32  ;;  %v1787_v35 = vunpack.c.h.s8.bf16 %v612_v23  ;;  %v688_v23 = vld [vmem:[%s7354_s12 + $0xd98] sm:$0xff] }
 0x291   : > { %3444 = vmatprep.subr.bf16.mxu0 %v1612_v41  ;;  %3616 = vmatprep.subr.bf16.mxu1 %v1614_v42  ;;  %v1789_v41 = vunpack.c.h.s8.bf16 %v614_v24  ;;  %v637_v42 = vld [vmem:[%s7354_s12 + $0xc00] sm:$0xff] }
 0x294   : > { %3445 = vmatpush1.bf16.msra.mxu0 %v1611_v48  ;;  %3617 = vmatpush1.bf16.msra.mxu1 %v1613_v49  ;;  %v1788_v48 = vunpack.c.h.s8.bf16 %v613_v32  ;;  %v1812_v49 = vunpack.c.l.s8.bf16 %v637_v42 }
 0x295   : > { %3446 = vmatprep.subr.bf16.mxu0 %v1637_v54  ;;  %3618 = vmatprep.subr.bf16.mxu1 %v1639_v55  ;;  %v1814_v54 = vunpack.c.l.s8.bf16 %v639_v43  ;;  %v636_v55 = vld [vmem:[%s7354_s12 + $0xbf8] sm:$0xff] }
 0x296   : > { %v1811_v57 = vunpack.c.l.s8.bf16 %v636_v55  ;;  %v1836_v62 = vunpack.c.h.s8.bf16 %v636_v55  ;;  %v739_v55 = vld [vmem:[%s7354_s12 + $0xf30] sm:$0xff] }
 0x298   : > { %3447 = vmatpush1.bf16.msra.mxu0 %v1636_v2  ;;  %3619 = vmatpush1.bf16.msra.mxu1 %v1638_v58  ;;  %v1813_v2 = vunpack.c.l.s8.bf16 %v638_v56  ;;  %v1837_v58 = vunpack.c.h.s8.bf16 %v637_v42  ;;  %v713_v42 = vld [vmem:[%s7354_s12 + $0xe60] sm:$0xff] }
 0x299   : > { %3448 = vmatprep.subr.bf16.mxu0 %v1662_v59  ;;  %3620 = vmatprep.subr.bf16.mxu1 %v1664_v60  ;;  %v1839_v59 = vunpack.c.h.s8.bf16 %v639_v43  ;;  %v662_v60 = vld [vmem:[%s7354_s12 + $0xcc8] sm:$0xff] }
 0x29c   : > { %3449 = vmatpush1.bf16.msra.mxu0 %v1661_v63  ;;  %3621 = vmatpush1.bf16.msra.mxu1 %v1663_v0  ;;  %v1838_v63 = vunpack.c.h.s8.bf16 %v638_v56  ;;  %v1862_v0 = vunpack.c.l.s8.bf16 %v662_v60 }
 0x29d   : > { %3450 = vmatprep.subr.bf16.mxu0 %v1687_v4  ;;  %3622 = vmatprep.subr.bf16.mxu1 %v1689_v5  ;;  %v1864_v4 = vunpack.c.l.s8.bf16 %v664_v61  ;;  %v661_v5 = vld [vmem:[%s7354_s12 + $0xcc0] sm:$0xff] }
 0x29e   : > { %v1861_v21 = vunpack.c.l.s8.bf16 %v661_v5  ;;  %v1886_v15 = vunpack.c.h.s8.bf16 %v661_v5  ;;  %v764_v5 = vld [vmem:[%s7354_s12 + $0xff8] sm:$0xff] }
 0x2a0   : > { %3451 = vmatpush1.bf16.msra.mxu0 %v1686_v7  ;;  %3623 = vmatpush1.bf16.msra.mxu1 %v1688_v9  ;;  %v1863_v7 = vunpack.c.l.s8.bf16 %v663_v6  ;;  %v1887_v9 = vunpack.c.h.s8.bf16 %v662_v60  ;;  %v738_v60 = vld [vmem:[%s7354_s12 + $0xf28] sm:$0xff] }
 0x2a1   : > { %3452 = vmatprep.subr.bf16.mxu0 %v1712_v10  ;;  %3624 = vmatprep.subr.bf16.mxu1 %v1714_v13  ;;  %v1889_v10 = vunpack.c.h.s8.bf16 %v664_v61  ;;  %v687_v13 = vld [vmem:[%s7354_s12 + $0xd90] sm:$0xff] }
 0x2a4   : > { %3453 = vmatpush1.bf16.msra.mxu0 %v1711_v16  ;;  %3625 = vmatpush1.bf16.msra.mxu1 %v1713_v17  ;;  %v1888_v16 = vunpack.c.h.s8.bf16 %v663_v6  ;;  %v1912_v17 = vunpack.c.l.s8.bf16 %v687_v13 }
 0x2a5   : > { %3454 = vmatprep.subr.bf16.mxu0 %v1737_v18  ;;  %3626 = vmatprep.subr.bf16.mxu1 %v1739_v22  ;;  %v1914_v18 = vunpack.c.l.s8.bf16 %v689_v14  ;;  %v686_v22 = vld [vmem:[%s7354_s12 + $0xd88] sm:$0xff] }
 0x2a6   : > { %v1911_v24 = vunpack.c.l.s8.bf16 %v686_v22  ;;  %v1936_v32 = vunpack.c.h.s8.bf16 %v686_v22  ;;  %v789_v22 = vld [vmem:[%s7354_s12 + $0x10c0] sm:$0xff] }
 0x2a8   : > { %3455 = vmatpush1.bf16.msra.mxu0 %v1736_v45  ;;  %3627 = vmatpush1.bf16.msra.mxu1 %v1738_v25  ;;  %v1913_v45 = vunpack.c.l.s8.bf16 %v688_v23  ;;  %v1937_v25 = vunpack.c.h.s8.bf16 %v687_v13  ;;  %v763_v13 = vld [vmem:[%s7354_s12 + $0xff0] sm:$0xff] }
 0x2a9   : > { %3456 = vmatprep.subr.bf16.mxu0 %v1762_v27  ;;  %3628 = vmatprep.subr.bf16.mxu1 %v1764_v28  ;;  %v1939_v27 = vunpack.c.h.s8.bf16 %v689_v14  ;;  %v712_v28 = vld [vmem:[%s7354_s12 + $0xe58] sm:$0xff] }
 0x2ac   : > { %3457 = vmatpush1.bf16.msra.mxu0 %v1761_v33  ;;  %3629 = vmatpush1.bf16.msra.mxu1 %v1763_v34  ;;  %v1938_v33 = vunpack.c.h.s8.bf16 %v688_v23  ;;  %v1962_v34 = vunpack.c.l.s8.bf16 %v712_v28 }
 0x2ad   : > { %3458 = vmatprep.subr.bf16.mxu0 %v1787_v35  ;;  %3630 = vmatprep.subr.bf16.mxu1 %v1789_v41  ;;  %v1964_v35 = vunpack.c.l.s8.bf16 %v714_v29  ;;  %v711_v41 = vld [vmem:[%s7354_s12 + $0xe50] sm:$0xff] }
 0x2ae   : > { %v1961_v43 = vunpack.c.l.s8.bf16 %v711_v41  ;;  %v1986_v56 = vunpack.c.h.s8.bf16 %v711_v41  ;;  %v814_v41 = vld [vmem:[%s7354_s12 + $0x1188] sm:$0xff] }
 0x2b0   : > { %3459 = vmatpush1.bf16.msra.mxu0 %v1786_v47  ;;  %3631 = vmatpush1.bf16.msra.mxu1 %v1788_v48  ;;  %v1963_v47 = vunpack.c.l.s8.bf16 %v713_v42  ;;  %v1987_v48 = vunpack.c.h.s8.bf16 %v712_v28  ;;  %v788_v28 = vld [vmem:[%s7354_s12 + $0x10b8] sm:$0xff] }
 0x2b1   : > { %3460 = vmatprep.subr.bf16.mxu0 %v1812_v49  ;;  %3632 = vmatprep.subr.bf16.mxu1 %v1814_v54  ;;  %v1989_v49 = vunpack.c.h.s8.bf16 %v714_v29  ;;  %v737_v54 = vld [vmem:[%s7354_s12 + $0xf20] sm:$0xff] }
 0x2b4   : > { %3461 = vmatpush1.bf16.msra.mxu0 %v1811_v57  ;;  %3633 = vmatpush1.bf16.msra.mxu1 %v1813_v2  ;;  %v1988_v57 = vunpack.c.h.s8.bf16 %v713_v42  ;;  %v2012_v2 = vunpack.c.l.s8.bf16 %v737_v54 }
 0x2b5   : > { %3462 = vmatprep.subr.bf16.mxu0 %v1837_v58  ;;  %3634 = vmatprep.subr.bf16.mxu1 %v1839_v59  ;;  %v2014_v58 = vunpack.c.l.s8.bf16 %v739_v55  ;;  %v736_v59 = vld [vmem:[%s7354_s12 + $0xf18] sm:$0xff] }
 0x2b6   : > { %v2011_v61 = vunpack.c.l.s8.bf16 %v736_v59  ;;  %v2036_v6 = vunpack.c.h.s8.bf16 %v736_v59  ;;  %v839_v59 = vld [vmem:[%s7354_s12 + $0x1250] sm:$0xff] }
 0x2b8   : > { %3463 = vmatpush1.bf16.msra.mxu0 %v1836_v62  ;;  %3635 = vmatpush1.bf16.msra.mxu1 %v1838_v63  ;;  %v2013_v62 = vunpack.c.l.s8.bf16 %v738_v60  ;;  %v2037_v63 = vunpack.c.h.s8.bf16 %v737_v54  ;;  %v813_v54 = vld [vmem:[%s7354_s12 + $0x1180] sm:$0xff] }
 0x2b9   : > { %3475 = vmatprep.subr.bf16.mxu0 %v1862_v0  ;;  %3647 = vmatprep.subr.bf16.mxu1 %v1864_v4  ;;  %v2039_v0 = vunpack.c.h.s8.bf16 %v739_v55  ;;  %v762_v4 = vld [vmem:[%s7354_s12 + $0xfe8] sm:$0xff] }
 0x2bb   : > { %3465 = vmatmul.mubr.bf16.vlgmr.msra.gmra.mrb[8].mxu0 %v7468_v19  ;;  %3637 = vmatmul.mubr.bf16.vlgmr.msra.gmra.mrb[8].mxu1 %v7468_v19 }
 0x2bc   : > { %3476 = vmatpush1.bf16.msra.mxu0 %v1861_v21  ;;  %3648 = vmatpush1.bf16.msra.mxu1 %v1863_v7  ;;  %v2038_v21 = vunpack.c.h.s8.bf16 %v738_v60  ;;  %v2062_v7 = vunpack.c.l.s8.bf16 %v762_v4 }
 0x2bd   : > { %3477 = vmatprep.subr.bf16.mxu0 %v1887_v9  ;;  %3649 = vmatprep.subr.bf16.mxu1 %v1889_v10  ;;  %v2064_v9 = vunpack.c.l.s8.bf16 %v764_v5  ;;  %v761_v10 = vld [vmem:[%s7354_s12 + $0xfe0] sm:$0xff] }
 0x2be   : > { %3507 = vmatprep.mubr.bf16.mxu0 %v7484_v26  ;;  %3679 = vmatprep.mubr.bf16.mxu1 %v7484_v26  ;;  %v2061_v14 = vunpack.c.l.s8.bf16 %v761_v10  ;;  %v2086_v23 = vunpack.c.h.s8.bf16 %v761_v10  ;;  %v862_v10 = vld [vmem:[%s7354_s12 + $0x1308] sm:$0xff] }
 0x2c0   : > { %3478 = vmatpush1.bf16.msra.mxu0 %v1886_v15  ;;  %3650 = vmatpush1.bf16.msra.mxu1 %v1888_v16  ;;  %v2063_v15 = vunpack.c.l.s8.bf16 %v763_v13  ;;  %v2087_v16 = vunpack.c.h.s8.bf16 %v762_v4  ;;  %v836_v4 = vld [vmem:[%s7354_s12 + $0x1238] sm:$0xff] }
 0x2c1   : > { %3479 = vmatprep.subr.bf16.mxu0 %v1912_v17  ;;  %3651 = vmatprep.subr.bf16.mxu1 %v1914_v18  ;;  %v2089_v17 = vunpack.c.h.s8.bf16 %v764_v5  ;;  %v787_v18 = vld [vmem:[%s7354_s12 + $0x10b0] sm:$0xff]  ;;  %v838_v5 = vld [vmem:[%s7354_s12 + $0x1248] sm:$0xff] }
 0x2c4   : > { %3480 = vmatpush1.bf16.msra.mxu0 %v1911_v24  ;;  %3652 = vmatpush1.bf16.msra.mxu1 %v1913_v45  ;;  %v2088_v24 = vunpack.c.h.s8.bf16 %v763_v13  ;;  %v2112_v45 = vunpack.c.l.s8.bf16 %v787_v18  ;;  %v864_v13 = vld [vmem:[%s7354_s12 + $0x1318] sm:$0xff] }
 0x2c5   : > { %3481 = vmatprep.subr.bf16.mxu0 %v1937_v25  ;;  %3653 = vmatprep.subr.bf16.mxu1 %v1939_v27  ;;  %v2114_v25 = vunpack.c.l.s8.bf16 %v789_v22  ;;  %v786_v27 = vld [vmem:[%s7354_s12 + $0x10a8] sm:$0xff] }
 0x2c6   : > { %v2111_v29 = vunpack.c.l.s8.bf16 %v786_v27  ;;  %v2136_v42 = vunpack.c.h.s8.bf16 %v786_v27  ;;  %v887_v27 = vld [vmem:[%s7354_s12 + $0x13d0] sm:$0xff] }
 0x2c8   : > { %3482 = vmatpush1.bf16.msra.mxu0 %v1936_v32  ;;  %3654 = vmatpush1.bf16.msra.mxu1 %v1938_v33  ;;  %v2113_v32 = vunpack.c.l.s8.bf16 %v788_v28  ;;  %v2137_v33 = vunpack.c.h.s8.bf16 %v787_v18  ;;  %v861_v18 = vld [vmem:[%s7354_s12 + $0x1300] sm:$0xff] }
 0x2c9   : > { %3483 = vmatprep.subr.bf16.mxu0 %v1962_v34  ;;  %3655 = vmatprep.subr.bf16.mxu1 %v1964_v35  ;;  %v2139_v34 = vunpack.c.h.s8.bf16 %v789_v22  ;;  %v812_v35 = vld [vmem:[%s7354_s12 + $0x1178] sm:$0xff]  ;;  %v863_v22 = vld [vmem:[%s7354_s12 + $0x1310] sm:$0xff] }
 0x2cc   : > { %3484 = vmatpush1.bf16.msra.mxu0 %v1961_v43  ;;  %3656 = vmatpush1.bf16.msra.mxu1 %v1963_v47  ;;  %v2138_v43 = vunpack.c.h.s8.bf16 %v788_v28  ;;  %v2162_v47 = vunpack.c.l.s8.bf16 %v812_v35  ;;  %v889_v28 = vld [vmem:[%s7354_s12 + $0x13e0] sm:$0xff] }
 0x2cd   : > { %3485 = vmatprep.subr.bf16.mxu0 %v1987_v48  ;;  %3657 = vmatprep.subr.bf16.mxu1 %v1989_v49  ;;  %v2164_v48 = vunpack.c.l.s8.bf16 %v814_v41  ;;  %v811_v49 = vld [vmem:[%s7354_s12 + $0x1170] sm:$0xff] }
 0x2ce   : > { %v2161_v55 = vunpack.c.l.s8.bf16 %v811_v49  ;;  %v2186_v60 = vunpack.c.h.s8.bf16 %v811_v49  ;;  %v912_v49 = vld [vmem:[%s7354_s12 + $0x1498] sm:$0xff] }
 0x2d0   : > { %3486 = vmatpush1.bf16.msra.mxu0 %v1986_v56  ;;  %3658 = vmatpush1.bf16.msra.mxu1 %v1988_v57  ;;  %v2163_v56 = vunpack.c.l.s8.bf16 %v813_v54  ;;  %v2187_v57 = vunpack.c.h.s8.bf16 %v812_v35  ;;  %v886_v35 = vld [vmem:[%s7354_s12 + $0x13c8] sm:$0xff] }
 0x2d1   : > { %3487 = vmatprep.subr.bf16.mxu0 %v2012_v2  ;;  %3659 = vmatprep.subr.bf16.mxu1 %v2014_v58  ;;  %v2189_v2 = vunpack.c.h.s8.bf16 %v814_v41  ;;  %v837_v58 = vld [vmem:[%s7354_s12 + $0x1240] sm:$0xff]  ;;  %v888_v41 = vld [vmem:[%s7354_s12 + $0x13d8] sm:$0xff] }
 0x2d4   : > { %3488 = vmatpush1.bf16.msra.mxu0 %v2011_v61  ;;  %3660 = vmatpush1.bf16.msra.mxu1 %v2013_v62  ;;  %v2188_v61 = vunpack.c.h.s8.bf16 %v813_v54  ;;  %v7235_v62 = vmov 0.0|0.0   ;;  %v914_v54 = vld [vmem:[%s7354_s12 + $0x14a8] sm:$0xff] }
 0x2d5   : > { %3489 = vmatprep.subr.bf16.mxu0 %v2037_v63  ;;  %3661 = vmatprep.subr.bf16.mxu1 %v2039_v0  ;;  %6578 = vst [vmem:[%s7875_s11 + $0x64] sm:$0xff] %v7235_v62  ;;  %6579 = vst [vmem:[%s7875_s11 + $0x6c] sm:$0xff] %v7235_v62  ;;  %v2212_v63 = vunpack.c.l.s8.bf16 %v837_v58  ;;  %v2214_v0 = vunpack.c.l.s8.bf16 %v839_v59 }
 0x2d6   : > { %6580 = vst [vmem:[%s7875_s11 + $0x74] sm:$0xff] %v7235_v62  ;;  %6581 = vst [vmem:[%s7875_s11 + $0x7c] sm:$0xff] %v7235_v62 }
 0x2d7   : > { %6582 = vst [vmem:[%s7875_s11 + $0x84] sm:$0xff] %v7235_v62  ;;  %6583 = vst [vmem:[%s7875_s11 + $0x8c] sm:$0xff] %v7235_v62 }
 0x2d8   : > { %3490 = vmatpush1.bf16.msra.mxu0 %v2036_v6  ;;  %3662 = vmatpush1.bf16.msra.mxu1 %v2038_v21  ;;  %6584 = vst [vmem:[%s7875_s11 + $0x94] sm:$0xff] %v7235_v62  ;;  %6585 = vst [vmem:[%s7875_s11 + $0x9c] sm:$0xff] %v7235_v62  ;;  %v2211_v6 = vunpack.c.l.s8.bf16 %v836_v4  ;;  %v2213_v21 = vunpack.c.l.s8.bf16 %v838_v5 }
 0x2d9   : > { %3491 = vmatprep.subr.bf16.mxu0 %v2062_v7  ;;  %3663 = vmatprep.subr.bf16.mxu1 %v2064_v9  ;;  %6586 = vst [vmem:[%s7875_s11 + $0xa4] sm:$0xff] %v7235_v62  ;;  %6587 = vst [vmem:[%s7875_s11 + $0xac] sm:$0xff] %v7235_v62  ;;  %v2237_v7 = vunpack.c.h.s8.bf16 %v837_v58  ;;  %v2239_v9 = vunpack.c.h.s8.bf16 %v839_v59  ;;  %v911_v58 = vld [vmem:[%s7354_s12 + $0x1490] sm:$0xff]  ;;  %v913_v59 = vld [vmem:[%s7354_s12 + $0x14a0] sm:$0xff] }
 0x2da   : > { %6588 = vst [vmem:[%s7875_s11 + $0xb4] sm:$0xff] %v7235_v62  ;;  %6589 = vst [vmem:[%s7875_s11 + $0xbc] sm:$0xff] %v7235_v62 }
 0x2db   : > { %6590 = vst [vmem:[%s7875_s11 + $0xc4] sm:$0xf] %v7235_v62  ;;  %v2387_v62 = vunpack.c.h.s8.bf16 %v912_v49 }
 0x2dc   : > { %3492 = vmatpush1.bf16.msra.mxu0 %v2061_v14  ;;  %3664 = vmatpush1.bf16.msra.mxu1 %v2063_v15  ;;  %v2236_v14 = vunpack.c.h.s8.bf16 %v836_v4  ;;  %v2238_v15 = vunpack.c.h.s8.bf16 %v838_v5  ;;  %v939_v4 = vld [vmem:[%s7354_s12 + $0x1570] sm:$0xff]  ;;  %v2386_v5 = vunpack.c.h.s8.bf16 %v911_v58 }
 0x2dd   : > { %3493 = vmatprep.subr.bf16.mxu0 %v2087_v16  ;;  %3665 = vmatprep.subr.bf16.mxu1 %v2089_v17  ;;  %v2262_v16 = vunpack.c.l.s8.bf16 %v862_v10  ;;  %v2264_v17 = vunpack.c.l.s8.bf16 %v864_v13 }
 0x2e0   : > { %3494 = vmatpush1.bf16.msra.mxu0 %v2086_v23  ;;  %3666 = vmatpush1.bf16.msra.mxu1 %v2088_v24  ;;  %v2261_v23 = vunpack.c.l.s8.bf16 %v861_v18  ;;  %v2263_v24 = vunpack.c.l.s8.bf16 %v863_v22 }
 0x2e1   : > { %3495 = vmatprep.subr.bf16.mxu0 %v2112_v45  ;;  %3667 = vmatprep.subr.bf16.mxu1 %v2114_v25  ;;  %v2287_v45 = vunpack.c.h.s8.bf16 %v862_v10  ;;  %v2289_v25 = vunpack.c.h.s8.bf16 %v864_v13  ;;  %v938_v10 = vld [vmem:[%s7354_s12 + $0x1568] sm:$0xff] }
 0x2e4   : > { %3496 = vmatpush1.bf16.msra.mxu0 %v2111_v29  ;;  %3668 = vmatpush1.bf16.msra.mxu1 %v2113_v32  ;;  %v2286_v29 = vunpack.c.h.s8.bf16 %v861_v18  ;;  %v2288_v32 = vunpack.c.h.s8.bf16 %v863_v22 }
 0x2e5   : > { %3497 = vmatprep.subr.bf16.mxu0 %v2137_v33  ;;  %3669 = vmatprep.subr.bf16.mxu1 %v2139_v34  ;;  %v2312_v33 = vunpack.c.l.s8.bf16 %v887_v27  ;;  %v2314_v34 = vunpack.c.l.s8.bf16 %v889_v28 }
 0x2e8   : > { %3498 = vmatpush1.bf16.msra.mxu0 %v2136_v42  ;;  %3670 = vmatpush1.bf16.msra.mxu1 %v2138_v43  ;;  %v2311_v42 = vunpack.c.l.s8.bf16 %v886_v35  ;;  %v2313_v43 = vunpack.c.l.s8.bf16 %v888_v41 }
 0x2e9   : > { %3499 = vmatprep.subr.bf16.mxu0 %v2162_v47  ;;  %3671 = vmatprep.subr.bf16.mxu1 %v2164_v48  ;;  %v2337_v47 = vunpack.c.h.s8.bf16 %v887_v27  ;;  %v2339_v48 = vunpack.c.h.s8.bf16 %v889_v28 }
 0x2ec   : > { %3500 = vmatpush1.bf16.msra.mxu0 %v2161_v55  ;;  %3672 = vmatpush1.bf16.msra.mxu1 %v2163_v56  ;;  %v2336_v55 = vunpack.c.h.s8.bf16 %v886_v35  ;;  %v2338_v56 = vunpack.c.h.s8.bf16 %v888_v41  ;;  %v964_v35 = vld [vmem:[%s7354_s12 + $0x1638] sm:$0xff] }
 0x2ed   : > { %3501 = vmatprep.subr.bf16.mxu0 %v2187_v57  ;;  %3673 = vmatprep.subr.bf16.mxu1 %v2189_v2  ;;  %v2362_v57 = vunpack.c.l.s8.bf16 %v912_v49  ;;  %v2364_v2 = vunpack.c.l.s8.bf16 %v914_v54  ;;  %v2438_v49 = vunpack.c.h.s8.bf16 %v938_v10 }
 0x2f0   : > { %3502 = vmatpush1.bf16.msra.mxu0 %v2186_v60  ;;  %3674 = vmatpush1.bf16.msra.mxu1 %v2188_v61  ;;  %v2361_v60 = vunpack.c.l.s8.bf16 %v911_v58  ;;  %v2363_v61 = vunpack.c.l.s8.bf16 %v913_v59  ;;  %v963_v58 = vld [vmem:[%s7354_s12 + $0x1630] sm:$0xff] }
 0x2f1   : > { %3503 = vmatprep.subr.bf16.mxu0 %v2212_v63  ;;  %3675 = vmatprep.subr.bf16.mxu1 %v2214_v0  ;;  %v2389_v63 = vunpack.c.h.s8.bf16 %v914_v54  ;;  %v937_v0 = vld [vmem:[%s7354_s12 + $0x1560] sm:$0xff] }
 0x2f2   : > { %v2437_v28 = vunpack.c.h.s8.bf16 %v937_v0 }
 0x2f4   : > { %3504 = vmatpush1.bf16.msra.mxu0 %v2211_v6  ;;  %3676 = vmatpush1.bf16.msra.mxu1 %v2213_v21  ;;  %v2388_v6 = vunpack.c.h.s8.bf16 %v913_v59  ;;  %v2412_v21 = vunpack.c.l.s8.bf16 %v937_v0 }
 0x2f5   : > { %3505 = vmatprep.subr.bf16.mxu0 %v2237_v7  ;;  %3677 = vmatprep.subr.bf16.mxu1 %v2239_v9  ;;  %v2414_v7 = vunpack.c.l.s8.bf16 %v939_v4  ;;  %v936_v9 = vld [vmem:[%s7354_s12 + $0x1558] sm:$0xff] }
 0x2f6   : > { %v2411_v22 = vunpack.c.l.s8.bf16 %v936_v9 }
 0x2f8   : > { %3506 = vmatpush1.bf16.msra.mxu0 %v2236_v14  ;;  %3678 = vmatpush1.bf16.msra.mxu1 %v2238_v15 }
 0x2f9   : > { %3518 = vmatprep.subr.bf16.mxu0 %v2262_v16  ;;  %3690 = vmatprep.subr.bf16.mxu1 %v2264_v17 }
 0x2fb   : > { %3508 = vmatmul.mubr.bf16.vlgmr.msra.gmra.mrb[8].mxu0 %v7522_v1  ;;  %3680 = vmatmul.mubr.bf16.vlgmr.msra.gmra.mrb[8].mxu1 %v7522_v1 }
 0x2fc   : > { %3519 = vmatpush1.bf16.msra.mxu0 %v2261_v23  ;;  %3691 = vmatpush1.bf16.msra.mxu1 %v2263_v24  ;;  %v2413_v23 = vunpack.c.l.s8.bf16 %v938_v10 }
 0x2fd   : > { %3520 = vmatprep.subr.bf16.mxu0 %v2287_v45  ;;  %3692 = vmatprep.subr.bf16.mxu1 %v2289_v25 }
 0x2fe   : > { %3550 = vmatprep.mubr.bf16.mxu0 %v7538_v8  ;;  %3722 = vmatprep.mubr.bf16.mxu1 %v7538_v8 }
 0x300   : > { %3521 = vmatpush1.bf16.msra.mxu0 %v2286_v29  ;;  %3693 = vmatpush1.bf16.msra.mxu1 %v2288_v32  ;;  %v2439_v29 = vunpack.c.h.s8.bf16 %v939_v4 }
 0x301   : > { %3522 = vmatprep.subr.bf16.mxu0 %v2312_v33  ;;  %3694 = vmatprep.subr.bf16.mxu1 %v2314_v34  ;;  %v962_v34 = vld [vmem:[%s7354_s12 + $0x1628] sm:$0xff] }
 0x304   : > { %3523 = vmatpush1.bf16.msra.mxu0 %v2311_v42  ;;  %3695 = vmatpush1.bf16.msra.mxu1 %v2313_v43 }
 0x305   : > { %3524 = vmatprep.subr.bf16.mxu0 %v2337_v47  ;;  %3696 = vmatprep.subr.bf16.mxu1 %v2339_v48  ;;  %v2436_v48 = vunpack.c.h.s8.bf16 %v936_v9  ;;  %v2489_v9 = vunpack.c.h.s8.bf16 %v964_v35 }
 0x308   : > { %3525 = vmatpush1.bf16.msra.mxu0 %v2336_v55  ;;  %3697 = vmatpush1.bf16.msra.mxu1 %v2338_v56  ;;  %v2462_v56 = vunpack.c.l.s8.bf16 %v962_v34 }
 0x309   : > { %3526 = vmatprep.subr.bf16.mxu0 %v2362_v57  ;;  %3698 = vmatprep.subr.bf16.mxu1 %v2364_v2  ;;  %v2464_v57 = vunpack.c.l.s8.bf16 %v964_v35  ;;  %v961_v2 = vld [vmem:[%s7354_s12 + $0x1620] sm:$0xff]  ;;  %v986_v35 = vld [vmem:[%s7354_s12 + $0x16e8] sm:$0xff] }
 0x30a   : > { %v2461_v4 = vunpack.c.l.s8.bf16 %v961_v2 }
 0x30c   : > { %3527 = vmatpush1.bf16.msra.mxu0 %v2361_v60  ;;  %3699 = vmatpush1.bf16.msra.mxu1 %v2363_v61 }
 0x30d   : > { %3528 = vmatprep.subr.bf16.mxu0 %v2387_v62  ;;  %3700 = vmatprep.subr.bf16.mxu1 %v2389_v63 }
 0x30e   : > { %v7912_v13 = vpop.f32.mrb[4].mxu0  ;;  %v7914_v14 = vpop.f32.mrb[4].mxu1 }
 0x30f   : > { %v7916_v15 = vpop.f32.mrb[5].mxu0  ;;  %v7918_v16 = vpop.f32.mrb[5].mxu1 }
 0x310   : > { %v3212_v17 = vpop.f32.mrb[6].mxu0  ;;  %v3384_v18 = vpop.f32.mrb[6].mxu1  ;;  %3529 = vmatpush1.bf16.msra.mxu0 %v2386_v5  ;;  %3701 = vmatpush1.bf16.msra.mxu1 %v2388_v6  ;;  %v2463_v5 = vunpack.c.l.s8.bf16 %v963_v58 }
 0x311   : > { %v4962_v24 = vadd.f32 %v3212_v17, %v7912_v13  ;;  %v4976_v45 = vadd.f32 %v3384_v18, %v7914_v14  ;;  %v3214_v25 = vpop.f32.mrb[7].mxu0  ;;  %v3386_v27 = vpop.f32.mrb[7].mxu1  ;;  %3530 = vmatprep.subr.bf16.mxu0 %v2412_v21  ;;  %3702 = vmatprep.subr.bf16.mxu1 %v2414_v7  ;;  %v2487_v7 = vunpack.c.h.s8.bf16 %v962_v34  ;;  %v987_v18 = vld [vmem:[%s7354_s12 + $0x16f0] sm:$0xff] }
 0x312   : > { %v4969_v32 = vadd.f32 %v3214_v25, %v7916_v15  ;;  %v4983_v33 = vadd.f32 %v3386_v27, %v7918_v16  ;;  %v2486_v27 = vunpack.c.h.s8.bf16 %v961_v2 }
 0x313   : > { %v4963_v41 = vrot.slane %v4962_v24, 4  ;;  %v4977_v42 = vrot.slane %v4976_v45, 4 }
 0x314   : > { %v4970_v43 = vrot.slane %v4969_v32, 4  ;;  %v4984_v47 = vrot.slane %v4983_v33, 4  ;;  %3531 = vmatpush1.bf16.msra.mxu0 %v2411_v22  ;;  %3703 = vmatpush1.bf16.msra.mxu1 %v2413_v23  ;;  %v989_v22 = vld [vmem:[%s7354_s12 + $0x1700] sm:$0xff] }
 0x315   : > { %v4964_v54 = vadd.f32 %v4963_v41, %v4962_v24  ;;  %v4978_v55 = vadd.f32 %v4977_v42, %v4976_v45  ;;  %3532 = vmatprep.subr.bf16.mxu0 %v2437_v28  ;;  %3704 = vmatprep.subr.bf16.mxu1 %v2439_v29  ;;  %v2488_v28 = vunpack.c.h.s8.bf16 %v963_v58  ;;  %v2514_v34 = vunpack.c.l.s8.bf16 %v989_v22  ;;  %v988_v41 = vld [vmem:[%s7354_s12 + $0x16f8] sm:$0xff] }
 0x316   : > { %v4971_v59 = vadd.f32 %v4970_v43, %v4969_v32  ;;  %v4985_v60 = vadd.f32 %v4984_v47, %v4983_v33  ;;  %v2512_v33 = vunpack.c.l.s8.bf16 %v987_v18  ;;  %v2537_v58 = vunpack.c.h.s8.bf16 %v987_v18 }
 0x317   : > { %v4965_v61 = vrot.slane %v4964_v54, 2  ;;  %v4979_v62 = vrot.slane %v4978_v55, 2 }
 0x318   : > { %v4972_v63 = vrot.slane %v4971_v59, 2  ;;  %v4986_v0 = vrot.slane %v4985_v60, 2  ;;  %3533 = vmatpush1.bf16.msra.mxu0 %v2436_v48  ;;  %3705 = vmatpush1.bf16.msra.mxu1 %v2438_v49 }
 0x319   : > { %v4966_v6 = vadd.f32 %v4965_v61, %v4964_v54  ;;  %v4980_v21 = vadd.f32 %v4979_v62, %v4978_v55  ;;  %3534 = vmatprep.subr.bf16.mxu0 %v2462_v56  ;;  %3706 = vmatprep.subr.bf16.mxu1 %v2464_v57  ;;  %v2511_v55 = vunpack.c.l.s8.bf16 %v986_v35  ;;  %v2513_v56 = vunpack.c.l.s8.bf16 %v988_v41  ;;  %v1012_v62 = vld [vmem:[%s7354_s12 + $0x17b8] sm:$0xff] }
 0x31a   : > { %v4973_v10 = vadd.f32 %v4972_v63, %v4971_v59  ;;  %v4987_v17 = vadd.f32 %v4986_v0, %v4985_v60  ;;  %v2539_v59 = vunpack.c.h.s8.bf16 %v989_v22  ;;  %v1014_v63 = vld [vmem:[%s7354_s12 + $0x17c8] sm:$0xff]  ;;  %v2562_v22 = vunpack.c.l.s8.bf16 %v1012_v62 }
 0x31b   : > { %v4967_v23 = vrot.slane %v4966_v6, 1  ;;  %v4981_v24 = vrot.slane %v4980_v21, 1 }
 0x31c   : > { %v4974_v45 = vrot.slane %v4973_v10, 1  ;;  %v4988_v25 = vrot.slane %v4987_v17, 1  ;;  %3535 = vmatpush1.bf16.msra.mxu0 %v2461_v4  ;;  %3707 = vmatpush1.bf16.msra.mxu1 %v2463_v5  ;;  %v2536_v5 = vunpack.c.h.s8.bf16 %v986_v35 }
 0x31d   : > { %v4968_v29 = vadd.f32 %v4967_v23, %v4966_v6  ;;  %v4982_v32 = vadd.f32 %v4981_v24, %v4980_v21  ;;  %3536 = vmatprep.subr.bf16.mxu0 %v2487_v7  ;;  %3708 = vmatprep.subr.bf16.mxu1 %v2489_v9  ;;  %v2538_v6 = vunpack.c.h.s8.bf16 %v988_v41  ;;  %v2564_v23 = vunpack.c.l.s8.bf16 %v1014_v63  ;;  %v1011_v24 = vld [vmem:[%s7354_s12 + $0x17b0] sm:$0xff] }
 0x31e   : > { %v4975_v42 = vadd.f32 %v4974_v45, %v4973_v10  ;;  %v4989_v43 = vadd.f32 %v4988_v25, %v4987_v17  ;;  %v1013_v45 = vld [vmem:[%s7354_s12 + $0x17c0] sm:$0xff] }
 0x31f   : > { %v7932_v47 = vmul.f32 0.25, %v4968_v29  ;;  %v7934_v48 = vmul.f32 0.25, %v4982_v32  ;;  %v2563_v35 = vunpack.c.l.s8.bf16 %v1013_v45 }
 0x320   : > { %v7936_v49 = vmul.f32 0.25, %v4975_v42  ;;  %v7938_v54 = vmul.f32 0.25, %v4989_v43  ;;  %3537 = vmatpush1.bf16.msra.mxu0 %v2486_v27  ;;  %3709 = vmatpush1.bf16.msra.mxu1 %v2488_v28  ;;  %v2587_v43 = vunpack.c.h.s8.bf16 %v1012_v62 }
 0x321   : > { %v5138_v57 = vsub.f32 %v7912_v13, %v7932_v47  ;;  %v5140_v2 = vsub.f32 %v7914_v14, %v7934_v48  ;;  %3538 = vmatprep.subr.bf16.mxu0 %v2512_v33  ;;  %3710 = vmatprep.subr.bf16.mxu1 %v2514_v34  ;;  %v2561_v34 = vunpack.c.l.s8.bf16 %v1011_v24 }
 0x322   : > { %v5139_v60 = vsub.f32 %v7916_v15, %v7936_v49  ;;  %v5141_v61 = vsub.f32 %v7918_v16, %v7938_v54 }
 0x323   : > { %v5188_v0 = vsel %vm4932_vm0, %v5138_v57, 0.0  ;;  %v5190_v4 = vsel %vm4932_vm0, %v5140_v2, 0.0  ;;  %v1037_v2 = vld [vmem:[%s7354_s12 + $0x1880] sm:$0xff] }
 0x324   : > { %v5238_v21 = vmul.f32 %v5188_v0, %v5188_v0  ;;  %v5240_v7 = vmul.f32 %v5190_v4, %v5190_v4  ;;  %v5189_v9 = vsel %vm4932_vm0, %v5139_v60, 0.0  ;;  %v5191_v10 = vsel %vm4932_vm0, %v5141_v61, 0.0  ;;  %3539 = vmatpush1.bf16.msra.mxu0 %v2511_v55  ;;  %3711 = vmatpush1.bf16.msra.mxu1 %v2513_v56 }
 0x325   : > { %v5239_v17 = vmul.f32 %v5189_v9, %v5189_v9  ;;  %v5241_v18 = vmul.f32 %v5191_v10, %v5191_v10  ;;  %3540 = vmatprep.subr.bf16.mxu0 %v2537_v58  ;;  %3712 = vmatprep.subr.bf16.mxu1 %v2539_v59  ;;  %v2589_v55 = vunpack.c.h.s8.bf16 %v1014_v63  ;;  %v1039_v58 = vld [vmem:[%s7354_s12 + $0x1890] sm:$0xff]  ;;  %v2586_v4 = vunpack.c.h.s8.bf16 %v1011_v24  ;;  %v1038_v9 = vld [vmem:[%s7354_s12 + $0x1888] sm:$0xff] }
 0x326   : > { %v5313_v25 = vrot.slane %v5238_v21, 4  ;;  %v5327_v27 = vrot.slane %v5240_v7, 4  ;;  %v2612_v62 = vunpack.c.l.s8.bf16 %v1037_v2  ;;  %v2614_v63 = vunpack.c.l.s8.bf16 %v1039_v58 }
 0x327   : > { %v5320_v28 = vrot.slane %v5239_v17, 4  ;;  %v5334_v29 = vrot.slane %v5241_v18, 4 }
 0x328   : > { %v5314_v32 = vadd.f32 %v5313_v25, %v5238_v21  ;;  %v5328_v33 = vadd.f32 %v5327_v27, %v5240_v7  ;;  %3541 = vmatpush1.bf16.msra.mxu0 %v2536_v5  ;;  %3713 = vmatpush1.bf16.msra.mxu1 %v2538_v6  ;;  %v2588_v5 = vunpack.c.h.s8.bf16 %v1013_v45  ;;  %v1036_v7 = vld [vmem:[%s7354_s12 + $0x1878] sm:$0xff]  ;;  %v2613_v45 = vunpack.c.l.s8.bf16 %v1038_v9 }
 0x329   : > { %v5321_v41 = vadd.f32 %v5320_v28, %v5239_v17  ;;  %v5335_v42 = vadd.f32 %v5334_v29, %v5241_v18  ;;  %3542 = vmatprep.subr.bf16.mxu0 %v2562_v22  ;;  %3714 = vmatprep.subr.bf16.mxu1 %v2564_v23  ;;  %v2611_v24 = vunpack.c.l.s8.bf16 %v1036_v7  ;;  %v2637_v29 = vunpack.c.h.s8.bf16 %v1037_v2 }
 0x32a   : > { %v5315_v56 = vrot.slane %v5314_v32, 2  ;;  %v5329_v57 = vrot.slane %v5328_v33, 2 }
 0x32b   : > { %v5322_v59 = vrot.slane %v5321_v41, 2  ;;  %v5336_v60 = vrot.slane %v5335_v42, 2 }
 0x32c   : > { %v5316_v61 = vadd.f32 %v5315_v56, %v5314_v32  ;;  %v5330_v0 = vadd.f32 %v5329_v57, %v5328_v33  ;;  %3543 = vmatpush1.bf16.msra.mxu0 %v2561_v34  ;;  %3715 = vmatpush1.bf16.msra.mxu1 %v2563_v35  ;;  %v2639_v32 = vunpack.c.h.s8.bf16 %v1039_v58  ;;  %v266_v35 = vld [vmem:[%s7354_s12 + $0x68] sm:$0xff]  ;;  %v2636_v57 = vunpack.c.h.s8.bf16 %v1036_v7  ;;  %v293_v7 = vld [vmem:[%s7354_s12 + $0x140] sm:$0xff] }
 0x32d   : > { %v5323_v6 = vadd.f32 %v5322_v59, %v5321_v41  ;;  %v5337_v21 = vadd.f32 %v5336_v60, %v5335_v42  ;;  %3544 = vmatprep.subr.bf16.mxu0 %v2587_v43  ;;  %3716 = vmatprep.subr.bf16.mxu1 %v2589_v55  ;;  %v268_v41 = vld [vmem:[%s7354_s12 + $0x78] sm:$0xff]  ;;  %v2638_v59 = vunpack.c.h.s8.bf16 %v1038_v9  ;;  %v1066_v2 = vunpack.c.l.s8.bf16 %v266_v35 }
 0x32e   : > { %v5317_v10 = vrot.slane %v5316_v61, 1  ;;  %v5331_v17 = vrot.slane %v5330_v0, 1  ;;  %v1068_v58 = vunpack.c.l.s8.bf16 %v268_v41 }
 0x32f   : > { %v5324_v18 = vrot.slane %v5323_v6, 1  ;;  %v5338_v22 = vrot.slane %v5337_v21, 1 }
 0x330   : > { %v5318_v23 = vadd.f32 %v5317_v10, %v5316_v61  ;;  %v5332_v25 = vadd.f32 %v5331_v17, %v5330_v0  ;;  %3545 = vmatpush1.bf16.msra.mxu0 %v2586_v4  ;;  %3717 = vmatpush1.bf16.msra.mxu1 %v2588_v5  ;;  %v265_v0 = vld [vmem:[%s7354_s12 + $0x60] sm:$0xff]  ;;  %v267_v4 = vld [vmem:[%s7354_s12 + $0x70] sm:$0xff] }
 0x331   : > { %v5325_v27 = vadd.f32 %v5324_v18, %v5323_v6  ;;  %v5339_v28 = vadd.f32 %v5338_v22, %v5337_v21  ;;  %3546 = vmatprep.subr.bf16.mxu0 %v2612_v62  ;;  %3718 = vmatprep.subr.bf16.mxu1 %v2614_v63  ;;  %v1065_v5 = vunpack.c.l.s8.bf16 %v265_v0  ;;  %v1067_v6 = vunpack.c.l.s8.bf16 %v267_v4  ;;  %v291_v63 = vld [vmem:[%s7354_s12 + $0x130] sm:$0xff]  ;;  %v290_v22 = vld [vmem:[%s7354_s12 + $0x128] sm:$0xff] }
 0x332   : > { %v5463_v33 = vmul.f32 0.25, %v5318_v23  ;;  %v5465_v34 = vmul.f32 0.25, %v5332_v25  ;;  %v1091_v21 = vunpack.c.h.s8.bf16 %v266_v35  ;;  %v1093_v62 = vunpack.c.h.s8.bf16 %v268_v41  ;;  %v292_v23 = vld [vmem:[%s7354_s12 + $0x138] sm:$0xff] }
 0x333   : > { %v5464_v42 = vmul.f32 0.25, %v5325_v27  ;;  %v5466_v43 = vmul.f32 0.25, %v5339_v28  ;;  %v1090_v9 = vunpack.c.h.s8.bf16 %v265_v0  ;;  %v1092_v10 = vunpack.c.h.s8.bf16 %v267_v4 }
 0x334   : > { %v5492_v55 = vadd.f32 1e-05, %v5463_v33  ;;  %v5494_v56 = vadd.f32 1e-05, %v5465_v34  ;;  %3547 = vmatpush1.bf16.msra.mxu0 %v2611_v24  ;;  %3719 = vmatpush1.bf16.msra.mxu1 %v2613_v45  ;;  %v1116_v17 = vunpack.c.l.s8.bf16 %v291_v63  ;;  %v1118_v18 = vunpack.c.l.s8.bf16 %v293_v7  ;;  %v316_v33 = vld [vmem:[%s7354_s12 + $0x1f8] sm:$0xff]  ;;  %v318_v34 = vld [vmem:[%s7354_s12 + $0x208] sm:$0xff] }
 0x335   : > { %v5493_v60 = vadd.f32 1e-05, %v5464_v42  ;;  %v5495_v61 = vadd.f32 1e-05, %v5466_v43  ;;  %3548 = vmatprep.subr.bf16.mxu0 %v2637_v29  ;;  %3720 = vmatprep.subr.bf16.mxu1 %v2639_v32  ;;  %v1115_v24 = vunpack.c.l.s8.bf16 %v290_v22  ;;  %v1117_v45 = vunpack.c.l.s8.bf16 %v292_v23 }
 0x336   : > { %7122 = vrsqrt.f32 %v5492_v55  ;;  %v1141_v28 = vunpack.c.h.s8.bf16 %v291_v63  ;;  %v1143_v29 = vunpack.c.h.s8.bf16 %v293_v7  ;;  %v1140_v43 = vunpack.c.h.s8.bf16 %v290_v22 }
 0x337   : > { %7124 = vrsqrt.f32 %v5494_v56  ;;  %v1142_v55 = vunpack.c.h.s8.bf16 %v292_v23  ;;  %v8003_v63 = vsub.s32 0, %v7720_v46  ;;  %v8006_v7 = vsub.s32 1, %v7720_v46  ;;  %v8031_v23 = vld [vmem:[%s7354_s12 + $0x2c8] sm:$0xff] }
 0x338   : > { %7126 = vrsqrt.f32 %v5493_v60  ;;  %3549 = vmatpush1.bf16.msra.mxu0 %v2636_v57  ;;  %3721 = vmatpush1.bf16.msra.mxu1 %v2638_v59  ;;  %v1166_v57 = vunpack.c.l.s8.bf16 %v316_v33  ;;  %v1168_v59 = vunpack.c.l.s8.bf16 %v318_v34  ;;  %v315_v60 = vld [vmem:[%s7354_s12 + $0x1f0] sm:$0xff]  ;;  %v8028_v22 = vsub.s32 5, %v7720_v46 }
 0x339   : > { %7128 = vrsqrt.f32 %v5495_v61  ;;  %3733 = vmatprep.subr.bf16.mxu0 %v1066_v2  ;;  %3905 = vmatprep.subr.bf16.mxu1 %v1068_v58  ;;  %v317_v61 = vld [vmem:[%s7354_s12 + $0x200] sm:$0xff]  ;;  %v1165_v0 = vunpack.c.l.s8.bf16 %v315_v60 }
 0x33a   : > { %v1167_v4 = vunpack.c.l.s8.bf16 %v317_v61 }
 0x33b   : > { %3551 = vmatmul.mubr.bf16.vlgmr.msra.gmra.mrb[8].mxu0 %v7576_v50  ;;  %3723 = vmatmul.mubr.bf16.vlgmr.msra.gmra.mrb[8].mxu1 %v7576_v50 }
 0x33c   : > { %3734 = vmatpush1.bf16.msra.mxu0 %v1065_v5  ;;  %3906 = vmatpush1.bf16.msra.mxu1 %v1067_v6  ;;  %v1191_v5 = vunpack.c.h.s8.bf16 %v316_v33  ;;  %v1193_v6 = vunpack.c.h.s8.bf16 %v318_v34 }
 0x33d   : > { %3735 = vmatprep.subr.bf16.mxu0 %v1091_v21  ;;  %3907 = vmatprep.subr.bf16.mxu1 %v1093_v62  ;;  %v5603_v21 = vrot.slane %v5595_v12, %v7770_v3  ;;  %v8025_v12 = vsub.s32 4, %v7720_v46 }
 0x33e   : > { %3765 = vmatprep.mubr.bf16.mxu0 %v7384_v36  ;;  %3937 = vmatprep.mubr.bf16.mxu1 %v7384_v36 }
 0x340   : > { %v7123_v25 = vpop.eup %7122  ;;  %3736 = vmatpush1.bf16.msra.mxu0 %v1090_v9  ;;  %3908 = vmatpush1.bf16.msra.mxu1 %v1092_v10  ;;  %v8009_v9 = vld [vmem:[%s7354_s12 + $0x2c0] sm:$0xff]  ;;  %v8012_v10 = vld [vmem:[%s7354_s12 + $0x2d0] sm:$0xff] }
 0x341   : > { %v7125_v27 = vpop.eup %7124  ;;  %3737 = vmatprep.subr.bf16.mxu0 %v1116_v17  ;;  %3909 = vmatprep.subr.bf16.mxu1 %v1118_v18  ;;  %v8015_v17 = vld [vmem:[%s7354_s12 + $0x2b8] sm:$0xff]  ;;  %v5484_v18 = vld [vmem:[%s7995_s6] sm:$0xff]  ;;  %v1216_v33 = vunpack.c.l.s8.bf16 %v8009_v9  ;;  %v1218_v34 = vunpack.c.l.s8.bf16 %v8012_v10 }
 0x342   : > { %v7127_v32 = vpop.eup %7126 }
 0x343   : > { %v7129_v35 = vpop.eup %7128  ;;  %v5565_v41 = vcombine.low %v7123_v25, %v7127_v32  ;;  %v1192_v32 = vunpack.c.h.s8.bf16 %v317_v61 }
 0x344   : > { %v5566_v42 = vcombine.low %v7125_v27, %v7129_v35  ;;  %3738 = vmatpush1.bf16.msra.mxu0 %v1115_v24  ;;  %3910 = vmatpush1.bf16.msra.mxu1 %v1117_v45  ;;  %v8034_v24 = vsub.s32 6, %v7720_v46  ;;  %v8037_v45 = vsub.s32 7, %v7720_v46  ;;  %v1190_v27 = vunpack.c.h.s8.bf16 %v315_v60 }
 0x345   : > { %v5587_v56 = vrot.slane %v5565_v41, %v7770_v3  ;;  %3739 = vmatprep.subr.bf16.mxu0 %v1141_v28  ;;  %3911 = vmatprep.subr.bf16.mxu1 %v1143_v29  ;;  %v8040_v28 = vld [vmem:[%s7354_s12 + $0x388] sm:$0xff]  ;;  %v8043_v29 = vld [vmem:[%s7354_s12 + $0x398] sm:$0xff]  ;;  %v1215_v35 = vunpack.c.l.s8.bf16 %v8015_v17 }
 0x346   : > { %v5594_v2 = vrot.slane %v5566_v42, %v7770_v3  ;;  %v1217_v42 = vunpack.c.l.s8.bf16 %v8031_v23  ;;  %v1268_v60 = vunpack.c.l.s8.bf16 %v8043_v29 }
 0x348   : > { %v5596_v58 = vcombine.low %v5587_v56, %v5594_v2  ;;  %3740 = vmatpush1.bf16.msra.mxu0 %v1140_v43  ;;  %3912 = vmatpush1.bf16.msra.mxu1 %v1142_v55  ;;  %v1241_v43 = vunpack.c.h.s8.bf16 %v8009_v9  ;;  %v1243_v55 = vunpack.c.h.s8.bf16 %v8012_v10  ;;  %v1240_v56 = vunpack.c.h.s8.bf16 %v8015_v17 }
 0x349   : > { %3741 = vmatprep.subr.bf16.mxu0 %v1166_v57  ;;  %3913 = vmatprep.subr.bf16.mxu1 %v1168_v59  ;;  %v1242_v57 = vunpack.c.h.s8.bf16 %v8031_v23  ;;  %v1266_v59 = vunpack.c.l.s8.bf16 %v8040_v28 }
 0x34a   : > { %v5610_v62 = vrot.slane %v5596_v58, %v7770_v3 }
 0x34c   : > { %v5611_v25 = vcombine.low %v5603_v21, %v5610_v62  ;;  %3742 = vmatpush1.bf16.msra.mxu0 %v1165_v0  ;;  %3914 = vmatpush1.bf16.msra.mxu1 %v1167_v4 }
 0x34d   : > { %3743 = vmatprep.subr.bf16.mxu0 %v1191_v5  ;;  %3915 = vmatprep.subr.bf16.mxu1 %v1193_v6 }
 0x34e   : > { %v5728_v41 = vmul.f32 %v5611_v25, %v5484_v18 }
 0x350   : > { %v5743_v61 = vrot.slane %v5728_v41, %v8003_v63  ;;  %v5747_v2 = vrot.slane %v5728_v41, %v8006_v7  ;;  %v5751_v58 = vrot.slane %v5728_v41, %v8019_v20  ;;  %v5755_v0 = vrot.slane %v5728_v41, %v8022_v11  ;;  %3744 = vmatpush1.bf16.msra.mxu0 %v1190_v27 }
 0x351   : > { %v5759_v4 = vrot.slane %v5728_v41, %v8025_v12  ;;  %v5763_v5 = vrot.slane %v5728_v41, %v8028_v22  ;;  %v5767_v6 = vrot.slane %v5728_v41, %v8034_v24  ;;  %v5771_v21 = vrot.slane %v5728_v41, %v8037_v45  ;;  %3916 = vmatpush1.bf16.msra.mxu1 %v1192_v32 }
 0x352   : > { %v5865_v62 = vmul.f32 %v5743_v61, %v7725_v30  ;;  %v5866_v9 = vmul.f32 %v5747_v2, %v7729_v52  ;;  %v5867_v10 = vmul.f32 %v5751_v58, %v7727_v31  ;;  %v5868_v17 = vmul.f32 %v5755_v0, %v7731_v53  ;;  %3745 = vmatprep.subr.bf16.mxu0 %v1216_v33 }
 0x353   : > { %v5869_v18 = vmul.f32 %v5759_v4, %v7932_v47  ;;  %v5870_v23 = vmul.f32 %v5763_v5, %v7936_v49  ;;  %v5871_v25 = vmul.f32 %v5767_v6, %v7934_v48  ;;  %v5872_v27 = vmul.f32 %v5771_v21, %v7938_v54  ;;  %3917 = vmatprep.subr.bf16.mxu1 %v1218_v34  ;;  %v365_v49 = vld [vmem:[%s7354_s12 + $0x380] sm:$0xff] }
 0x354   : > { %v5915_v32 = vcombine.low %v5865_v62, %v5866_v9  ;;  %v5916_v30 = vcombine.low %v5867_v10, %v5868_v17  ;;  %v8072_v52 = vmul.f32 %v5743_v61, %v7702_v37  ;;  %v8075_v31 = vmul.f32 %v5747_v2, %v7706_v39  ;;  %3746 = vmatpush1.bf16.msra.mxu0 %v1215_v35  ;;  %v367_v35 = vld [vmem:[%s7354_s12 + $0x390] sm:$0xff]  ;;  %v393_v2 = vld [vmem:[%s7354_s12 + $0x460] sm:$0xff] }
 0x355   : > { %v5917_v53 = vcombine.low %v5869_v18, %v5870_v23  ;;  %v5918_v33 = vcombine.low %v5871_v25, %v5872_v27  ;;  %v8078_v47 = vmul.f32 %v5751_v58, %v7704_v38  ;;  %v8081_v48 = vmul.f32 %v5755_v0, %v7708_v40  ;;  %3918 = vmatpush1.bf16.msra.mxu1 %v1217_v42  ;;  %v8114_v0 = vld [vmem:[%s7354_s12 + $0x448] sm:$0xff]  ;;  %v8127_v62 = vld [vmem:[%s7354_s12 + $0x510] sm:$0xff]  ;;  %v8130_v9 = vld [vmem:[%s7354_s12 + $0x520] sm:$0xff] }
 0x356   : > { %v5925_v54 = vrot.slane %v5915_v32, %v7770_v3  ;;  %v5932_v37 = vrot.slane %v5916_v30, %v7770_v3  ;;  %v8087_v34 = vmul.f32 %v5759_v4, %v7912_v13  ;;  %v8090_v39 = vmul.f32 %v5763_v5, %v7916_v15  ;;  %3747 = vmatprep.subr.bf16.mxu0 %v1241_v43  ;;  %v8117_v4 = vld [vmem:[%s7354_s12 + $0x458] sm:$0xff] }
 0x357   : > { %v5939_v38 = vrot.slane %v5917_v53, %v7770_v3  ;;  %v5946_v40 = vrot.slane %v5918_v33, %v7770_v3  ;;  %v8096_v41 = vmul.f32 %v5767_v6, %v7914_v14  ;;  %v8099_v42 = vmul.f32 %v5771_v21, %v7918_v16  ;;  %3919 = vmatprep.subr.bf16.mxu1 %v1243_v55  ;;  %v8124_v21 = vld [vmem:[%s7354_s12 + $0x528] sm:$0xff] }
 0x358   : > { %v5947_v13 = vcombine.low %v5925_v54, %v5932_v37  ;;  %3748 = vmatpush1.bf16.msra.mxu0 %v1240_v56  ;;  %v1265_v15 = vunpack.c.l.s8.bf16 %v365_v49  ;;  %v1267_v14 = vunpack.c.l.s8.bf16 %v367_v35  ;;  %v1291_v16 = vunpack.c.h.s8.bf16 %v8040_v28  ;;  %v391_v56 = vld [vmem:[%s7354_s12 + $0x450] sm:$0xff]  ;;  %v8121_v28 = vld [vmem:[%s7354_s12 + $0x518] sm:$0xff] }
 0x359   : > { %v5948_v43 = vcombine.low %v5939_v38, %v5946_v40  ;;  %3920 = vmatpush1.bf16.msra.mxu1 %v1242_v57  ;;  %3749 = vmatprep.subr.bf16.mxu0 %v1266_v59  ;;  %v1293_v61 = vunpack.c.h.s8.bf16 %v8043_v29  ;;  %v5732_v57 = vld [vmem:[%s8105_s13] sm:$0xff]  ;;  %v1290_v59 = vunpack.c.h.s8.bf16 %v365_v49  ;;  %v1292_v29 = vunpack.c.h.s8.bf16 %v367_v35 }
 0x35a   : > { %v5955_v55 = vrot.slane %v5947_v13, %v7770_v3  ;;  %3921 = vmatprep.subr.bf16.mxu1 %v1268_v60  ;;  %v1316_v60 = vunpack.c.l.s8.bf16 %v391_v56  ;;  %v1318_v6 = vunpack.c.l.s8.bf16 %v393_v2  ;;  %v1315_v10 = vunpack.c.l.s8.bf16 %v8114_v0 }
 0x35b   : > { %v5962_v58 = vrot.slane %v5948_v43, %v7770_v3  ;;  %v1317_v17 = vunpack.c.l.s8.bf16 %v8117_v4  ;;  %v1341_v18 = vunpack.c.h.s8.bf16 %v391_v56  ;;  %v1343_v23 = vunpack.c.h.s8.bf16 %v393_v2 }
 0x35c   : > { %3750 = vmatpush1.bf16.msra.mxu0 %v1265_v15  ;;  %v1340_v27 = vunpack.c.h.s8.bf16 %v8114_v0  ;;  %v1342_v32 = vunpack.c.h.s8.bf16 %v8117_v4  ;;  %v1366_v30 = vunpack.c.l.s8.bf16 %v8121_v28  ;;  %v1368_v53 = vunpack.c.l.s8.bf16 %v8124_v21 }
 0x35d   : > { %v5963_v5 = vcombine.low %v5955_v55, %v5962_v58  ;;  %3922 = vmatpush1.bf16.msra.mxu1 %v1267_v14  ;;  %3751 = vmatprep.subr.bf16.mxu0 %v1291_v16  ;;  %v1365_v33 = vunpack.c.l.s8.bf16 %v8127_v62  ;;  %v1367_v49 = vunpack.c.l.s8.bf16 %v8130_v9  ;;  %v1391_v54 = vunpack.c.h.s8.bf16 %v8121_v28 }
 0x35e   : > { %3923 = vmatprep.subr.bf16.mxu1 %v1293_v61 }
 0x35f   : > { %v6080_v25 = vsub.f32 %v5732_v57, %v5963_v5 }
 0x360   : > { %3752 = vmatpush1.bf16.msra.mxu0 %v1290_v59 }
 0x361   : > { %v6141_v37 = vrot.slane %v6080_v25, %v8003_v63  ;;  %v6145_v35 = vrot.slane %v6080_v25, %v8006_v7  ;;  %v6149_v38 = vrot.slane %v6080_v25, %v8019_v20  ;;  %v6153_v40 = vrot.slane %v6080_v25, %v8022_v11  ;;  %3924 = vmatpush1.bf16.msra.mxu1 %v1292_v29 }
 0x362   : > { %v6157_v13 = vrot.slane %v6080_v25, %v8025_v12  ;;  %v6161_v15 = vrot.slane %v6080_v25, %v8028_v22  ;;  %v6165_v43 = vrot.slane %v6080_v25, %v8034_v24  ;;  %v6169_v14 = vrot.slane %v6080_v25, %v8037_v45  ;;  %3753 = vmatprep.subr.bf16.mxu0 %v1316_v60 }
 0x363   : > { %v6263_v16 = vadd.f32 %v6141_v37, %v8072_v52  ;;  %v6264_v55 = vadd.f32 %v6145_v35, %v8075_v31  ;;  %v6265_v61 = vadd.f32 %v6149_v38, %v8078_v47  ;;  %v6266_v56 = vadd.f32 %v6153_v40, %v8081_v48  ;;  %3925 = vmatprep.subr.bf16.mxu1 %v1318_v6  ;;  %v441_v35 = vld [vmem:[%s7354_s12 + $0x5e0] sm:$0xff]  ;;  %v443_v38 = vld [vmem:[%s7354_s12 + $0x5f0] sm:$0xff]  ;;  %v442_v40 = vld [vmem:[%s7354_s12 + $0x5e8] sm:$0xff] }
 0x364   : > { %v6267_v2 = vadd.f32 %v6157_v13, %v8087_v34  ;;  %v6268_v58 = vadd.f32 %v6161_v15, %v8090_v39  ;;  %v6269_v0 = vadd.f32 %v6165_v43, %v8096_v41  ;;  %v6270_v4 = vadd.f32 %v6169_v14, %v8099_v42  ;;  %3754 = vmatpush1.bf16.msra.mxu0 %v1315_v10 }
 0x365   : > { %v6313_v57 = vmax.f32 %v6263_v16, 0.0  ;;  %v6314_v59 = vmax.f32 %v6264_v55, 0.0  ;;  %v6315_v28 = vmax.f32 %v6265_v61, 0.0  ;;  %v6316_v52 = vmax.f32 %v6266_v56, 0.0  ;;  %3926 = vmatpush1.bf16.msra.mxu1 %v1317_v17  ;;  %3755 = vmatprep.subr.bf16.mxu0 %v1341_v18  ;;  %v465_v16 = vld [vmem:[%s7354_s12 + $0x6a0] sm:$0xff]  ;;  %v467_v61 = vld [vmem:[%s7354_s12 + $0x6b0] sm:$0xff] }
 0x366   : > { %v6317_v31 = vmax.f32 %v6267_v2, 0.0  ;;  %v6318_v47 = vmax.f32 %v6268_v58, 0.0  ;;  %v6319_v5 = vmax.f32 %v6269_v0, 0.0  ;;  %v6320_v48 = vmax.f32 %v6270_v4, 0.0  ;;  %3927 = vmatprep.subr.bf16.mxu1 %v1343_v23  ;;  %v491_v4 = vld [vmem:[%s7354_s12 + $0x770] sm:$0xff] }
 0x367   : > { %v6363_v34 = vsel %vm4932_vm0, %v6313_v57, 0.0  ;;  %v6364_v39 = vsel %vm4932_vm0, %v6314_v59, 0.0  ;;  %v6365_v41 = vsel %vm4932_vm0, %v6315_v28, 0.0  ;;  %v6366_v42 = vsel %vm4932_vm0, %v6316_v52, 0.0  ;;  %v493_v57 = vld [vmem:[%s7354_s12 + $0x780] sm:$0xff] }
 0x368   : > { %v6367_v29 = vsel %vm4932_vm0, %v6317_v31, 0.0  ;;  %v6368_v60 = vsel %vm4932_vm0, %v6318_v47, 0.0  ;;  %v6369_v6 = vsel %vm4932_vm0, %v6319_v5, 0.0  ;;  %v6370_v10 = vsel %vm4932_vm0, %v6320_v48, 0.0  ;;  %3756 = vmatpush1.bf16.msra.mxu0 %v1340_v27  ;;  %v490_v31 = vld [vmem:[%s7354_s12 + $0x768] sm:$0xff]  ;;  %v492_v5 = vld [vmem:[%s7354_s12 + $0x778] sm:$0xff] }
 0x369   : > { %v6808_v17 = vpack.c.bf16 %v6364_v39, %v6363_v34  ;;  %v6809_v18 = vpack.c.bf16 %v6366_v42, %v6365_v41  ;;  %v6810_v23 = vpack.c.bf16 %v6368_v60, %v6367_v29  ;;  %v6811_v25 = vpack.c.bf16 %v6370_v10, %v6369_v6  ;;  %3928 = vmatpush1.bf16.msra.mxu1 %v1342_v32  ;;  %v516_v42 = vld [vmem:[%s7354_s12 + $0x838] sm:$0xff]  ;;  %v518_v29 = vld [vmem:[%s7354_s12 + $0x848] sm:$0xff] }
 0x36a   : > { %3757 = vmatprep.subr.bf16.mxu0 %v1366_v30  ;;  %3929 = vmatprep.subr.bf16.mxu1 %v1368_v53  ;;  %v1393_v37 = vunpack.c.h.s8.bf16 %v8124_v21  ;;  %v1390_v27 = vunpack.c.h.s8.bf16 %v8127_v62  ;;  %v1392_v32 = vunpack.c.h.s8.bf16 %v8130_v9  ;;  %v1416_v30 = vunpack.c.l.s8.bf16 %v441_v35  ;;  %v440_v53 = vld [vmem:[%s7354_s12 + $0x5d8] sm:$0xff] }
 0x36b   : > { %6565 = vst [vmem:[%s7875_s11] sm:$0xff] %v6808_v17  ;;  %6566 = vst [vmem:[%s7875_s11 + $0x8] sm:$0xff] %v6809_v18  ;;  %v1418_v21 = vunpack.c.l.s8.bf16 %v443_v38  ;;  %v1415_v13 = vunpack.c.l.s8.bf16 %v440_v53  ;;  %v1441_v15 = vunpack.c.h.s8.bf16 %v441_v35  ;;  %v1443_v62 = vunpack.c.h.s8.bf16 %v443_v38  ;;  %v515_v17 = vld [vmem:[%s7354_s12 + $0x830] sm:$0xff] }
 0x36c   : > { %6567 = vst [vmem:[%s7875_s11 + $0x10] sm:$0xff] %v6810_v23  ;;  %6568 = vst [vmem:[%s7875_s11 + $0x18] sm:$0xff] %v6811_v25  ;;  %3758 = vmatpush1.bf16.msra.mxu0 %v1365_v33  ;;  %v1417_v33 = vunpack.c.l.s8.bf16 %v442_v40  ;;  %v1440_v43 = vunpack.c.h.s8.bf16 %v440_v53  ;;  %v1442_v9 = vunpack.c.h.s8.bf16 %v442_v40  ;;  %v1465_v56 = vunpack.c.l.s8.bf16 %v465_v16  ;;  %v517_v23 = vld [vmem:[%s7354_s12 + $0x840] sm:$0xff]  ;;  %v540_v40 = vld [vmem:[%s7354_s12 + $0x8f8] sm:$0xff] }
 0x36d   : > { %3930 = vmatpush1.bf16.msra.mxu1 %v1367_v49  ;;  %3759 = vmatprep.subr.bf16.mxu0 %v1391_v54  ;;  %v466_v49 = vld [vmem:[%s7354_s12 + $0x6a8] sm:$0xff]  ;;  %v468_v54 = vld [vmem:[%s7354_s12 + $0x6b8] sm:$0xff]  ;;  %v1467_v2 = vunpack.c.l.s8.bf16 %v467_v61  ;;  %v1490_v59 = vunpack.c.h.s8.bf16 %v465_v16  ;;  %v1492_v28 = vunpack.c.h.s8.bf16 %v467_v61  ;;  %v1516_v52 = vunpack.c.l.s8.bf16 %v491_v4  ;;  %v565_v61 = vld [vmem:[%s7354_s12 + $0x9c0] sm:$0xff] }
 0x36e   : > { %3931 = vmatprep.subr.bf16.mxu1 %v1393_v37  ;;  %v1466_v14 = vunpack.c.l.s8.bf16 %v466_v49  ;;  %v1468_v55 = vunpack.c.l.s8.bf16 %v468_v54  ;;  %v1491_v58 = vunpack.c.h.s8.bf16 %v466_v49  ;;  %v1493_v0 = vunpack.c.h.s8.bf16 %v468_v54 }
 0x36f   : > { %v1518_v47 = vunpack.c.l.s8.bf16 %v493_v57  ;;  %v1515_v48 = vunpack.c.l.s8.bf16 %v490_v31  ;;  %v1517_v34 = vunpack.c.l.s8.bf16 %v492_v5  ;;  %v1541_v39 = vunpack.c.h.s8.bf16 %v491_v4 }
 0x370   : > { %3760 = vmatpush1.bf16.msra.mxu0 %v1390_v27  ;;  %v1543_v41 = vunpack.c.h.s8.bf16 %v493_v57  ;;  %v1540_v60 = vunpack.c.h.s8.bf16 %v490_v31  ;;  %v1542_v6 = vunpack.c.h.s8.bf16 %v492_v5  ;;  %v1566_v10 = vunpack.c.l.s8.bf16 %v516_v42  ;;  %v541_v27 = vld [vmem:[%s7354_s12 + $0x900] sm:$0xff]  ;;  %v590_v5 = vld [vmem:[%s7354_s12 + $0xa88] sm:$0xff] }
 0x371   : > { %3932 = vmatpush1.bf16.msra.mxu1 %v1392_v32  ;;  %3761 = vmatprep.subr.bf16.mxu0 %v1416_v30  ;;  %v1568_v18 = vunpack.c.l.s8.bf16 %v518_v29  ;;  %v1565_v25 = vunpack.c.l.s8.bf16 %v515_v17  ;;  %v1567_v37 = vunpack.c.l.s8.bf16 %v517_v23  ;;  %v1591_v35 = vunpack.c.h.s8.bf16 %v516_v42  ;;  %v543_v32 = vld [vmem:[%s7354_s12 + $0x910] sm:$0xff] }
 0x372   : > { %3933 = vmatprep.subr.bf16.mxu1 %v1418_v21  ;;  %v1593_v38 = vunpack.c.h.s8.bf16 %v518_v29  ;;  %v1590_v30 = vunpack.c.h.s8.bf16 %v515_v17  ;;  %v1592_v53 = vunpack.c.h.s8.bf16 %v517_v23  ;;  %v1616_v21 = vunpack.c.l.s8.bf16 %v541_v27  ;;  %v615_v23 = vld [vmem:[%s7354_s12 + $0xb50] sm:$0xff] }
 0x373   : > { %v1641_v49 = vunpack.c.h.s8.bf16 %v541_v27  ;;  %v1643_v54 = vunpack.c.h.s8.bf16 %v543_v32  ;;  %v6619_v46 = vld [vmem:[%s7875_s11 + $0x10] sm:$0xff] (%p9099_p9) }
 0x374   : > { %3762 = vmatpush1.bf16.msra.mxu0 %v1415_v13  ;;  %v1618_v13 = vunpack.c.l.s8.bf16 %v543_v32 }
 0x375   : > { %3934 = vmatpush1.bf16.msra.mxu1 %v1417_v33  ;;  %3763 = vmatprep.subr.bf16.mxu0 %v1441_v15  ;;  %v542_v33 = vld [vmem:[%s7354_s12 + $0x908] sm:$0xff]  ;;  %v1615_v15 = vunpack.c.l.s8.bf16 %v540_v40 }
 0x376   : > { %3935 = vmatprep.subr.bf16.mxu1 %v1443_v62  ;;  %v1617_v62 = vunpack.c.l.s8.bf16 %v542_v33  ;;  %v1642_v16 = vunpack.c.h.s8.bf16 %v542_v33  ;;  %v640_v33 = vld [vmem:[%s7354_s12 + $0xc18] sm:$0xff] }
 0x378   : > { %3764 = vmatpush1.bf16.msra.mxu0 %v1440_v43  ;;  %v566_v43 = vld [vmem:[%s7354_s12 + $0x9c8] sm:$0xff] }
 0x379   : > { %3936 = vmatpush1.bf16.msra.mxu1 %v1442_v9  ;;  %3776 = vmatprep.subr.bf16.mxu0 %v1466_v14  ;;  %v568_v9 = vld [vmem:[%s7354_s12 + $0x9d8] sm:$0xff]  ;;  %v1640_v14 = vunpack.c.h.s8.bf16 %v540_v40  ;;  %v1691_v4 = vunpack.c.h.s8.bf16 %v566_v43 }
 0x37a   : > { %3948 = vmatprep.subr.bf16.mxu1 %v1468_v55  ;;  %v1666_v55 = vunpack.c.l.s8.bf16 %v566_v43  ;;  %v1693_v57 = vunpack.c.h.s8.bf16 %v568_v9 }
 0x37b   : > { %3766 = vmatmul.mubr.bf16.vlgmr.msra.gmra.mrb[12].mxu0 %v7414_v44 }
 0x37c   : > { %3777 = vmatpush1.bf16.msra.mxu0 %v1465_v56  ;;  %3938 = vmatmul.mubr.bf16.vlgmr.msra.gmra.mrb[12].mxu1 %v7414_v44  ;;  %v1668_v56 = vunpack.c.l.s8.bf16 %v568_v9 }
 0x37d   : > { %3949 = vmatpush1.bf16.msra.mxu1 %v1467_v2  ;;  %3778 = vmatprep.subr.bf16.mxu0 %v1491_v58  ;;  %v567_v2 = vld [vmem:[%s7354_s12 + $0x9d0] sm:$0xff]  ;;  %v1665_v58 = vunpack.c.l.s8.bf16 %v565_v61 }
 0x37e   : > { %3950 = vmatprep.subr.bf16.mxu1 %v1493_v0  ;;  %3808 = vmatprep.mubr.bf16.mxu0 %v7430_v51  ;;  %v1667_v0 = vunpack.c.l.s8.bf16 %v567_v2  ;;  %v1692_v31 = vunpack.c.h.s8.bf16 %v567_v2  ;;  %v665_v2 = vld [vmem:[%s7354_s12 + $0xce0] sm:$0xff] }
 0x37f   : > { %3980 = vmatprep.mubr.bf16.mxu1 %v7430_v51 }
 0x380   : > { %3779 = vmatpush1.bf16.msra.mxu0 %v1490_v59  ;;  %v591_v59 = vld [vmem:[%s7354_s12 + $0xa90] sm:$0xff] }
 0x381   : > { %3951 = vmatpush1.bf16.msra.mxu1 %v1492_v28  ;;  %3780 = vmatprep.subr.bf16.mxu0 %v1516_v52  ;;  %v593_v28 = vld [vmem:[%s7354_s12 + $0xaa0] sm:$0xff]  ;;  %v1690_v52 = vunpack.c.h.s8.bf16 %v565_v61  ;;  %v1741_v42 = vunpack.c.h.s8.bf16 %v591_v59 }
 0x382   : > { %3952 = vmatprep.subr.bf16.mxu1 %v1518_v47  ;;  %v1716_v47 = vunpack.c.l.s8.bf16 %v591_v59  ;;  %v1743_v29 = vunpack.c.h.s8.bf16 %v593_v28 }
 0x384   : > { %3781 = vmatpush1.bf16.msra.mxu0 %v1515_v48  ;;  %v1718_v48 = vunpack.c.l.s8.bf16 %v593_v28 }
 0x385   : > { %3953 = vmatpush1.bf16.msra.mxu1 %v1517_v34  ;;  %3782 = vmatprep.subr.bf16.mxu0 %v1541_v39  ;;  %v592_v34 = vld [vmem:[%s7354_s12 + $0xa98] sm:$0xff]  ;;  %v1715_v39 = vunpack.c.l.s8.bf16 %v590_v5 }
 0x386   : > { %3954 = vmatprep.subr.bf16.mxu1 %v1543_v41  ;;  %v1717_v41 = vunpack.c.l.s8.bf16 %v592_v34  ;;  %v1742_v17 = vunpack.c.h.s8.bf16 %v592_v34  ;;  %v690_v34 = vld [vmem:[%s7354_s12 + $0xda8] sm:$0xff] }
 0x388   : > { %3783 = vmatpush1.bf16.msra.mxu0 %v1540_v60  ;;  %v616_v60 = vld [vmem:[%s7354_s12 + $0xb58] sm:$0xff] }
 0x389   : > { %3955 = vmatpush1.bf16.msra.mxu1 %v1542_v6  ;;  %3784 = vmatprep.subr.bf16.mxu0 %v1566_v10  ;;  %v618_v6 = vld [vmem:[%s7354_s12 + $0xb68] sm:$0xff]  ;;  %v1740_v10 = vunpack.c.h.s8.bf16 %v590_v5  ;;  %v1791_v27 = vunpack.c.h.s8.bf16 %v616_v60 }
 0x38a   : > { %3956 = vmatprep.subr.bf16.mxu1 %v1568_v18  ;;  %v1766_v18 = vunpack.c.l.s8.bf16 %v616_v60  ;;  %v1793_v32 = vunpack.c.h.s8.bf16 %v618_v6 }
 0x38c   : > { %3785 = vmatpush1.bf16.msra.mxu0 %v1565_v25  ;;  %v1768_v25 = vunpack.c.l.s8.bf16 %v618_v6 }
 0x38d   : > { %3957 = vmatpush1.bf16.msra.mxu1 %v1567_v37  ;;  %3786 = vmatprep.subr.bf16.mxu0 %v1591_v35  ;;  %v617_v37 = vld [vmem:[%s7354_s12 + $0xb60] sm:$0xff]  ;;  %v1765_v35 = vunpack.c.l.s8.bf16 %v615_v23 }
 0x38e   : > { %3958 = vmatprep.subr.bf16.mxu1 %v1593_v38  ;;  %v1767_v38 = vunpack.c.l.s8.bf16 %v617_v37  ;;  %v1792_v40 = vunpack.c.h.s8.bf16 %v617_v37  ;;  %v715_v37 = vld [vmem:[%s7354_s12 + $0xe70] sm:$0xff] }
 0x390   : > { %3787 = vmatpush1.bf16.msra.mxu0 %v1590_v30  ;;  %v641_v30 = vld [vmem:[%s7354_s12 + $0xc20] sm:$0xff] }
 0x391   : > { %3959 = vmatpush1.bf16.msra.mxu1 %v1592_v53  ;;  %3788 = vmatprep.subr.bf16.mxu0 %v1616_v21  ;;  %v643_v53 = vld [vmem:[%s7354_s12 + $0xc30] sm:$0xff]  ;;  %v1790_v21 = vunpack.c.h.s8.bf16 %v615_v23  ;;  %v1841_v43 = vunpack.c.h.s8.bf16 %v641_v30 }
 0x392   : > { %3960 = vmatprep.subr.bf16.mxu1 %v1618_v13  ;;  %v1816_v13 = vunpack.c.l.s8.bf16 %v641_v30  ;;  %v1843_v9 = vunpack.c.h.s8.bf16 %v643_v53 }
 0x394   : > { %3789 = vmatpush1.bf16.msra.mxu0 %v1615_v15  ;;  %v1818_v15 = vunpack.c.l.s8.bf16 %v643_v53 }
 0x395   : > { %3961 = vmatpush1.bf16.msra.mxu1 %v1617_v62  ;;  %3790 = vmatprep.subr.bf16.mxu0 %v1641_v49  ;;  %v642_v62 = vld [vmem:[%s7354_s12 + $0xc28] sm:$0xff]  ;;  %v1815_v49 = vunpack.c.l.s8.bf16 %v640_v33 }
 0x396   : > { %3962 = vmatprep.subr.bf16.mxu1 %v1643_v54  ;;  %v1817_v54 = vunpack.c.l.s8.bf16 %v642_v62  ;;  %v1842_v61 = vunpack.c.h.s8.bf16 %v642_v62  ;;  %v740_v62 = vld [vmem:[%s7354_s12 + $0xf38] sm:$0xff] }
 0x398   : > { %3791 = vmatpush1.bf16.msra.mxu0 %v1640_v14  ;;  %v666_v14 = vld [vmem:[%s7354_s12 + $0xce8] sm:$0xff] }
 0x399   : > { %3963 = vmatpush1.bf16.msra.mxu1 %v1642_v16  ;;  %3792 = vmatprep.subr.bf16.mxu0 %v1666_v55  ;;  %v668_v16 = vld [vmem:[%s7354_s12 + $0xcf8] sm:$0xff]  ;;  %v1840_v55 = vunpack.c.h.s8.bf16 %v640_v33  ;;  %v1891_v59 = vunpack.c.h.s8.bf16 %v666_v14 }
 0x39a   : > { %3964 = vmatprep.subr.bf16.mxu1 %v1668_v56  ;;  %v1866_v56 = vunpack.c.l.s8.bf16 %v666_v14  ;;  %v1893_v28 = vunpack.c.h.s8.bf16 %v668_v16 }
 0x39c   : > { %3793 = vmatpush1.bf16.msra.mxu0 %v1665_v58  ;;  %v1868_v58 = vunpack.c.l.s8.bf16 %v668_v16 }
 0x39d   : > { %3965 = vmatpush1.bf16.msra.mxu1 %v1667_v0  ;;  %3794 = vmatprep.subr.bf16.mxu0 %v1691_v4  ;;  %v667_v0 = vld [vmem:[%s7354_s12 + $0xcf0] sm:$0xff]  ;;  %v1865_v4 = vunpack.c.l.s8.bf16 %v665_v2 }
 0x39e   : > { %3966 = vmatprep.subr.bf16.mxu1 %v1693_v57  ;;  %v1867_v57 = vunpack.c.l.s8.bf16 %v667_v0  ;;  %v1892_v5 = vunpack.c.h.s8.bf16 %v667_v0  ;;  %v765_v0 = vld [vmem:[%s7354_s12 + $0x1000] sm:$0xff] }
 0x3a0   : > { %3795 = vmatpush1.bf16.msra.mxu0 %v1690_v52  ;;  %v691_v52 = vld [vmem:[%s7354_s12 + $0xdb0] sm:$0xff] }
 0x3a1   : > { %3967 = vmatpush1.bf16.msra.mxu1 %v1692_v31  ;;  %3796 = vmatprep.subr.bf16.mxu0 %v1716_v47  ;;  %v693_v31 = vld [vmem:[%s7354_s12 + $0xdc0] sm:$0xff]  ;;  %v1890_v47 = vunpack.c.h.s8.bf16 %v665_v2  ;;  %v1941_v60 = vunpack.c.h.s8.bf16 %v691_v52 }
 0x3a2   : > { %3968 = vmatprep.subr.bf16.mxu1 %v1718_v48  ;;  %v1916_v48 = vunpack.c.l.s8.bf16 %v691_v52  ;;  %v1943_v6 = vunpack.c.h.s8.bf16 %v693_v31 }
 0x3a4   : > { %3797 = vmatpush1.bf16.msra.mxu0 %v1715_v39  ;;  %v1918_v39 = vunpack.c.l.s8.bf16 %v693_v31 }
 0x3a5   : > { %3969 = vmatpush1.bf16.msra.mxu1 %v1717_v41  ;;  %3798 = vmatprep.subr.bf16.mxu0 %v1741_v42  ;;  %v692_v41 = vld [vmem:[%s7354_s12 + $0xdb8] sm:$0xff]  ;;  %v1915_v42 = vunpack.c.l.s8.bf16 %v690_v34 }
 0x3a6   : > { %3970 = vmatprep.subr.bf16.mxu1 %v1743_v29  ;;  %v1917_v29 = vunpack.c.l.s8.bf16 %v692_v41  ;;  %v1942_v23 = vunpack.c.h.s8.bf16 %v692_v41  ;;  %v790_v41 = vld [vmem:[%s7354_s12 + $0x10c8] sm:$0xff] }
 0x3a8   : > { %3799 = vmatpush1.bf16.msra.mxu0 %v1740_v10  ;;  %v716_v10 = vld [vmem:[%s7354_s12 + $0xe78] sm:$0xff] }
 0x3a9   : > { %3971 = vmatpush1.bf16.msra.mxu1 %v1742_v17  ;;  %3800 = vmatprep.subr.bf16.mxu0 %v1766_v18  ;;  %v718_v17 = vld [vmem:[%s7354_s12 + $0xe88] sm:$0xff]  ;;  %v1940_v18 = vunpack.c.h.s8.bf16 %v690_v34  ;;  %v1991_v30 = vunpack.c.h.s8.bf16 %v716_v10 }
 0x3aa   : > { %3972 = vmatprep.subr.bf16.mxu1 %v1768_v25  ;;  %v1966_v25 = vunpack.c.l.s8.bf16 %v716_v10  ;;  %v1993_v53 = vunpack.c.h.s8.bf16 %v718_v17 }
 0x3ac   : > { %3801 = vmatpush1.bf16.msra.mxu0 %v1765_v35  ;;  %v1968_v35 = vunpack.c.l.s8.bf16 %v718_v17 }
 0x3ad   : > { %3973 = vmatpush1.bf16.msra.mxu1 %v1767_v38  ;;  %3802 = vmatprep.subr.bf16.mxu0 %v1791_v27  ;;  %v717_v38 = vld [vmem:[%s7354_s12 + $0xe80] sm:$0xff]  ;;  %v1965_v27 = vunpack.c.l.s8.bf16 %v715_v37 }
 0x3ae   : > { %3974 = vmatprep.subr.bf16.mxu1 %v1793_v32  ;;  %v1967_v32 = vunpack.c.l.s8.bf16 %v717_v38  ;;  %v1992_v33 = vunpack.c.h.s8.bf16 %v717_v38  ;;  %v815_v38 = vld [vmem:[%s7354_s12 + $0x1190] sm:$0xff] }
 0x3b0   : > { %3803 = vmatpush1.bf16.msra.mxu0 %v1790_v21  ;;  %v741_v21 = vld [vmem:[%s7354_s12 + $0xf40] sm:$0xff] }
 0x3b1   : > { %3975 = vmatpush1.bf16.msra.mxu1 %v1792_v40  ;;  %3804 = vmatprep.subr.bf16.mxu0 %v1816_v13  ;;  %v743_v40 = vld [vmem:[%s7354_s12 + $0xf50] sm:$0xff]  ;;  %v1990_v13 = vunpack.c.h.s8.bf16 %v715_v37  ;;  %v2041_v14 = vunpack.c.h.s8.bf16 %v741_v21 }
 0x3b2   : > { %3976 = vmatprep.subr.bf16.mxu1 %v1818_v15  ;;  %v2016_v15 = vunpack.c.l.s8.bf16 %v741_v21  ;;  %v2043_v16 = vunpack.c.h.s8.bf16 %v743_v40 }
 0x3b4   : > { %3805 = vmatpush1.bf16.msra.mxu0 %v1815_v49  ;;  %v2018_v49 = vunpack.c.l.s8.bf16 %v743_v40 }
 0x3b5   : > { %3977 = vmatpush1.bf16.msra.mxu1 %v1817_v54  ;;  %3806 = vmatprep.subr.bf16.mxu0 %v1841_v43  ;;  %v742_v54 = vld [vmem:[%s7354_s12 + $0xf48] sm:$0xff]  ;;  %v2015_v43 = vunpack.c.l.s8.bf16 %v740_v62 }
 0x3b6   : > { %3978 = vmatprep.subr.bf16.mxu1 %v1843_v9  ;;  %v2017_v9 = vunpack.c.l.s8.bf16 %v742_v54  ;;  %v2042_v2 = vunpack.c.h.s8.bf16 %v742_v54  ;;  %v840_v54 = vld [vmem:[%s7354_s12 + $0x1258] sm:$0xff] }
 0x3b8   : > { %3807 = vmatpush1.bf16.msra.mxu0 %v1840_v55  ;;  %v766_v55 = vld [vmem:[%s7354_s12 + $0x1008] sm:$0xff] }
 0x3b9   : > { %3979 = vmatpush1.bf16.msra.mxu1 %v1842_v61  ;;  %3819 = vmatprep.subr.bf16.mxu0 %v1866_v56  ;;  %v768_v61 = vld [vmem:[%s7354_s12 + $0x1018] sm:$0xff]  ;;  %v2040_v56 = vunpack.c.h.s8.bf16 %v740_v62  ;;  %v2091_v52 = vunpack.c.h.s8.bf16 %v766_v55 }
 0x3ba   : > { %3991 = vmatprep.subr.bf16.mxu1 %v1868_v58  ;;  %v2066_v58 = vunpack.c.l.s8.bf16 %v766_v55  ;;  %v2093_v31 = vunpack.c.h.s8.bf16 %v768_v61 }
 0x3bb   : > { %3809 = vmatmul.mubr.bf16.vlgmr.msra.gmra.mrb[12].mxu0 %v7468_v19 }
 0x3bc   : > { %3820 = vmatpush1.bf16.msra.mxu0 %v1865_v4  ;;  %3981 = vmatmul.mubr.bf16.vlgmr.msra.gmra.mrb[12].mxu1 %v7468_v19  ;;  %v2068_v4 = vunpack.c.l.s8.bf16 %v768_v61 }
 0x3bd   : > { %3992 = vmatpush1.bf16.msra.mxu1 %v1867_v57  ;;  %3821 = vmatprep.subr.bf16.mxu0 %v1891_v59  ;;  %v767_v57 = vld [vmem:[%s7354_s12 + $0x1010] sm:$0xff]  ;;  %v2065_v59 = vunpack.c.l.s8.bf16 %v765_v0 }
 0x3be   : > { %3993 = vmatprep.subr.bf16.mxu1 %v1893_v28  ;;  %3851 = vmatprep.mubr.bf16.mxu0 %v7484_v26  ;;  %v2067_v28 = vunpack.c.l.s8.bf16 %v767_v57  ;;  %v2092_v34 = vunpack.c.h.s8.bf16 %v767_v57  ;;  %v865_v57 = vld [vmem:[%s7354_s12 + $0x1320] sm:$0xff] }
 0x3bf   : > { %4023 = vmatprep.mubr.bf16.mxu1 %v7484_v26 }
 0x3c0   : > { %3822 = vmatpush1.bf16.msra.mxu0 %v1890_v47  ;;  %v791_v47 = vld [vmem:[%s7354_s12 + $0x10d0] sm:$0xff] }
 0x3c1   : > { %3994 = vmatpush1.bf16.msra.mxu1 %v1892_v5  ;;  %3823 = vmatprep.subr.bf16.mxu0 %v1916_v48  ;;  %v793_v5 = vld [vmem:[%s7354_s12 + $0x10e0] sm:$0xff]  ;;  %v2090_v48 = vunpack.c.h.s8.bf16 %v765_v0  ;;  %v2141_v10 = vunpack.c.h.s8.bf16 %v791_v47 }
 0x3c2   : > { %3995 = vmatprep.subr.bf16.mxu1 %v1918_v39  ;;  %v2116_v39 = vunpack.c.l.s8.bf16 %v791_v47  ;;  %v2143_v17 = vunpack.c.h.s8.bf16 %v793_v5 }
 0x3c4   : > { %3824 = vmatpush1.bf16.msra.mxu0 %v1915_v42  ;;  %v2118_v42 = vunpack.c.l.s8.bf16 %v793_v5 }
 0x3c5   : > { %3996 = vmatpush1.bf16.msra.mxu1 %v1917_v29  ;;  %3825 = vmatprep.subr.bf16.mxu0 %v1941_v60  ;;  %v792_v29 = vld [vmem:[%s7354_s12 + $0x10d8] sm:$0xff]  ;;  %v2115_v60 = vunpack.c.l.s8.bf16 %v790_v41 }
 0x3c6   : > { %3997 = vmatprep.subr.bf16.mxu1 %v1943_v6  ;;  %v2117_v6 = vunpack.c.l.s8.bf16 %v792_v29  ;;  %v2142_v37 = vunpack.c.h.s8.bf16 %v792_v29  ;;  %v890_v29 = vld [vmem:[%s7354_s12 + $0x13e8] sm:$0xff] }
 0x3c8   : > { %3826 = vmatpush1.bf16.msra.mxu0 %v1940_v18  ;;  %v816_v18 = vld [vmem:[%s7354_s12 + $0x1198] sm:$0xff] }
 0x3c9   : > { %3998 = vmatpush1.bf16.msra.mxu1 %v1942_v23  ;;  %3827 = vmatprep.subr.bf16.mxu0 %v1966_v25  ;;  %v818_v23 = vld [vmem:[%s7354_s12 + $0x11a8] sm:$0xff]  ;;  %v2140_v25 = vunpack.c.h.s8.bf16 %v790_v41  ;;  %v2191_v21 = vunpack.c.h.s8.bf16 %v816_v18 }
 0x3ca   : > { %3999 = vmatprep.subr.bf16.mxu1 %v1968_v35  ;;  %v2166_v35 = vunpack.c.l.s8.bf16 %v816_v18  ;;  %v2193_v40 = vunpack.c.h.s8.bf16 %v818_v23 }
 0x3cc   : > { %3828 = vmatpush1.bf16.msra.mxu0 %v1965_v27  ;;  %v2168_v27 = vunpack.c.l.s8.bf16 %v818_v23 }
 0x3cd   : > { %4000 = vmatpush1.bf16.msra.mxu1 %v1967_v32  ;;  %3829 = vmatprep.subr.bf16.mxu0 %v1991_v30  ;;  %v817_v32 = vld [vmem:[%s7354_s12 + $0x11a0] sm:$0xff]  ;;  %v2165_v30 = vunpack.c.l.s8.bf16 %v815_v38 }
 0x3ce   : > { %4001 = vmatprep.subr.bf16.mxu1 %v1993_v53  ;;  %v2167_v53 = vunpack.c.l.s8.bf16 %v817_v32  ;;  %v2192_v62 = vunpack.c.h.s8.bf16 %v817_v32  ;;  %v915_v32 = vld [vmem:[%s7354_s12 + $0x14b0] sm:$0xff] }
 0x3d0   : > { %3830 = vmatpush1.bf16.msra.mxu0 %v1990_v13  ;;  %v841_v13 = vld [vmem:[%s7354_s12 + $0x1260] sm:$0xff] }
 0x3d1   : > { %4002 = vmatpush1.bf16.msra.mxu1 %v1992_v33  ;;  %3831 = vmatprep.subr.bf16.mxu0 %v2016_v15  ;;  %v843_v33 = vld [vmem:[%s7354_s12 + $0x1270] sm:$0xff]  ;;  %v2190_v15 = vunpack.c.h.s8.bf16 %v815_v38  ;;  %v2241_v55 = vunpack.c.h.s8.bf16 %v841_v13 }
 0x3d2   : > { %4003 = vmatprep.subr.bf16.mxu1 %v2018_v49  ;;  %v2216_v49 = vunpack.c.l.s8.bf16 %v841_v13  ;;  %v2243_v61 = vunpack.c.h.s8.bf16 %v843_v33 }
 0x3d4   : > { %3832 = vmatpush1.bf16.msra.mxu0 %v2015_v43  ;;  %v2218_v43 = vunpack.c.l.s8.bf16 %v843_v33 }
 0x3d5   : > { %4004 = vmatpush1.bf16.msra.mxu1 %v2017_v9  ;;  %3833 = vmatprep.subr.bf16.mxu0 %v2041_v14  ;;  %v842_v9 = vld [vmem:[%s7354_s12 + $0x1268] sm:$0xff]  ;;  %v2215_v14 = vunpack.c.l.s8.bf16 %v840_v54 }
 0x3d6   : > { %4005 = vmatprep.subr.bf16.mxu1 %v2043_v16  ;;  %v2217_v16 = vunpack.c.l.s8.bf16 %v842_v9  ;;  %v2242_v0 = vunpack.c.h.s8.bf16 %v842_v9  ;;  %v940_v9 = vld [vmem:[%s7354_s12 + $0x1578] sm:$0xff] }
 0x3d8   : > { %3834 = vmatpush1.bf16.msra.mxu0 %v2040_v56  ;;  %v866_v56 = vld [vmem:[%s7354_s12 + $0x1328] sm:$0xff] }
 0x3d9   : > { %4006 = vmatpush1.bf16.msra.mxu1 %v2042_v2  ;;  %3835 = vmatprep.subr.bf16.mxu0 %v2066_v58  ;;  %v868_v2 = vld [vmem:[%s7354_s12 + $0x1338] sm:$0xff]  ;;  %v2240_v58 = vunpack.c.h.s8.bf16 %v840_v54  ;;  %v2291_v47 = vunpack.c.h.s8.bf16 %v866_v56 }
 0x3da   : > { %4007 = vmatprep.subr.bf16.mxu1 %v2068_v4  ;;  %v2266_v4 = vunpack.c.l.s8.bf16 %v866_v56  ;;  %v2293_v5 = vunpack.c.h.s8.bf16 %v868_v2 }
 0x3dc   : > { %3836 = vmatpush1.bf16.msra.mxu0 %v2065_v59  ;;  %v2268_v59 = vunpack.c.l.s8.bf16 %v868_v2 }
 0x3dd   : > { %4008 = vmatpush1.bf16.msra.mxu1 %v2067_v28  ;;  %3837 = vmatprep.subr.bf16.mxu0 %v2091_v52  ;;  %v867_v28 = vld [vmem:[%s7354_s12 + $0x1330] sm:$0xff]  ;;  %v2265_v52 = vunpack.c.l.s8.bf16 %v865_v57 }
 0x3de   : > { %4009 = vmatprep.subr.bf16.mxu1 %v2093_v31  ;;  %v2267_v31 = vunpack.c.l.s8.bf16 %v867_v28  ;;  %v2292_v41 = vunpack.c.h.s8.bf16 %v867_v28 }
 0x3e0   : > { %3838 = vmatpush1.bf16.msra.mxu0 %v2090_v48  ;;  %v891_v48 = vld [vmem:[%s7354_s12 + $0x13f0] sm:$0xff] }
 0x3e1   : > { %4010 = vmatpush1.bf16.msra.mxu1 %v2092_v34  ;;  %3839 = vmatprep.subr.bf16.mxu0 %v2116_v39  ;;  %v893_v34 = vld [vmem:[%s7354_s12 + $0x1400] sm:$0xff]  ;;  %v2290_v39 = vunpack.c.h.s8.bf16 %v865_v57  ;;  %v2341_v18 = vunpack.c.h.s8.bf16 %v891_v48 }
 0x3e2   : > { %4011 = vmatprep.subr.bf16.mxu1 %v2118_v42  ;;  %v2316_v42 = vunpack.c.l.s8.bf16 %v891_v48  ;;  %v2343_v23 = vunpack.c.h.s8.bf16 %v893_v34 }
 0x3e4   : > { %3840 = vmatpush1.bf16.msra.mxu0 %v2115_v60  ;;  %v2318_v60 = vunpack.c.l.s8.bf16 %v893_v34 }
 0x3e5   : > { %4012 = vmatpush1.bf16.msra.mxu1 %v2117_v6  ;;  %3841 = vmatprep.subr.bf16.mxu0 %v2141_v10  ;;  %v892_v6 = vld [vmem:[%s7354_s12 + $0x13f8] sm:$0xff]  ;;  %v2315_v10 = vunpack.c.l.s8.bf16 %v890_v29 }
 0x3e6   : > { %4013 = vmatprep.subr.bf16.mxu1 %v2143_v17  ;;  %v2317_v17 = vunpack.c.l.s8.bf16 %v892_v6  ;;  %v2342_v38 = vunpack.c.h.s8.bf16 %v892_v6 }
 0x3e8   : > { %3842 = vmatpush1.bf16.msra.mxu0 %v2140_v25  ;;  %v916_v25 = vld [vmem:[%s7354_s12 + $0x14b8] sm:$0xff] }
 0x3e9   : > { %4014 = vmatpush1.bf16.msra.mxu1 %v2142_v37  ;;  %3843 = vmatprep.subr.bf16.mxu0 %v2166_v35  ;;  %v918_v37 = vld [vmem:[%s7354_s12 + $0x14c8] sm:$0xff]  ;;  %v2340_v35 = vunpack.c.h.s8.bf16 %v890_v29  ;;  %v2391_v13 = vunpack.c.h.s8.bf16 %v916_v25  ;;  %v968_v29 = vld [vmem:[%s7354_s12 + $0x1658] sm:$0xff] }
 0x3ea   : > { %4015 = vmatprep.subr.bf16.mxu1 %v2168_v27  ;;  %v2366_v27 = vunpack.c.l.s8.bf16 %v916_v25  ;;  %v2393_v33 = vunpack.c.h.s8.bf16 %v918_v37 }
 0x3ec   : > { %3844 = vmatpush1.bf16.msra.mxu0 %v2165_v30  ;;  %v2368_v30 = vunpack.c.l.s8.bf16 %v918_v37  ;;  %v965_v37 = vld [vmem:[%s7354_s12 + $0x1640] sm:$0xff] }
 0x3ed   : > { %4016 = vmatpush1.bf16.msra.mxu1 %v2167_v53  ;;  %3845 = vmatprep.subr.bf16.mxu0 %v2191_v21  ;;  %v917_v53 = vld [vmem:[%s7354_s12 + $0x14c0] sm:$0xff]  ;;  %v2365_v21 = vunpack.c.l.s8.bf16 %v915_v32 }
 0x3ee   : > { %4017 = vmatprep.subr.bf16.mxu1 %v2193_v40  ;;  %v2367_v40 = vunpack.c.l.s8.bf16 %v917_v53  ;;  %v2392_v54 = vunpack.c.h.s8.bf16 %v917_v53 }
 0x3f0   : > { %3846 = vmatpush1.bf16.msra.mxu0 %v2190_v15  ;;  %v941_v15 = vld [vmem:[%s7354_s12 + $0x1580] sm:$0xff] }
 0x3f1   : > { %4018 = vmatpush1.bf16.msra.mxu1 %v2192_v62  ;;  %3847 = vmatprep.subr.bf16.mxu0 %v2216_v49  ;;  %v943_v62 = vld [vmem:[%s7354_s12 + $0x1590] sm:$0xff]  ;;  %v2390_v49 = vunpack.c.h.s8.bf16 %v915_v32 }
 0x3f2   : > { %4019 = vmatprep.subr.bf16.mxu1 %v2218_v43  ;;  %v2416_v43 = vunpack.c.l.s8.bf16 %v941_v15  ;;  %v2443_v34 = vunpack.c.h.s8.bf16 %v943_v62  ;;  %v967_v32 = vld [vmem:[%s7354_s12 + $0x1650] sm:$0xff] }
 0x3f4   : > { %3848 = vmatpush1.bf16.msra.mxu0 %v2215_v14 }
 0x3f5   : > { %4020 = vmatpush1.bf16.msra.mxu1 %v2217_v16  ;;  %3849 = vmatprep.subr.bf16.mxu0 %v2241_v55  ;;  %v2418_v55 = vunpack.c.l.s8.bf16 %v943_v62  ;;  %v2467_v62 = vunpack.c.l.s8.bf16 %v967_v32 }
 0x3f6   : > { %4021 = vmatprep.subr.bf16.mxu1 %v2243_v61  ;;  %v942_v61 = vld [vmem:[%s7354_s12 + $0x1588] sm:$0xff] }
 0x3f8   : > { %3850 = vmatpush1.bf16.msra.mxu0 %v2240_v58 }
 0x3f9   : > { %4022 = vmatpush1.bf16.msra.mxu1 %v2242_v0  ;;  %3862 = vmatprep.subr.bf16.mxu0 %v2266_v4  ;;  %v2415_v4 = vunpack.c.l.s8.bf16 %v940_v9 }
 0x3fa   : > { %4034 = vmatprep.subr.bf16.mxu1 %v2268_v59 }
 0x3fb   : > { %3852 = vmatmul.mubr.bf16.vlgmr.msra.gmra.mrb[12].mxu0 %v7522_v1 }
 0x3fc   : > { %3863 = vmatpush1.bf16.msra.mxu0 %v2265_v52  ;;  %4024 = vmatmul.mubr.bf16.vlgmr.msra.gmra.mrb[12].mxu1 %v7522_v1 }
 0x3fd   : > { %4035 = vmatpush1.bf16.msra.mxu1 %v2267_v31  ;;  %3864 = vmatprep.subr.bf16.mxu0 %v2291_v47  ;;  %v2417_v31 = vunpack.c.l.s8.bf16 %v942_v61  ;;  %v2441_v47 = vunpack.c.h.s8.bf16 %v941_v15 }
 0x3fe   : > { %4036 = vmatprep.subr.bf16.mxu1 %v2293_v5  ;;  %3894 = vmatprep.mubr.bf16.mxu0 %v7538_v8 }
 0x3ff   : > { %4066 = vmatprep.mubr.bf16.mxu1 %v7538_v8 }
 0x400   : > { %3865 = vmatpush1.bf16.msra.mxu0 %v2290_v39  ;;  %v966_v39 = vld [vmem:[%s7354_s12 + $0x1648] sm:$0xff] }
 0x401   : > { %4037 = vmatpush1.bf16.msra.mxu1 %v2292_v41  ;;  %3866 = vmatprep.subr.bf16.mxu0 %v2316_v42  ;;  %v2466_v25 = vunpack.c.l.s8.bf16 %v966_v39 }
 0x402   : > { %4038 = vmatprep.subr.bf16.mxu1 %v2318_v60 }
 0x404   : > { %3867 = vmatpush1.bf16.msra.mxu0 %v2315_v10  ;;  %v2440_v10 = vunpack.c.h.s8.bf16 %v940_v9  ;;  %v2493_v9 = vunpack.c.h.s8.bf16 %v968_v29 }
 0x405   : > { %4039 = vmatpush1.bf16.msra.mxu1 %v2317_v17  ;;  %3868 = vmatprep.subr.bf16.mxu0 %v2341_v18 }
 0x406   : > { %4040 = vmatprep.subr.bf16.mxu1 %v2343_v23  ;;  %v2442_v23 = vunpack.c.h.s8.bf16 %v942_v61 }
 0x408   : > { %3869 = vmatpush1.bf16.msra.mxu0 %v2340_v35 }
 0x409   : > { %4041 = vmatpush1.bf16.msra.mxu1 %v2342_v38  ;;  %3870 = vmatprep.subr.bf16.mxu0 %v2366_v27  ;;  %v2468_v27 = vunpack.c.l.s8.bf16 %v968_v29 }
 0x40a   : > { %4042 = vmatprep.subr.bf16.mxu1 %v2368_v30 }
 0x40c   : > { %3871 = vmatpush1.bf16.msra.mxu0 %v2365_v21 }
 0x40d   : > { %4043 = vmatpush1.bf16.msra.mxu1 %v2367_v40  ;;  %3872 = vmatprep.subr.bf16.mxu0 %v2391_v13  ;;  %v2465_v13 = vunpack.c.l.s8.bf16 %v965_v37 }
 0x40e   : > { %v8275_v14 = vpop.f32.mrb[8].mxu0  ;;  %v8277_v16 = vpop.f32.mrb[8].mxu1  ;;  %4044 = vmatprep.subr.bf16.mxu1 %v2393_v33 }
 0x40f   : > { %v8280_v56 = vpop.f32.mrb[9].mxu0  ;;  %v8282_v2 = vpop.f32.mrb[9].mxu1 }
 0x410   : > { %v3556_v58 = vpop.f32.mrb[10].mxu0  ;;  %v3728_v0 = vpop.f32.mrb[10].mxu1  ;;  %3873 = vmatpush1.bf16.msra.mxu0 %v2390_v49  ;;  %v2491_v49 = vunpack.c.h.s8.bf16 %v966_v39 }
 0x411   : > { %v4990_v57 = vadd.f32 %v3556_v58, %v8275_v14  ;;  %v5004_v59 = vadd.f32 %v3728_v0, %v8277_v16  ;;  %4045 = vmatpush1.bf16.msra.mxu1 %v2392_v54  ;;  %v3558_v28 = vpop.f32.mrb[11].mxu0  ;;  %v3730_v52 = vpop.f32.mrb[11].mxu1  ;;  %3874 = vmatprep.subr.bf16.mxu0 %v2416_v43  ;;  %v993_v0 = vld [vmem:[%s7354_s12 + $0x1720] sm:$0xff] }
 0x412   : > { %v4997_v5 = vadd.f32 %v3558_v28, %v8280_v56  ;;  %v5011_v48 = vadd.f32 %v3730_v52, %v8282_v2  ;;  %4046 = vmatprep.subr.bf16.mxu1 %v2418_v55  ;;  %v991_v55 = vld [vmem:[%s7354_s12 + $0x1710] sm:$0xff]  ;;  %v2518_v39 = vunpack.c.l.s8.bf16 %v993_v0 }
 0x413   : > { %v4991_v41 = vrot.slane %v4990_v57, 4  ;;  %v5005_v42 = vrot.slane %v5004_v59, 4 }
 0x414   : > { %v4998_v60 = vrot.slane %v4997_v5, 4  ;;  %v5012_v6 = vrot.slane %v5011_v48, 4  ;;  %3875 = vmatpush1.bf16.msra.mxu0 %v2415_v4 }
 0x415   : > { %v4992_v17 = vadd.f32 %v4991_v41, %v4990_v57  ;;  %v5006_v18 = vadd.f32 %v5005_v42, %v5004_v59  ;;  %4047 = vmatpush1.bf16.msra.mxu1 %v2417_v31  ;;  %3876 = vmatprep.subr.bf16.mxu0 %v2441_v47  ;;  %v2490_v59 = vunpack.c.h.s8.bf16 %v965_v37  ;;  %v2492_v31 = vunpack.c.h.s8.bf16 %v967_v32  ;;  %v992_v41 = vld [vmem:[%s7354_s12 + $0x1718] sm:$0xff] }
 0x416   : > { %v4999_v35 = vadd.f32 %v4998_v60, %v4997_v5  ;;  %v5013_v38 = vadd.f32 %v5012_v6, %v5011_v48  ;;  %4048 = vmatprep.subr.bf16.mxu1 %v2443_v34  ;;  %v2516_v47 = vunpack.c.l.s8.bf16 %v991_v55  ;;  %v990_v5 = vld [vmem:[%s7354_s12 + $0x1708] sm:$0xff] }
 0x417   : > { %v4993_v30 = vrot.slane %v4992_v17, 2  ;;  %v5007_v53 = vrot.slane %v5006_v18, 2 }
 0x418   : > { %v5000_v21 = vrot.slane %v4999_v35, 2  ;;  %v5014_v40 = vrot.slane %v5013_v38, 2  ;;  %3877 = vmatpush1.bf16.msra.mxu0 %v2440_v10  ;;  %v2515_v10 = vunpack.c.l.s8.bf16 %v990_v5 }
 0x419   : > { %v4994_v33 = vadd.f32 %v4993_v30, %v4992_v17  ;;  %v5008_v15 = vadd.f32 %v5007_v53, %v5006_v18  ;;  %4049 = vmatpush1.bf16.msra.mxu1 %v2442_v23  ;;  %3878 = vmatprep.subr.bf16.mxu0 %v2466_v25  ;;  %v2517_v23 = vunpack.c.l.s8.bf16 %v992_v41  ;;  %v2541_v25 = vunpack.c.h.s8.bf16 %v991_v55 }
 0x41a   : > { %v5001_v54 = vadd.f32 %v5000_v21, %v4999_v35  ;;  %v5015_v43 = vadd.f32 %v5014_v40, %v5013_v38  ;;  %4050 = vmatprep.subr.bf16.mxu1 %v2468_v27  ;;  %v2543_v38 = vunpack.c.h.s8.bf16 %v993_v0  ;;  %v1016_v27 = vld [vmem:[%s7354_s12 + $0x17d8] sm:$0xff]  ;;  %v2540_v53 = vunpack.c.h.s8.bf16 %v990_v5  ;;  %v1018_v21 = vld [vmem:[%s7354_s12 + $0x17e8] sm:$0xff]  ;;  %v1017_v0 = vld [vmem:[%s7354_s12 + $0x17e0] sm:$0xff] }
 0x41b   : > { %v4995_v61 = vrot.slane %v4994_v33, 1  ;;  %v5009_v58 = vrot.slane %v5008_v15, 1  ;;  %v2567_v5 = vunpack.c.l.s8.bf16 %v1017_v0 }
 0x41c   : > { %v5002_v4 = vrot.slane %v5001_v54, 1  ;;  %v5016_v57 = vrot.slane %v5015_v43, 1  ;;  %3879 = vmatpush1.bf16.msra.mxu0 %v2465_v13 }
 0x41d   : > { %v4996_v28 = vadd.f32 %v4995_v61, %v4994_v33  ;;  %v5010_v52 = vadd.f32 %v5009_v58, %v5008_v15  ;;  %4051 = vmatpush1.bf16.msra.mxu1 %v2467_v62  ;;  %3880 = vmatprep.subr.bf16.mxu0 %v2491_v49  ;;  %v2568_v58 = vunpack.c.l.s8.bf16 %v1018_v21 }
 0x41e   : > { %v5003_v48 = vadd.f32 %v5002_v4, %v5001_v54  ;;  %v5017_v34 = vadd.f32 %v5016_v57, %v5015_v43  ;;  %4052 = vmatprep.subr.bf16.mxu1 %v2493_v9  ;;  %v2542_v54 = vunpack.c.h.s8.bf16 %v992_v41  ;;  %v2566_v43 = vunpack.c.l.s8.bf16 %v1016_v27  ;;  %v1015_v9 = vld [vmem:[%s7354_s12 + $0x17d0] sm:$0xff] }
 0x41f   : > { %v8296_v42 = vmul.f32 0.25, %v4996_v28  ;;  %v8298_v29 = vmul.f32 0.25, %v5010_v52  ;;  %v2565_v52 = vunpack.c.l.s8.bf16 %v1015_v9  ;;  %v2593_v41 = vunpack.c.h.s8.bf16 %v1018_v21 }
 0x420   : > { %v8300_v60 = vmul.f32 0.25, %v5003_v48  ;;  %v8302_v6 = vmul.f32 0.25, %v5017_v34  ;;  %3881 = vmatpush1.bf16.msra.mxu0 %v2490_v59  ;;  %v2591_v48 = vunpack.c.h.s8.bf16 %v1016_v27 }
 0x421   : > { %v5142_v17 = vsub.f32 %v8275_v14, %v8296_v42  ;;  %v5144_v18 = vsub.f32 %v8277_v16, %v8298_v29  ;;  %4053 = vmatpush1.bf16.msra.mxu1 %v2492_v31  ;;  %3882 = vmatprep.subr.bf16.mxu0 %v2516_v47 }
 0x422   : > { %v5143_v37 = vsub.f32 %v8280_v56, %v8300_v60  ;;  %v5145_v35 = vsub.f32 %v8282_v2, %v8302_v6  ;;  %4054 = vmatprep.subr.bf16.mxu1 %v2518_v39 }
 0x423   : > { %v5192_v32 = vsel %vm4932_vm0, %v5142_v17, 0.0  ;;  %v5194_v30 = vsel %vm4932_vm0, %v5144_v18, 0.0 }
 0x424   : > { %v5242_v40 = vmul.f32 %v5192_v32, %v5192_v32  ;;  %v5244_v13 = vmul.f32 %v5194_v30, %v5194_v30  ;;  %v5193_v33 = vsel %vm4932_vm0, %v5143_v37, 0.0  ;;  %v5195_v15 = vsel %vm4932_vm0, %v5145_v35, 0.0  ;;  %3883 = vmatpush1.bf16.msra.mxu0 %v2515_v10  ;;  %v1041_v10 = vld [vmem:[%s7354_s12 + $0x18a0] sm:$0xff] }
 0x425   : > { %v5243_v62 = vmul.f32 %v5193_v33, %v5193_v33  ;;  %v5245_v49 = vmul.f32 %v5195_v15, %v5195_v15  ;;  %4055 = vmatpush1.bf16.msra.mxu1 %v2517_v23  ;;  %3884 = vmatprep.subr.bf16.mxu0 %v2541_v25  ;;  %v1043_v23 = vld [vmem:[%s7354_s12 + $0x18b0] sm:$0xff]  ;;  %v2590_v35 = vunpack.c.h.s8.bf16 %v1015_v9  ;;  %v2592_v30 = vunpack.c.h.s8.bf16 %v1017_v0  ;;  %v1042_v33 = vld [vmem:[%s7354_s12 + $0x18a8] sm:$0xff] }
 0x426   : > { %v5341_v55 = vrot.slane %v5242_v40, 4  ;;  %v5355_v61 = vrot.slane %v5244_v13, 4  ;;  %4056 = vmatprep.subr.bf16.mxu1 %v2543_v38  ;;  %v2616_v27 = vunpack.c.l.s8.bf16 %v1041_v10  ;;  %v2618_v21 = vunpack.c.l.s8.bf16 %v1043_v23 }
 0x427   : > { %v5348_v4 = vrot.slane %v5243_v62, 4  ;;  %v5362_v57 = vrot.slane %v5245_v49, 4 }
 0x428   : > { %v5342_v59 = vadd.f32 %v5341_v55, %v5242_v40  ;;  %v5356_v28 = vadd.f32 %v5355_v61, %v5244_v13  ;;  %3885 = vmatpush1.bf16.msra.mxu0 %v2540_v53  ;;  %v1040_v53 = vld [vmem:[%s7354_s12 + $0x1898] sm:$0xff]  ;;  %v2617_v61 = vunpack.c.l.s8.bf16 %v1042_v33 }
 0x429   : > { %v5349_v31 = vadd.f32 %v5348_v4, %v5243_v62  ;;  %v5363_v47 = vadd.f32 %v5362_v57, %v5245_v49  ;;  %4057 = vmatpush1.bf16.msra.mxu1 %v2542_v54  ;;  %3886 = vmatprep.subr.bf16.mxu0 %v2566_v43  ;;  %v2615_v43 = vunpack.c.l.s8.bf16 %v1040_v53  ;;  %v2643_v57 = vunpack.c.h.s8.bf16 %v1043_v23  ;;  %v271_v23 = vld [vmem:[%s7354_s12 + $0x90] sm:$0xff] }
 0x42a   : > { %v5343_v34 = vrot.slane %v5342_v59, 2  ;;  %v5357_v39 = vrot.slane %v5356_v28, 2  ;;  %4058 = vmatprep.subr.bf16.mxu1 %v2568_v58  ;;  %v2641_v58 = vunpack.c.h.s8.bf16 %v1041_v10 }
 0x42b   : > { %v5350_v17 = vrot.slane %v5349_v31, 2  ;;  %v5364_v18 = vrot.slane %v5363_v47, 2 }
 0x42c   : > { %v5344_v25 = vadd.f32 %v5343_v34, %v5342_v59  ;;  %v5358_v37 = vadd.f32 %v5357_v39, %v5356_v28  ;;  %3887 = vmatpush1.bf16.msra.mxu0 %v2565_v52  ;;  %v270_v59 = vld [vmem:[%s7354_s12 + $0x88] sm:$0xff] }
 0x42d   : > { %v5351_v38 = vadd.f32 %v5350_v17, %v5349_v31  ;;  %v5365_v32 = vadd.f32 %v5364_v18, %v5363_v47  ;;  %4059 = vmatpush1.bf16.msra.mxu1 %v2567_v5  ;;  %3888 = vmatprep.subr.bf16.mxu0 %v2591_v48  ;;  %v272_v31 = vld [vmem:[%s7354_s12 + $0x98] sm:$0xff]  ;;  %v2640_v48 = vunpack.c.h.s8.bf16 %v1040_v53  ;;  %v1070_v10 = vunpack.c.l.s8.bf16 %v270_v59  ;;  %v269_v17 = vld [vmem:[%s7354_s12 + $0x80] sm:$0xff] }
 0x42e   : > { %v5345_v40 = vrot.slane %v5344_v25, 1  ;;  %v5359_v13 = vrot.slane %v5358_v37, 1  ;;  %4060 = vmatprep.subr.bf16.mxu1 %v2593_v41  ;;  %v2642_v41 = vunpack.c.h.s8.bf16 %v1042_v33  ;;  %v1072_v18 = vunpack.c.l.s8.bf16 %v272_v31  ;;  %v296_v33 = vld [vmem:[%s7354_s12 + $0x158] sm:$0xff] }
 0x42f   : > { %v5352_v15 = vrot.slane %v5351_v38, 1  ;;  %v5366_v62 = vrot.slane %v5365_v32, 1  ;;  %v1096_v53 = vunpack.c.h.s8.bf16 %v271_v23 }
 0x430   : > { %v5346_v49 = vadd.f32 %v5345_v40, %v5344_v25  ;;  %v5360_v54 = vadd.f32 %v5359_v13, %v5358_v37  ;;  %3889 = vmatpush1.bf16.msra.mxu0 %v2590_v35  ;;  %v1069_v25 = vunpack.c.l.s8.bf16 %v269_v17  ;;  %v1071_v37 = vunpack.c.l.s8.bf16 %v271_v23  ;;  %v294_v13 = vld [vmem:[%s7354_s12 + $0x148] sm:$0xff]  ;;  %v345_v23 = vld [vmem:[%s7354_s12 + $0x2e0] sm:$0xff] }
 0x431   : > { %v5353_v9 = vadd.f32 %v5352_v15, %v5351_v38  ;;  %v5367_v55 = vadd.f32 %v5366_v62, %v5365_v32  ;;  %4061 = vmatpush1.bf16.msra.mxu1 %v2592_v30  ;;  %3890 = vmatprep.subr.bf16.mxu0 %v2616_v27  ;;  %v1095_v35 = vunpack.c.h.s8.bf16 %v270_v59  ;;  %v1097_v38 = vunpack.c.h.s8.bf16 %v272_v31  ;;  %v295_v32 = vld [vmem:[%s7354_s12 + $0x150] sm:$0xff]  ;;  %v297_v30 = vld [vmem:[%s7354_s12 + $0x160] sm:$0xff] }
 0x432   : > { %v5467_v0 = vmul.f32 0.25, %v5346_v49  ;;  %v5469_v4 = vmul.f32 0.25, %v5360_v54  ;;  %4062 = vmatprep.subr.bf16.mxu1 %v2618_v21  ;;  %v1094_v27 = vunpack.c.h.s8.bf16 %v269_v17  ;;  %v1120_v40 = vunpack.c.l.s8.bf16 %v295_v32 }
 0x433   : > { %v5468_v28 = vmul.f32 0.25, %v5353_v9  ;;  %v5470_v52 = vmul.f32 0.25, %v5367_v55  ;;  %v1122_v21 = vunpack.c.l.s8.bf16 %v297_v30  ;;  %v1119_v62 = vunpack.c.l.s8.bf16 %v294_v13 }
 0x434   : > { %v5496_v47 = vadd.f32 1e-05, %v5467_v0  ;;  %v5498_v5 = vadd.f32 1e-05, %v5469_v4  ;;  %3891 = vmatpush1.bf16.msra.mxu0 %v2615_v43  ;;  %v1121_v54 = vunpack.c.l.s8.bf16 %v296_v33  ;;  %v1145_v43 = vunpack.c.h.s8.bf16 %v295_v32  ;;  %v322_v4 = vld [vmem:[%s7354_s12 + $0x228] sm:$0xff]  ;;  %v344_v32 = vld [vmem:[%s7354_s12 + $0x2d8] sm:$0xff] }
 0x435   : > { %v5497_v34 = vadd.f32 1e-05, %v5468_v28  ;;  %v5499_v39 = vadd.f32 1e-05, %v5470_v52  ;;  %4063 = vmatpush1.bf16.msra.mxu1 %v2617_v61  ;;  %3892 = vmatprep.subr.bf16.mxu0 %v2641_v58  ;;  %v1147_v55 = vunpack.c.h.s8.bf16 %v297_v30  ;;  %v320_v61 = vld [vmem:[%s7354_s12 + $0x218] sm:$0xff]  ;;  %v1144_v59 = vunpack.c.h.s8.bf16 %v294_v13 }
 0x436   : > { %7130 = vrsqrt.f32 %v5496_v47  ;;  %4064 = vmatprep.subr.bf16.mxu1 %v2643_v57  ;;  %v1146_v52 = vunpack.c.h.s8.bf16 %v296_v33  ;;  %v1170_v31 = vunpack.c.l.s8.bf16 %v320_v61  ;;  %v319_v47 = vld [vmem:[%s7354_s12 + $0x210] sm:$0xff]  ;;  %v1195_v17 = vunpack.c.h.s8.bf16 %v320_v61  ;;  %v370_v33 = vld [vmem:[%s7354_s12 + $0x3a8] sm:$0xff] }
 0x437   : > { %7132 = vrsqrt.f32 %v5498_v5  ;;  %v1245_v13 = vunpack.c.h.s8.bf16 %v345_v23 }
 0x438   : > { %7134 = vrsqrt.f32 %v5497_v34  ;;  %3893 = vmatpush1.bf16.msra.mxu0 %v2640_v48  ;;  %v1172_v48 = vunpack.c.l.s8.bf16 %v322_v4  ;;  %v321_v34 = vld [vmem:[%s7354_s12 + $0x220] sm:$0xff] }
 0x439   : > { %7136 = vrsqrt.f32 %v5499_v39  ;;  %4065 = vmatpush1.bf16.msra.mxu1 %v2642_v41  ;;  %4077 = vmatprep.subr.bf16.mxu0 %v1070_v10  ;;  %v1169_v41 = vunpack.c.l.s8.bf16 %v319_v47  ;;  %v1171_v10 = vunpack.c.l.s8.bf16 %v321_v34 }
 0x43a   : > { %4249 = vmatprep.subr.bf16.mxu1 %v1072_v18  ;;  %v1197_v18 = vunpack.c.h.s8.bf16 %v322_v4 }
 0x43b   : > { %3895 = vmatmul.mubr.bf16.vlgmr.msra.gmra.mrb[12].mxu0 %v7576_v50 }
 0x43c   : > { %4067 = vmatmul.mubr.bf16.vlgmr.msra.gmra.mrb[12].mxu1 %v7576_v50  ;;  %4078 = vmatpush1.bf16.msra.mxu0 %v1069_v25  ;;  %v347_v25 = vld [vmem:[%s7354_s12 + $0x2f0] sm:$0xff] }
 0x43d   : > { %4250 = vmatpush1.bf16.msra.mxu1 %v1071_v37  ;;  %4079 = vmatprep.subr.bf16.mxu0 %v1095_v35  ;;  %v1194_v37 = vunpack.c.h.s8.bf16 %v319_v47  ;;  %v1196_v35 = vunpack.c.h.s8.bf16 %v321_v34  ;;  %v1222_v30 = vunpack.c.l.s8.bf16 %v347_v25 }
 0x43e   : > { %4251 = vmatprep.subr.bf16.mxu1 %v1097_v38  ;;  %4109 = vmatprep.mubr.bf16.mxu0 %v7384_v36  ;;  %v1220_v38 = vunpack.c.l.s8.bf16 %v345_v23 }
 0x43f   : > { %4281 = vmatprep.mubr.bf16.mxu1 %v7384_v36 }
 0x440   : > { %v7131_v15 = vpop.eup %7130  ;;  %4080 = vmatpush1.bf16.msra.mxu0 %v1094_v27  ;;  %v346_v27 = vld [vmem:[%s7354_s12 + $0x2e8] sm:$0xff] }
 0x441   : > { %v7133_v49 = vpop.eup %7132  ;;  %4252 = vmatpush1.bf16.msra.mxu1 %v1096_v53  ;;  %4081 = vmatprep.subr.bf16.mxu0 %v1120_v40  ;;  %v1219_v53 = vunpack.c.l.s8.bf16 %v344_v32  ;;  %v1221_v40 = vunpack.c.l.s8.bf16 %v346_v27 }
 0x442   : > { %v7135_v9 = vpop.eup %7134  ;;  %4253 = vmatprep.subr.bf16.mxu1 %v1122_v21  ;;  %v1247_v21 = vunpack.c.h.s8.bf16 %v347_v25  ;;  %v420_v25 = vld [vmem:[%s7354_s12 + $0x538] sm:$0xff] }
 0x443   : > { %v7137_v58 = vpop.eup %7136  ;;  %v5612_v0 = vcombine.low %v7131_v15, %v7135_v9  ;;  %v372_v15 = vld [vmem:[%s7354_s12 + $0x3b8] sm:$0xff] }
 0x444   : > { %v5613_v57 = vcombine.low %v7133_v49, %v7137_v58  ;;  %4082 = vmatpush1.bf16.msra.mxu0 %v1119_v62  ;;  %v1244_v62 = vunpack.c.h.s8.bf16 %v344_v32  ;;  %v1246_v49 = vunpack.c.h.s8.bf16 %v346_v27  ;;  %v1272_v9 = vunpack.c.l.s8.bf16 %v372_v15 }
 0x445   : > { %v8343_v28 = vrot.slane %v5612_v0, %v7770_v3  ;;  %4254 = vmatpush1.bf16.msra.mxu1 %v1121_v54  ;;  %4083 = vmatprep.subr.bf16.mxu0 %v1145_v43  ;;  %v1270_v54 = vunpack.c.l.s8.bf16 %v370_v33  ;;  %v369_v43 = vld [vmem:[%s7354_s12 + $0x3a0] sm:$0xff]  ;;  %v1295_v0 = vunpack.c.h.s8.bf16 %v370_v33  ;;  %v1297_v4 = vunpack.c.h.s8.bf16 %v372_v15 }
 0x446   : > { %v8347_v5 = vrot.slane %v5613_v57, %v7770_v3  ;;  %4255 = vmatprep.subr.bf16.mxu1 %v1147_v55  ;;  %v371_v55 = vld [vmem:[%s7354_s12 + $0x3b0] sm:$0xff]  ;;  %v1269_v61 = vunpack.c.l.s8.bf16 %v369_v43  ;;  %v1370_v32 = vunpack.c.l.s8.bf16 %v420_v25  ;;  %v445_v15 = vld [vmem:[%s7354_s12 + $0x600] sm:$0xff] }
 0x447   : > { %v1271_v58 = vunpack.c.l.s8.bf16 %v371_v55  ;;  %v395_v57 = vld [vmem:[%s7354_s12 + $0x470] sm:$0xff] }
 0x448   : > { %4084 = vmatpush1.bf16.msra.mxu0 %v1144_v59  ;;  %v397_v59 = vld [vmem:[%s7354_s12 + $0x480] sm:$0xff]  ;;  %v1320_v47 = vunpack.c.l.s8.bf16 %v395_v57 }
 0x449   : > { %4256 = vmatpush1.bf16.msra.mxu1 %v1146_v52  ;;  %4085 = vmatprep.subr.bf16.mxu0 %v1170_v31  ;;  %v1294_v52 = vunpack.c.h.s8.bf16 %v369_v43  ;;  %v1296_v31 = vunpack.c.h.s8.bf16 %v371_v55  ;;  %v1322_v34 = vunpack.c.l.s8.bf16 %v397_v59  ;;  %v1347_v23 = vunpack.c.h.s8.bf16 %v397_v59  ;;  %v470_v59 = vld [vmem:[%s7354_s12 + $0x6c8] sm:$0xff] }
 0x44a   : > { %4257 = vmatprep.subr.bf16.mxu1 %v1172_v48  ;;  %v394_v48 = vld [vmem:[%s7354_s12 + $0x468] sm:$0xff]  ;;  %v1420_v43 = vunpack.c.l.s8.bf16 %v445_v15 }
 0x44c   : > { %4086 = vmatpush1.bf16.msra.mxu0 %v1169_v41  ;;  %v396_v41 = vld [vmem:[%s7354_s12 + $0x478] sm:$0xff] }
 0x44d   : > { %4258 = vmatpush1.bf16.msra.mxu1 %v1171_v10  ;;  %4087 = vmatprep.subr.bf16.mxu0 %v1195_v17  ;;  %v1319_v10 = vunpack.c.l.s8.bf16 %v394_v48  ;;  %v1321_v17 = vunpack.c.l.s8.bf16 %v396_v41 }
 0x44e   : > { %4259 = vmatprep.subr.bf16.mxu1 %v1197_v18  ;;  %v1345_v18 = vunpack.c.h.s8.bf16 %v395_v57 }
 0x450   : > { %4088 = vmatpush1.bf16.msra.mxu0 %v1194_v37  ;;  %v422_v37 = vld [vmem:[%s7354_s12 + $0x548] sm:$0xff] }
 0x451   : > { %4260 = vmatpush1.bf16.msra.mxu1 %v1196_v35  ;;  %4089 = vmatprep.subr.bf16.mxu0 %v1220_v38  ;;  %v1344_v35 = vunpack.c.h.s8.bf16 %v394_v48  ;;  %v1346_v38 = vunpack.c.h.s8.bf16 %v396_v41  ;;  %v1372_v27 = vunpack.c.l.s8.bf16 %v422_v37  ;;  %v1397_v33 = vunpack.c.h.s8.bf16 %v422_v37  ;;  %v495_v37 = vld [vmem:[%s7354_s12 + $0x790] sm:$0xff] }
 0x452   : > { %4261 = vmatprep.subr.bf16.mxu1 %v1222_v30  ;;  %v419_v30 = vld [vmem:[%s7354_s12 + $0x530] sm:$0xff]  ;;  %v1470_v48 = vunpack.c.l.s8.bf16 %v470_v59 }
 0x454   : > { %4090 = vmatpush1.bf16.msra.mxu0 %v1219_v53  ;;  %v421_v53 = vld [vmem:[%s7354_s12 + $0x540] sm:$0xff] }
 0x455   : > { %4262 = vmatpush1.bf16.msra.mxu1 %v1221_v40  ;;  %4091 = vmatprep.subr.bf16.mxu0 %v1245_v13  ;;  %v1369_v40 = vunpack.c.l.s8.bf16 %v419_v30  ;;  %v1371_v13 = vunpack.c.l.s8.bf16 %v421_v53 }
 0x456   : > { %4263 = vmatprep.subr.bf16.mxu1 %v1247_v21  ;;  %v1395_v21 = vunpack.c.h.s8.bf16 %v420_v25 }
 0x458   : > { %4092 = vmatpush1.bf16.msra.mxu0 %v1244_v62  ;;  %v447_v62 = vld [vmem:[%s7354_s12 + $0x610] sm:$0xff] }
 0x459   : > { %4264 = vmatpush1.bf16.msra.mxu1 %v1246_v49  ;;  %4093 = vmatprep.subr.bf16.mxu0 %v1270_v54  ;;  %v1394_v49 = vunpack.c.h.s8.bf16 %v419_v30  ;;  %v1396_v54 = vunpack.c.h.s8.bf16 %v421_v53  ;;  %v1422_v55 = vunpack.c.l.s8.bf16 %v447_v62  ;;  %v1447_v57 = vunpack.c.h.s8.bf16 %v447_v62  ;;  %v520_v62 = vld [vmem:[%s7354_s12 + $0x858] sm:$0xff] }
 0x45a   : > { %4265 = vmatprep.subr.bf16.mxu1 %v1272_v9  ;;  %v444_v9 = vld [vmem:[%s7354_s12 + $0x5f8] sm:$0xff]  ;;  %v1520_v30 = vunpack.c.l.s8.bf16 %v495_v37 }
 0x45c   : > { %4094 = vmatpush1.bf16.msra.mxu0 %v1269_v61  ;;  %v446_v61 = vld [vmem:[%s7354_s12 + $0x608] sm:$0xff] }
 0x45d   : > { %4266 = vmatpush1.bf16.msra.mxu1 %v1271_v58  ;;  %4095 = vmatprep.subr.bf16.mxu0 %v1295_v0  ;;  %v1419_v58 = vunpack.c.l.s8.bf16 %v444_v9  ;;  %v1421_v0 = vunpack.c.l.s8.bf16 %v446_v61 }
 0x45e   : > { %4267 = vmatprep.subr.bf16.mxu1 %v1297_v4  ;;  %v1445_v4 = vunpack.c.h.s8.bf16 %v445_v15 }
 0x460   : > { %4096 = vmatpush1.bf16.msra.mxu0 %v1294_v52  ;;  %v472_v52 = vld [vmem:[%s7354_s12 + $0x6d8] sm:$0xff] }
 0x461   : > { %4268 = vmatpush1.bf16.msra.mxu1 %v1296_v31  ;;  %4097 = vmatprep.subr.bf16.mxu0 %v1320_v47  ;;  %v1444_v31 = vunpack.c.h.s8.bf16 %v444_v9  ;;  %v1446_v47 = vunpack.c.h.s8.bf16 %v446_v61  ;;  %v1472_v41 = vunpack.c.l.s8.bf16 %v472_v52  ;;  %v1497_v25 = vunpack.c.h.s8.bf16 %v472_v52  ;;  %v545_v52 = vld [vmem:[%s7354_s12 + $0x920] sm:$0xff] }
 0x462   : > { %4269 = vmatprep.subr.bf16.mxu1 %v1322_v34  ;;  %v469_v34 = vld [vmem:[%s7354_s12 + $0x6c0] sm:$0xff]  ;;  %v1570_v9 = vunpack.c.l.s8.bf16 %v520_v62 }
 0x464   : > { %4098 = vmatpush1.bf16.msra.mxu0 %v1319_v10  ;;  %v471_v10 = vld [vmem:[%s7354_s12 + $0x6d0] sm:$0xff] }
 0x465   : > { %4270 = vmatpush1.bf16.msra.mxu1 %v1321_v17  ;;  %4099 = vmatprep.subr.bf16.mxu0 %v1345_v18  ;;  %v1469_v17 = vunpack.c.l.s8.bf16 %v469_v34  ;;  %v1471_v18 = vunpack.c.l.s8.bf16 %v471_v10 }
 0x466   : > { %4271 = vmatprep.subr.bf16.mxu1 %v1347_v23  ;;  %v1495_v23 = vunpack.c.h.s8.bf16 %v470_v59 }
 0x468   : > { %4100 = vmatpush1.bf16.msra.mxu0 %v1344_v35  ;;  %v497_v35 = vld [vmem:[%s7354_s12 + $0x7a0] sm:$0xff] }
 0x469   : > { %4272 = vmatpush1.bf16.msra.mxu1 %v1346_v38  ;;  %4101 = vmatprep.subr.bf16.mxu0 %v1370_v32  ;;  %v1494_v38 = vunpack.c.h.s8.bf16 %v469_v34  ;;  %v1496_v32 = vunpack.c.h.s8.bf16 %v471_v10  ;;  %v1522_v53 = vunpack.c.l.s8.bf16 %v497_v35  ;;  %v1547_v15 = vunpack.c.h.s8.bf16 %v497_v35  ;;  %v570_v35 = vld [vmem:[%s7354_s12 + $0x9e8] sm:$0xff] }
 0x46a   : > { %4273 = vmatprep.subr.bf16.mxu1 %v1372_v27  ;;  %v494_v27 = vld [vmem:[%s7354_s12 + $0x788] sm:$0xff]  ;;  %v1620_v34 = vunpack.c.l.s8.bf16 %v545_v52 }
 0x46c   : > { %4102 = vmatpush1.bf16.msra.mxu0 %v1369_v40  ;;  %v496_v40 = vld [vmem:[%s7354_s12 + $0x798] sm:$0xff] }
 0x46d   : > { %4274 = vmatpush1.bf16.msra.mxu1 %v1371_v13  ;;  %4103 = vmatprep.subr.bf16.mxu0 %v1395_v21  ;;  %v1519_v13 = vunpack.c.l.s8.bf16 %v494_v27  ;;  %v1521_v21 = vunpack.c.l.s8.bf16 %v496_v40 }
 0x46e   : > { %4275 = vmatprep.subr.bf16.mxu1 %v1397_v33  ;;  %v1545_v33 = vunpack.c.h.s8.bf16 %v495_v37 }
 0x470   : > { %4104 = vmatpush1.bf16.msra.mxu0 %v1394_v49  ;;  %v522_v49 = vld [vmem:[%s7354_s12 + $0x868] sm:$0xff] }
 0x471   : > { %4276 = vmatpush1.bf16.msra.mxu1 %v1396_v54  ;;  %4105 = vmatprep.subr.bf16.mxu0 %v1420_v43  ;;  %v1544_v54 = vunpack.c.h.s8.bf16 %v494_v27  ;;  %v1546_v43 = vunpack.c.h.s8.bf16 %v496_v40  ;;  %v1572_v61 = vunpack.c.l.s8.bf16 %v522_v49  ;;  %v1597_v59 = vunpack.c.h.s8.bf16 %v522_v49  ;;  %v595_v49 = vld [vmem:[%s7354_s12 + $0xab0] sm:$0xff] }
 0x472   : > { %4277 = vmatprep.subr.bf16.mxu1 %v1422_v55  ;;  %v519_v55 = vld [vmem:[%s7354_s12 + $0x850] sm:$0xff]  ;;  %v1670_v27 = vunpack.c.l.s8.bf16 %v570_v35 }
 0x474   : > { %4106 = vmatpush1.bf16.msra.mxu0 %v1419_v58  ;;  %v521_v58 = vld [vmem:[%s7354_s12 + $0x860] sm:$0xff] }
 0x475   : > { %4278 = vmatpush1.bf16.msra.mxu1 %v1421_v0  ;;  %4107 = vmatprep.subr.bf16.mxu0 %v1445_v4  ;;  %v1569_v0 = vunpack.c.l.s8.bf16 %v519_v55  ;;  %v1571_v4 = vunpack.c.l.s8.bf16 %v521_v58 }
 0x476   : > { %4279 = vmatprep.subr.bf16.mxu1 %v1447_v57  ;;  %v1595_v57 = vunpack.c.h.s8.bf16 %v520_v62 }
 0x478   : > { %4108 = vmatpush1.bf16.msra.mxu0 %v1444_v31  ;;  %v547_v31 = vld [vmem:[%s7354_s12 + $0x930] sm:$0xff] }
 0x479   : > { %4280 = vmatpush1.bf16.msra.mxu1 %v1446_v47  ;;  %4120 = vmatprep.subr.bf16.mxu0 %v1470_v48  ;;  %v1594_v47 = vunpack.c.h.s8.bf16 %v519_v55  ;;  %v1596_v48 = vunpack.c.h.s8.bf16 %v521_v58  ;;  %v1622_v10 = vunpack.c.l.s8.bf16 %v547_v31  ;;  %v1647_v37 = vunpack.c.h.s8.bf16 %v547_v31  ;;  %v620_v31 = vld [vmem:[%s7354_s12 + $0xb78] sm:$0xff] }
 0x47a   : > { %4292 = vmatprep.subr.bf16.mxu1 %v1472_v41  ;;  %v544_v41 = vld [vmem:[%s7354_s12 + $0x918] sm:$0xff]  ;;  %v1720_v55 = vunpack.c.l.s8.bf16 %v595_v49 }
 0x47b   : > { %4110 = vmatmul.mubr.bf16.vlgmr.msra.gmra.mrb[16].mxu0 %v7414_v44 }
 0x47c   : > { %4121 = vmatpush1.bf16.msra.mxu0 %v1469_v17  ;;  %4282 = vmatmul.mubr.bf16.vlgmr.msra.gmra.mrb[16].mxu1 %v7414_v44  ;;  %v546_v17 = vld [vmem:[%s7354_s12 + $0x928] sm:$0xff] }
 0x47d   : > { %4293 = vmatpush1.bf16.msra.mxu1 %v1471_v18  ;;  %4122 = vmatprep.subr.bf16.mxu0 %v1495_v23  ;;  %v1619_v18 = vunpack.c.l.s8.bf16 %v544_v41  ;;  %v1621_v23 = vunpack.c.l.s8.bf16 %v546_v17 }
 0x47e   : > { %4294 = vmatprep.subr.bf16.mxu1 %v1497_v25  ;;  %4152 = vmatprep.mubr.bf16.mxu0 %v7430_v51  ;;  %v1645_v25 = vunpack.c.h.s8.bf16 %v545_v52 }
 0x47f   : > { %4324 = vmatprep.mubr.bf16.mxu1 %v7430_v51 }
 0x480   : > { %4123 = vmatpush1.bf16.msra.mxu0 %v1494_v38  ;;  %v572_v38 = vld [vmem:[%s7354_s12 + $0x9f8] sm:$0xff] }
 0x481   : > { %4295 = vmatpush1.bf16.msra.mxu1 %v1496_v32  ;;  %4124 = vmatprep.subr.bf16.mxu0 %v1520_v30  ;;  %v1644_v32 = vunpack.c.h.s8.bf16 %v544_v41  ;;  %v1646_v30 = vunpack.c.h.s8.bf16 %v546_v17  ;;  %v1672_v40 = vunpack.c.l.s8.bf16 %v572_v38  ;;  %v1697_v62 = vunpack.c.h.s8.bf16 %v572_v38  ;;  %v645_v38 = vld [vmem:[%s7354_s12 + $0xc40] sm:$0xff] }
 0x482   : > { %4296 = vmatprep.subr.bf16.mxu1 %v1522_v53  ;;  %v569_v53 = vld [vmem:[%s7354_s12 + $0x9e0] sm:$0xff]  ;;  %v1770_v41 = vunpack.c.l.s8.bf16 %v620_v31 }
 0x484   : > { %4125 = vmatpush1.bf16.msra.mxu0 %v1519_v13  ;;  %v571_v13 = vld [vmem:[%s7354_s12 + $0x9f0] sm:$0xff] }
 0x485   : > { %4297 = vmatpush1.bf16.msra.mxu1 %v1521_v21  ;;  %4126 = vmatprep.subr.bf16.mxu0 %v1545_v33  ;;  %v1669_v21 = vunpack.c.l.s8.bf16 %v569_v53  ;;  %v1671_v33 = vunpack.c.l.s8.bf16 %v571_v13 }
 0x486   : > { %4298 = vmatprep.subr.bf16.mxu1 %v1547_v15  ;;  %v1695_v15 = vunpack.c.h.s8.bf16 %v570_v35 }
 0x488   : > { %4127 = vmatpush1.bf16.msra.mxu0 %v1544_v54  ;;  %v597_v54 = vld [vmem:[%s7354_s12 + $0xac0] sm:$0xff] }
 0x489   : > { %4299 = vmatpush1.bf16.msra.mxu1 %v1546_v43  ;;  %4128 = vmatprep.subr.bf16.mxu0 %v1570_v9  ;;  %v1694_v43 = vunpack.c.h.s8.bf16 %v569_v53  ;;  %v1696_v9 = vunpack.c.h.s8.bf16 %v571_v13  ;;  %v1722_v58 = vunpack.c.l.s8.bf16 %v597_v54  ;;  %v1747_v52 = vunpack.c.h.s8.bf16 %v597_v54  ;;  %v670_v54 = vld [vmem:[%s7354_s12 + $0xd08] sm:$0xff] }
 0x48a   : > { %4300 = vmatprep.subr.bf16.mxu1 %v1572_v61  ;;  %v594_v61 = vld [vmem:[%s7354_s12 + $0xaa8] sm:$0xff]  ;;  %v1820_v53 = vunpack.c.l.s8.bf16 %v645_v38 }
 0x48c   : > { %4129 = vmatpush1.bf16.msra.mxu0 %v1569_v0  ;;  %v596_v0 = vld [vmem:[%s7354_s12 + $0xab8] sm:$0xff] }
 0x48d   : > { %4301 = vmatpush1.bf16.msra.mxu1 %v1571_v4  ;;  %4130 = vmatprep.subr.bf16.mxu0 %v1595_v57  ;;  %v1719_v4 = vunpack.c.l.s8.bf16 %v594_v61  ;;  %v1721_v57 = vunpack.c.l.s8.bf16 %v596_v0 }
 0x48e   : > { %4302 = vmatprep.subr.bf16.mxu1 %v1597_v59  ;;  %v1745_v59 = vunpack.c.h.s8.bf16 %v595_v49 }
 0x490   : > { %4131 = vmatpush1.bf16.msra.mxu0 %v1594_v47  ;;  %v622_v47 = vld [vmem:[%s7354_s12 + $0xb88] sm:$0xff] }
 0x491   : > { %4303 = vmatpush1.bf16.msra.mxu1 %v1596_v48  ;;  %4132 = vmatprep.subr.bf16.mxu0 %v1620_v34  ;;  %v1744_v48 = vunpack.c.h.s8.bf16 %v594_v61  ;;  %v1746_v34 = vunpack.c.h.s8.bf16 %v596_v0  ;;  %v1772_v17 = vunpack.c.l.s8.bf16 %v622_v47  ;;  %v1797_v35 = vunpack.c.h.s8.bf16 %v622_v47  ;;  %v695_v47 = vld [vmem:[%s7354_s12 + $0xdd0] sm:$0xff] }
 0x492   : > { %4304 = vmatprep.subr.bf16.mxu1 %v1622_v10  ;;  %v619_v10 = vld [vmem:[%s7354_s12 + $0xb70] sm:$0xff]  ;;  %v1870_v61 = vunpack.c.l.s8.bf16 %v670_v54 }
 0x494   : > { %4133 = vmatpush1.bf16.msra.mxu0 %v1619_v18  ;;  %v621_v18 = vld [vmem:[%s7354_s12 + $0xb80] sm:$0xff] }
 0x495   : > { %4305 = vmatpush1.bf16.msra.mxu1 %v1621_v23  ;;  %4134 = vmatprep.subr.bf16.mxu0 %v1645_v25  ;;  %v1769_v23 = vunpack.c.l.s8.bf16 %v619_v10  ;;  %v1771_v25 = vunpack.c.l.s8.bf16 %v621_v18 }
 0x496   : > { %4306 = vmatprep.subr.bf16.mxu1 %v1647_v37  ;;  %v1795_v37 = vunpack.c.h.s8.bf16 %v620_v31 }
 0x498   : > { %4135 = vmatpush1.bf16.msra.mxu0 %v1644_v32  ;;  %v647_v32 = vld [vmem:[%s7354_s12 + $0xc50] sm:$0xff] }
 0x499   : > { %4307 = vmatpush1.bf16.msra.mxu1 %v1646_v30  ;;  %4136 = vmatprep.subr.bf16.mxu0 %v1670_v27  ;;  %v1794_v30 = vunpack.c.h.s8.bf16 %v619_v10  ;;  %v1796_v27 = vunpack.c.h.s8.bf16 %v621_v18  ;;  %v1822_v13 = vunpack.c.l.s8.bf16 %v647_v32  ;;  %v1847_v49 = vunpack.c.h.s8.bf16 %v647_v32  ;;  %v720_v32 = vld [vmem:[%s7354_s12 + $0xe98] sm:$0xff] }
 0x49a   : > { %4308 = vmatprep.subr.bf16.mxu1 %v1672_v40  ;;  %v644_v40 = vld [vmem:[%s7354_s12 + $0xc38] sm:$0xff]  ;;  %v1920_v10 = vunpack.c.l.s8.bf16 %v695_v47 }
 0x49c   : > { %4137 = vmatpush1.bf16.msra.mxu0 %v1669_v21  ;;  %v646_v21 = vld [vmem:[%s7354_s12 + $0xc48] sm:$0xff] }
 0x49d   : > { %4309 = vmatpush1.bf16.msra.mxu1 %v1671_v33  ;;  %4138 = vmatprep.subr.bf16.mxu0 %v1695_v15  ;;  %v1819_v33 = vunpack.c.l.s8.bf16 %v644_v40  ;;  %v1821_v15 = vunpack.c.l.s8.bf16 %v646_v21 }
 0x49e   : > { %4310 = vmatprep.subr.bf16.mxu1 %v1697_v62  ;;  %v1845_v62 = vunpack.c.h.s8.bf16 %v645_v38 }
 0x4a0   : > { %4139 = vmatpush1.bf16.msra.mxu0 %v1694_v43  ;;  %v672_v43 = vld [vmem:[%s7354_s12 + $0xd18] sm:$0xff] }
 0x4a1   : > { %4311 = vmatpush1.bf16.msra.mxu1 %v1696_v9  ;;  %4140 = vmatprep.subr.bf16.mxu0 %v1720_v55  ;;  %v1844_v9 = vunpack.c.h.s8.bf16 %v644_v40  ;;  %v1846_v55 = vunpack.c.h.s8.bf16 %v646_v21  ;;  %v1872_v0 = vunpack.c.l.s8.bf16 %v672_v43  ;;  %v1897_v31 = vunpack.c.h.s8.bf16 %v672_v43  ;;  %v745_v43 = vld [vmem:[%s7354_s12 + $0xf60] sm:$0xff] }
 0x4a2   : > { %4312 = vmatprep.subr.bf16.mxu1 %v1722_v58  ;;  %v669_v58 = vld [vmem:[%s7354_s12 + $0xd00] sm:$0xff]  ;;  %v1970_v40 = vunpack.c.l.s8.bf16 %v720_v32 }
 0x4a4   : > { %4141 = vmatpush1.bf16.msra.mxu0 %v1719_v4  ;;  %v671_v4 = vld [vmem:[%s7354_s12 + $0xd10] sm:$0xff] }
 0x4a5   : > { %4313 = vmatpush1.bf16.msra.mxu1 %v1721_v57  ;;  %4142 = vmatprep.subr.bf16.mxu0 %v1745_v59  ;;  %v1869_v57 = vunpack.c.l.s8.bf16 %v669_v58  ;;  %v1871_v59 = vunpack.c.l.s8.bf16 %v671_v4 }
 0x4a6   : > { %4314 = vmatprep.subr.bf16.mxu1 %v1747_v52  ;;  %v1895_v52 = vunpack.c.h.s8.bf16 %v670_v54 }
 0x4a8   : > { %4143 = vmatpush1.bf16.msra.mxu0 %v1744_v48  ;;  %v697_v48 = vld [vmem:[%s7354_s12 + $0xde0] sm:$0xff] }
 0x4a9   : > { %4315 = vmatpush1.bf16.msra.mxu1 %v1746_v34  ;;  %4144 = vmatprep.subr.bf16.mxu0 %v1770_v41  ;;  %v1894_v34 = vunpack.c.h.s8.bf16 %v669_v58  ;;  %v1896_v41 = vunpack.c.h.s8.bf16 %v671_v4  ;;  %v1922_v18 = vunpack.c.l.s8.bf16 %v697_v48  ;;  %v1947_v38 = vunpack.c.h.s8.bf16 %v697_v48  ;;  %v770_v48 = vld [vmem:[%s7354_s12 + $0x1028] sm:$0xff] }
 0x4aa   : > { %4316 = vmatprep.subr.bf16.mxu1 %v1772_v17  ;;  %v694_v17 = vld [vmem:[%s7354_s12 + $0xdc8] sm:$0xff]  ;;  %v2020_v58 = vunpack.c.l.s8.bf16 %v745_v43 }
 0x4ac   : > { %4145 = vmatpush1.bf16.msra.mxu0 %v1769_v23  ;;  %v696_v23 = vld [vmem:[%s7354_s12 + $0xdd8] sm:$0xff] }
 0x4ad   : > { %4317 = vmatpush1.bf16.msra.mxu1 %v1771_v25  ;;  %4146 = vmatprep.subr.bf16.mxu0 %v1795_v37  ;;  %v1919_v25 = vunpack.c.l.s8.bf16 %v694_v17  ;;  %v1921_v37 = vunpack.c.l.s8.bf16 %v696_v23 }
 0x4ae   : > { %4318 = vmatprep.subr.bf16.mxu1 %v1797_v35  ;;  %v1945_v35 = vunpack.c.h.s8.bf16 %v695_v47 }
 0x4b0   : > { %4147 = vmatpush1.bf16.msra.mxu0 %v1794_v30  ;;  %v722_v30 = vld [vmem:[%s7354_s12 + $0xea8] sm:$0xff] }
 0x4b1   : > { %4319 = vmatpush1.bf16.msra.mxu1 %v1796_v27  ;;  %4148 = vmatprep.subr.bf16.mxu0 %v1820_v53  ;;  %v1944_v27 = vunpack.c.h.s8.bf16 %v694_v17  ;;  %v1946_v53 = vunpack.c.h.s8.bf16 %v696_v23  ;;  %v1972_v21 = vunpack.c.l.s8.bf16 %v722_v30  ;;  %v1997_v54 = vunpack.c.h.s8.bf16 %v722_v30  ;;  %v795_v30 = vld [vmem:[%s7354_s12 + $0x10f0] sm:$0xff] }
 0x4b2   : > { %4320 = vmatprep.subr.bf16.mxu1 %v1822_v13  ;;  %v719_v13 = vld [vmem:[%s7354_s12 + $0xe90] sm:$0xff]  ;;  %v2070_v17 = vunpack.c.l.s8.bf16 %v770_v48 }
 0x4b4   : > { %4149 = vmatpush1.bf16.msra.mxu0 %v1819_v33  ;;  %v721_v33 = vld [vmem:[%s7354_s12 + $0xea0] sm:$0xff] }
 0x4b5   : > { %4321 = vmatpush1.bf16.msra.mxu1 %v1821_v15  ;;  %4150 = vmatprep.subr.bf16.mxu0 %v1845_v62  ;;  %v1969_v15 = vunpack.c.l.s8.bf16 %v719_v13  ;;  %v1971_v62 = vunpack.c.l.s8.bf16 %v721_v33 }
 0x4b6   : > { %4322 = vmatprep.subr.bf16.mxu1 %v1847_v49  ;;  %v1995_v49 = vunpack.c.h.s8.bf16 %v720_v32 }
 0x4b8   : > { %4151 = vmatpush1.bf16.msra.mxu0 %v1844_v9  ;;  %v747_v9 = vld [vmem:[%s7354_s12 + $0xf70] sm:$0xff] }
 0x4b9   : > { %4323 = vmatpush1.bf16.msra.mxu1 %v1846_v55  ;;  %4163 = vmatprep.subr.bf16.mxu0 %v1870_v61  ;;  %v1994_v55 = vunpack.c.h.s8.bf16 %v719_v13  ;;  %v1996_v61 = vunpack.c.h.s8.bf16 %v721_v33  ;;  %v2022_v4 = vunpack.c.l.s8.bf16 %v747_v9  ;;  %v2047_v47 = vunpack.c.h.s8.bf16 %v747_v9  ;;  %v820_v9 = vld [vmem:[%s7354_s12 + $0x11b8] sm:$0xff] }
 0x4ba   : > { %4335 = vmatprep.subr.bf16.mxu1 %v1872_v0  ;;  %v744_v0 = vld [vmem:[%s7354_s12 + $0xf58] sm:$0xff]  ;;  %v2120_v13 = vunpack.c.l.s8.bf16 %v795_v30 }
 0x4bb   : > { %4153 = vmatmul.mubr.bf16.vlgmr.msra.gmra.mrb[16].mxu0 %v7468_v19 }
 0x4bc   : > { %4164 = vmatpush1.bf16.msra.mxu0 %v1869_v57  ;;  %4325 = vmatmul.mubr.bf16.vlgmr.msra.gmra.mrb[16].mxu1 %v7468_v19  ;;  %v746_v57 = vld [vmem:[%s7354_s12 + $0xf68] sm:$0xff] }
 0x4bd   : > { %4336 = vmatpush1.bf16.msra.mxu1 %v1871_v59  ;;  %4165 = vmatprep.subr.bf16.mxu0 %v1895_v52  ;;  %v2019_v59 = vunpack.c.l.s8.bf16 %v744_v0  ;;  %v2021_v52 = vunpack.c.l.s8.bf16 %v746_v57 }
 0x4be   : > { %4337 = vmatprep.subr.bf16.mxu1 %v1897_v31  ;;  %4195 = vmatprep.mubr.bf16.mxu0 %v7484_v26  ;;  %v2045_v31 = vunpack.c.h.s8.bf16 %v745_v43 }
 0x4bf   : > { %4367 = vmatprep.mubr.bf16.mxu1 %v7484_v26 }
 0x4c0   : > { %4166 = vmatpush1.bf16.msra.mxu0 %v1894_v34  ;;  %v772_v34 = vld [vmem:[%s7354_s12 + $0x1038] sm:$0xff] }
 0x4c1   : > { %4338 = vmatpush1.bf16.msra.mxu1 %v1896_v41  ;;  %4167 = vmatprep.subr.bf16.mxu0 %v1920_v10  ;;  %v2044_v41 = vunpack.c.h.s8.bf16 %v744_v0  ;;  %v2046_v10 = vunpack.c.h.s8.bf16 %v746_v57  ;;  %v2072_v23 = vunpack.c.l.s8.bf16 %v772_v34  ;;  %v2097_v32 = vunpack.c.h.s8.bf16 %v772_v34  ;;  %v845_v34 = vld [vmem:[%s7354_s12 + $0x1280] sm:$0xff] }
 0x4c2   : > { %4339 = vmatprep.subr.bf16.mxu1 %v1922_v18  ;;  %v769_v18 = vld [vmem:[%s7354_s12 + $0x1020] sm:$0xff]  ;;  %v2170_v0 = vunpack.c.l.s8.bf16 %v820_v9 }
 0x4c4   : > { %4168 = vmatpush1.bf16.msra.mxu0 %v1919_v25  ;;  %v771_v25 = vld [vmem:[%s7354_s12 + $0x1030] sm:$0xff] }
 0x4c5   : > { %4340 = vmatpush1.bf16.msra.mxu1 %v1921_v37  ;;  %4169 = vmatprep.subr.bf16.mxu0 %v1945_v35  ;;  %v2069_v37 = vunpack.c.l.s8.bf16 %v769_v18  ;;  %v2071_v35 = vunpack.c.l.s8.bf16 %v771_v25 }
 0x4c6   : > { %4341 = vmatprep.subr.bf16.mxu1 %v1947_v38  ;;  %v2095_v38 = vunpack.c.h.s8.bf16 %v770_v48 }
 0x4c8   : > { %4170 = vmatpush1.bf16.msra.mxu0 %v1944_v27  ;;  %v797_v27 = vld [vmem:[%s7354_s12 + $0x1100] sm:$0xff] }
 0x4c9   : > { %4342 = vmatpush1.bf16.msra.mxu1 %v1946_v53  ;;  %4171 = vmatprep.subr.bf16.mxu0 %v1970_v40  ;;  %v2094_v53 = vunpack.c.h.s8.bf16 %v769_v18  ;;  %v2096_v40 = vunpack.c.h.s8.bf16 %v771_v25  ;;  %v2122_v33 = vunpack.c.l.s8.bf16 %v797_v27  ;;  %v2147_v43 = vunpack.c.h.s8.bf16 %v797_v27  ;;  %v870_v27 = vld [vmem:[%s7354_s12 + $0x1348] sm:$0xff] }
 0x4ca   : > { %4343 = vmatprep.subr.bf16.mxu1 %v1972_v21  ;;  %v794_v21 = vld [vmem:[%s7354_s12 + $0x10e8] sm:$0xff]  ;;  %v2220_v18 = vunpack.c.l.s8.bf16 %v845_v34 }
 0x4cc   : > { %4172 = vmatpush1.bf16.msra.mxu0 %v1969_v15  ;;  %v796_v15 = vld [vmem:[%s7354_s12 + $0x10f8] sm:$0xff] }
 0x4cd   : > { %4344 = vmatpush1.bf16.msra.mxu1 %v1971_v62  ;;  %4173 = vmatprep.subr.bf16.mxu0 %v1995_v49  ;;  %v2119_v62 = vunpack.c.l.s8.bf16 %v794_v21  ;;  %v2121_v49 = vunpack.c.l.s8.bf16 %v796_v15 }
 0x4ce   : > { %4345 = vmatprep.subr.bf16.mxu1 %v1997_v54  ;;  %v2145_v54 = vunpack.c.h.s8.bf16 %v795_v30 }
 0x4d0   : > { %4174 = vmatpush1.bf16.msra.mxu0 %v1994_v55  ;;  %v822_v55 = vld [vmem:[%s7354_s12 + $0x11c8] sm:$0xff] }
 0x4d1   : > { %4346 = vmatpush1.bf16.msra.mxu1 %v1996_v61  ;;  %4175 = vmatprep.subr.bf16.mxu0 %v2020_v58  ;;  %v2144_v61 = vunpack.c.h.s8.bf16 %v794_v21  ;;  %v2146_v58 = vunpack.c.h.s8.bf16 %v796_v15  ;;  %v2172_v57 = vunpack.c.l.s8.bf16 %v822_v55  ;;  %v2197_v48 = vunpack.c.h.s8.bf16 %v822_v55  ;;  %v895_v55 = vld [vmem:[%s7354_s12 + $0x1410] sm:$0xff] }
 0x4d2   : > { %4347 = vmatprep.subr.bf16.mxu1 %v2022_v4  ;;  %v819_v4 = vld [vmem:[%s7354_s12 + $0x11b0] sm:$0xff]  ;;  %v2270_v21 = vunpack.c.l.s8.bf16 %v870_v27 }
 0x4d4   : > { %4176 = vmatpush1.bf16.msra.mxu0 %v2019_v59  ;;  %v821_v59 = vld [vmem:[%s7354_s12 + $0x11c0] sm:$0xff] }
 0x4d5   : > { %4348 = vmatpush1.bf16.msra.mxu1 %v2021_v52  ;;  %4177 = vmatprep.subr.bf16.mxu0 %v2045_v31  ;;  %v2169_v52 = vunpack.c.l.s8.bf16 %v819_v4  ;;  %v2171_v31 = vunpack.c.l.s8.bf16 %v821_v59 }
 0x4d6   : > { %4349 = vmatprep.subr.bf16.mxu1 %v2047_v47  ;;  %v2195_v47 = vunpack.c.h.s8.bf16 %v820_v9 }
 0x4d8   : > { %4178 = vmatpush1.bf16.msra.mxu0 %v2044_v41  ;;  %v847_v41 = vld [vmem:[%s7354_s12 + $0x1290] sm:$0xff] }
 0x4d9   : > { %4350 = vmatpush1.bf16.msra.mxu1 %v2046_v10  ;;  %4179 = vmatprep.subr.bf16.mxu0 %v2070_v17  ;;  %v2194_v10 = vunpack.c.h.s8.bf16 %v819_v4  ;;  %v2196_v17 = vunpack.c.h.s8.bf16 %v821_v59  ;;  %v2222_v25 = vunpack.c.l.s8.bf16 %v847_v41  ;;  %v2247_v30 = vunpack.c.h.s8.bf16 %v847_v41  ;;  %v920_v41 = vld [vmem:[%s7354_s12 + $0x14d8] sm:$0xff] }
 0x4da   : > { %4351 = vmatprep.subr.bf16.mxu1 %v2072_v23  ;;  %v844_v23 = vld [vmem:[%s7354_s12 + $0x1278] sm:$0xff]  ;;  %v2320_v4 = vunpack.c.l.s8.bf16 %v895_v55 }
 0x4dc   : > { %4180 = vmatpush1.bf16.msra.mxu0 %v2069_v37  ;;  %v846_v37 = vld [vmem:[%s7354_s12 + $0x1288] sm:$0xff] }
 0x4dd   : > { %4352 = vmatpush1.bf16.msra.mxu1 %v2071_v35  ;;  %4181 = vmatprep.subr.bf16.mxu0 %v2095_v38  ;;  %v2219_v35 = vunpack.c.l.s8.bf16 %v844_v23  ;;  %v2221_v38 = vunpack.c.l.s8.bf16 %v846_v37 }
 0x4de   : > { %4353 = vmatprep.subr.bf16.mxu1 %v2097_v32  ;;  %v2245_v32 = vunpack.c.h.s8.bf16 %v845_v34 }
 0x4e0   : > { %4182 = vmatpush1.bf16.msra.mxu0 %v2094_v53  ;;  %v872_v53 = vld [vmem:[%s7354_s12 + $0x1358] sm:$0xff] }
 0x4e1   : > { %4354 = vmatpush1.bf16.msra.mxu1 %v2096_v40  ;;  %4183 = vmatprep.subr.bf16.mxu0 %v2120_v13  ;;  %v2244_v40 = vunpack.c.h.s8.bf16 %v844_v23  ;;  %v2246_v13 = vunpack.c.h.s8.bf16 %v846_v37  ;;  %v2272_v15 = vunpack.c.l.s8.bf16 %v872_v53  ;;  %v2297_v9 = vunpack.c.h.s8.bf16 %v872_v53  ;;  %v945_v53 = vld [vmem:[%s7354_s12 + $0x15a0] sm:$0xff] }
 0x4e2   : > { %4355 = vmatprep.subr.bf16.mxu1 %v2122_v33  ;;  %v869_v33 = vld [vmem:[%s7354_s12 + $0x1340] sm:$0xff]  ;;  %v2370_v23 = vunpack.c.l.s8.bf16 %v920_v41 }
 0x4e4   : > { %4184 = vmatpush1.bf16.msra.mxu0 %v2119_v62  ;;  %v871_v62 = vld [vmem:[%s7354_s12 + $0x1350] sm:$0xff] }
 0x4e5   : > { %4356 = vmatpush1.bf16.msra.mxu1 %v2121_v49  ;;  %4185 = vmatprep.subr.bf16.mxu0 %v2145_v54  ;;  %v2269_v49 = vunpack.c.l.s8.bf16 %v869_v33  ;;  %v2271_v54 = vunpack.c.l.s8.bf16 %v871_v62 }
 0x4e6   : > { %4357 = vmatprep.subr.bf16.mxu1 %v2147_v43  ;;  %v2295_v43 = vunpack.c.h.s8.bf16 %v870_v27 }
 0x4e8   : > { %4186 = vmatpush1.bf16.msra.mxu0 %v2144_v61  ;;  %v897_v61 = vld [vmem:[%s7354_s12 + $0x1420] sm:$0xff] }
 0x4e9   : > { %4358 = vmatpush1.bf16.msra.mxu1 %v2146_v58  ;;  %4187 = vmatprep.subr.bf16.mxu0 %v2170_v0  ;;  %v2294_v58 = vunpack.c.h.s8.bf16 %v869_v33  ;;  %v2296_v0 = vunpack.c.h.s8.bf16 %v871_v62  ;;  %v2322_v59 = vunpack.c.l.s8.bf16 %v897_v61  ;;  %v2347_v34 = vunpack.c.h.s8.bf16 %v897_v61 }
 0x4ea   : > { %4359 = vmatprep.subr.bf16.mxu1 %v2172_v57  ;;  %v894_v57 = vld [vmem:[%s7354_s12 + $0x1408] sm:$0xff]  ;;  %v2420_v33 = vunpack.c.l.s8.bf16 %v945_v53 }
 0x4ec   : > { %4188 = vmatpush1.bf16.msra.mxu0 %v2169_v52  ;;  %v896_v52 = vld [vmem:[%s7354_s12 + $0x1418] sm:$0xff] }
 0x4ed   : > { %4360 = vmatpush1.bf16.msra.mxu1 %v2171_v31  ;;  %4189 = vmatprep.subr.bf16.mxu0 %v2195_v47  ;;  %v2319_v31 = vunpack.c.l.s8.bf16 %v894_v57  ;;  %v2321_v47 = vunpack.c.l.s8.bf16 %v896_v52 }
 0x4ee   : > { %4361 = vmatprep.subr.bf16.mxu1 %v2197_v48  ;;  %v2345_v48 = vunpack.c.h.s8.bf16 %v895_v55 }
 0x4f0   : > { %4190 = vmatpush1.bf16.msra.mxu0 %v2194_v10  ;;  %v922_v10 = vld [vmem:[%s7354_s12 + $0x14e8] sm:$0xff] }
 0x4f1   : > { %4362 = vmatpush1.bf16.msra.mxu1 %v2196_v17  ;;  %4191 = vmatprep.subr.bf16.mxu0 %v2220_v18  ;;  %v2344_v17 = vunpack.c.h.s8.bf16 %v894_v57  ;;  %v2346_v18 = vunpack.c.h.s8.bf16 %v896_v52  ;;  %v2372_v37 = vunpack.c.l.s8.bf16 %v922_v10  ;;  %v2397_v27 = vunpack.c.h.s8.bf16 %v922_v10 }
 0x4f2   : > { %4363 = vmatprep.subr.bf16.mxu1 %v2222_v25  ;;  %v919_v25 = vld [vmem:[%s7354_s12 + $0x14d0] sm:$0xff]  ;;  %v2445_v52 = vunpack.c.h.s8.bf16 %v945_v53 }
 0x4f4   : > { %4192 = vmatpush1.bf16.msra.mxu0 %v2219_v35  ;;  %v921_v35 = vld [vmem:[%s7354_s12 + $0x14e0] sm:$0xff] }
 0x4f5   : > { %4364 = vmatpush1.bf16.msra.mxu1 %v2221_v38  ;;  %4193 = vmatprep.subr.bf16.mxu0 %v2245_v32  ;;  %v2369_v38 = vunpack.c.l.s8.bf16 %v919_v25  ;;  %v2371_v32 = vunpack.c.l.s8.bf16 %v921_v35 }
 0x4f6   : > { %4365 = vmatprep.subr.bf16.mxu1 %v2247_v30  ;;  %v2395_v30 = vunpack.c.h.s8.bf16 %v920_v41  ;;  %v970_v41 = vld [vmem:[%s7354_s12 + $0x1668] sm:$0xff] }
 0x4f8   : > { %4194 = vmatpush1.bf16.msra.mxu0 %v2244_v40  ;;  %v947_v40 = vld [vmem:[%s7354_s12 + $0x15b0] sm:$0xff] }
 0x4f9   : > { %4366 = vmatpush1.bf16.msra.mxu1 %v2246_v13  ;;  %4206 = vmatprep.subr.bf16.mxu0 %v2270_v21  ;;  %v2394_v13 = vunpack.c.h.s8.bf16 %v919_v25  ;;  %v2396_v21 = vunpack.c.h.s8.bf16 %v921_v35 }
 0x4fa   : > { %4378 = vmatprep.subr.bf16.mxu1 %v2272_v15  ;;  %v944_v15 = vld [vmem:[%s7354_s12 + $0x1598] sm:$0xff] }
 0x4fb   : > { %4196 = vmatmul.mubr.bf16.vlgmr.msra.gmra.mrb[16].mxu0 %v7522_v1 }
 0x4fc   : > { %4207 = vmatpush1.bf16.msra.mxu0 %v2269_v49  ;;  %4368 = vmatmul.mubr.bf16.vlgmr.msra.gmra.mrb[16].mxu1 %v7522_v1  ;;  %v2422_v49 = vunpack.c.l.s8.bf16 %v947_v40 }
 0x4fd   : > { %4379 = vmatpush1.bf16.msra.mxu1 %v2271_v54  ;;  %4208 = vmatprep.subr.bf16.mxu0 %v2295_v43  ;;  %v946_v54 = vld [vmem:[%s7354_s12 + $0x15a8] sm:$0xff] }
 0x4fe   : > { %4380 = vmatprep.subr.bf16.mxu1 %v2297_v9  ;;  %4238 = vmatprep.mubr.bf16.mxu0 %v7538_v8 }
 0x4ff   : > { %4410 = vmatprep.mubr.bf16.mxu1 %v7538_v8  ;;  %v1047_v8 = vld [vmem:[%s7354_s12 + $0x18d0] sm:$0xff] }
 0x500   : > { %4209 = vmatpush1.bf16.msra.mxu0 %v2294_v58  ;;  %v2419_v58 = vunpack.c.l.s8.bf16 %v944_v15 }
 0x501   : > { %4381 = vmatpush1.bf16.msra.mxu1 %v2296_v0  ;;  %4210 = vmatprep.subr.bf16.mxu0 %v2320_v4 }
 0x502   : > { %4382 = vmatprep.subr.bf16.mxu1 %v2322_v59  ;;  %v2421_v59 = vunpack.c.l.s8.bf16 %v946_v54 }
 0x504   : > { %4211 = vmatpush1.bf16.msra.mxu0 %v2319_v31 }
 0x505   : > { %4383 = vmatpush1.bf16.msra.mxu1 %v2321_v47  ;;  %4212 = vmatprep.subr.bf16.mxu0 %v2345_v48 }
 0x506   : > { %4384 = vmatprep.subr.bf16.mxu1 %v2347_v34  ;;  %v2447_v34 = vunpack.c.h.s8.bf16 %v947_v40 }
 0x508   : > { %4213 = vmatpush1.bf16.msra.mxu0 %v2344_v17 }
 0x509   : > { %4385 = vmatpush1.bf16.msra.mxu1 %v2346_v18  ;;  %4214 = vmatprep.subr.bf16.mxu0 %v2370_v23  ;;  %v972_v18 = vld [vmem:[%s7354_s12 + $0x1678] sm:$0xff] }
 0x50a   : > { %4386 = vmatprep.subr.bf16.mxu1 %v2372_v37  ;;  %v2444_v37 = vunpack.c.h.s8.bf16 %v944_v15  ;;  %v2472_v40 = vunpack.c.l.s8.bf16 %v972_v18 }
 0x50c   : > { %4215 = vmatpush1.bf16.msra.mxu0 %v2369_v38 }
 0x50d   : > { %4387 = vmatpush1.bf16.msra.mxu1 %v2371_v32  ;;  %4216 = vmatprep.subr.bf16.mxu0 %v2395_v30  ;;  %v2446_v32 = vunpack.c.h.s8.bf16 %v946_v54  ;;  %v2470_v30 = vunpack.c.l.s8.bf16 %v970_v41 }
 0x50e   : > { %v8463_v62 = vpop.f32.mrb[12].mxu0  ;;  %4388 = vmatprep.subr.bf16.mxu1 %v2397_v27  ;;  %v969_v27 = vld [vmem:[%s7354_s12 + $0x1660] sm:$0xff] }
 0x50f   : > { %v8466_v43 = vpop.f32.mrb[12].mxu1  ;;  %v8468_v9 = vpop.f32.mrb[13].mxu0  ;;  %v2469_v15 = vunpack.c.l.s8.bf16 %v969_v27 }
 0x510   : > { %v8470_v55 = vpop.f32.mrb[13].mxu1  ;;  %v3900_v61 = vpop.f32.mrb[14].mxu0  ;;  %4217 = vmatpush1.bf16.msra.mxu0 %v2394_v13 }
 0x511   : > { %v5018_v0 = vadd.f32 %v3900_v61, %v8463_v62  ;;  %v4072_v4 = vpop.f32.mrb[14].mxu1  ;;  %4389 = vmatpush1.bf16.msra.mxu1 %v2396_v21  ;;  %v3902_v57 = vpop.f32.mrb[15].mxu0  ;;  %4218 = vmatprep.subr.bf16.mxu0 %v2420_v33  ;;  %v971_v21 = vld [vmem:[%s7354_s12 + $0x1670] sm:$0xff] }
 0x512   : > { %v5032_v31 = vadd.f32 %v4072_v4, %v8466_v43  ;;  %v5025_v47 = vadd.f32 %v3902_v57, %v8468_v9  ;;  %v4074_v48 = vpop.f32.mrb[15].mxu1  ;;  %4390 = vmatprep.subr.bf16.mxu1 %v2422_v49  ;;  %v2471_v54 = vunpack.c.l.s8.bf16 %v971_v21  ;;  %v2495_v57 = vunpack.c.h.s8.bf16 %v970_v41 }
 0x513   : > { %v5019_v10 = vrot.slane %v5018_v0, 4  ;;  %v5039_v17 = vadd.f32 %v4074_v48, %v8470_v55 }
 0x514   : > { %v5033_v23 = vrot.slane %v5032_v31, 4  ;;  %v5026_v25 = vrot.slane %v5025_v47, 4  ;;  %4219 = vmatpush1.bf16.msra.mxu0 %v2419_v58 }
 0x515   : > { %v5020_v35 = vadd.f32 %v5019_v10, %v5018_v0  ;;  %v5040_v38 = vrot.slane %v5039_v17, 4  ;;  %4391 = vmatpush1.bf16.msra.mxu1 %v2421_v59  ;;  %4220 = vmatprep.subr.bf16.mxu0 %v2445_v52  ;;  %v997_v10 = vld [vmem:[%s7354_s12 + $0x1740] sm:$0xff] }
 0x516   : > { %v5034_v53 = vadd.f32 %v5033_v23, %v5032_v31  ;;  %v5027_v13 = vadd.f32 %v5026_v25, %v5025_v47  ;;  %4392 = vmatprep.subr.bf16.mxu1 %v2447_v34  ;;  %v2497_v31 = vunpack.c.h.s8.bf16 %v972_v18  ;;  %v995_v47 = vld [vmem:[%s7354_s12 + $0x1730] sm:$0xff]  ;;  %v2494_v25 = vunpack.c.h.s8.bf16 %v969_v27 }
 0x517   : > { %v5021_v33 = vrot.slane %v5020_v35, 2  ;;  %v5041_v49 = vadd.f32 %v5040_v38, %v5039_v17  ;;  %v2496_v38 = vunpack.c.h.s8.bf16 %v971_v21  ;;  %v2520_v41 = vunpack.c.l.s8.bf16 %v995_v47 }
 0x518   : > { %v5035_v61 = vrot.slane %v5034_v53, 2  ;;  %v5028_v4 = vrot.slane %v5027_v13, 2  ;;  %4221 = vmatpush1.bf16.msra.mxu0 %v2444_v37  ;;  %v2522_v18 = vunpack.c.l.s8.bf16 %v997_v10 }
 0x519   : > { %v5022_v58 = vadd.f32 %v5021_v33, %v5020_v35  ;;  %v5042_v0 = vrot.slane %v5041_v49, 2  ;;  %4393 = vmatpush1.bf16.msra.mxu1 %v2446_v32  ;;  %4222 = vmatprep.subr.bf16.mxu0 %v2470_v30  ;;  %v994_v32 = vld [vmem:[%s7354_s12 + $0x1728] sm:$0xff] }
 0x51a   : > { %v5036_v59 = vadd.f32 %v5035_v61, %v5034_v53  ;;  %v5029_v52 = vadd.f32 %v5028_v4, %v5027_v13  ;;  %4394 = vmatprep.subr.bf16.mxu1 %v2472_v40  ;;  %v996_v13 = vld [vmem:[%s7354_s12 + $0x1738] sm:$0xff]  ;;  %v2519_v27 = vunpack.c.l.s8.bf16 %v994_v32 }
 0x51b   : > { %v5023_v48 = vrot.slane %v5022_v58, 1  ;;  %v5043_v34 = vadd.f32 %v5042_v0, %v5041_v49 }
 0x51c   : > { %v5037_v17 = vrot.slane %v5036_v59, 1  ;;  %v5030_v23 = vrot.slane %v5029_v52, 1  ;;  %4223 = vmatpush1.bf16.msra.mxu0 %v2469_v15  ;;  %v2521_v15 = vunpack.c.l.s8.bf16 %v996_v13 }
 0x51d   : > { %v5024_v37 = vadd.f32 %v5023_v48, %v5022_v58  ;;  %v5044_v35 = vrot.slane %v5043_v34, 1  ;;  %4395 = vmatpush1.bf16.msra.mxu1 %v2471_v54  ;;  %4224 = vmatprep.subr.bf16.mxu0 %v2495_v57  ;;  %v2545_v58 = vunpack.c.h.s8.bf16 %v995_v47  ;;  %v2547_v57 = vunpack.c.h.s8.bf16 %v997_v10 }
 0x51e   : > { %v5038_v30 = vadd.f32 %v5037_v17, %v5036_v59  ;;  %v5031_v53 = vadd.f32 %v5030_v23, %v5029_v52  ;;  %4396 = vmatprep.subr.bf16.mxu1 %v2497_v31  ;;  %v1020_v59 = vld [vmem:[%s7354_s12 + $0x17f8] sm:$0xff]  ;;  %v2544_v48 = vunpack.c.h.s8.bf16 %v994_v32  ;;  %v2546_v10 = vunpack.c.h.s8.bf16 %v996_v13 }
 0x51f   : > { %v8484_v40 = vmul.f32 0.25, %v5024_v37  ;;  %v5045_v33 = vadd.f32 %v5044_v35, %v5043_v34  ;;  %v1022_v34 = vld [vmem:[%s7354_s12 + $0x1808] sm:$0xff] }
 0x520   : > { %v8486_v49 = vmul.f32 0.25, %v5038_v30  ;;  %v8488_v61 = vmul.f32 0.25, %v5031_v53  ;;  %4225 = vmatpush1.bf16.msra.mxu0 %v2494_v25  ;;  %v2572_v53 = vunpack.c.l.s8.bf16 %v1022_v34 }
 0x521   : > { %v5146_v21 = vsub.f32 %v8463_v62, %v8484_v40  ;;  %v8492_v4 = vmul.f32 0.25, %v5045_v33  ;;  %4397 = vmatpush1.bf16.msra.mxu1 %v2496_v38  ;;  %4226 = vmatprep.subr.bf16.mxu0 %v2520_v41  ;;  %v2570_v38 = vunpack.c.l.s8.bf16 %v1020_v59  ;;  %v1019_v41 = vld [vmem:[%s7354_s12 + $0x17f0] sm:$0xff] }
 0x522   : > { %v5148_v0 = vsub.f32 %v8466_v43, %v8486_v49  ;;  %v5147_v54 = vsub.f32 %v8468_v9, %v8488_v61  ;;  %4398 = vmatprep.subr.bf16.mxu1 %v2522_v18  ;;  %v1021_v18 = vld [vmem:[%s7354_s12 + $0x1800] sm:$0xff]  ;;  %v2569_v13 = vunpack.c.l.s8.bf16 %v1019_v41 }
 0x523   : > { %v5196_v52 = vsel %vm4932_vm0, %v5146_v21, 0.0  ;;  %v5149_v31 = vsub.f32 %v8470_v55, %v8492_v4 }
 0x524   : > { %v5246_v17 = vmul.f32 %v5196_v52, %v5196_v52  ;;  %v5198_v47 = vsel %vm4932_vm0, %v5148_v0, 0.0  ;;  %v5197_v23 = vsel %vm4932_vm0, %v5147_v54, 0.0  ;;  %4227 = vmatpush1.bf16.msra.mxu0 %v2519_v27 }
 0x525   : > { %v5248_v25 = vmul.f32 %v5198_v47, %v5198_v47  ;;  %v5247_v37 = vmul.f32 %v5197_v23, %v5197_v23  ;;  %v5199_v35 = vsel %vm4932_vm0, %v5149_v31, 0.0  ;;  %4399 = vmatpush1.bf16.msra.mxu1 %v2521_v15  ;;  %4228 = vmatprep.subr.bf16.mxu0 %v2545_v58  ;;  %v2571_v15 = vunpack.c.l.s8.bf16 %v1021_v18  ;;  %v1045_v23 = vld [vmem:[%s7354_s12 + $0x18c0] sm:$0xff] }
 0x526   : > { %v5369_v32 = vrot.slane %v5246_v17, 4  ;;  %v5249_v30 = vmul.f32 %v5199_v35, %v5199_v35  ;;  %4400 = vmatprep.subr.bf16.mxu1 %v2547_v57  ;;  %v2595_v58 = vunpack.c.h.s8.bf16 %v1020_v59  ;;  %v2597_v57 = vunpack.c.h.s8.bf16 %v1022_v34 }
 0x527   : > { %v5383_v33 = vrot.slane %v5248_v25, 4  ;;  %v5376_v21 = vrot.slane %v5247_v37, 4  ;;  %v2620_v59 = vunpack.c.l.s8.bf16 %v1045_v23  ;;  %v2622_v34 = vunpack.c.l.s8.bf16 %v1047_v8 }
 0x528   : > { %v5370_v0 = vadd.f32 %v5369_v32, %v5246_v17  ;;  %v5390_v27 = vrot.slane %v5249_v30, 4  ;;  %4229 = vmatpush1.bf16.msra.mxu0 %v2544_v48  ;;  %v2594_v48 = vunpack.c.h.s8.bf16 %v1019_v41 }
 0x529   : > { %v5384_v54 = vadd.f32 %v5383_v33, %v5248_v25  ;;  %v5377_v52 = vadd.f32 %v5376_v21, %v5247_v37  ;;  %4401 = vmatpush1.bf16.msra.mxu1 %v2546_v10  ;;  %4230 = vmatprep.subr.bf16.mxu0 %v2570_v38  ;;  %v2596_v10 = vunpack.c.h.s8.bf16 %v1021_v18  ;;  %v1044_v38 = vld [vmem:[%s7354_s12 + $0x18b8] sm:$0xff]  ;;  %v1046_v33 = vld [vmem:[%s7354_s12 + $0x18c8] sm:$0xff] }
 0x52a   : > { %v5371_v31 = vrot.slane %v5370_v0, 2  ;;  %v5391_v47 = vadd.f32 %v5390_v27, %v5249_v30  ;;  %4402 = vmatprep.subr.bf16.mxu1 %v2572_v53  ;;  %v2619_v41 = vunpack.c.l.s8.bf16 %v1044_v38  ;;  %v2621_v18 = vunpack.c.l.s8.bf16 %v1046_v33 }
 0x52b   : > { %v5385_v35 = vrot.slane %v5384_v54, 2  ;;  %v5378_v39 = vrot.slane %v5377_v52, 2 }
 0x52c   : > { %v5372_v17 = vadd.f32 %v5371_v31, %v5370_v0  ;;  %v5392_v32 = vrot.slane %v5391_v47, 2  ;;  %4231 = vmatpush1.bf16.msra.mxu0 %v2569_v13  ;;  %v274_v31 = vld [vmem:[%s7354_s12 + $0xa8] sm:$0xff] }
 0x52d   : > { %v5386_v25 = vadd.f32 %v5385_v35, %v5384_v54  ;;  %v5379_v37 = vadd.f32 %v5378_v39, %v5377_v52  ;;  %4403 = vmatpush1.bf16.msra.mxu1 %v2571_v15  ;;  %4232 = vmatprep.subr.bf16.mxu0 %v2595_v58  ;;  %v2645_v54 = vunpack.c.h.s8.bf16 %v1045_v23  ;;  %v2647_v58 = vunpack.c.h.s8.bf16 %v1047_v8  ;;  %v276_v35 = vld [vmem:[%s7354_s12 + $0xb8] sm:$0xff] }
 0x52e   : > { %v5373_v30 = vrot.slane %v5372_v17, 1  ;;  %v5393_v53 = vadd.f32 %v5392_v32, %v5391_v47  ;;  %4404 = vmatprep.subr.bf16.mxu1 %v2597_v57  ;;  %v1074_v23 = vunpack.c.l.s8.bf16 %v274_v31  ;;  %v1076_v8 = vunpack.c.l.s8.bf16 %v276_v35 }
 0x52f   : > { %v5387_v21 = vrot.slane %v5386_v25, 1  ;;  %v5380_v27 = vrot.slane %v5379_v37, 1 }
 0x530   : > { %v5374_v1 = vadd.f32 %v5373_v30, %v5372_v17  ;;  %v5394_v0 = vrot.slane %v5393_v53, 1  ;;  %4233 = vmatpush1.bf16.msra.mxu0 %v2594_v48  ;;  %v2644_v48 = vunpack.c.h.s8.bf16 %v1044_v38  ;;  %v275_v30 = vld [vmem:[%s7354_s12 + $0xb0] sm:$0xff] }
 0x531   : > { %v5388_v13 = vadd.f32 %v5387_v21, %v5386_v25  ;;  %v5381_v39 = vadd.f32 %v5380_v27, %v5379_v37  ;;  %4405 = vmatpush1.bf16.msra.mxu1 %v2596_v10  ;;  %4234 = vmatprep.subr.bf16.mxu0 %v2620_v59  ;;  %v2646_v10 = vunpack.c.h.s8.bf16 %v1046_v33  ;;  %v1075_v38 = vunpack.c.l.s8.bf16 %v275_v30  ;;  %v299_v21 = vld [vmem:[%s7354_s12 + $0x170] sm:$0xff]  ;;  %v301_v27 = vld [vmem:[%s7354_s12 + $0x180] sm:$0xff] }
 0x532   : > { %v5471_v52 = vmul.f32 0.25, %v5374_v1  ;;  %v5395_v15 = vadd.f32 %v5394_v0, %v5393_v53  ;;  %4406 = vmatprep.subr.bf16.mxu1 %v2622_v34  ;;  %v273_v1 = vld [vmem:[%s7354_s12 + $0xa0] sm:$0xff]  ;;  %v1099_v34 = vunpack.c.h.s8.bf16 %v274_v31  ;;  %v1101_v33 = vunpack.c.h.s8.bf16 %v276_v35 }
 0x533   : > { %v5473_v47 = vmul.f32 0.25, %v5388_v13  ;;  %v5472_v57 = vmul.f32 0.25, %v5381_v39  ;;  %v1073_v53 = vunpack.c.l.s8.bf16 %v273_v1  ;;  %v1098_v0 = vunpack.c.h.s8.bf16 %v273_v1  ;;  %v298_v39 = vld [vmem:[%s7354_s12 + $0x168] sm:$0xff] }
 0x534   : > { %v5500_v17 = vadd.f32 1e-05, %v5471_v52  ;;  %v5474_v32 = vmul.f32 0.25, %v5395_v15  ;;  %4235 = vmatpush1.bf16.msra.mxu0 %v2619_v41  ;;  %v1100_v41 = vunpack.c.h.s8.bf16 %v275_v30  ;;  %v1124_v13 = vunpack.c.l.s8.bf16 %v299_v21 }
 0x535   : > { %v5502_v25 = vadd.f32 1e-05, %v5473_v47  ;;  %v5501_v37 = vadd.f32 1e-05, %v5472_v57  ;;  %4407 = vmatpush1.bf16.msra.mxu1 %v2621_v18  ;;  %4236 = vmatprep.subr.bf16.mxu0 %v2645_v54  ;;  %v1126_v18 = vunpack.c.l.s8.bf16 %v301_v27  ;;  %v300_v54 = vld [vmem:[%s7354_s12 + $0x178] sm:$0xff]  ;;  %v1123_v15 = vunpack.c.l.s8.bf16 %v298_v39 }
 0x536   : > { %7138 = vrsqrt.f32 %v5500_v17  ;;  %v5503_v59 = vadd.f32 1e-05, %v5474_v32  ;;  %4408 = vmatprep.subr.bf16.mxu1 %v2647_v58  ;;  %v1125_v31 = vunpack.c.l.s8.bf16 %v300_v54  ;;  %v1149_v47 = vunpack.c.h.s8.bf16 %v299_v21  ;;  %v324_v17 = vld [vmem:[%s7354_s12 + $0x238] sm:$0xff] }
 0x537   : > { %7140 = vrsqrt.f32 %v5502_v25  ;;  %v1151_v35 = vunpack.c.h.s8.bf16 %v301_v27  ;;  %v326_v25 = vld [vmem:[%s7354_s12 + $0x248] sm:$0xff]  ;;  %v1150_v1 = vunpack.c.h.s8.bf16 %v300_v54  ;;  %v1199_v27 = vunpack.c.h.s8.bf16 %v324_v17  ;;  %v8541_v54 = vld [vmem:[%s7354_s12 + $0x310] sm:$0xff] }
 0x538   : > { %7142 = vrsqrt.f32 %v5501_v37  ;;  %4237 = vmatpush1.bf16.msra.mxu0 %v2644_v48 }
 0x539   : > { %7144 = vrsqrt.f32 %v5503_v59  ;;  %4409 = vmatpush1.bf16.msra.mxu1 %v2646_v10  ;;  %4421 = vmatprep.subr.bf16.mxu0 %v1074_v23  ;;  %v1148_v10 = vunpack.c.h.s8.bf16 %v298_v39  ;;  %v1174_v59 = vunpack.c.l.s8.bf16 %v324_v17  ;;  %v1201_v39 = vunpack.c.h.s8.bf16 %v326_v25 }
 0x53a   : > { %4593 = vmatprep.subr.bf16.mxu1 %v1076_v8  ;;  %v323_v8 = vld [vmem:[%s7354_s12 + $0x230] sm:$0xff]  ;;  %v1226_v17 = vunpack.c.l.s8.bf16 %v8541_v54 }
 0x53b   : > { %4239 = vmatmul.mubr.bf16.vlgmr.msra.gmra.mrb[16].mxu0 %v7576_v50 }
 0x53c   : > { %4411 = vmatmul.mubr.bf16.vlgmr.msra.gmra.mrb[16].mxu1 %v7576_v50  ;;  %4422 = vmatpush1.bf16.msra.mxu0 %v1073_v53  ;;  %v1176_v53 = vunpack.c.l.s8.bf16 %v326_v25 }
 0x53d   : > { %4594 = vmatpush1.bf16.msra.mxu1 %v1075_v38  ;;  %4423 = vmatprep.subr.bf16.mxu0 %v1099_v34  ;;  %v325_v38 = vld [vmem:[%s7354_s12 + $0x240] sm:$0xff] }
 0x53e   : > { %4595 = vmatprep.subr.bf16.mxu1 %v1101_v33  ;;  %4453 = vmatprep.mubr.bf16.mxu0 %v7384_v36  ;;  %v1173_v33 = vunpack.c.l.s8.bf16 %v323_v8  ;;  %v1175_v21 = vunpack.c.l.s8.bf16 %v325_v38 }
 0x53f   : > { %4625 = vmatprep.mubr.bf16.mxu1 %v7384_v36 }
 0x540   : > { %v7139_v52 = vpop.eup %7138  ;;  %4424 = vmatpush1.bf16.msra.mxu0 %v1098_v0  ;;  %v9096_v0 = vcombine.low %v8343_v28, %v8347_v5  ;;  %v1200_v28 = vunpack.c.h.s8.bf16 %v325_v38 }
 0x541   : > { %v7141_v58 = vpop.eup %7140  ;;  %4596 = vmatpush1.bf16.msra.mxu1 %v1100_v41  ;;  %4425 = vmatprep.subr.bf16.mxu0 %v1124_v13 }
 0x542   : > { %v7143_v57 = vpop.eup %7142  ;;  %4597 = vmatprep.subr.bf16.mxu1 %v1126_v18  ;;  %v5652_v41 = vrot.slane %v9096_v0, %v7770_v3  ;;  %v349_v18 = vld [vmem:[%s7354_s12 + $0x300] sm:$0xff] }
 0x543   : > { %v7145_v32 = vpop.eup %7144  ;;  %v5614_v48 = vcombine.low %v7139_v52, %v7143_v57  ;;  %v8544_v52 = vld [vmem:[%s7354_s12 + $0x2f8] sm:$0xff]  ;;  %v8551_v57 = vld [vmem:[%s7354_s12 + $0x3c8] sm:$0xff]  ;;  %v1224_v5 = vunpack.c.l.s8.bf16 %v349_v18 }
 0x544   : > { %v5615_v37 = vcombine.low %v7141_v58, %v7145_v32  ;;  %4426 = vmatpush1.bf16.msra.mxu0 %v1123_v15  ;;  %v5485_v15 = vld [vmem:[%s7995_s6 + $0x8] sm:$0xff]  ;;  %v1223_v32 = vunpack.c.l.s8.bf16 %v8544_v52 }
 0x545   : > { %v5636_v23 = vrot.slane %v5614_v48, %v7770_v3  ;;  %4598 = vmatpush1.bf16.msra.mxu1 %v1125_v31  ;;  %4427 = vmatprep.subr.bf16.mxu0 %v1149_v47  ;;  %v8548_v58 = vld [vmem:[%s7354_s12 + $0x308] sm:$0xff]  ;;  %v1198_v47 = vunpack.c.h.s8.bf16 %v323_v8 }
 0x546   : > { %v5643_v30 = vrot.slane %v5615_v37, %v7770_v3  ;;  %4599 = vmatprep.subr.bf16.mxu1 %v1151_v35  ;;  %v8554_v35 = vld [vmem:[%s7354_s12 + $0x3d8] sm:$0xff]  ;;  %v1225_v25 = vunpack.c.l.s8.bf16 %v8548_v58  ;;  %v1249_v37 = vunpack.c.h.s8.bf16 %v349_v18 }
 0x547   : > { %v1276_v8 = vunpack.c.l.s8.bf16 %v8554_v35 }
 0x548   : > { %v5645_v34 = vcombine.low %v5636_v23, %v5643_v30  ;;  %4428 = vmatpush1.bf16.msra.mxu0 %v1148_v10  ;;  %v1251_v10 = vunpack.c.h.s8.bf16 %v8541_v54  ;;  %v1248_v23 = vunpack.c.h.s8.bf16 %v8544_v52 }
 0x549   : > { %4600 = vmatpush1.bf16.msra.mxu1 %v1150_v1  ;;  %4429 = vmatprep.subr.bf16.mxu0 %v1174_v59  ;;  %v1250_v1 = vunpack.c.h.s8.bf16 %v8548_v58  ;;  %v1274_v59 = vunpack.c.l.s8.bf16 %v8551_v57 }
 0x54a   : > { %v5659_v13 = vrot.slane %v5645_v34, %v7770_v3  ;;  %4601 = vmatprep.subr.bf16.mxu1 %v1176_v53 }
 0x54c   : > { %v5660_v31 = vcombine.low %v5652_v41, %v5659_v13  ;;  %4430 = vmatpush1.bf16.msra.mxu0 %v1173_v33 }
 0x54d   : > { %4602 = vmatpush1.bf16.msra.mxu1 %v1175_v21  ;;  %4431 = vmatprep.subr.bf16.mxu0 %v1199_v27 }
 0x54e   : > { %v5729_v48 = vmul.f32 %v5660_v31, %v5485_v15  ;;  %4603 = vmatprep.subr.bf16.mxu1 %v1201_v39 }
 0x550   : > { %v5775_v30 = vrot.slane %v5729_v48, %v8003_v63  ;;  %v5779_v53 = vrot.slane %v5729_v48, %v8006_v7  ;;  %v5783_v38 = vrot.slane %v5729_v48, %v8019_v20  ;;  %v5787_v34 = vrot.slane %v5729_v48, %v8022_v11  ;;  %4432 = vmatpush1.bf16.msra.mxu0 %v1198_v47 }
 0x551   : > { %v5791_v33 = vrot.slane %v5729_v48, %v8025_v12  ;;  %v5795_v21 = vrot.slane %v5729_v48, %v8028_v22  ;;  %v5799_v27 = vrot.slane %v5729_v48, %v8034_v24  ;;  %v5803_v0 = vrot.slane %v5729_v48, %v8037_v45  ;;  %4604 = vmatpush1.bf16.msra.mxu1 %v1200_v28 }
 0x552   : > { %v5873_v41 = vmul.f32 %v5775_v30, %v8296_v42  ;;  %v5874_v13 = vmul.f32 %v5779_v53, %v8300_v60  ;;  %v5875_v39 = vmul.f32 %v5783_v38, %v8298_v29  ;;  %v5876_v18 = vmul.f32 %v5787_v34, %v8302_v6  ;;  %4433 = vmatprep.subr.bf16.mxu0 %v1224_v5  ;;  %v375_v5 = vld [vmem:[%s7354_s12 + $0x3d0] sm:$0xff] }
 0x553   : > { %v5877_v54 = vmul.f32 %v5791_v33, %v8484_v40  ;;  %v5878_v52 = vmul.f32 %v5795_v21, %v8488_v61  ;;  %v5879_v15 = vmul.f32 %v5799_v27, %v8486_v49  ;;  %v5880_v58 = vmul.f32 %v5803_v0, %v8492_v4  ;;  %4605 = vmatprep.subr.bf16.mxu1 %v1226_v17  ;;  %v373_v61 = vld [vmem:[%s7354_s12 + $0x3c0] sm:$0xff] }
 0x554   : > { %v5964_v31 = vcombine.low %v5873_v41, %v5874_v13  ;;  %v5965_v42 = vcombine.low %v5875_v39, %v5876_v18  ;;  %v8581_v60 = vmul.f32 %v5775_v30, %v8275_v14  ;;  %v8584_v29 = vmul.f32 %v5779_v53, %v8280_v56  ;;  %4434 = vmatpush1.bf16.msra.mxu0 %v1223_v32  ;;  %v399_v30 = vld [vmem:[%s7354_s12 + $0x490] sm:$0xff]  ;;  %v8617_v53 = vld [vmem:[%s7354_s12 + $0x488] sm:$0xff] }
 0x555   : > { %v5966_v6 = vcombine.low %v5877_v54, %v5878_v52  ;;  %v5967_v47 = vcombine.low %v5879_v15, %v5880_v58  ;;  %v8587_v40 = vmul.f32 %v5783_v38, %v8277_v16  ;;  %v8590_v49 = vmul.f32 %v5787_v34, %v8282_v2  ;;  %4606 = vmatpush1.bf16.msra.mxu1 %v1225_v25  ;;  %v8620_v38 = vld [vmem:[%s7354_s12 + $0x498] sm:$0xff] }
 0x556   : > { %v5974_v4 = vrot.slane %v5964_v31, %v7770_v3  ;;  %v5981_v28 = vrot.slane %v5965_v42, %v7770_v3  ;;  %v8596_v14 = vmul.f32 %v5791_v33, %v8463_v62  ;;  %v8599_v56 = vmul.f32 %v5795_v21, %v8468_v9  ;;  %4435 = vmatprep.subr.bf16.mxu0 %v1249_v37  ;;  %v8627_v21 = vld [vmem:[%s7354_s12 + $0x568] sm:$0xff] }
 0x557   : > { %v5988_v16 = vrot.slane %v5966_v6, %v7770_v3  ;;  %v5995_v2 = vrot.slane %v5967_v47, %v7770_v3  ;;  %v8605_v17 = vmul.f32 %v5799_v27, %v8466_v43  ;;  %v8608_v32 = vmul.f32 %v5803_v0, %v8470_v55  ;;  %4607 = vmatprep.subr.bf16.mxu1 %v1251_v10  ;;  %v401_v10 = vld [vmem:[%s7354_s12 + $0x4a0] sm:$0xff]  ;;  %v8630_v27 = vld [vmem:[%s7354_s12 + $0x550] sm:$0xff] }
 0x558   : > { %v5996_v62 = vcombine.low %v5974_v4, %v5981_v28  ;;  %4436 = vmatpush1.bf16.msra.mxu0 %v1248_v23  ;;  %v1273_v9 = vunpack.c.l.s8.bf16 %v373_v61  ;;  %v1275_v25 = vunpack.c.l.s8.bf16 %v375_v5  ;;  %v1299_v37 = vunpack.c.h.s8.bf16 %v8551_v57  ;;  %v8624_v57 = vld [vmem:[%s7354_s12 + $0x558] sm:$0xff]  ;;  %v8633_v0 = vld [vmem:[%s7354_s12 + $0x560] sm:$0xff] }
 0x559   : > { %v5997_v48 = vcombine.low %v5988_v16, %v5995_v2  ;;  %4608 = vmatpush1.bf16.msra.mxu1 %v1250_v1  ;;  %4437 = vmatprep.subr.bf16.mxu0 %v1274_v59  ;;  %v1301_v55 = vunpack.c.h.s8.bf16 %v8554_v35  ;;  %v5733_v1 = vld [vmem:[%s8105_s13 + $0x8] sm:$0xff]  ;;  %v1298_v59 = vunpack.c.h.s8.bf16 %v373_v61  ;;  %v1300_v35 = vunpack.c.h.s8.bf16 %v375_v5 }
 0x55a   : > { %v6004_v43 = vrot.slane %v5996_v62, %v7770_v3  ;;  %4609 = vmatprep.subr.bf16.mxu1 %v1276_v8  ;;  %v1324_v8 = vunpack.c.l.s8.bf16 %v399_v30  ;;  %v1326_v33 = vunpack.c.l.s8.bf16 %v401_v10  ;;  %v1323_v41 = vunpack.c.l.s8.bf16 %v8617_v53 }
 0x55b   : > { %v6011_v23 = vrot.slane %v5997_v48, %v7770_v3  ;;  %v1325_v13 = vunpack.c.l.s8.bf16 %v8620_v38  ;;  %v1349_v39 = vunpack.c.h.s8.bf16 %v399_v30  ;;  %v1351_v18 = vunpack.c.h.s8.bf16 %v401_v10 }
 0x55c   : > { %4438 = vmatpush1.bf16.msra.mxu0 %v1273_v9  ;;  %v1348_v52 = vunpack.c.h.s8.bf16 %v8617_v53  ;;  %v1350_v15 = vunpack.c.h.s8.bf16 %v8620_v38  ;;  %v1374_v58 = vunpack.c.l.s8.bf16 %v8624_v57  ;;  %v1376_v31 = vunpack.c.l.s8.bf16 %v8627_v21 }
 0x55d   : > { %v6012_v34 = vcombine.low %v6004_v43, %v6011_v23  ;;  %4610 = vmatpush1.bf16.msra.mxu1 %v1275_v25  ;;  %4439 = vmatprep.subr.bf16.mxu0 %v1299_v37  ;;  %v1373_v42 = vunpack.c.l.s8.bf16 %v8630_v27  ;;  %v1375_v6 = vunpack.c.l.s8.bf16 %v8633_v0  ;;  %v1399_v47 = vunpack.c.h.s8.bf16 %v8624_v57 }
 0x55e   : > { %4611 = vmatprep.subr.bf16.mxu1 %v1301_v55 }
 0x55f   : > { %v6081_v54 = vsub.f32 %v5733_v1, %v6012_v34 }
 0x560   : > { %4440 = vmatpush1.bf16.msra.mxu0 %v1298_v59 }
 0x561   : > { %v6173_v61 = vrot.slane %v6081_v54, %v8003_v63  ;;  %v6177_v4 = vrot.slane %v6081_v54, %v8006_v7  ;;  %v6181_v28 = vrot.slane %v6081_v54, %v8019_v20  ;;  %v6185_v5 = vrot.slane %v6081_v54, %v8022_v11  ;;  %4612 = vmatpush1.bf16.msra.mxu1 %v1300_v35 }
 0x562   : > { %v6189_v16 = vrot.slane %v6081_v54, %v8025_v12  ;;  %v6193_v2 = vrot.slane %v6081_v54, %v8028_v22  ;;  %v6197_v62 = vrot.slane %v6081_v54, %v8034_v24  ;;  %v6201_v9 = vrot.slane %v6081_v54, %v8037_v45  ;;  %4441 = vmatprep.subr.bf16.mxu0 %v1324_v8  ;;  %v449_v54 = vld [vmem:[%s7354_s12 + $0x620] sm:$0xff] }
 0x563   : > { %v6271_v48 = vadd.f32 %v6173_v61, %v8581_v60  ;;  %v6272_v25 = vadd.f32 %v6177_v4, %v8584_v29  ;;  %v6273_v37 = vadd.f32 %v6181_v28, %v8587_v40  ;;  %v6274_v43 = vadd.f32 %v6185_v5, %v8590_v49  ;;  %4613 = vmatprep.subr.bf16.mxu1 %v1326_v33  ;;  %v451_v61 = vld [vmem:[%s7354_s12 + $0x630] sm:$0xff]  ;;  %v450_v4 = vld [vmem:[%s7354_s12 + $0x628] sm:$0xff] }
 0x564   : > { %v6275_v55 = vadd.f32 %v6189_v16, %v8596_v14  ;;  %v6276_v30 = vadd.f32 %v6193_v2, %v8599_v56  ;;  %v6277_v10 = vadd.f32 %v6197_v62, %v8605_v17  ;;  %v6278_v23 = vadd.f32 %v6201_v9, %v8608_v32  ;;  %4442 = vmatpush1.bf16.msra.mxu0 %v1323_v41  ;;  %v473_v62 = vld [vmem:[%s7354_s12 + $0x6e0] sm:$0xff] }
 0x565   : > { %v6321_v53 = vmax.f32 %v6271_v48, 0.0  ;;  %v6322_v38 = vmax.f32 %v6272_v25, 0.0  ;;  %v6323_v1 = vmax.f32 %v6273_v37, 0.0  ;;  %v6324_v60 = vmax.f32 %v6274_v43, 0.0  ;;  %4614 = vmatpush1.bf16.msra.mxu1 %v1325_v13  ;;  %4443 = vmatprep.subr.bf16.mxu0 %v1349_v39  ;;  %v475_v48 = vld [vmem:[%s7354_s12 + $0x6f0] sm:$0xff] }
 0x566   : > { %v6325_v29 = vmax.f32 %v6275_v55, 0.0  ;;  %v6326_v40 = vmax.f32 %v6276_v30, 0.0  ;;  %v6327_v59 = vmax.f32 %v6277_v10, 0.0  ;;  %v6328_v49 = vmax.f32 %v6278_v23, 0.0  ;;  %4615 = vmatprep.subr.bf16.mxu1 %v1351_v18  ;;  %v499_v30 = vld [vmem:[%s7354_s12 + $0x7b0] sm:$0xff]  ;;  %v501_v10 = vld [vmem:[%s7354_s12 + $0x7c0] sm:$0xff] }
 0x567   : > { %v6371_v14 = vsel %vm4932_vm0, %v6321_v53, 0.0  ;;  %v6372_v56 = vsel %vm4932_vm0, %v6322_v38, 0.0  ;;  %v6373_v17 = vsel %vm4932_vm0, %v6323_v1, 0.0  ;;  %v6374_v32 = vsel %vm4932_vm0, %v6324_v60, 0.0  ;;  %v498_v1 = vld [vmem:[%s7354_s12 + $0x7a8] sm:$0xff] }
 0x568   : > { %v6375_v57 = vsel %vm4932_vm0, %v6325_v29, 0.0  ;;  %v6376_v34 = vsel %vm4932_vm0, %v6326_v40, 0.0  ;;  %v6377_v35 = vsel %vm4932_vm0, %v6327_v59, 0.0  ;;  %v6378_v8 = vsel %vm4932_vm0, %v6328_v49, 0.0  ;;  %4444 = vmatpush1.bf16.msra.mxu0 %v1348_v52  ;;  %v500_v29 = vld [vmem:[%s7354_s12 + $0x7b8] sm:$0xff] }
 0x569   : > { %v6812_v33 = vpack.c.bf16 %v6372_v56, %v6371_v14  ;;  %v6813_v41 = vpack.c.bf16 %v6374_v32, %v6373_v17  ;;  %v6814_v13 = vpack.c.bf16 %v6376_v34, %v6375_v57  ;;  %v6815_v39 = vpack.c.bf16 %v6378_v8, %v6377_v35  ;;  %4616 = vmatpush1.bf16.msra.mxu1 %v1350_v15  ;;  %v524_v56 = vld [vmem:[%s7354_s12 + $0x878] sm:$0xff]  ;;  %v526_v17 = vld [vmem:[%s7354_s12 + $0x888] sm:$0xff]  ;;  %v523_v35 = vld [vmem:[%s7354_s12 + $0x870] sm:$0xff] }
 0x56a   : > { %4445 = vmatprep.subr.bf16.mxu0 %v1374_v58  ;;  %4617 = vmatprep.subr.bf16.mxu1 %v1376_v31  ;;  %v1401_v18 = vunpack.c.h.s8.bf16 %v8627_v21  ;;  %v1398_v52 = vunpack.c.h.s8.bf16 %v8630_v27  ;;  %v1400_v15 = vunpack.c.h.s8.bf16 %v8633_v0  ;;  %v1424_v58 = vunpack.c.l.s8.bf16 %v449_v54  ;;  %v448_v31 = vld [vmem:[%s7354_s12 + $0x618] sm:$0xff] }
 0x56b   : > { %6569 = vst [vmem:[%s7875_s11 + $0x20] sm:$0xff] %v6812_v33  ;;  %6570 = vst [vmem:[%s7875_s11 + $0x28] sm:$0xff] %v6813_v41  ;;  %v1426_v21 = vunpack.c.l.s8.bf16 %v451_v61  ;;  %v1423_v28 = vunpack.c.l.s8.bf16 %v448_v31  ;;  %v1449_v5 = vunpack.c.h.s8.bf16 %v449_v54  ;;  %v1451_v27 = vunpack.c.h.s8.bf16 %v451_v61  ;;  %v525_v33 = vld [vmem:[%s7354_s12 + $0x880] sm:$0xff]  ;;  %v551_v61 = vld [vmem:[%s7354_s12 + $0x950] sm:$0xff] }
 0x56c   : > { %6571 = vst [vmem:[%s7875_s11 + $0x30] sm:$0xff] %v6814_v13  ;;  %6572 = vst [vmem:[%s7875_s11 + $0x38] sm:$0xff] %v6815_v39  ;;  %4446 = vmatpush1.bf16.msra.mxu0 %v1373_v42  ;;  %v1425_v42 = vunpack.c.l.s8.bf16 %v450_v4  ;;  %v1448_v16 = vunpack.c.h.s8.bf16 %v448_v31  ;;  %v1450_v0 = vunpack.c.h.s8.bf16 %v450_v4  ;;  %v1473_v25 = vunpack.c.l.s8.bf16 %v473_v62  ;;  %v549_v54 = vld [vmem:[%s7354_s12 + $0x940] sm:$0xff]  ;;  %v548_v31 = vld [vmem:[%s7354_s12 + $0x938] sm:$0xff] }
 0x56d   : > { %4618 = vmatpush1.bf16.msra.mxu1 %v1375_v6  ;;  %4447 = vmatprep.subr.bf16.mxu0 %v1399_v47  ;;  %v474_v6 = vld [vmem:[%s7354_s12 + $0x6e8] sm:$0xff]  ;;  %v476_v47 = vld [vmem:[%s7354_s12 + $0x6f8] sm:$0xff]  ;;  %v1475_v37 = vunpack.c.l.s8.bf16 %v475_v48  ;;  %v1498_v23 = vunpack.c.h.s8.bf16 %v473_v62  ;;  %v1500_v53 = vunpack.c.h.s8.bf16 %v475_v48  ;;  %v1524_v38 = vunpack.c.l.s8.bf16 %v499_v30  ;;  %v573_v62 = vld [vmem:[%s7354_s12 + $0xa00] sm:$0xff] }
 0x56e   : > { %4619 = vmatprep.subr.bf16.mxu1 %v1401_v18  ;;  %v1474_v2 = vunpack.c.l.s8.bf16 %v474_v6  ;;  %v1476_v9 = vunpack.c.l.s8.bf16 %v476_v47  ;;  %v1499_v43 = vunpack.c.h.s8.bf16 %v474_v6  ;;  %v1501_v55 = vunpack.c.h.s8.bf16 %v476_v47  ;;  %v550_v4 = vld [vmem:[%s7354_s12 + $0x948] sm:$0xff]  ;;  %v576_v47 = vld [vmem:[%s7354_s12 + $0xa18] sm:$0xff]  ;;  %v575_v48 = vld [vmem:[%s7354_s12 + $0xa10] sm:$0xff] }
 0x56f   : > { %v1526_v60 = vunpack.c.l.s8.bf16 %v501_v10  ;;  %v1523_v40 = vunpack.c.l.s8.bf16 %v498_v1  ;;  %v1525_v59 = vunpack.c.l.s8.bf16 %v500_v29  ;;  %v1549_v49 = vunpack.c.h.s8.bf16 %v499_v30  ;;  %v574_v6 = vld [vmem:[%s7354_s12 + $0xa08] sm:$0xff]  ;;  %v599_v30 = vld [vmem:[%s7354_s12 + $0xad0] sm:$0xff] }
 0x570   : > { %4448 = vmatpush1.bf16.msra.mxu0 %v1398_v52  ;;  %v1551_v14 = vunpack.c.h.s8.bf16 %v501_v10  ;;  %v1548_v32 = vunpack.c.h.s8.bf16 %v498_v1  ;;  %v1550_v57 = vunpack.c.h.s8.bf16 %v500_v29  ;;  %v1574_v34 = vunpack.c.l.s8.bf16 %v524_v56  ;;  %v601_v10 = vld [vmem:[%s7354_s12 + $0xae0] sm:$0xff]  ;;  %v598_v1 = vld [vmem:[%s7354_s12 + $0xac8] sm:$0xff]  ;;  %v600_v29 = vld [vmem:[%s7354_s12 + $0xad8] sm:$0xff] }
 0x571   : > { %4620 = vmatpush1.bf16.msra.mxu1 %v1400_v15  ;;  %4449 = vmatprep.subr.bf16.mxu0 %v1424_v58  ;;  %v1576_v8 = vunpack.c.l.s8.bf16 %v526_v17  ;;  %v1573_v41 = vunpack.c.l.s8.bf16 %v523_v35  ;;  %v1575_v13 = vunpack.c.l.s8.bf16 %v525_v33  ;;  %v1599_v39 = vunpack.c.h.s8.bf16 %v524_v56  ;;  %v624_v56 = vld [vmem:[%s7354_s12 + $0xb98] sm:$0xff] }
 0x572   : > { %4621 = vmatprep.subr.bf16.mxu1 %v1426_v21  ;;  %v1601_v18 = vunpack.c.h.s8.bf16 %v526_v17  ;;  %v1598_v52 = vunpack.c.h.s8.bf16 %v523_v35  ;;  %v1600_v15 = vunpack.c.h.s8.bf16 %v525_v33  ;;  %v1624_v58 = vunpack.c.l.s8.bf16 %v549_v54  ;;  %v626_v17 = vld [vmem:[%s7354_s12 + $0xba8] sm:$0xff]  ;;  %v623_v35 = vld [vmem:[%s7354_s12 + $0xb90] sm:$0xff]  ;;  %v625_v33 = vld [vmem:[%s7354_s12 + $0xba0] sm:$0xff] }
 0x573   : > { %v1626_v21 = vunpack.c.l.s8.bf16 %v551_v61 }
 0x574   : > { %4450 = vmatpush1.bf16.msra.mxu0 %v1423_v28  ;;  %v1623_v28 = vunpack.c.l.s8.bf16 %v548_v31 }
 0x575   : > { %4622 = vmatpush1.bf16.msra.mxu1 %v1425_v42  ;;  %4451 = vmatprep.subr.bf16.mxu0 %v1449_v5  ;;  %v1625_v42 = vunpack.c.l.s8.bf16 %v550_v4  ;;  %v1649_v5 = vunpack.c.h.s8.bf16 %v549_v54  ;;  %v649_v54 = vld [vmem:[%s7354_s12 + $0xc60] sm:$0xff] }
 0x576   : > { %4623 = vmatprep.subr.bf16.mxu1 %v1451_v27  ;;  %v1651_v27 = vunpack.c.h.s8.bf16 %v551_v61  ;;  %v651_v61 = vld [vmem:[%s7354_s12 + $0xc70] sm:$0xff] }
 0x578   : > { %4452 = vmatpush1.bf16.msra.mxu0 %v1448_v16  ;;  %v1648_v16 = vunpack.c.h.s8.bf16 %v548_v31  ;;  %v648_v31 = vld [vmem:[%s7354_s12 + $0xc58] sm:$0xff] }
 0x579   : > { %4624 = vmatpush1.bf16.msra.mxu1 %v1450_v0  ;;  %4464 = vmatprep.subr.bf16.mxu0 %v1474_v2  ;;  %v1650_v0 = vunpack.c.h.s8.bf16 %v550_v4  ;;  %v1674_v2 = vunpack.c.l.s8.bf16 %v574_v6  ;;  %v650_v4 = vld [vmem:[%s7354_s12 + $0xc68] sm:$0xff] }
 0x57a   : > { %4636 = vmatprep.subr.bf16.mxu1 %v1476_v9  ;;  %v1676_v9 = vunpack.c.l.s8.bf16 %v576_v47 }
 0x57b   : > { %4454 = vmatmul.mubr.bf16.vlgmr.msra.gmra.mrb[20].mxu0 %v7414_v44 }
 0x57c   : > { %4465 = vmatpush1.bf16.msra.mxu0 %v1473_v25  ;;  %4626 = vmatmul.mubr.bf16.vlgmr.msra.gmra.mrb[20].mxu1 %v7414_v44  ;;  %v1673_v25 = vunpack.c.l.s8.bf16 %v573_v62 }
 0x57d   : > { %4637 = vmatpush1.bf16.msra.mxu1 %v1475_v37  ;;  %4466 = vmatprep.subr.bf16.mxu0 %v1499_v43  ;;  %v1675_v37 = vunpack.c.l.s8.bf16 %v575_v48  ;;  %v1699_v43 = vunpack.c.h.s8.bf16 %v574_v6  ;;  %v674_v6 = vld [vmem:[%s7354_s12 + $0xd28] sm:$0xff] }
 0x57e   : > { %4638 = vmatprep.subr.bf16.mxu1 %v1501_v55  ;;  %4496 = vmatprep.mubr.bf16.mxu0 %v7430_v51  ;;  %v1701_v55 = vunpack.c.h.s8.bf16 %v576_v47  ;;  %v676_v47 = vld [vmem:[%s7354_s12 + $0xd38] sm:$0xff] }
 0x57f   : > { %4668 = vmatprep.mubr.bf16.mxu1 %v7430_v51 }
 0x580   : > { %4467 = vmatpush1.bf16.msra.mxu0 %v1498_v23  ;;  %v1698_v23 = vunpack.c.h.s8.bf16 %v573_v62  ;;  %v673_v62 = vld [vmem:[%s7354_s12 + $0xd20] sm:$0xff] }
 0x581   : > { %4639 = vmatpush1.bf16.msra.mxu1 %v1500_v53  ;;  %4468 = vmatprep.subr.bf16.mxu0 %v1524_v38  ;;  %v1700_v53 = vunpack.c.h.s8.bf16 %v575_v48  ;;  %v1724_v38 = vunpack.c.l.s8.bf16 %v599_v30  ;;  %v675_v48 = vld [vmem:[%s7354_s12 + $0xd30] sm:$0xff] }
 0x582   : > { %4640 = vmatprep.subr.bf16.mxu1 %v1526_v60  ;;  %v1726_v60 = vunpack.c.l.s8.bf16 %v601_v10 }
 0x584   : > { %4469 = vmatpush1.bf16.msra.mxu0 %v1523_v40  ;;  %v1723_v40 = vunpack.c.l.s8.bf16 %v598_v1 }
 0x585   : > { %4641 = vmatpush1.bf16.msra.mxu1 %v1525_v59  ;;  %4470 = vmatprep.subr.bf16.mxu0 %v1549_v49  ;;  %v1725_v59 = vunpack.c.l.s8.bf16 %v600_v29  ;;  %v1749_v49 = vunpack.c.h.s8.bf16 %v599_v30  ;;  %v699_v30 = vld [vmem:[%s7354_s12 + $0xdf0] sm:$0xff] }
 0x586   : > { %4642 = vmatprep.subr.bf16.mxu1 %v1551_v14  ;;  %v1751_v14 = vunpack.c.h.s8.bf16 %v601_v10  ;;  %v701_v10 = vld [vmem:[%s7354_s12 + $0xe00] sm:$0xff] }
 0x588   : > { %4471 = vmatpush1.bf16.msra.mxu0 %v1548_v32  ;;  %v1748_v32 = vunpack.c.h.s8.bf16 %v598_v1  ;;  %v698_v1 = vld [vmem:[%s7354_s12 + $0xde8] sm:$0xff] }
 0x589   : > { %4643 = vmatpush1.bf16.msra.mxu1 %v1550_v57  ;;  %4472 = vmatprep.subr.bf16.mxu0 %v1574_v34  ;;  %v1750_v57 = vunpack.c.h.s8.bf16 %v600_v29  ;;  %v1774_v34 = vunpack.c.l.s8.bf16 %v624_v56  ;;  %v700_v29 = vld [vmem:[%s7354_s12 + $0xdf8] sm:$0xff] }
 0x58a   : > { %4644 = vmatprep.subr.bf16.mxu1 %v1576_v8  ;;  %v1776_v8 = vunpack.c.l.s8.bf16 %v626_v17 }
 0x58c   : > { %4473 = vmatpush1.bf16.msra.mxu0 %v1573_v41  ;;  %v1773_v41 = vunpack.c.l.s8.bf16 %v623_v35 }
 0x58d   : > { %4645 = vmatpush1.bf16.msra.mxu1 %v1575_v13  ;;  %4474 = vmatprep.subr.bf16.mxu0 %v1599_v39  ;;  %v1775_v13 = vunpack.c.l.s8.bf16 %v625_v33  ;;  %v1799_v39 = vunpack.c.h.s8.bf16 %v624_v56  ;;  %v724_v56 = vld [vmem:[%s7354_s12 + $0xeb8] sm:$0xff] }
 0x58e   : > { %4646 = vmatprep.subr.bf16.mxu1 %v1601_v18  ;;  %v1801_v18 = vunpack.c.h.s8.bf16 %v626_v17  ;;  %v726_v17 = vld [vmem:[%s7354_s12 + $0xec8] sm:$0xff] }
 0x590   : > { %4475 = vmatpush1.bf16.msra.mxu0 %v1598_v52  ;;  %v1798_v52 = vunpack.c.h.s8.bf16 %v623_v35  ;;  %v723_v35 = vld [vmem:[%s7354_s12 + $0xeb0] sm:$0xff] }
 0x591   : > { %4647 = vmatpush1.bf16.msra.mxu1 %v1600_v15  ;;  %4476 = vmatprep.subr.bf16.mxu0 %v1624_v58  ;;  %v1800_v15 = vunpack.c.h.s8.bf16 %v625_v33  ;;  %v1824_v58 = vunpack.c.l.s8.bf16 %v649_v54  ;;  %v725_v33 = vld [vmem:[%s7354_s12 + $0xec0] sm:$0xff] }
 0x592   : > { %4648 = vmatprep.subr.bf16.mxu1 %v1626_v21  ;;  %v1826_v21 = vunpack.c.l.s8.bf16 %v651_v61 }
 0x594   : > { %4477 = vmatpush1.bf16.msra.mxu0 %v1623_v28  ;;  %v1823_v28 = vunpack.c.l.s8.bf16 %v648_v31 }
 0x595   : > { %4649 = vmatpush1.bf16.msra.mxu1 %v1625_v42  ;;  %4478 = vmatprep.subr.bf16.mxu0 %v1649_v5  ;;  %v1825_v42 = vunpack.c.l.s8.bf16 %v650_v4  ;;  %v1849_v5 = vunpack.c.h.s8.bf16 %v649_v54  ;;  %v749_v54 = vld [vmem:[%s7354_s12 + $0xf80] sm:$0xff] }
 0x596   : > { %4650 = vmatprep.subr.bf16.mxu1 %v1651_v27  ;;  %v1851_v27 = vunpack.c.h.s8.bf16 %v651_v61  ;;  %v751_v61 = vld [vmem:[%s7354_s12 + $0xf90] sm:$0xff] }
 0x598   : > { %4479 = vmatpush1.bf16.msra.mxu0 %v1648_v16  ;;  %v1848_v16 = vunpack.c.h.s8.bf16 %v648_v31  ;;  %v748_v31 = vld [vmem:[%s7354_s12 + $0xf78] sm:$0xff] }
 0x599   : > { %4651 = vmatpush1.bf16.msra.mxu1 %v1650_v0  ;;  %4480 = vmatprep.subr.bf16.mxu0 %v1674_v2  ;;  %v1850_v0 = vunpack.c.h.s8.bf16 %v650_v4  ;;  %v1874_v2 = vunpack.c.l.s8.bf16 %v674_v6  ;;  %v750_v4 = vld [vmem:[%s7354_s12 + $0xf88] sm:$0xff] }
 0x59a   : > { %4652 = vmatprep.subr.bf16.mxu1 %v1676_v9  ;;  %v1876_v9 = vunpack.c.l.s8.bf16 %v676_v47 }
 0x59c   : > { %4481 = vmatpush1.bf16.msra.mxu0 %v1673_v25  ;;  %v1873_v25 = vunpack.c.l.s8.bf16 %v673_v62 }
 0x59d   : > { %4653 = vmatpush1.bf16.msra.mxu1 %v1675_v37  ;;  %4482 = vmatprep.subr.bf16.mxu0 %v1699_v43  ;;  %v1875_v37 = vunpack.c.l.s8.bf16 %v675_v48  ;;  %v1899_v43 = vunpack.c.h.s8.bf16 %v674_v6  ;;  %v774_v6 = vld [vmem:[%s7354_s12 + $0x1048] sm:$0xff] }
 0x59e   : > { %4654 = vmatprep.subr.bf16.mxu1 %v1701_v55  ;;  %v1901_v55 = vunpack.c.h.s8.bf16 %v676_v47  ;;  %v776_v47 = vld [vmem:[%s7354_s12 + $0x1058] sm:$0xff] }
 0x5a0   : > { %4483 = vmatpush1.bf16.msra.mxu0 %v1698_v23  ;;  %v1898_v23 = vunpack.c.h.s8.bf16 %v673_v62  ;;  %v773_v62 = vld [vmem:[%s7354_s12 + $0x1040] sm:$0xff] }
 0x5a1   : > { %4655 = vmatpush1.bf16.msra.mxu1 %v1700_v53  ;;  %4484 = vmatprep.subr.bf16.mxu0 %v1724_v38  ;;  %v1900_v53 = vunpack.c.h.s8.bf16 %v675_v48  ;;  %v1924_v38 = vunpack.c.l.s8.bf16 %v699_v30  ;;  %v775_v48 = vld [vmem:[%s7354_s12 + $0x1050] sm:$0xff] }
 0x5a2   : > { %4656 = vmatprep.subr.bf16.mxu1 %v1726_v60  ;;  %v1926_v60 = vunpack.c.l.s8.bf16 %v701_v10 }
 0x5a4   : > { %4485 = vmatpush1.bf16.msra.mxu0 %v1723_v40  ;;  %v1923_v40 = vunpack.c.l.s8.bf16 %v698_v1 }
 0x5a5   : > { %4657 = vmatpush1.bf16.msra.mxu1 %v1725_v59  ;;  %4486 = vmatprep.subr.bf16.mxu0 %v1749_v49  ;;  %v1925_v59 = vunpack.c.l.s8.bf16 %v700_v29  ;;  %v1949_v49 = vunpack.c.h.s8.bf16 %v699_v30  ;;  %v799_v30 = vld [vmem:[%s7354_s12 + $0x1110] sm:$0xff] }
 0x5a6   : > { %4658 = vmatprep.subr.bf16.mxu1 %v1751_v14  ;;  %v1951_v14 = vunpack.c.h.s8.bf16 %v701_v10  ;;  %v801_v10 = vld [vmem:[%s7354_s12 + $0x1120] sm:$0xff] }
 0x5a8   : > { %4487 = vmatpush1.bf16.msra.mxu0 %v1748_v32  ;;  %v1948_v32 = vunpack.c.h.s8.bf16 %v698_v1  ;;  %v798_v1 = vld [vmem:[%s7354_s12 + $0x1108] sm:$0xff] }
 0x5a9   : > { %4659 = vmatpush1.bf16.msra.mxu1 %v1750_v57  ;;  %4488 = vmatprep.subr.bf16.mxu0 %v1774_v34  ;;  %v1950_v57 = vunpack.c.h.s8.bf16 %v700_v29  ;;  %v1974_v34 = vunpack.c.l.s8.bf16 %v724_v56  ;;  %v800_v29 = vld [vmem:[%s7354_s12 + $0x1118] sm:$0xff] }
 0x5aa   : > { %4660 = vmatprep.subr.bf16.mxu1 %v1776_v8  ;;  %v1976_v8 = vunpack.c.l.s8.bf16 %v726_v17 }
 0x5ac   : > { %4489 = vmatpush1.bf16.msra.mxu0 %v1773_v41  ;;  %v1973_v41 = vunpack.c.l.s8.bf16 %v723_v35 }
 0x5ad   : > { %4661 = vmatpush1.bf16.msra.mxu1 %v1775_v13  ;;  %4490 = vmatprep.subr.bf16.mxu0 %v1799_v39  ;;  %v1975_v13 = vunpack.c.l.s8.bf16 %v725_v33  ;;  %v1999_v39 = vunpack.c.h.s8.bf16 %v724_v56  ;;  %v824_v56 = vld [vmem:[%s7354_s12 + $0x11d8] sm:$0xff] }
 0x5ae   : > { %4662 = vmatprep.subr.bf16.mxu1 %v1801_v18  ;;  %v2001_v18 = vunpack.c.h.s8.bf16 %v726_v17  ;;  %v826_v17 = vld [vmem:[%s7354_s12 + $0x11e8] sm:$0xff] }
 0x5b0   : > { %4491 = vmatpush1.bf16.msra.mxu0 %v1798_v52  ;;  %v1998_v52 = vunpack.c.h.s8.bf16 %v723_v35  ;;  %v823_v35 = vld [vmem:[%s7354_s12 + $0x11d0] sm:$0xff] }
 0x5b1   : > { %4663 = vmatpush1.bf16.msra.mxu1 %v1800_v15  ;;  %4492 = vmatprep.subr.bf16.mxu0 %v1824_v58  ;;  %v2000_v15 = vunpack.c.h.s8.bf16 %v725_v33  ;;  %v2024_v58 = vunpack.c.l.s8.bf16 %v749_v54  ;;  %v825_v33 = vld [vmem:[%s7354_s12 + $0x11e0] sm:$0xff] }
 0x5b2   : > { %4664 = vmatprep.subr.bf16.mxu1 %v1826_v21  ;;  %v2026_v21 = vunpack.c.l.s8.bf16 %v751_v61 }
 0x5b4   : > { %4493 = vmatpush1.bf16.msra.mxu0 %v1823_v28  ;;  %v2023_v28 = vunpack.c.l.s8.bf16 %v748_v31 }
 0x5b5   : > { %4665 = vmatpush1.bf16.msra.mxu1 %v1825_v42  ;;  %4494 = vmatprep.subr.bf16.mxu0 %v1849_v5  ;;  %v2025_v42 = vunpack.c.l.s8.bf16 %v750_v4  ;;  %v2049_v5 = vunpack.c.h.s8.bf16 %v749_v54  ;;  %v849_v54 = vld [vmem:[%s7354_s12 + $0x12a0] sm:$0xff] }
 0x5b6   : > { %4666 = vmatprep.subr.bf16.mxu1 %v1851_v27  ;;  %v2051_v27 = vunpack.c.h.s8.bf16 %v751_v61  ;;  %v851_v61 = vld [vmem:[%s7354_s12 + $0x12b0] sm:$0xff] }
 0x5b8   : > { %4495 = vmatpush1.bf16.msra.mxu0 %v1848_v16  ;;  %v2048_v16 = vunpack.c.h.s8.bf16 %v748_v31  ;;  %v848_v31 = vld [vmem:[%s7354_s12 + $0x1298] sm:$0xff] }
 0x5b9   : > { %4667 = vmatpush1.bf16.msra.mxu1 %v1850_v0  ;;  %4507 = vmatprep.subr.bf16.mxu0 %v1874_v2  ;;  %v2050_v0 = vunpack.c.h.s8.bf16 %v750_v4  ;;  %v2074_v2 = vunpack.c.l.s8.bf16 %v774_v6  ;;  %v850_v4 = vld [vmem:[%s7354_s12 + $0x12a8] sm:$0xff] }
 0x5ba   : > { %4679 = vmatprep.subr.bf16.mxu1 %v1876_v9  ;;  %v2076_v9 = vunpack.c.l.s8.bf16 %v776_v47 }
 0x5bb   : > { %4497 = vmatmul.mubr.bf16.vlgmr.msra.gmra.mrb[20].mxu0 %v7468_v19 }
 0x5bc   : > { %4508 = vmatpush1.bf16.msra.mxu0 %v1873_v25  ;;  %4669 = vmatmul.mubr.bf16.vlgmr.msra.gmra.mrb[20].mxu1 %v7468_v19  ;;  %v2073_v25 = vunpack.c.l.s8.bf16 %v773_v62 }
 0x5bd   : > { %4680 = vmatpush1.bf16.msra.mxu1 %v1875_v37  ;;  %4509 = vmatprep.subr.bf16.mxu0 %v1899_v43  ;;  %v2075_v37 = vunpack.c.l.s8.bf16 %v775_v48  ;;  %v2099_v43 = vunpack.c.h.s8.bf16 %v774_v6  ;;  %v874_v6 = vld [vmem:[%s7354_s12 + $0x1368] sm:$0xff] }
 0x5be   : > { %4681 = vmatprep.subr.bf16.mxu1 %v1901_v55  ;;  %4539 = vmatprep.mubr.bf16.mxu0 %v7484_v26  ;;  %v2101_v55 = vunpack.c.h.s8.bf16 %v776_v47  ;;  %v876_v47 = vld [vmem:[%s7354_s12 + $0x1378] sm:$0xff] }
 0x5bf   : > { %4711 = vmatprep.mubr.bf16.mxu1 %v7484_v26 }
 0x5c0   : > { %4510 = vmatpush1.bf16.msra.mxu0 %v1898_v23  ;;  %v2098_v23 = vunpack.c.h.s8.bf16 %v773_v62  ;;  %v873_v62 = vld [vmem:[%s7354_s12 + $0x1360] sm:$0xff] }
 0x5c1   : > { %4682 = vmatpush1.bf16.msra.mxu1 %v1900_v53  ;;  %4511 = vmatprep.subr.bf16.mxu0 %v1924_v38  ;;  %v2100_v53 = vunpack.c.h.s8.bf16 %v775_v48  ;;  %v2124_v38 = vunpack.c.l.s8.bf16 %v799_v30  ;;  %v875_v48 = vld [vmem:[%s7354_s12 + $0x1370] sm:$0xff] }
 0x5c2   : > { %4683 = vmatprep.subr.bf16.mxu1 %v1926_v60  ;;  %v2126_v60 = vunpack.c.l.s8.bf16 %v801_v10 }
 0x5c4   : > { %4512 = vmatpush1.bf16.msra.mxu0 %v1923_v40  ;;  %v2123_v40 = vunpack.c.l.s8.bf16 %v798_v1 }
 0x5c5   : > { %4684 = vmatpush1.bf16.msra.mxu1 %v1925_v59  ;;  %4513 = vmatprep.subr.bf16.mxu0 %v1949_v49  ;;  %v2125_v59 = vunpack.c.l.s8.bf16 %v800_v29  ;;  %v2149_v49 = vunpack.c.h.s8.bf16 %v799_v30  ;;  %v899_v30 = vld [vmem:[%s7354_s12 + $0x1430] sm:$0xff] }
 0x5c6   : > { %4685 = vmatprep.subr.bf16.mxu1 %v1951_v14  ;;  %v2151_v14 = vunpack.c.h.s8.bf16 %v801_v10  ;;  %v9097_v10 = vld [vmem:[#allocation6_spill] sm:$0xff] }
 0x5c8   : > { %4514 = vmatpush1.bf16.msra.mxu0 %v1948_v32  ;;  %v2148_v32 = vunpack.c.h.s8.bf16 %v798_v1  ;;  %v2324_v1 = vunpack.c.l.s8.bf16 %v899_v30 }
 0x5c9   : > { %4686 = vmatpush1.bf16.msra.mxu1 %v1950_v57  ;;  %4515 = vmatprep.subr.bf16.mxu0 %v1974_v34  ;;  %v2150_v57 = vunpack.c.h.s8.bf16 %v800_v29  ;;  %v2174_v34 = vunpack.c.l.s8.bf16 %v824_v56 }
 0x5ca   : > { %4687 = vmatprep.subr.bf16.mxu1 %v1976_v8  ;;  %v2176_v8 = vunpack.c.l.s8.bf16 %v826_v17 }
 0x5cc   : > { %4516 = vmatpush1.bf16.msra.mxu0 %v1973_v41  ;;  %v2173_v41 = vunpack.c.l.s8.bf16 %v823_v35 }
 0x5cd   : > { %4688 = vmatpush1.bf16.msra.mxu1 %v1975_v13  ;;  %4517 = vmatprep.subr.bf16.mxu0 %v1999_v39  ;;  %v2175_v13 = vunpack.c.l.s8.bf16 %v825_v33  ;;  %v2199_v39 = vunpack.c.h.s8.bf16 %v824_v56  ;;  %v2349_v56 = vunpack.c.h.s8.bf16 %v899_v30 }
 0x5ce   : > { %4689 = vmatprep.subr.bf16.mxu1 %v2001_v18  ;;  %v2201_v18 = vunpack.c.h.s8.bf16 %v826_v17 }
 0x5d0   : > { %4518 = vmatpush1.bf16.msra.mxu0 %v1998_v52  ;;  %v2198_v52 = vunpack.c.h.s8.bf16 %v823_v35 }
 0x5d1   : > { %4690 = vmatpush1.bf16.msra.mxu1 %v2000_v15  ;;  %4519 = vmatprep.subr.bf16.mxu0 %v2024_v58  ;;  %v2200_v15 = vunpack.c.h.s8.bf16 %v825_v33  ;;  %v2224_v58 = vunpack.c.l.s8.bf16 %v849_v54  ;;  %v923_v33 = vld [vmem:[%s7354_s12 + $0x14f0] sm:$0xff] }
 0x5d2   : > { %4691 = vmatprep.subr.bf16.mxu1 %v2026_v21  ;;  %v2226_v21 = vunpack.c.l.s8.bf16 %v851_v61 }
 0x5d4   : > { %4520 = vmatpush1.bf16.msra.mxu0 %v2023_v28  ;;  %v2223_v28 = vunpack.c.l.s8.bf16 %v848_v31 }
 0x5d5   : > { %4692 = vmatpush1.bf16.msra.mxu1 %v2025_v42  ;;  %4521 = vmatprep.subr.bf16.mxu0 %v2049_v5  ;;  %v2225_v42 = vunpack.c.l.s8.bf16 %v850_v4  ;;  %v2249_v5 = vunpack.c.h.s8.bf16 %v849_v54 }
 0x5d6   : > { %4693 = vmatprep.subr.bf16.mxu1 %v2051_v27  ;;  %v2251_v27 = vunpack.c.h.s8.bf16 %v851_v61 }
 0x5d8   : > { %4522 = vmatpush1.bf16.msra.mxu0 %v2048_v16  ;;  %v2248_v16 = vunpack.c.h.s8.bf16 %v848_v31 }
 0x5d9   : > { %4694 = vmatpush1.bf16.msra.mxu1 %v2050_v0  ;;  %4523 = vmatprep.subr.bf16.mxu0 %v2074_v2  ;;  %v2250_v0 = vunpack.c.h.s8.bf16 %v850_v4  ;;  %v2274_v2 = vunpack.c.l.s8.bf16 %v874_v6  ;;  %v948_v4 = vld [vmem:[%s7354_s12 + $0x15b8] sm:$0xff] }
 0x5da   : > { %4695 = vmatprep.subr.bf16.mxu1 %v2076_v9  ;;  %v2276_v9 = vunpack.c.l.s8.bf16 %v876_v47 }
 0x5dc   : > { %4524 = vmatpush1.bf16.msra.mxu0 %v2073_v25  ;;  %v2273_v25 = vunpack.c.l.s8.bf16 %v873_v62 }
 0x5dd   : > { %4696 = vmatpush1.bf16.msra.mxu1 %v2075_v37  ;;  %4525 = vmatprep.subr.bf16.mxu0 %v2099_v43  ;;  %v2275_v37 = vunpack.c.l.s8.bf16 %v875_v48  ;;  %v2299_v43 = vunpack.c.h.s8.bf16 %v874_v6 }
 0x5de   : > { %4697 = vmatprep.subr.bf16.mxu1 %v2101_v55  ;;  %v2301_v55 = vunpack.c.h.s8.bf16 %v876_v47 }
 0x5e0   : > { %4526 = vmatpush1.bf16.msra.mxu0 %v2098_v23  ;;  %v901_v23 = vld [vmem:[%s7354_s12 + $0x1440] sm:$0xff] }
 0x5e1   : > { %4698 = vmatpush1.bf16.msra.mxu1 %v2100_v53  ;;  %4527 = vmatprep.subr.bf16.mxu0 %v2124_v38  ;;  %v2298_v53 = vunpack.c.h.s8.bf16 %v873_v62  ;;  %v2300_v38 = vunpack.c.h.s8.bf16 %v875_v48  ;;  %v2326_v29 = vunpack.c.l.s8.bf16 %v901_v23  ;;  %v2351_v17 = vunpack.c.h.s8.bf16 %v901_v23  ;;  %v974_v23 = vld [vmem:[%s7354_s12 + $0x1688] sm:$0xff] }
 0x5e2   : > { %4699 = vmatprep.subr.bf16.mxu1 %v2126_v60  ;;  %v898_v60 = vld [vmem:[%s7354_s12 + $0x1428] sm:$0xff] }
 0x5e4   : > { %4528 = vmatpush1.bf16.msra.mxu0 %v2123_v40  ;;  %v900_v40 = vld [vmem:[%s7354_s12 + $0x1438] sm:$0xff] }
 0x5e5   : > { %4700 = vmatpush1.bf16.msra.mxu1 %v2125_v59  ;;  %4529 = vmatprep.subr.bf16.mxu0 %v2149_v49  ;;  %v9098_v59 = vld [vmem:[#allocation7_spill] sm:$0xff]  ;;  %v2323_v49 = vunpack.c.l.s8.bf16 %v898_v60  ;;  %v2350_v35 = vunpack.c.h.s8.bf16 %v900_v40 }
 0x5e6   : > { %4701 = vmatprep.subr.bf16.mxu1 %v2151_v14  ;;  %v2325_v14 = vunpack.c.l.s8.bf16 %v900_v40  ;;  %v2448_v40 = vunpack.c.h.s8.bf16 %v948_v4 }
 0x5e8   : > { %4530 = vmatpush1.bf16.msra.mxu0 %v2148_v32  ;;  %v924_v32 = vld [vmem:[%s7354_s12 + $0x14f8] sm:$0xff] }
 0x5e9   : > { %4702 = vmatpush1.bf16.msra.mxu1 %v2150_v57  ;;  %4531 = vmatprep.subr.bf16.mxu0 %v2174_v34  ;;  %v926_v57 = vld [vmem:[%s7354_s12 + $0x1508] sm:$0xff]  ;;  %v2348_v34 = vunpack.c.h.s8.bf16 %v898_v60  ;;  %v2399_v54 = vunpack.c.h.s8.bf16 %v924_v32 }
 0x5ea   : > { %4703 = vmatprep.subr.bf16.mxu1 %v2176_v8  ;;  %v2374_v8 = vunpack.c.l.s8.bf16 %v924_v32  ;;  %v2401_v61 = vunpack.c.h.s8.bf16 %v926_v57  ;;  %v973_v32 = vld [vmem:[%s7354_s12 + $0x1680] sm:$0xff] }
 0x5ec   : > { %4532 = vmatpush1.bf16.msra.mxu0 %v2173_v41  ;;  %v2376_v41 = vunpack.c.l.s8.bf16 %v926_v57 }
 0x5ed   : > { %4704 = vmatpush1.bf16.msra.mxu1 %v2175_v13  ;;  %4533 = vmatprep.subr.bf16.mxu0 %v2199_v39  ;;  %v925_v13 = vld [vmem:[%s7354_s12 + $0x1500] sm:$0xff]  ;;  %v2373_v39 = vunpack.c.l.s8.bf16 %v923_v33 }
 0x5ee   : > { %4705 = vmatprep.subr.bf16.mxu1 %v2201_v18  ;;  %v2375_v18 = vunpack.c.l.s8.bf16 %v925_v13  ;;  %v2400_v31 = vunpack.c.h.s8.bf16 %v925_v13 }
 0x5f0   : > { %4534 = vmatpush1.bf16.msra.mxu0 %v2198_v52  ;;  %v949_v52 = vld [vmem:[%s7354_s12 + $0x15c0] sm:$0xff] }
 0x5f1   : > { %4706 = vmatpush1.bf16.msra.mxu1 %v2200_v15  ;;  %4535 = vmatprep.subr.bf16.mxu0 %v2224_v58  ;;  %v951_v15 = vld [vmem:[%s7354_s12 + $0x15d0] sm:$0xff]  ;;  %v2398_v58 = vunpack.c.h.s8.bf16 %v923_v33 }
 0x5f2   : > { %4707 = vmatprep.subr.bf16.mxu1 %v2226_v21  ;;  %v2424_v21 = vunpack.c.l.s8.bf16 %v949_v52  ;;  %v2451_v30 = vunpack.c.h.s8.bf16 %v951_v15 }
 0x5f4   : > { %4536 = vmatpush1.bf16.msra.mxu0 %v2223_v28 }
 0x5f5   : > { %4708 = vmatpush1.bf16.msra.mxu1 %v2225_v42  ;;  %4537 = vmatprep.subr.bf16.mxu0 %v2249_v5  ;;  %v2426_v42 = vunpack.c.l.s8.bf16 %v951_v15  ;;  %v950_v5 = vld [vmem:[%s7354_s12 + $0x15c8] sm:$0xff]  ;;  %v2499_v15 = vunpack.c.h.s8.bf16 %v974_v23 }
 0x5f6   : > { %4709 = vmatprep.subr.bf16.mxu1 %v2251_v27  ;;  %v2425_v48 = vunpack.c.l.s8.bf16 %v950_v5 }
 0x5f8   : > { %4538 = vmatpush1.bf16.msra.mxu0 %v2248_v16 }
 0x5f9   : > { %4710 = vmatpush1.bf16.msra.mxu1 %v2250_v0  ;;  %4550 = vmatprep.subr.bf16.mxu0 %v2274_v2  ;;  %v2423_v0 = vunpack.c.l.s8.bf16 %v948_v4  ;;  %v999_v4 = vld [vmem:[%s7354_s12 + $0x1750] sm:$0xff] }
 0x5fa   : > { %4722 = vmatprep.subr.bf16.mxu1 %v2276_v9 }
 0x5fb   : > { %4540 = vmatmul.mubr.bf16.vlgmr.msra.gmra.mrb[20].mxu0 %v9097_v10 }
 0x5fc   : > { %4551 = vmatpush1.bf16.msra.mxu0 %v2273_v25  ;;  %4712 = vmatmul.mubr.bf16.vlgmr.msra.gmra.mrb[20].mxu1 %v9097_v10  ;;  %v2449_v25 = vunpack.c.h.s8.bf16 %v949_v52 }
 0x5fd   : > { %4723 = vmatpush1.bf16.msra.mxu1 %v2275_v37  ;;  %4552 = vmatprep.subr.bf16.mxu0 %v2299_v43 }
 0x5fe   : > { %4724 = vmatprep.subr.bf16.mxu1 %v2301_v55  ;;  %4582 = vmatprep.mubr.bf16.mxu0 %v9098_v59 }
 0x5ff   : > { %4754 = vmatprep.mubr.bf16.mxu1 %v9098_v59 }
 0x600   : > { %4553 = vmatpush1.bf16.msra.mxu0 %v2298_v53 }
 0x601   : > { %4725 = vmatpush1.bf16.msra.mxu1 %v2300_v38  ;;  %4554 = vmatprep.subr.bf16.mxu0 %v2324_v1  ;;  %v976_v1 = vld [vmem:[%s7354_s12 + $0x1698] sm:$0xff] }
 0x602   : > { %4726 = vmatprep.subr.bf16.mxu1 %v2326_v29 }
 0x604   : > { %4555 = vmatpush1.bf16.msra.mxu0 %v2323_v49 }
 0x605   : > { %4727 = vmatpush1.bf16.msra.mxu1 %v2325_v14  ;;  %4556 = vmatprep.subr.bf16.mxu0 %v2349_v56  ;;  %v2450_v56 = vunpack.c.h.s8.bf16 %v950_v5 }
 0x606   : > { %4728 = vmatprep.subr.bf16.mxu1 %v2351_v17  ;;  %v2474_v17 = vunpack.c.l.s8.bf16 %v974_v23 }
 0x608   : > { %4557 = vmatpush1.bf16.msra.mxu0 %v2348_v34 }
 0x609   : > { %4729 = vmatpush1.bf16.msra.mxu1 %v2350_v35  ;;  %4558 = vmatprep.subr.bf16.mxu0 %v2374_v8  ;;  %v2476_v35 = vunpack.c.l.s8.bf16 %v976_v1  ;;  %v975_v8 = vld [vmem:[%s7354_s12 + $0x1690] sm:$0xff] }
 0x60a   : > { %4730 = vmatprep.subr.bf16.mxu1 %v2376_v41  ;;  %v2475_v52 = vunpack.c.l.s8.bf16 %v975_v8 }
 0x60c   : > { %4559 = vmatpush1.bf16.msra.mxu0 %v2373_v39 }
 0x60d   : > { %4731 = vmatpush1.bf16.msra.mxu1 %v2375_v18  ;;  %4560 = vmatprep.subr.bf16.mxu0 %v2399_v54  ;;  %v2473_v18 = vunpack.c.l.s8.bf16 %v973_v32 }
 0x60e   : > { %v8778_v28 = vpop.f32.mrb[16].mxu0  ;;  %4732 = vmatprep.subr.bf16.mxu1 %v2401_v61 }
 0x60f   : > { %v8781_v27 = vpop.f32.mrb[16].mxu1  ;;  %v8783_v6 = vpop.f32.mrb[17].mxu0 }
 0x610   : > { %v8785_v47 = vpop.f32.mrb[17].mxu1  ;;  %v4244_v16 = vpop.f32.mrb[18].mxu0  ;;  %4561 = vmatpush1.bf16.msra.mxu0 %v2398_v58 }
 0x611   : > { %v5046_v2 = vadd.f32 %v4244_v16, %v8778_v28  ;;  %v4416_v62 = vpop.f32.mrb[18].mxu1  ;;  %4733 = vmatpush1.bf16.msra.mxu1 %v2400_v31  ;;  %v4246_v9 = vpop.f32.mrb[19].mxu0  ;;  %4562 = vmatprep.subr.bf16.mxu0 %v2424_v21  ;;  %v2501_v21 = vunpack.c.h.s8.bf16 %v976_v1  ;;  %v1001_v16 = vld [vmem:[%s7354_s12 + $0x1760] sm:$0xff] }
 0x612   : > { %v5060_v37 = vadd.f32 %v4416_v62, %v8781_v27  ;;  %v5053_v43 = vadd.f32 %v4246_v9, %v8783_v6  ;;  %v4418_v55 = vpop.f32.mrb[19].mxu1  ;;  %4734 = vmatprep.subr.bf16.mxu1 %v2426_v42  ;;  %v2498_v62 = vunpack.c.h.s8.bf16 %v973_v32  ;;  %v2526_v23 = vunpack.c.l.s8.bf16 %v1001_v16 }
 0x613   : > { %v5047_v53 = vrot.slane %v5046_v2, 4  ;;  %v5067_v38 = vadd.f32 %v4418_v55, %v8785_v47 }
 0x614   : > { %v5061_v60 = vrot.slane %v5060_v37, 4  ;;  %v5054_v29 = vrot.slane %v5053_v43, 4  ;;  %4563 = vmatpush1.bf16.msra.mxu0 %v2423_v0 }
 0x615   : > { %v5048_v49 = vadd.f32 %v5047_v53, %v5046_v2  ;;  %v5068_v14 = vrot.slane %v5067_v38, 4  ;;  %4735 = vmatpush1.bf16.msra.mxu1 %v2425_v48  ;;  %4564 = vmatprep.subr.bf16.mxu0 %v2449_v25  ;;  %v2500_v25 = vunpack.c.h.s8.bf16 %v975_v8  ;;  %v1000_v53 = vld [vmem:[%s7354_s12 + $0x1758] sm:$0xff] }
 0x616   : > { %v5062_v57 = vadd.f32 %v5061_v60, %v5060_v37  ;;  %v5055_v34 = vadd.f32 %v5054_v29, %v5053_v43  ;;  %4736 = vmatprep.subr.bf16.mxu1 %v2451_v30  ;;  %v2524_v37 = vunpack.c.l.s8.bf16 %v999_v4  ;;  %v998_v43 = vld [vmem:[%s7354_s12 + $0x1748] sm:$0xff] }
 0x617   : > { %v5049_v33 = vrot.slane %v5048_v49, 2  ;;  %v5069_v41 = vadd.f32 %v5068_v14, %v5067_v38 }
 0x618   : > { %v5063_v13 = vrot.slane %v5062_v57, 2  ;;  %v5056_v39 = vrot.slane %v5055_v34, 2  ;;  %4565 = vmatpush1.bf16.msra.mxu0 %v2448_v40  ;;  %v2523_v40 = vunpack.c.l.s8.bf16 %v998_v43 }
 0x619   : > { %v5050_v54 = vadd.f32 %v5049_v33, %v5048_v49  ;;  %v5070_v61 = vrot.slane %v5069_v41, 2  ;;  %4737 = vmatpush1.bf16.msra.mxu1 %v2450_v56  ;;  %4566 = vmatprep.subr.bf16.mxu0 %v2474_v17  ;;  %v2525_v56 = vunpack.c.l.s8.bf16 %v1000_v53  ;;  %v2549_v17 = vunpack.c.h.s8.bf16 %v999_v4 }
 0x61a   : > { %v5064_v58 = vadd.f32 %v5063_v13, %v5062_v57  ;;  %v5057_v31 = vadd.f32 %v5056_v39, %v5055_v34  ;;  %4738 = vmatprep.subr.bf16.mxu1 %v2476_v35  ;;  %v2551_v34 = vunpack.c.h.s8.bf16 %v1001_v16  ;;  %v1024_v35 = vld [vmem:[%s7354_s12 + $0x1818] sm:$0xff]  ;;  %v1026_v13 = vld [vmem:[%s7354_s12 + $0x1828] sm:$0xff]  ;;  %v1025_v16 = vld [vmem:[%s7354_s12 + $0x1820] sm:$0xff] }
 0x61b   : > { %v5051_v42 = vrot.slane %v5050_v54, 1  ;;  %v5071_v5 = vadd.f32 %v5070_v61, %v5069_v41  ;;  %v2548_v41 = vunpack.c.h.s8.bf16 %v998_v43  ;;  %v2550_v61 = vunpack.c.h.s8.bf16 %v1000_v53 }
 0x61c   : > { %v5065_v0 = vrot.slane %v5064_v58, 1  ;;  %v5058_v2 = vrot.slane %v5057_v31, 1  ;;  %4567 = vmatpush1.bf16.msra.mxu0 %v2473_v18  ;;  %v2575_v43 = vunpack.c.l.s8.bf16 %v1025_v16  ;;  %v2601_v53 = vunpack.c.h.s8.bf16 %v1026_v13 }
 0x61d   : > { %v5052_v9 = vadd.f32 %v5051_v42, %v5050_v54  ;;  %v5072_v48 = vrot.slane %v5071_v5, 1  ;;  %4739 = vmatpush1.bf16.msra.mxu1 %v2475_v52  ;;  %4568 = vmatprep.subr.bf16.mxu0 %v2499_v15 }
 0x61e   : > { %v5066_v55 = vadd.f32 %v5065_v0, %v5064_v58  ;;  %v5059_v30 = vadd.f32 %v5058_v2, %v5057_v31  ;;  %4740 = vmatprep.subr.bf16.mxu1 %v2501_v21  ;;  %v2574_v31 = vunpack.c.l.s8.bf16 %v1024_v35  ;;  %v1023_v21 = vld [vmem:[%s7354_s12 + $0x1810] sm:$0xff] }
 0x61f   : > { %v8799_v38 = vmul.f32 0.25, %v5052_v9  ;;  %v5073_v1 = vadd.f32 %v5072_v48, %v5071_v5  ;;  %v2576_v5 = vunpack.c.l.s8.bf16 %v1026_v13  ;;  %v2573_v48 = vunpack.c.l.s8.bf16 %v1023_v21 }
 0x620   : > { %v8801_v60 = vmul.f32 0.25, %v5066_v55  ;;  %v8803_v29 = vmul.f32 0.25, %v5059_v30  ;;  %4569 = vmatpush1.bf16.msra.mxu0 %v2498_v62  ;;  %v2599_v55 = vunpack.c.h.s8.bf16 %v1024_v35 }
 0x621   : > { %v5150_v49 = vsub.f32 %v8778_v28, %v8799_v38  ;;  %v8807_v14 = vmul.f32 0.25, %v5073_v1  ;;  %4741 = vmatpush1.bf16.msra.mxu1 %v2500_v25  ;;  %4570 = vmatprep.subr.bf16.mxu0 %v2524_v37  ;;  %v1049_v1 = vld [vmem:[%s7354_s12 + $0x18e0] sm:$0xff] }
 0x622   : > { %v5152_v32 = vsub.f32 %v8781_v27, %v8801_v60  ;;  %v5151_v57 = vsub.f32 %v8783_v6, %v8803_v29  ;;  %4742 = vmatprep.subr.bf16.mxu1 %v2526_v23  ;;  %v2624_v35 = vunpack.c.l.s8.bf16 %v1049_v1 }
 0x623   : > { %v5200_v8 = vsel %vm4932_vm0, %v5150_v49, 0.0  ;;  %v5153_v33 = vsub.f32 %v8785_v47, %v8807_v14 }
 0x624   : > { %v5250_v39 = vmul.f32 %v5200_v8, %v5200_v8  ;;  %v5202_v18 = vsel %vm4932_vm0, %v5152_v32, 0.0  ;;  %v5201_v54 = vsel %vm4932_vm0, %v5151_v57, 0.0  ;;  %4571 = vmatpush1.bf16.msra.mxu0 %v2523_v40  ;;  %v2598_v57 = vunpack.c.h.s8.bf16 %v1023_v21 }
 0x625   : > { %v5252_v52 = vmul.f32 %v5202_v18, %v5202_v18  ;;  %v5251_v15 = vmul.f32 %v5201_v54, %v5201_v54  ;;  %v5203_v58 = vsel %vm4932_vm0, %v5153_v33, 0.0  ;;  %4743 = vmatpush1.bf16.msra.mxu1 %v2525_v56  ;;  %4572 = vmatprep.subr.bf16.mxu0 %v2549_v17  ;;  %v1051_v56 = vld [vmem:[%s7354_s12 + $0x18f0] sm:$0xff]  ;;  %v2600_v33 = vunpack.c.h.s8.bf16 %v1025_v16  ;;  %v1050_v54 = vld [vmem:[%s7354_s12 + $0x18e8] sm:$0xff] }
 0x626   : > { %v5397_v4 = vrot.slane %v5250_v39, 4  ;;  %v5253_v42 = vmul.f32 %v5203_v58, %v5203_v58  ;;  %4744 = vmatprep.subr.bf16.mxu1 %v2551_v34  ;;  %v2626_v13 = vunpack.c.l.s8.bf16 %v1051_v56 }
 0x627   : > { %v5411_v0 = vrot.slane %v5252_v52, 4  ;;  %v5404_v2 = vrot.slane %v5251_v15, 4 }
 0x628   : > { %v5398_v62 = vadd.f32 %v5397_v4, %v5250_v39  ;;  %v5418_v9 = vrot.slane %v5253_v42, 4  ;;  %4573 = vmatpush1.bf16.msra.mxu0 %v2548_v41  ;;  %v1048_v41 = vld [vmem:[%s7354_s12 + $0x18d8] sm:$0xff] }
 0x629   : > { %v5412_v25 = vadd.f32 %v5411_v0, %v5252_v52  ;;  %v5405_v37 = vadd.f32 %v5404_v2, %v5251_v15  ;;  %4745 = vmatpush1.bf16.msra.mxu1 %v2550_v61  ;;  %4574 = vmatprep.subr.bf16.mxu0 %v2574_v31  ;;  %v2623_v31 = vunpack.c.l.s8.bf16 %v1048_v41  ;;  %v2651_v2 = vunpack.c.h.s8.bf16 %v1051_v56 }
 0x62a   : > { %v5399_v30 = vrot.slane %v5398_v62, 2  ;;  %v5419_v23 = vadd.f32 %v5418_v9, %v5253_v42  ;;  %4746 = vmatprep.subr.bf16.mxu1 %v2576_v5  ;;  %v2625_v42 = vunpack.c.l.s8.bf16 %v1050_v54  ;;  %v2649_v5 = vunpack.c.h.s8.bf16 %v1049_v1 }
 0x62b   : > { %v5413_v40 = vrot.slane %v5412_v25, 2  ;;  %v5406_v49 = vrot.slane %v5405_v37, 2 }
 0x62c   : > { %v5400_v17 = vadd.f32 %v5399_v30, %v5398_v62  ;;  %v5420_v32 = vrot.slane %v5419_v23, 2  ;;  %4575 = vmatpush1.bf16.msra.mxu0 %v2573_v48  ;;  %v377_v62 = vld [vmem:[%s7354_s12 + $0x3e0] sm:$0xff] }
 0x62d   : > { %v5414_v34 = vadd.f32 %v5413_v40, %v5412_v25  ;;  %v5407_v8 = vadd.f32 %v5406_v49, %v5405_v37  ;;  %4747 = vmatpush1.bf16.msra.mxu1 %v2575_v43  ;;  %4576 = vmatprep.subr.bf16.mxu0 %v2599_v55  ;;  %v577_v25 = vld [vmem:[%s7354_s12 + $0xa20] sm:$0xff]  ;;  %v2648_v55 = vunpack.c.h.s8.bf16 %v1048_v41  ;;  %v1277_v1 = vunpack.c.l.s8.bf16 %v377_v62 }
 0x62e   : > { %v5401_v39 = vrot.slane %v5400_v17, 1  ;;  %v5421_v18 = vadd.f32 %v5420_v32, %v5419_v23  ;;  %4748 = vmatprep.subr.bf16.mxu1 %v2601_v53  ;;  %v2650_v53 = vunpack.c.h.s8.bf16 %v1050_v54  ;;  %v277_v40 = vld [vmem:[%s7354_s12 + $0xc0] sm:$0xff]  ;;  %v1677_v56 = vunpack.c.l.s8.bf16 %v577_v25 }
 0x62f   : > { %v5415_v61 = vrot.slane %v5414_v34, 1  ;;  %v5408_v52 = vrot.slane %v5407_v8, 1  ;;  %v1077_v32 = vunpack.c.l.s8.bf16 %v277_v40  ;;  %v1102_v41 = vunpack.c.h.s8.bf16 %v277_v40 }
 0x630   : > { %v5402_v15 = vadd.f32 %v5401_v39, %v5400_v17  ;;  %v5422_v58 = vrot.slane %v5421_v18, 1  ;;  %4577 = vmatpush1.bf16.msra.mxu0 %v2598_v57  ;;  %v477_v17 = vld [vmem:[%s7354_s12 + $0x700] sm:$0xff] }
 0x631   : > { %v5416_v21 = vadd.f32 %v5415_v61, %v5414_v34  ;;  %v5409_v4 = vadd.f32 %v5408_v52, %v5407_v8  ;;  %4749 = vmatpush1.bf16.msra.mxu1 %v2600_v33  ;;  %4578 = vmatprep.subr.bf16.mxu0 %v2624_v35  ;;  %v1477_v57 = vunpack.c.l.s8.bf16 %v477_v17  ;;  %v1302_v34 = vunpack.c.h.s8.bf16 %v377_v62  ;;  %v402_v33 = vld [vmem:[%s7354_s12 + $0x4a8] sm:$0xff] }
 0x632   : > { %v5475_v16 = vmul.f32 0.25, %v5402_v15  ;;  %v5423_v0 = vadd.f32 %v5422_v58, %v5421_v18  ;;  %4750 = vmatprep.subr.bf16.mxu1 %v2626_v13  ;;  %v1702_v8 = vunpack.c.h.s8.bf16 %v577_v25  ;;  %v602_v35 = vld [vmem:[%s7354_s12 + $0xae8] sm:$0xff]  ;;  %v1502_v39 = vunpack.c.h.s8.bf16 %v477_v17  ;;  %v327_v25 = vld [vmem:[%s7354_s12 + $0x250] sm:$0xff] }
 0x633   : > { %v5477_v9 = vmul.f32 0.25, %v5416_v21  ;;  %v5476_v48 = vmul.f32 0.25, %v5409_v4  ;;  %v1327_v18 = vunpack.c.l.s8.bf16 %v402_v33  ;;  %v302_v13 = vld [vmem:[%s7354_s12 + $0x188] sm:$0xff]  ;;  %v1727_v54 = vunpack.c.l.s8.bf16 %v602_v35 }
 0x634   : > { %v5504_v37 = vadd.f32 1e-05, %v5475_v16  ;;  %v5478_v43 = vmul.f32 0.25, %v5423_v0  ;;  %4579 = vmatpush1.bf16.msra.mxu0 %v2623_v31  ;;  %v502_v61 = vld [vmem:[%s7354_s12 + $0x7c8] sm:$0xff]  ;;  %v1127_v15 = vunpack.c.l.s8.bf16 %v302_v13  ;;  %v1352_v21 = vunpack.c.h.s8.bf16 %v402_v33  ;;  %v552_v33 = vld [vmem:[%s7354_s12 + $0x958] sm:$0xff] }
 0x635   : > { %v5506_v30 = vadd.f32 1e-05, %v5477_v9  ;;  %v5505_v23 = vadd.f32 1e-05, %v5476_v48  ;;  %4751 = vmatpush1.bf16.msra.mxu1 %v2625_v42  ;;  %4580 = vmatprep.subr.bf16.mxu0 %v2649_v5  ;;  %v1527_v31 = vunpack.c.l.s8.bf16 %v502_v61  ;;  %v1752_v42 = vunpack.c.h.s8.bf16 %v602_v35  ;;  %v427_v5 = vld [vmem:[%s7354_s12 + $0x570] sm:$0xff] }
 0x636   : > { %7146 = vrsqrt.f32 %v5504_v37  ;;  %v5507_v49 = vadd.f32 1e-05, %v5478_v43  ;;  %4752 = vmatprep.subr.bf16.mxu1 %v2651_v2  ;;  %v1552_v9 = vunpack.c.h.s8.bf16 %v502_v61  ;;  %v1377_v48 = vunpack.c.l.s8.bf16 %v427_v5 }
 0x637   : > { %7148 = vrsqrt.f32 %v5506_v30  ;;  %v1202_v17 = vunpack.c.h.s8.bf16 %v327_v25 }
 0x638   : > { %7150 = vrsqrt.f32 %v5505_v23  ;;  %4581 = vmatpush1.bf16.msra.mxu0 %v2648_v55  ;;  %v527_v55 = vld [vmem:[%s7354_s12 + $0x890] sm:$0xff]  ;;  %v1177_v23 = vunpack.c.l.s8.bf16 %v327_v25 }
 0x639   : > { %7152 = vrsqrt.f32 %v5507_v49  ;;  %4753 = vmatpush1.bf16.msra.mxu1 %v2650_v53  ;;  %6835 = vmatprep.subr.bf16.mxu0 %v1277_v1  ;;  %v1577_v53 = vunpack.c.l.s8.bf16 %v527_v55  ;;  %v1402_v1 = vunpack.c.h.s8.bf16 %v427_v5  ;;  %v452_v49 = vld [vmem:[%s7354_s12 + $0x638] sm:$0xff] }
 0x63a   : > { %6857 = vmatprep.subr.bf16.mxu1 %v1677_v56  ;;  %v652_v56 = vld [vmem:[%s7354_s12 + $0xc78] sm:$0xff] }
 0x63b   : > { %4583 = vmatmul.mubr.bf16.vlgmr.msra.gmra.mrb[20].mxu0 %v7576_v50 }
 0x63c   : > { %4755 = vmatmul.mubr.bf16.vlgmr.msra.gmra.mrb[20].mxu1 %v7576_v50  ;;  %6836 = vmatpush3.bf16.msra.mxu0 %v1077_v32  ;;  %v1602_v32 = vunpack.c.h.s8.bf16 %v527_v55 }
 0x63d   : > { %6858 = vmatpush3.bf16.msra.mxu1 %v1477_v57  ;;  %6837 = vmatprep.subr.bf16.mxu0 %v1302_v34  ;;  %v1427_v57 = vunpack.c.l.s8.bf16 %v452_v49  ;;  %v352_v34 = vld [vmem:[%s7354_s12 + $0x318] sm:$0xff] }
 0x63e   : > { %6859 = vmatprep.subr.bf16.mxu1 %v1702_v8  ;;  %4797 = vmatprep.mubr.bf16.mxu0 %v7384_v36  ;;  %v627_v36 = vld [vmem:[%s7354_s12 + $0xbb0] sm:$0xff]  ;;  %v1827_v8 = vunpack.c.l.s8.bf16 %v652_v56  ;;  %v1227_v35 = vunpack.c.l.s8.bf16 %v352_v34  ;;  %v1252_v61 = vunpack.c.h.s8.bf16 %v352_v34 }
 0x63f   : > { %4838 = vmatprep.mubr.bf16.mxu1 %v7430_v51  ;;  %v1152_v51 = vunpack.c.h.s8.bf16 %v302_v13  ;;  %v1777_v43 = vunpack.c.l.s8.bf16 %v627_v36  ;;  %v1802_v40 = vunpack.c.h.s8.bf16 %v627_v36  ;;  %v777_v13 = vld [vmem:[%s7354_s12 + $0x1060] sm:$0xff]  ;;  %v1002_v36 = vld [vmem:[%s7354_s12 + $0x1768] sm:$0xff] }
 0x640   : > { %v7147_v52 = vpop.eup %7146  ;;  %6838 = vmatpush3.bf16.msra.mxu0 %v1102_v41  ;;  %v1627_v41 = vunpack.c.l.s8.bf16 %v552_v33  ;;  %v2102_v5 = vunpack.c.h.s8.bf16 %v777_v13  ;;  %v2527_v25 = vunpack.c.l.s8.bf16 %v1002_v36 }
 0x641   : > { %v7149_v58 = vpop.eup %7148  ;;  %6860 = vmatpush3.bf16.msra.mxu1 %v1502_v39  ;;  %6839 = vmatprep.subr.bf16.mxu0 %v1327_v18  ;;  %v1452_v39 = vunpack.c.h.s8.bf16 %v452_v49  ;;  %v1852_v18 = vunpack.c.h.s8.bf16 %v652_v56  ;;  %v727_v49 = vld [vmem:[%s7354_s12 + $0xed0] sm:$0xff] }
 0x642   : > { %v7151_v4 = vpop.eup %7150  ;;  %6861 = vmatprep.subr.bf16.mxu1 %v1727_v54  ;;  %v977_v54 = vld [vmem:[%s7354_s12 + $0x16a0] sm:$0xff] }
 0x643   : > { %v7153_v16 = vpop.eup %7152  ;;  %v5661_v0 = vcombine.low %v7147_v52, %v7151_v4  ;;  %v1652_v52 = vunpack.c.h.s8.bf16 %v552_v33  ;;  %v852_v33 = vld [vmem:[%s7354_s12 + $0x12b8] sm:$0xff] }
 0x644   : > { %v5662_v2 = vcombine.low %v7149_v58, %v7153_v16  ;;  %6840 = vmatpush3.bf16.msra.mxu0 %v1127_v15  ;;  %v2077_v15 = vunpack.c.l.s8.bf16 %v777_v13  ;;  %v677_v58 = vld [vmem:[%s7354_s12 + $0xd40] sm:$0xff]  ;;  %v2502_v16 = vunpack.c.h.s8.bf16 %v977_v54  ;;  %v752_v13 = vld [vmem:[%s7354_s12 + $0xf98] sm:$0xff] }
 0x645   : > { %v8846_v62 = vrot.slane %v5661_v0, %v7770_v3  ;;  %6862 = vmatpush3.bf16.msra.mxu1 %v1527_v31  ;;  %6841 = vmatprep.subr.bf16.mxu0 %v1352_v21  ;;  %v2477_v31 = vunpack.c.l.s8.bf16 %v977_v54  ;;  %v877_v21 = vld [vmem:[%s7354_s12 + $0x1380] sm:$0xff]  ;;  %v1877_v4 = vunpack.c.l.s8.bf16 %v677_v58  ;;  %v802_v0 = vld [vmem:[%s7354_s12 + $0x1128] sm:$0xff] }
 0x646   : > { %v8850_v37 = vrot.slane %v5662_v2, %v7770_v3  ;;  %6863 = vmatprep.subr.bf16.mxu1 %v1752_v42  ;;  %v2277_v42 = vunpack.c.l.s8.bf16 %v877_v21  ;;  %v1902_v2 = vunpack.c.h.s8.bf16 %v677_v58  ;;  %v2152_v55 = vunpack.c.h.s8.bf16 %v802_v0 }
 0x647   : > { %v2252_v58 = vunpack.c.h.s8.bf16 %v852_v33 }
 0x648   : > { %v5693_v30 = vcombine.low %v8846_v62, %v8850_v37  ;;  %6842 = vmatpush3.bf16.msra.mxu0 %v1152_v51  ;;  %v2302_v51 = vunpack.c.h.s8.bf16 %v877_v21  ;;  %v2052_v21 = vunpack.c.h.s8.bf16 %v752_v13 }
 0x649   : > { %6864 = vmatpush3.bf16.msra.mxu1 %v1552_v9  ;;  %6843 = vmatprep.subr.bf16.mxu0 %v1377_v48  ;;  %v2127_v9 = vunpack.c.l.s8.bf16 %v802_v0  ;;  %v702_v48 = vld [vmem:[%s7354_s12 + $0xe08] sm:$0xff] }
 0x64a   : > { %6865 = vmatprep.subr.bf16.mxu1 %v1777_v43  ;;  %v902_v43 = vld [vmem:[%s7354_s12 + $0x1448] sm:$0xff] }
 0x64c   : > { %6844 = vmatpush3.bf16.msra.mxu0 %v1177_v23  ;;  %v2552_v23 = vunpack.c.h.s8.bf16 %v1002_v36 }
 0x64d   : > { %6866 = vmatpush3.bf16.msra.mxu1 %v1577_v53  ;;  %6845 = vmatprep.subr.bf16.mxu0 %v1402_v1  ;;  %v827_v53 = vld [vmem:[%s7354_s12 + $0x11f0] sm:$0xff] }
 0x64e   : > { %6867 = vmatprep.subr.bf16.mxu1 %v1802_v40  ;;  %v1027_v1 = vld [vmem:[%s7354_s12 + $0x1830] sm:$0xff]  ;;  %v1952_v40 = vunpack.c.h.s8.bf16 %v702_v48  ;;  %v2202_v34 = vunpack.c.h.s8.bf16 %v827_v53 }
 0x64f   : > { %v2577_v56 = vunpack.c.l.s8.bf16 %v1027_v1 }
 0x650   : > { %6846 = vmatpush3.bf16.msra.mxu0 %v1202_v17  ;;  %v927_v17 = vld [vmem:[%s7354_s12 + $0x1510] sm:$0xff] }
 0x651   : > { %6868 = vmatpush3.bf16.msra.mxu1 %v1602_v32  ;;  %6847 = vmatprep.subr.bf16.mxu0 %v1427_v57  ;;  %v1977_v32 = vunpack.c.l.s8.bf16 %v727_v49  ;;  %v2377_v57 = vunpack.c.l.s8.bf16 %v927_v17 }
 0x652   : > { %6869 = vmatprep.subr.bf16.mxu1 %v1827_v8  ;;  %v2602_v8 = vunpack.c.h.s8.bf16 %v1027_v1 }
 0x654   : > { %6848 = vmatpush3.bf16.msra.mxu0 %v1227_v35  ;;  %v1052_v35 = vld [vmem:[%s7354_s12 + $0x18f8] sm:$0xff] }
 0x655   : > { %6870 = vmatpush3.bf16.msra.mxu1 %v1627_v41  ;;  %6849 = vmatprep.subr.bf16.mxu0 %v1452_v39  ;;  %v2002_v41 = vunpack.c.h.s8.bf16 %v727_v49  ;;  %v2402_v39 = vunpack.c.h.s8.bf16 %v927_v17  ;;  %v2627_v54 = vunpack.c.l.s8.bf16 %v1052_v35 }
 0x656   : > { %6871 = vmatprep.subr.bf16.mxu1 %v1852_v18  ;;  %v2227_v18 = vunpack.c.l.s8.bf16 %v852_v33 }
 0x658   : > { %6850 = vmatpush3.bf16.msra.mxu0 %v1252_v61  ;;  %v952_v61 = vld [vmem:[%s7354_s12 + $0x15d8] sm:$0xff]  ;;  %s6834_s12 = smul.u32 (%p9099_p9), 100, %s7280_s19 }
 0x659   : > { %6872 = vmatpush3.bf16.msra.mxu1 %v1652_v52  ;;  %6879 = vmatprep.subr.bf16.mxu0 %v2077_v15  ;;  %v2027_v52 = vunpack.c.l.s8.bf16 %v752_v13  ;;  %v2427_v15 = vunpack.c.l.s8.bf16 %v952_v61 }
 0x65a   : > { %6901 = vmatprep.subr.bf16.mxu1 %v2477_v31  ;;  %v2652_v31 = vunpack.c.h.s8.bf16 %v1052_v35  ;;  %s9020_s15 = scalar_lea.vmem (%p9099_p9), %s9085_s4, %s6834_s12 }
 0x65b   : > { %4798 = vmatmul.mubr.bf16.vlgmr.msra.gmra.mrb[24].mxu0 %v7414_v44  ;;  %v1927_v44 = vunpack.c.l.s8.bf16 %v702_v48  ;;  %6620 = vst [vmem:[%s9020_s15 + $0x10] sm:$0xff] (%p9099_p9), %v6619_v46 }
 0x65c   : > { %4839 = vmatmul.mubr.bf16.vlgmr.msra.gmra.mrb[24].mxu1 %v7468_v19  ;;  %6880 = vmatpush3.bf16.msra.mxu0 %v1877_v4  ;;  %v2327_v19 = vunpack.c.l.s8.bf16 %v902_v43  ;;  %v2452_v4 = vunpack.c.h.s8.bf16 %v952_v61 }
 0x65d   : > { %6902 = vmatpush3.bf16.msra.mxu1 %v2277_v42  ;;  %6881 = vmatprep.subr.bf16.mxu0 %v2102_v5 }
 0x65e   : > { %6903 = vmatprep.subr.bf16.mxu1 %v2502_v16  ;;  %4879 = vmatprep.mubr.bf16.mxu0 %v7484_v26  ;;  %v2352_v26 = vunpack.c.h.s8.bf16 %v902_v43 }
 0x65f   : > { %4920 = vmatprep.mubr.bf16.mxu1 %v9098_v59  ;;  %v2177_v59 = vunpack.c.l.s8.bf16 %v827_v53 }
 0x660   : > { %6882 = vmatpush3.bf16.msra.mxu0 %v1902_v2 }
 0x661   : > { %6904 = vmatpush3.bf16.msra.mxu1 %v2302_v51  ;;  %6883 = vmatprep.subr.bf16.mxu0 %v2127_v9 }
 0x662   : > { %6905 = vmatprep.subr.bf16.mxu1 %v2527_v25 }
 0x664   : > { %6884 = vmatpush3.bf16.msra.mxu0 %v1927_v44 }
 0x665   : > { %6906 = vmatpush3.bf16.msra.mxu1 %v2327_v19  ;;  %6885 = vmatprep.subr.bf16.mxu0 %v2152_v55 }
 0x666   : > { %6907 = vmatprep.subr.bf16.mxu1 %v2552_v23 }
 0x668   : > { %6886 = vmatpush3.bf16.msra.mxu0 %v1952_v40 }
 0x669   : > { %6908 = vmatpush3.bf16.msra.mxu1 %v2352_v26  ;;  %6887 = vmatprep.subr.bf16.mxu0 %v2177_v59 }
 0x66a   : > { %6909 = vmatprep.subr.bf16.mxu1 %v2577_v56 }
 0x66c   : > { %6888 = vmatpush3.bf16.msra.mxu0 %v1977_v32 }
 0x66d   : > { %6910 = vmatpush3.bf16.msra.mxu1 %v2377_v57  ;;  %6889 = vmatprep.subr.bf16.mxu0 %v2202_v34 }
 0x66e   : > { %6911 = vmatprep.subr.bf16.mxu1 %v2602_v8 }
 0x670   : > { %6890 = vmatpush3.bf16.msra.mxu0 %v2002_v41 }
 0x671   : > { %6912 = vmatpush3.bf16.msra.mxu1 %v2402_v39  ;;  %6891 = vmatprep.subr.bf16.mxu0 %v2227_v18 }
 0x672   : > { %6913 = vmatprep.subr.bf16.mxu1 %v2627_v54 }
 0x674   : > { %6892 = vmatpush3.bf16.msra.mxu0 %v2027_v52 }
 0x675   : > { %6914 = vmatpush3.bf16.msra.mxu1 %v2427_v15  ;;  %6893 = vmatprep.subr.bf16.mxu0 %v2252_v58 }
 0x676   : > { %6915 = vmatprep.subr.bf16.mxu1 %v2652_v31 }
 0x678   : > { %6894 = vmatpush3.bf16.msra.mxu0 %v2052_v21 }
 0x679   : > { %6916 = vmatpush3.bf16.msra.mxu1 %v2452_v4 }
 0x67b   : > { %4880 = vmatmul.mubr.bf16.vlgmr.msra.gmra.mrb[28].mxu0 %v9097_v10 }
 0x67c   : > { %4921 = vmatmul.mubr.bf16.vlgmr.msra.gmra.mrb[28].mxu1 %v7576_v50 }
 0x70e   : > { %v8881_v42 = vpop.f32.mrb[20].mxu0 }
 0x70f   : > { %v8883_v5 = vpop.f32.mrb[20].mxu1  ;;  %v8885_v16 = vpop.f32.mrb[21].mxu0 }
 0x710   : > { %v8887_v0 = vpop.f32.mrb[21].mxu1  ;;  %v4588_v36 = vpop.f32.mrb[22].mxu0 }
 0x711   : > { %v5074_v2 = vadd.f32 %v4588_v36, %v8881_v42  ;;  %v4760_v51 = vpop.f32.mrb[22].mxu1  ;;  %v4590_v9 = vpop.f32.mrb[23].mxu0 }
 0x712   : > { %v5088_v48 = vadd.f32 %v4760_v51, %v8883_v5  ;;  %v5081_v25 = vadd.f32 %v4590_v9, %v8885_v16  ;;  %v4762_v10 = vpop.f32.mrb[23].mxu1 }
 0x713   : > { %v5075_v43 = vrot.slane %v5074_v2, 4  ;;  %v5095_v50 = vadd.f32 %v4762_v10, %v8887_v0 }
 0x714   : > { %v5089_v44 = vrot.slane %v5088_v48, 4  ;;  %v5082_v19 = vrot.slane %v5081_v25, 4 }
 0x715   : > { %v5076_v55 = vadd.f32 %v5075_v43, %v5074_v2  ;;  %v5096_v23 = vrot.slane %v5095_v50, 4 }
 0x716   : > { %v5090_v53 = vadd.f32 %v5089_v44, %v5088_v48  ;;  %v5083_v1 = vadd.f32 %v5082_v19, %v5081_v25 }
 0x717   : > { %v5077_v40 = vrot.slane %v5076_v55, 2  ;;  %v5097_v26 = vadd.f32 %v5096_v23, %v5095_v50 }
 0x718   : > { %v5091_v59 = vrot.slane %v5090_v53, 2  ;;  %v5084_v49 = vrot.slane %v5083_v1, 2 }
 0x719   : > { %v5078_v56 = vadd.f32 %v5077_v40, %v5076_v55  ;;  %v5098_v17 = vrot.slane %v5097_v26, 2 }
 0x71a   : > { %v5092_v32 = vadd.f32 %v5091_v59, %v5090_v53  ;;  %v5085_v57 = vadd.f32 %v5084_v49, %v5083_v1 }
 0x71b   : > { %v5079_v34 = vrot.slane %v5078_v56, 1  ;;  %v5099_v8 = vadd.f32 %v5098_v17, %v5097_v26 }
 0x71c   : > { %v5093_v33 = vrot.slane %v5092_v32, 1  ;;  %v5086_v35 = vrot.slane %v5085_v57, 1 }
 0x71d   : > { %v5080_v41 = vadd.f32 %v5079_v34, %v5078_v56  ;;  %v5100_v39 = vrot.slane %v5099_v8, 1 }
 0x71e   : > { %v5094_v18 = vadd.f32 %v5093_v33, %v5092_v32  ;;  %v5087_v13 = vadd.f32 %v5086_v35, %v5085_v57 }
 0x71f   : > { %v8893_v54 = vmul.f32 0.25, %v5080_v41  ;;  %v5101_v61 = vadd.f32 %v5100_v39, %v5099_v8 }
 0x720   : > { %v8895_v52 = vmul.f32 0.25, %v5094_v18  ;;  %v8897_v15 = vmul.f32 0.25, %v5087_v13 }
 0x721   : > { %v5154_v58 = vsub.f32 %v8881_v42, %v8893_v54  ;;  %v8901_v31 = vmul.f32 0.25, %v5101_v61 }
 0x722   : > { %v5156_v21 = vsub.f32 %v8883_v5, %v8895_v52  ;;  %v5155_v4 = vsub.f32 %v8885_v16, %v8897_v15 }
 0x723   : > { %v5204_v36 = vsel %vm4932_vm0, %v5154_v58, 0.0  ;;  %v5157_v2 = vsub.f32 %v8887_v0, %v8901_v31 }
 0x724   : > { %v5254_v51 = vmul.f32 %v5204_v36, %v5204_v36  ;;  %v5206_v9 = vsel %vm4932_vm0, %v5156_v21, 0.0  ;;  %v5205_v48 = vsel %vm4932_vm0, %v5155_v4, 0.0 }
 0x725   : > { %v5256_v25 = vmul.f32 %v5206_v9, %v5206_v9  ;;  %v5255_v10 = vmul.f32 %v5205_v48, %v5205_v48  ;;  %v5207_v43 = vsel %vm4932_vm0, %v5157_v2, 0.0 }
 0x726   : > { %v5425_v50 = vrot.slane %v5254_v51, 4  ;;  %v5257_v44 = vmul.f32 %v5207_v43, %v5207_v43 }
 0x727   : > { %v5439_v19 = vrot.slane %v5256_v25, 4  ;;  %v5432_v55 = vrot.slane %v5255_v10, 4 }
 0x728   : > { %v5426_v23 = vadd.f32 %v5425_v50, %v5254_v51  ;;  %v5446_v53 = vrot.slane %v5257_v44, 4 }
 0x729   : > { %v5440_v1 = vadd.f32 %v5439_v19, %v5256_v25  ;;  %v5433_v40 = vadd.f32 %v5432_v55, %v5255_v10 }
 0x72a   : > { %v5427_v26 = vrot.slane %v5426_v23, 2  ;;  %v5447_v59 = vadd.f32 %v5446_v53, %v5257_v44 }
 0x72b   : > { %v5441_v49 = vrot.slane %v5440_v1, 2  ;;  %v5434_v56 = vrot.slane %v5433_v40, 2 }
 0x72c   : > { %v5428_v17 = vadd.f32 %v5427_v26, %v5426_v23  ;;  %v5448_v32 = vrot.slane %v5447_v59, 2 }
 0x72d   : > { %v5442_v57 = vadd.f32 %v5441_v49, %v5440_v1  ;;  %v5435_v34 = vadd.f32 %v5434_v56, %v5433_v40 }
 0x72e   : > { %v5429_v8 = vrot.slane %v5428_v17, 1  ;;  %v5449_v33 = vadd.f32 %v5448_v32, %v5447_v59  ;;  %v6851_v35 = vpop.f32.mrb[24].mxu0 }
 0x72f   : > { %v5443_v41 = vrot.slane %v5442_v57, 1  ;;  %v5436_v39 = vrot.slane %v5435_v34, 1  ;;  %v6873_v18 = vpop.f32.mrb[24].mxu1  ;;  %v6852_v13 = vpop.f32.mrb[25].mxu0 }
 0x730   : > { %v5430_v61 = vadd.f32 %v5429_v8, %v5428_v17  ;;  %v5450_v58 = vrot.slane %v5449_v33, 1  ;;  %v6853_v21 = vadd.f32 %v6852_v13, %v6851_v35  ;;  %v6874_v4 = vpop.f32.mrb[25].mxu1  ;;  %v6854_v36 = vpop.f32.mrb[26].mxu0 }
 0x731   : > { %v5444_v2 = vadd.f32 %v5443_v41, %v5442_v57  ;;  %v5437_v51 = vadd.f32 %v5436_v39, %v5435_v34  ;;  %v6875_v9 = vadd.f32 %v6874_v4, %v6873_v18  ;;  %v6876_v48 = vpop.f32.mrb[26].mxu1  ;;  %v6855_v25 = vpop.f32.mrb[27].mxu0  ;;  %v5701_v18 = vrot.slane %v5693_v30, %v7770_v3 }
 0x732   : > { %v5479_v10 = vmul.f32 0.25, %v5430_v61  ;;  %v5451_v43 = vadd.f32 %v5450_v58, %v5449_v33  ;;  %v6856_v50 = vadd.f32 %v6855_v25, %v6854_v36  ;;  %v6877_v44 = vpop.f32.mrb[27].mxu1  ;;  %v5486_v61 = vld [vmem:[%s7995_s6 + $0x10] sm:$0xff] }
 0x733   : > { %v5481_v19 = vmul.f32 0.25, %v5444_v2  ;;  %v5480_v55 = vmul.f32 0.25, %v5437_v51  ;;  %v8917_v23 = vadd.f32 %v6875_v9, %v6853_v21  ;;  %v6878_v53 = vadd.f32 %v6877_v44, %v6876_v48 }
 0x734   : > { %v5508_v1 = vadd.f32 1e-05, %v5479_v10  ;;  %v5482_v40 = vmul.f32 0.25, %v5451_v43 }
 0x735   : > { %v5510_v26 = vadd.f32 1e-05, %v5481_v19  ;;  %v5509_v59 = vadd.f32 1e-05, %v5480_v55  ;;  %v8919_v49 = vadd.f32 %v6878_v53, %v6856_v50 }
 0x736   : > { %7154 = vrsqrt.f32 %v5508_v1  ;;  %v5511_v56 = vadd.f32 1e-05, %v5482_v40 }
 0x737   : > { %7156 = vrsqrt.f32 %v5510_v26 }
 0x738   : > { %7158 = vrsqrt.f32 %v5509_v59 }
 0x739   : > { %7160 = vrsqrt.f32 %v5511_v56 }
 0x740   : > { %v7155_v17 = vpop.eup %7154 }
 0x741   : > { %v7157_v32 = vpop.eup %7156 }
 0x742   : > { %v7159_v57 = vpop.eup %7158 }
 0x743   : > { %v7161_v34 = vpop.eup %7160  ;;  %v5663_v8 = vcombine.low %v7155_v17, %v7159_v57 }
 0x744   : > { %v5664_v33 = vcombine.low %v7157_v32, %v7161_v34 }
 0x745   : > { %v5685_v35 = vrot.slane %v5663_v8, %v7770_v3 }
 0x746   : > { %v5692_v41 = vrot.slane %v5664_v33, %v7770_v3 }
 0x748   : > { %v5694_v39 = vcombine.low %v5685_v35, %v5692_v41 }
 0x74a   : > { %v5708_v13 = vrot.slane %v5694_v39, %v7770_v3 }
 0x74c   : > { %v5709_v58 = vcombine.low %v5701_v18, %v5708_v13 }
 0x74e   : > { %v5730_v21 = vmul.f32 %v5709_v58, %v5486_v61  ;;  %v6895_v4 = vpop.f32.mrb[28].mxu0 }
 0x74f   : > { %v6917_v36 = vpop.f32.mrb[28].mxu1  ;;  %v6896_v2 = vpop.f32.mrb[29].mxu0 }
 0x750   : > { %v5807_v51 = vrot.slane %v5730_v21, %v8003_v63  ;;  %v5811_v9 = vrot.slane %v5730_v21, %v8006_v7  ;;  %v5815_v48 = vrot.slane %v5730_v21, %v8019_v20  ;;  %v5819_v25 = vrot.slane %v5730_v21, %v8022_v11  ;;  %v6918_v10 = vpop.f32.mrb[29].mxu1  ;;  %v6898_v43 = vpop.f32.mrb[30].mxu0 }
 0x751   : > { %v5823_v62 = vrot.slane %v5730_v21, %v8025_v12  ;;  %v5827_v37 = vrot.slane %v5730_v21, %v8028_v22  ;;  %v5831_v30 = vrot.slane %v5730_v21, %v8034_v24  ;;  %v5835_v50 = vrot.slane %v5730_v21, %v8037_v45  ;;  %v6920_v44 = vpop.f32.mrb[30].mxu1  ;;  %v6899_v19 = vpop.f32.mrb[31].mxu0 }
 0x752   : > { %v5881_v55 = vmul.f32 %v5807_v51, %v8799_v38  ;;  %v5882_v53 = vmul.f32 %v5811_v9, %v8803_v29  ;;  %v5883_v1 = vmul.f32 %v5815_v48, %v8801_v60  ;;  %v5884_v40 = vmul.f32 %v5819_v25, %v8807_v14  ;;  %v6921_v26 = vpop.f32.mrb[31].mxu1 }
 0x753   : > { %v5885_v59 = vmul.f32 %v5823_v62, %v8893_v54  ;;  %v5886_v56 = vmul.f32 %v5827_v37, %v8897_v15  ;;  %v5887_v17 = vmul.f32 %v5831_v30, %v8895_v52  ;;  %v5888_v32 = vmul.f32 %v5835_v50, %v8901_v31 }
 0x754   : > { %v6013_v57 = vcombine.low %v5881_v55, %v5882_v53  ;;  %v6014_v34 = vcombine.low %v5883_v1, %v5884_v40  ;;  %v6100_v8 = vmul.f32 %v5807_v51, %v8778_v28  ;;  %v6101_v38 = vmul.f32 %v5811_v9, %v8783_v6  ;;  %v5734_v51 = vld [vmem:[%s8105_s13 + $0x10] sm:$0xff] }
 0x755   : > { %v6015_v29 = vcombine.low %v5885_v59, %v5886_v56  ;;  %v6016_v33 = vcombine.low %v5887_v17, %v5888_v32  ;;  %v6102_v60 = vmul.f32 %v5815_v48, %v8781_v27  ;;  %v6103_v14 = vmul.f32 %v5819_v25, %v8785_v47 }
 0x756   : > { %v6023_v54 = vrot.slane %v6013_v57, %v7770_v3  ;;  %v6030_v15 = vrot.slane %v6014_v34, %v7770_v3  ;;  %v6104_v52 = vmul.f32 %v5823_v62, %v8881_v42  ;;  %v6105_v31 = vmul.f32 %v5827_v37, %v8885_v16 }
 0x757   : > { %v6037_v35 = vrot.slane %v6015_v29, %v7770_v3  ;;  %v6044_v28 = vrot.slane %v6016_v33, %v7770_v3  ;;  %v6106_v6 = vmul.f32 %v5831_v30, %v8883_v5  ;;  %v6107_v41 = vmul.f32 %v5835_v50, %v8887_v0 }
 0x758   : > { %v6045_v27 = vcombine.low %v6023_v54, %v6030_v15  ;;  %v6897_v39 = vadd.f32 %v6896_v2, %v6895_v4  ;;  %v6919_v47 = vadd.f32 %v6918_v10, %v6917_v36  ;;  %v6900_v18 = vadd.f32 %v6899_v19, %v6898_v43 }
 0x759   : > { %v6046_v13 = vcombine.low %v6037_v35, %v6044_v28  ;;  %v6922_v61 = vadd.f32 %v6921_v26, %v6920_v44 }
 0x75a   : > { %v6053_v58 = vrot.slane %v6045_v27, %v7770_v3  ;;  %v4882_v42 = vadd.f32 %v6897_v39, %v8917_v23  ;;  %v4885_v16 = vadd.f32 %v6900_v18, %v8919_v49 }
 0x75b   : > { %v6060_v21 = vrot.slane %v6046_v13, %v7770_v3 }
 0x75c   : > { %v8962_v9 = vadd.f32 %v6919_v47, %v4882_v42  ;;  %v4926_v5 = vadd.f32 %v6922_v61, %v4885_v16 }
 0x75d   : > { %v6061_v48 = vcombine.low %v6053_v58, %v6060_v21 }
 0x75e   : > { %v5102_v0 = vadd.f32 %v4926_v5, %v8962_v9  ;;  %v5487_v5 = vld [vmem:[%s7995_s6 + $0x18] sm:$0x1] }
 0x75f   : > { %v6082_v4 = vsub.f32 %v5734_v51, %v6061_v48 }
 0x760   : > { %v5103_v36 = vrot.slane %v5102_v0, 4 }
 0x761   : > { %v6205_v2 = vrot.slane %v6082_v4, %v8003_v63  ;;  %v6209_v25 = vrot.slane %v6082_v4, %v8006_v7  ;;  %v6213_v10 = vrot.slane %v6082_v4, %v8019_v20  ;;  %v6217_v23 = vrot.slane %v6082_v4, %v8022_v11 }
 0x762   : > { %v6221_v49 = vrot.slane %v6082_v4, %v8025_v12  ;;  %v6225_v43 = vrot.slane %v6082_v4, %v8028_v22  ;;  %v6229_v62 = vrot.slane %v6082_v4, %v8034_v24  ;;  %v6233_v37 = vrot.slane %v6082_v4, %v8037_v45 }
 0x763   : > { %v6279_v30 = vadd.f32 %v6205_v2, %v6100_v8  ;;  %v6280_v50 = vadd.f32 %v6209_v25, %v6101_v38  ;;  %v6281_v44 = vadd.f32 %v6213_v10, %v6102_v60  ;;  %v6282_v19 = vadd.f32 %v6217_v23, %v6103_v14  ;;  %v5735_v10 = vld [vmem:[%s8105_s13 + $0x18] sm:$0x1] }
 0x764   : > { %v6283_v55 = vadd.f32 %v6221_v49, %v6104_v52  ;;  %v6284_v53 = vadd.f32 %v6225_v43, %v6105_v31  ;;  %v6285_v1 = vadd.f32 %v6229_v62, %v6106_v6  ;;  %v6286_v7 = vadd.f32 %v6233_v37, %v6107_v41 }
 0x765   : > { %v6329_v40 = vmax.f32 %v6279_v30, 0.0  ;;  %v6330_v20 = vmax.f32 %v6280_v50, 0.0  ;;  %v6331_v26 = vmax.f32 %v6281_v44, 0.0  ;;  %v6332_v11 = vmax.f32 %v6282_v19, 0.0  ;;  %v6623_v44 = vld [vmem:[%s7875_s11 + $0x20] sm:$0xff] (%p9099_p9)  ;;  %v6625_v19 = vld [vmem:[%s7875_s11 + $0x28] sm:$0xff] (%p9099_p9) }
 0x766   : > { %v6333_v59 = vmax.f32 %v6283_v55, 0.0  ;;  %v6334_v12 = vmax.f32 %v6284_v53, 0.0  ;;  %v6335_v22 = vmax.f32 %v6285_v1, 0.0  ;;  %v6336_v24 = vmax.f32 %v6286_v7, 0.0  ;;  %v6627_v55 = vld [vmem:[%s7875_s11 + $0x30] sm:$0xff] (%p9099_p9)  ;;  %v6629_v53 = vld [vmem:[%s7875_s11 + $0x38] sm:$0xff] (%p9099_p9) }
 0x767   : > { %v6379_v45 = vsel %vm4932_vm0, %v6329_v40, 0.0  ;;  %v6380_v56 = vsel %vm4932_vm0, %v6330_v20, 0.0  ;;  %v6381_v17 = vsel %vm4932_vm0, %v6331_v26, 0.0  ;;  %v6382_v32 = vsel %vm4932_vm0, %v6332_v11, 0.0  ;;  %6624 = vst [vmem:[%s9020_s15 + $0x20] sm:$0xff] (%p9099_p9), %v6623_v44  ;;  %6626 = vst [vmem:[%s9020_s15 + $0x28] sm:$0xff] (%p9099_p9), %v6625_v19 }
 0x768   : > { %v6383_v57 = vsel %vm4932_vm0, %v6333_v59, 0.0  ;;  %v6384_v34 = vsel %vm4932_vm0, %v6334_v12, 0.0  ;;  %v6385_v8 = vsel %vm4932_vm0, %v6335_v22, 0.0  ;;  %v6386_v38 = vsel %vm4932_vm0, %v6336_v24, 0.0  ;;  %6628 = vst [vmem:[%s9020_s15 + $0x30] sm:$0xff] (%p9099_p9), %v6627_v55  ;;  %6630 = vst [vmem:[%s9020_s15 + $0x38] sm:$0xff] (%p9099_p9), %v6629_v53 }
 0x769   : > { %v6816_v29 = vpack.c.bf16 %v6380_v56, %v6379_v45  ;;  %v6817_v33 = vpack.c.bf16 %v6382_v32, %v6381_v17  ;;  %v6818_v60 = vpack.c.bf16 %v6384_v34, %v6383_v57  ;;  %v6819_v14 = vpack.c.bf16 %v6386_v38, %v6385_v8  ;;  %v6639_v26 = vld [vmem:[%s7875_s11 + $0x64] sm:$0xff] (%p9099_p9)  ;;  %v6641_v11 = vld [vmem:[%s7875_s11 + $0x6c] sm:$0xff] (%p9099_p9)  ;;  %v6643_v59 = vld [vmem:[%s7875_s11 + $0x74] sm:$0xff] (%p9099_p9) }
 0x76a   : > { %v5104_v54 = vadd.f32 %v5103_v36, %v5102_v0  ;;  %6640 = vst [vmem:[%s9020_s15 + $0x190] sm:$0xff] (%p9099_p9), %v6639_v26  ;;  %6642 = vst [vmem:[%s9020_s15 + $0x198] sm:$0xff] (%p9099_p9), %v6641_v11  ;;  %v6645_v12 = vld [vmem:[%s7875_s11 + $0x7c] sm:$0xff] (%p9099_p9)  ;;  %v6647_v22 = vld [vmem:[%s7875_s11 + $0x84] sm:$0xff] (%p9099_p9) }
 0x76b   : > { %6573 = vst [vmem:[%s7875_s11 + $0x40] sm:$0xff] %v6816_v29  ;;  %6574 = vst [vmem:[%s7875_s11 + $0x48] sm:$0xff] %v6817_v33  ;;  %v6649_v24 = vld [vmem:[%s7875_s11 + $0x8c] sm:$0xff] (%p9099_p9)  ;;  %v6651_v45 = vld [vmem:[%s7875_s11 + $0x94] sm:$0xff] (%p9099_p9) }
 0x76c   : > { %6575 = vst [vmem:[%s7875_s11 + $0x50] sm:$0xff] %v6818_v60  ;;  %6576 = vst [vmem:[%s7875_s11 + $0x58] sm:$0xff] %v6819_v14  ;;  %v5105_v15 = vrot.slane %v5104_v54, 2  ;;  %v6653_v56 = vld [vmem:[%s7875_s11 + $0x9c] sm:$0xff] (%p9099_p9)  ;;  %v6655_v17 = vld [vmem:[%s7875_s11 + $0xa4] sm:$0xff] (%p9099_p9) }
 0x76d   : > { %6644 = vst [vmem:[%s9020_s15 + $0x1a0] sm:$0xff] (%p9099_p9), %v6643_v59  ;;  %6646 = vst [vmem:[%s9020_s15 + $0x1a8] sm:$0xff] (%p9099_p9), %v6645_v12  ;;  %v6657_v32 = vld [vmem:[%s7875_s11 + $0xac] sm:$0xff] (%p9099_p9)  ;;  %v6659_v57 = vld [vmem:[%s7875_s11 + $0xb4] sm:$0xff] (%p9099_p9) }
 0x76e   : > { %v5106_v52 = vadd.f32 %v5105_v15, %v5104_v54  ;;  %6648 = vst [vmem:[%s9020_s15 + $0x1b0] sm:$0xff] (%p9099_p9), %v6647_v22  ;;  %6650 = vst [vmem:[%s9020_s15 + $0x1b8] sm:$0xff] (%p9099_p9), %v6649_v24  ;;  %v6661_v34 = vld [vmem:[%s7875_s11 + $0xbc] sm:$0xff] (%p9099_p9)  ;;  %v6803_v38 = vld [vmem:[%s7875_s11 + $0xc4] sm:$0xf] (%p9099_p9) }
 0x76f   : > { %6652 = vst [vmem:[%s9020_s15 + $0x1c0] sm:$0xff] (%p9099_p9), %v6651_v45  ;;  %6654 = vst [vmem:[%s9020_s15 + $0x1c8] sm:$0xff] (%p9099_p9), %v6653_v56 }
 0x770   : > { %v5107_v31 = vrot.slane %v5106_v52, 1  ;;  %6656 = vst [vmem:[%s9020_s15 + $0x1d0] sm:$0xff] (%p9099_p9), %v6655_v17  ;;  %6658 = vst [vmem:[%s9020_s15 + $0x1d8] sm:$0xff] (%p9099_p9), %v6657_v32 }
 0x771   : > { %6660 = vst [vmem:[%s9020_s15 + $0x1e0] sm:$0xff] (%p9099_p9), %v6659_v57  ;;  %6662 = vst [vmem:[%s9020_s15 + $0x1e8] sm:$0xff] (%p9099_p9), %v6661_v34 }
 0x772   : > { %v5108_v35 = vadd.f32 %v5107_v31, %v5106_v52  ;;  %v6631_v1 = vld [vmem:[%s7875_s11 + $0x40] sm:$0xff] (%p9099_p9)  ;;  %v6633_v7 = vld [vmem:[%s7875_s11 + $0x48] sm:$0xff] (%p9099_p9)  ;;  %6804 = vst [vmem:[%s9020_s15 + $0x1f0] sm:$0xf] (%p9099_p9), %v6803_v38 }
 0x773   : > { %6632 = vst [vmem:[%s9020_s15 + $0x40] sm:$0xff] (%p9099_p9), %v6631_v1  ;;  %v6635_v40 = vld [vmem:[%s7875_s11 + $0x50] sm:$0xff] (%p9099_p9)  ;;  %v6637_v20 = vld [vmem:[%s7875_s11 + $0x58] sm:$0xff] (%p9099_p9)  ;;  %6634 = vst [vmem:[%s9020_s15 + $0x48] sm:$0xff] (%p9099_p9), %v6633_v7 }
 0x774   : > { %v5133_v28 = vmul.f32 0.25, %v5108_v35  ;;  %6636 = vst [vmem:[%s9020_s15 + $0x50] sm:$0xff] (%p9099_p9), %v6635_v40  ;;  %6638 = vst [vmem:[%s9020_s15 + $0x58] sm:$0xff] (%p9099_p9), %v6637_v20 }
 0x776   : > { %v5158_v6 = vsub.f32 %v8962_v9, %v5133_v28 }
 0x778   : > { %v5208_v41 = vsel %vm4932_vm0, %v5158_v6, 0.0 }
 0x779   : > { %v5258_v27 = vmul.f32 %v5208_v41, %v5208_v41 }
 0x77b   : > { %v5453_v39 = vrot.slane %v5258_v27, 4 }
 0x77d   : > { %v5454_v47 = vadd.f32 %v5453_v39, %v5258_v27 }
 0x77f   : > { %v5455_v18 = vrot.slane %v5454_v47, 2 }
 0x781   : > { %v5456_v13 = vadd.f32 %v5455_v18, %v5454_v47 }
 0x783   : > { %v5457_v61 = vrot.slane %v5456_v13, 1 }
 0x785   : > { %v5458_v58 = vadd.f32 %v5457_v61, %v5456_v13 }
 0x787   : > { %v5483_v42 = vmul.f32 0.25, %v5458_v58 }
 0x789   : > { %v5512_v16 = vadd.f32 1e-05, %v5483_v42 }
 0x78b   : > { %7162 = vrsqrt.f32 %v5512_v16 }
 0x795   : > { %v7163_v21 = vpop.eup %7162 }
 0x796   : > { %v5716_v51 = vrot.slane %v7163_v21, %v7770_v3 }
 0x798   : > { %v5723_v48 = vrot.slane %v5716_v51, %v7770_v3 }
 0x79a   : > { %v5731_v0 = vmul.f32 %v5723_v48, %v5487_v5 }
 0x79c   : > { %v5839_v4 = vrot.slane %v5731_v0, %v8003_v63 }
 0x79e   : > { %v5889_v36 = vmul.f32 %v5839_v4, %v5133_v28  ;;  %v6108_v2 = vmul.f32 %v5839_v4, %v8962_v9  ;;  %v6621_v9 = vld [vmem:[%s7875_s11 + $0x18] sm:$0xff] (%p9099_p9) }
 0x79f   : > { %6622 = vst [vmem:[%s9020_s15 + $0x18] sm:$0xff] (%p9099_p9), %v6621_v9 }
 0x7a0   : > { %v6068_v25 = vrot.slane %v5889_v36, %v7770_v3 }
 0x7a2   : > { %v6075_v23 = vrot.slane %v6068_v25, %v7770_v3  ;;  %v6615_v3 = vld [vmem:[%s7875_s11] sm:$0xff] (%p9099_p9) }
 0x7a3   : > { %6616 = vst [vmem:[%s9020_s15] sm:$0xff] (%p9099_p9), %v6615_v3 }
 0x7a4   : > { %v6083_v49 = vsub.f32 %v5735_v10, %v6075_v23 }
 0x7a6   : > { %v6237_v43 = vrot.slane %v6083_v49, %v8003_v63  ;;  %v6617_v63 = vld [vmem:[%s7875_s11 + $0x8] sm:$0xff] (%p9099_p9) }
 0x7a7   : > { %6618 = vst [vmem:[%s9020_s15 + $0x8] sm:$0xff] (%p9099_p9), %v6617_v63 }
 0x7a8   : > { %v6287_v62 = vadd.f32 %v6237_v43, %v6108_v2 }
 0x7a9   : > { %6597 = sbr.rel (!%p9099_p9) target bundleno = 1976 (0x7b8), region = 44 }
 0x7aa   : > { %v6337_v37 = vmax.f32 %v6287_v62, 0.0 }
 0x7ac   : > { %v6387_v30 = vsel %vm4932_vm0, %v6337_v37, 0.0 }
 0x7ad   : > { %v6820_v50 = vpack.c.bf16 %v6387_v30, %v6387_v30 }
 0x7af   : > { %6577 = vst [vmem:[%s7875_s11 + $0x60] sm:$0xf] %v6820_v50 }
 0x7b6   : > { %v6801_v8 = vld [vmem:[%s7875_s11 + $0x60] sm:$0xf] }
 0x7b7   : > { %6802 = vst [vmem:[%s9020_s15 + $0x60] sm:$0xf] %v6801_v8 }
 0x7b8 PF: > { %p14_p10 = scmp.ge.s32.totalorder %s7283_s20, 6   ;;  %s9100_s15 = smov %s7220_s16 }
 0x7b9   : > { %s9101_s16 = smov %s7224_s17  ;;  %s9102_s17 = smov %s7293_s23 }
 0x7ba   : > { %s9103_s18 = smov %s7283_s20  ;;  %16 = sbr.rel (!%p14_p10) target bundleno = 3 (0x3), region = 114 }
 0x7c1   :  { %6689 = vsyncpa [#allocation3], 1 }
 0x7c2   :  { %6691 = vsyncpa [#allocation3 + $0x1], 1 }

// kernel: generator_fea_deconv_forward.6
= control target key start
LH: loop header
LB: loop body
LE: loop exit
PB: predicated region body
PF: predicated region fallthrough
CT: control target
= control target key end

     0   :  { %s4287_s15 = smov 0   ;;  %s4289_s16 = smov 0   ;;  %s5283_s0 = inlined_call_operand.vmem [shape: bf16[64,2048], index: 0, kind: input, shape index: {}]   ;;  %s5284_s1 = inlined_call_operand.vmem [shape: bf16[2048,256], index: 1, kind: input, shape index: {}]   ;;  %s5285_s2 = inlined_call_operand.vmem [shape: f32[1,256], index: 2, kind: input, shape index: {}]   ;;  %s5286_s3 = inlined_call_operand.vmem [shape: f32[1,256], index: 3, kind: input, shape index: {}]   ;;  %s5287_s4 = inlined_call_operand.vmem [shape: bf16[64,256], index: 4, kind: output, shape index: {}]  }
   0x1   :  { %s4291_s17 = smov 0  }
   0x2 LB: > { %s4303_s18 = sadd.s32 4294967295, %s4260_s17   ;;  %s4306_s19 = sadd.s32 1, %s4260_s17   ;;  %s4260_s17 = sphi %s4291_s17, %s5291_s17   ;;  %s4256_s16 = sphi %s4289_s16, %s5290_s16   ;;  %s4252_s15 = sphi %s4287_s15, %s5289_s15  }
   0x3   : > { %s39_s20 = ssub.s32 %s4260_s17, %s4306_s19  ;;  %s42_s21 = sadd.s32 1, %s4256_s16 }
   0x4   : > { %p40_p0 = scmp.eq.s32.totalorder %s39_s20, 0  ;;  %p49_p1 = scmp.ne.s32.totalorder %s4256_s16, %s4252_s15 }
   0x5   : > { %p50_p2 = scmp.eq.s32.totalorder %s4260_s17, 0  ;;  %p131_p3 = scmp.eq.s32.totalorder %s4303_s18, 1 }
   0x6   : > { %s4316_s22 = scalar_select %p40_p0, %s4256_s16, %s42_s21  }
   0x7   : > { %p51_p4 = por %p50_p2, %p49_p1  ;;  %p4318_p5 = por %p131_p3, %p49_p1 }
   0x8   : > { %p3523_p6 = scmp.ge.s32.totalorder %s4260_s17, 2 }
   0xa   : > { %156 = sbr.rel (%p3523_p6) target bundleno = 191 (0xbf), region = 20 }
  0x11   : > { %159 = sbr.rel (!%p51_p4) target bundleno = 191 (0xbf), region = 24  ;;  %s161_s24 = sand.u32 (%p51_p4), 1, %s4256_s16  }
  0x12   : > { %s3525_s25 = sshll.u32 (%p51_p4), %s4260_s17, 2  ;;  %s3524_s26 = sshll.u32 (%p51_p4), %s161_s24, 10 }
  0x13   : > { %s4328_s29 = scalar_lea.vmem (%p51_p4), %s5284_s1, %s3525_s25  ;;  %s4332_s30 = scalar_lea.vmem (%p51_p4), [#allocation2], %s3524_s26 }
  0x14   : > { %v181_v0 = vld [vmem:[%s4328_s29] sm:$0xf] (%p51_p4)  ;;  %v183_v1 = vld [vmem:[%s4328_s29 + $0x8] sm:$0xf] (%p51_p4)  ;;  %v185_v2 = vld [vmem:[%s4328_s29 + $0x10] sm:$0xf] (%p51_p4) }
  0x15   : > { %182 = vst [vmem:[%s4332_s30] sm:$0xf] (%p51_p4), %v181_v0  ;;  %184 = vst [vmem:[%s4332_s30 + $0x4] sm:$0xf] (%p51_p4), %v183_v1  ;;  %v187_v3 = vld [vmem:[%s4328_s29 + $0x18] sm:$0xf] (%p51_p4) }
  0x16   : > { %v189_v4 = vld [vmem:[%s4328_s29 + $0x20] sm:$0xf] (%p51_p4)  ;;  %186 = vst [vmem:[%s4332_s30 + $0x8] sm:$0xf] (%p51_p4), %v185_v2  ;;  %188 = vst [vmem:[%s4332_s30 + $0xc] sm:$0xf] (%p51_p4), %v187_v3 }
  0x17   : > { %190 = vst [vmem:[%s4332_s30 + $0x10] sm:$0xf] (%p51_p4), %v189_v4  ;;  %v191_v5 = vld [vmem:[%s4328_s29 + $0x28] sm:$0xf] (%p51_p4)  ;;  %v193_v6 = vld [vmem:[%s4328_s29 + $0x30] sm:$0xf] (%p51_p4) }
  0x18   : > { %v195_v7 = vld [vmem:[%s4328_s29 + $0x38] sm:$0xf]  ;;  %192 = vst [vmem:[%s4332_s30 + $0x14] sm:$0xf] %v191_v5  ;;  %194 = vst [vmem:[%s4332_s30 + $0x18] sm:$0xf] %v193_v6 }
  0x19   : > { %196 = vst [vmem:[%s4332_s30 + $0x1c] sm:$0xf] %v195_v7  ;;  %v197_v8 = vld [vmem:[%s4328_s29 + $0x40] sm:$0xf]  ;;  %v199_v9 = vld [vmem:[%s4328_s29 + $0x48] sm:$0xf] }
  0x1a   : > { %v201_v10 = vld [vmem:[%s4328_s29 + $0x50] sm:$0xf]  ;;  %198 = vst [vmem:[%s4332_s30 + $0x20] sm:$0xf] %v197_v8  ;;  %200 = vst [vmem:[%s4332_s30 + $0x24] sm:$0xf] %v199_v9 }
  0x1b   : > { %202 = vst [vmem:[%s4332_s30 + $0x28] sm:$0xf] %v201_v10  ;;  %v203_v11 = vld [vmem:[%s4328_s29 + $0x58] sm:$0xf]  ;;  %v205_v12 = vld [vmem:[%s4328_s29 + $0x60] sm:$0xf] }
  0x1c   : > { %v207_v13 = vld [vmem:[%s4328_s29 + $0x68] sm:$0xf]  ;;  %204 = vst [vmem:[%s4332_s30 + $0x2c] sm:$0xf] %v203_v11  ;;  %206 = vst [vmem:[%s4332_s30 + $0x30] sm:$0xf] %v205_v12 }
  0x1d   : > { %208 = vst [vmem:[%s4332_s30 + $0x34] sm:$0xf] %v207_v13  ;;  %v209_v14 = vld [vmem:[%s4328_s29 + $0x70] sm:$0xf]  ;;  %v211_v15 = vld [vmem:[%s4328_s29 + $0x78] sm:$0xf] }
  0x1e   : > { %v213_v16 = vld [vmem:[%s4328_s29 + $0x80] sm:$0xf]  ;;  %210 = vst [vmem:[%s4332_s30 + $0x38] sm:$0xf] %v209_v14  ;;  %212 = vst [vmem:[%s4332_s30 + $0x3c] sm:$0xf] %v211_v15 }
  0x1f   : > { %214 = vst [vmem:[%s4332_s30 + $0x40] sm:$0xf] %v213_v16  ;;  %v215_v17 = vld [vmem:[%s4328_s29 + $0x88] sm:$0xf]  ;;  %v217_v18 = vld [vmem:[%s4328_s29 + $0x90] sm:$0xf] }
  0x20   : > { %v219_v19 = vld [vmem:[%s4328_s29 + $0x98] sm:$0xf]  ;;  %216 = vst [vmem:[%s4332_s30 + $0x44] sm:$0xf] %v215_v17  ;;  %218 = vst [vmem:[%s4332_s30 + $0x48] sm:$0xf] %v217_v18 }
  0x21   : > { %220 = vst [vmem:[%s4332_s30 + $0x4c] sm:$0xf] %v219_v19  ;;  %v221_v20 = vld [vmem:[%s4328_s29 + $0xa0] sm:$0xf]  ;;  %v223_v21 = vld [vmem:[%s4328_s29 + $0xa8] sm:$0xf] }
  0x22   : > { %v225_v22 = vld [vmem:[%s4328_s29 + $0xb0] sm:$0xf]  ;;  %222 = vst [vmem:[%s4332_s30 + $0x50] sm:$0xf] %v221_v20  ;;  %224 = vst [vmem:[%s4332_s30 + $0x54] sm:$0xf] %v223_v21 }
  0x23   : > { %226 = vst [vmem:[%s4332_s30 + $0x58] sm:$0xf] %v225_v22  ;;  %v227_v23 = vld [vmem:[%s4328_s29 + $0xb8] sm:$0xf]  ;;  %v229_v24 = vld [vmem:[%s4328_s29 + $0xc0] sm:$0xf] }
  0x24   : > { %v231_v25 = vld [vmem:[%s4328_s29 + $0xc8] sm:$0xf]  ;;  %228 = vst [vmem:[%s4332_s30 + $0x5c] sm:$0xf] %v227_v23  ;;  %230 = vst [vmem:[%s4332_s30 + $0x60] sm:$0xf] %v229_v24 }
  0x25   : > { %232 = vst [vmem:[%s4332_s30 + $0x64] sm:$0xf] %v231_v25  ;;  %v233_v26 = vld [vmem:[%s4328_s29 + $0xd0] sm:$0xf]  ;;  %v235_v27 = vld [vmem:[%s4328_s29 + $0xd8] sm:$0xf] }
  0x26   : > { %v237_v28 = vld [vmem:[%s4328_s29 + $0xe0] sm:$0xf]  ;;  %234 = vst [vmem:[%s4332_s30 + $0x68] sm:$0xf] %v233_v26  ;;  %236 = vst [vmem:[%s4332_s30 + $0x6c] sm:$0xf] %v235_v27 }
  0x27   : > { %238 = vst [vmem:[%s4332_s30 + $0x70] sm:$0xf] %v237_v28  ;;  %v239_v29 = vld [vmem:[%s4328_s29 + $0xe8] sm:$0xf]  ;;  %v241_v30 = vld [vmem:[%s4328_s29 + $0xf0] sm:$0xf] }
  0x28   : > { %v243_v31 = vld [vmem:[%s4328_s29 + $0xf8] sm:$0xf]  ;;  %240 = vst [vmem:[%s4332_s30 + $0x74] sm:$0xf] %v239_v29  ;;  %242 = vst [vmem:[%s4332_s30 + $0x78] sm:$0xf] %v241_v30 }
  0x29   : > { %244 = vst [vmem:[%s4332_s30 + $0x7c] sm:$0xf] %v243_v31  ;;  %v245_v32 = vld [vmem:[%s4328_s29 + $0x100] sm:$0xf]  ;;  %v247_v33 = vld [vmem:[%s4328_s29 + $0x108] sm:$0xf] }
  0x2a   : > { %v249_v34 = vld [vmem:[%s4328_s29 + $0x110] sm:$0xf]  ;;  %246 = vst [vmem:[%s4332_s30 + $0x80] sm:$0xf] %v245_v32  ;;  %248 = vst [vmem:[%s4332_s30 + $0x84] sm:$0xf] %v247_v33 }
  0x2b   : > { %250 = vst [vmem:[%s4332_s30 + $0x88] sm:$0xf] %v249_v34  ;;  %v251_v35 = vld [vmem:[%s4328_s29 + $0x118] sm:$0xf]  ;;  %v253_v36 = vld [vmem:[%s4328_s29 + $0x120] sm:$0xf] }
  0x2c   : > { %v255_v37 = vld [vmem:[%s4328_s29 + $0x128] sm:$0xf]  ;;  %252 = vst [vmem:[%s4332_s30 + $0x8c] sm:$0xf] %v251_v35  ;;  %254 = vst [vmem:[%s4332_s30 + $0x90] sm:$0xf] %v253_v36 }
  0x2d   : > { %256 = vst [vmem:[%s4332_s30 + $0x94] sm:$0xf] %v255_v37  ;;  %v257_v38 = vld [vmem:[%s4328_s29 + $0x130] sm:$0xf]  ;;  %v259_v39 = vld [vmem:[%s4328_s29 + $0x138] sm:$0xf] }
  0x2e   : > { %v261_v40 = vld [vmem:[%s4328_s29 + $0x140] sm:$0xf]  ;;  %258 = vst [vmem:[%s4332_s30 + $0x98] sm:$0xf] %v257_v38  ;;  %260 = vst [vmem:[%s4332_s30 + $0x9c] sm:$0xf] %v259_v39 }
  0x2f   : > { %262 = vst [vmem:[%s4332_s30 + $0xa0] sm:$0xf] %v261_v40  ;;  %v263_v41 = vld [vmem:[%s4328_s29 + $0x148] sm:$0xf]  ;;  %v265_v42 = vld [vmem:[%s4328_s29 + $0x150] sm:$0xf] }
  0x30   : > { %v267_v43 = vld [vmem:[%s4328_s29 + $0x158] sm:$0xf]  ;;  %264 = vst [vmem:[%s4332_s30 + $0xa4] sm:$0xf] %v263_v41  ;;  %266 = vst [vmem:[%s4332_s30 + $0xa8] sm:$0xf] %v265_v42 }
  0x31   : > { %268 = vst [vmem:[%s4332_s30 + $0xac] sm:$0xf] %v267_v43  ;;  %v269_v44 = vld [vmem:[%s4328_s29 + $0x160] sm:$0xf]  ;;  %v271_v45 = vld [vmem:[%s4328_s29 + $0x168] sm:$0xf] }
  0x32   : > { %v273_v46 = vld [vmem:[%s4328_s29 + $0x170] sm:$0xf]  ;;  %270 = vst [vmem:[%s4332_s30 + $0xb0] sm:$0xf] %v269_v44  ;;  %272 = vst [vmem:[%s4332_s30 + $0xb4] sm:$0xf] %v271_v45 }
  0x33   : > { %274 = vst [vmem:[%s4332_s30 + $0xb8] sm:$0xf] %v273_v46  ;;  %v275_v47 = vld [vmem:[%s4328_s29 + $0x178] sm:$0xf]  ;;  %v277_v48 = vld [vmem:[%s4328_s29 + $0x180] sm:$0xf] }
  0x34   : > { %v279_v49 = vld [vmem:[%s4328_s29 + $0x188] sm:$0xf]  ;;  %276 = vst [vmem:[%s4332_s30 + $0xbc] sm:$0xf] %v275_v47  ;;  %278 = vst [vmem:[%s4332_s30 + $0xc0] sm:$0xf] %v277_v48 }
  0x35   : > { %280 = vst [vmem:[%s4332_s30 + $0xc4] sm:$0xf] %v279_v49  ;;  %v281_v50 = vld [vmem:[%s4328_s29 + $0x190] sm:$0xf]  ;;  %v283_v51 = vld [vmem:[%s4328_s29 + $0x198] sm:$0xf] }
  0x36   : > { %v285_v52 = vld [vmem:[%s4328_s29 + $0x1a0] sm:$0xf]  ;;  %282 = vst [vmem:[%s4332_s30 + $0xc8] sm:$0xf] %v281_v50  ;;  %284 = vst [vmem:[%s4332_s30 + $0xcc] sm:$0xf] %v283_v51 }
  0x37   : > { %286 = vst [vmem:[%s4332_s30 + $0xd0] sm:$0xf] %v285_v52  ;;  %v287_v53 = vld [vmem:[%s4328_s29 + $0x1a8] sm:$0xf]  ;;  %v289_v54 = vld [vmem:[%s4328_s29 + $0x1b0] sm:$0xf] }
  0x38   : > { %v291_v55 = vld [vmem:[%s4328_s29 + $0x1b8] sm:$0xf]  ;;  %288 = vst [vmem:[%s4332_s30 + $0xd4] sm:$0xf] %v287_v53  ;;  %290 = vst [vmem:[%s4332_s30 + $0xd8] sm:$0xf] %v289_v54 }
  0x39   : > { %292 = vst [vmem:[%s4332_s30 + $0xdc] sm:$0xf] %v291_v55  ;;  %v293_v56 = vld [vmem:[%s4328_s29 + $0x1c0] sm:$0xf]  ;;  %v295_v57 = vld [vmem:[%s4328_s29 + $0x1c8] sm:$0xf] }
  0x3a   : > { %v297_v58 = vld [vmem:[%s4328_s29 + $0x1d0] sm:$0xf]  ;;  %294 = vst [vmem:[%s4332_s30 + $0xe0] sm:$0xf] %v293_v56  ;;  %296 = vst [vmem:[%s4332_s30 + $0xe4] sm:$0xf] %v295_v57 }
  0x3b   : > { %298 = vst [vmem:[%s4332_s30 + $0xe8] sm:$0xf] %v297_v58  ;;  %v299_v59 = vld [vmem:[%s4328_s29 + $0x1d8] sm:$0xf]  ;;  %v301_v60 = vld [vmem:[%s4328_s29 + $0x1e0] sm:$0xf] }
  0x3c   : > { %v303_v61 = vld [vmem:[%s4328_s29 + $0x1e8] sm:$0xf]  ;;  %300 = vst [vmem:[%s4332_s30 + $0xec] sm:$0xf] %v299_v59  ;;  %302 = vst [vmem:[%s4332_s30 + $0xf0] sm:$0xf] %v301_v60 }
  0x3d   : > { %304 = vst [vmem:[%s4332_s30 + $0xf4] sm:$0xf] %v303_v61  ;;  %v305_v62 = vld [vmem:[%s4328_s29 + $0x1f0] sm:$0xf]  ;;  %v307_v63 = vld [vmem:[%s4328_s29 + $0x1f8] sm:$0xf] }
  0x3e   : > { %v309_v0 = vld [vmem:[%s4328_s29 + $0x200] sm:$0xf]  ;;  %306 = vst [vmem:[%s4332_s30 + $0xf8] sm:$0xf] %v305_v62  ;;  %308 = vst [vmem:[%s4332_s30 + $0xfc] sm:$0xf] %v307_v63 }
  0x3f   : > { %310 = vst [vmem:[%s4332_s30 + $0x100] sm:$0xf] %v309_v0  ;;  %v311_v1 = vld [vmem:[%s4328_s29 + $0x208] sm:$0xf]  ;;  %v313_v2 = vld [vmem:[%s4328_s29 + $0x210] sm:$0xf] }
  0x40   : > { %v315_v3 = vld [vmem:[%s4328_s29 + $0x218] sm:$0xf]  ;;  %312 = vst [vmem:[%s4332_s30 + $0x104] sm:$0xf] %v311_v1  ;;  %314 = vst [vmem:[%s4332_s30 + $0x108] sm:$0xf] %v313_v2 }
  0x41   : > { %316 = vst [vmem:[%s4332_s30 + $0x10c] sm:$0xf] %v315_v3  ;;  %v317_v4 = vld [vmem:[%s4328_s29 + $0x220] sm:$0xf]  ;;  %v319_v5 = vld [vmem:[%s4328_s29 + $0x228] sm:$0xf] }
  0x42   : > { %v321_v6 = vld [vmem:[%s4328_s29 + $0x230] sm:$0xf]  ;;  %318 = vst [vmem:[%s4332_s30 + $0x110] sm:$0xf] %v317_v4  ;;  %320 = vst [vmem:[%s4332_s30 + $0x114] sm:$0xf] %v319_v5 }
  0x43   : > { %322 = vst [vmem:[%s4332_s30 + $0x118] sm:$0xf] %v321_v6  ;;  %v323_v7 = vld [vmem:[%s4328_s29 + $0x238] sm:$0xf]  ;;  %v325_v8 = vld [vmem:[%s4328_s29 + $0x240] sm:$0xf] }
  0x44   : > { %v327_v9 = vld [vmem:[%s4328_s29 + $0x248] sm:$0xf]  ;;  %324 = vst [vmem:[%s4332_s30 + $0x11c] sm:$0xf] %v323_v7  ;;  %326 = vst [vmem:[%s4332_s30 + $0x120] sm:$0xf] %v325_v8 }
  0x45   : > { %328 = vst [vmem:[%s4332_s30 + $0x124] sm:$0xf] %v327_v9  ;;  %v329_v10 = vld [vmem:[%s4328_s29 + $0x250] sm:$0xf]  ;;  %v331_v11 = vld [vmem:[%s4328_s29 + $0x258] sm:$0xf] }
  0x46   : > { %v333_v12 = vld [vmem:[%s4328_s29 + $0x260] sm:$0xf]  ;;  %330 = vst [vmem:[%s4332_s30 + $0x128] sm:$0xf] %v329_v10  ;;  %332 = vst [vmem:[%s4332_s30 + $0x12c] sm:$0xf] %v331_v11 }
  0x47   : > { %334 = vst [vmem:[%s4332_s30 + $0x130] sm:$0xf] %v333_v12  ;;  %v335_v13 = vld [vmem:[%s4328_s29 + $0x268] sm:$0xf]  ;;  %v337_v14 = vld [vmem:[%s4328_s29 + $0x270] sm:$0xf] }
  0x48   : > { %v339_v15 = vld [vmem:[%s4328_s29 + $0x278] sm:$0xf]  ;;  %336 = vst [vmem:[%s4332_s30 + $0x134] sm:$0xf] %v335_v13  ;;  %338 = vst [vmem:[%s4332_s30 + $0x138] sm:$0xf] %v337_v14 }
  0x49   : > { %340 = vst [vmem:[%s4332_s30 + $0x13c] sm:$0xf] %v339_v15  ;;  %v341_v16 = vld [vmem:[%s4328_s29 + $0x280] sm:$0xf]  ;;  %v343_v17 = vld [vmem:[%s4328_s29 + $0x288] sm:$0xf] }
  0x4a   : > { %v345_v18 = vld [vmem:[%s4328_s29 + $0x290] sm:$0xf]  ;;  %342 = vst [vmem:[%s4332_s30 + $0x140] sm:$0xf] %v341_v16  ;;  %344 = vst [vmem:[%s4332_s30 + $0x144] sm:$0xf] %v343_v17 }
  0x4b   : > { %346 = vst [vmem:[%s4332_s30 + $0x148] sm:$0xf] %v345_v18  ;;  %v347_v19 = vld [vmem:[%s4328_s29 + $0x298] sm:$0xf]  ;;  %v349_v20 = vld [vmem:[%s4328_s29 + $0x2a0] sm:$0xf] }
  0x4c   : > { %v351_v21 = vld [vmem:[%s4328_s29 + $0x2a8] sm:$0xf]  ;;  %348 = vst [vmem:[%s4332_s30 + $0x14c] sm:$0xf] %v347_v19  ;;  %350 = vst [vmem:[%s4332_s30 + $0x150] sm:$0xf] %v349_v20 }
  0x4d   : > { %352 = vst [vmem:[%s4332_s30 + $0x154] sm:$0xf] %v351_v21  ;;  %v353_v22 = vld [vmem:[%s4328_s29 + $0x2b0] sm:$0xf]  ;;  %v355_v23 = vld [vmem:[%s4328_s29 + $0x2b8] sm:$0xf] }
  0x4e   : > { %v357_v24 = vld [vmem:[%s4328_s29 + $0x2c0] sm:$0xf]  ;;  %354 = vst [vmem:[%s4332_s30 + $0x158] sm:$0xf] %v353_v22  ;;  %356 = vst [vmem:[%s4332_s30 + $0x15c] sm:$0xf] %v355_v23 }
  0x4f   : > { %358 = vst [vmem:[%s4332_s30 + $0x160] sm:$0xf] %v357_v24  ;;  %v359_v25 = vld [vmem:[%s4328_s29 + $0x2c8] sm:$0xf]  ;;  %v361_v26 = vld [vmem:[%s4328_s29 + $0x2d0] sm:$0xf] }
  0x50   : > { %v363_v27 = vld [vmem:[%s4328_s29 + $0x2d8] sm:$0xf]  ;;  %360 = vst [vmem:[%s4332_s30 + $0x164] sm:$0xf] %v359_v25  ;;  %362 = vst [vmem:[%s4332_s30 + $0x168] sm:$0xf] %v361_v26 }
  0x51   : > { %364 = vst [vmem:[%s4332_s30 + $0x16c] sm:$0xf] %v363_v27  ;;  %v365_v28 = vld [vmem:[%s4328_s29 + $0x2e0] sm:$0xf]  ;;  %v367_v29 = vld [vmem:[%s4328_s29 + $0x2e8] sm:$0xf] }
  0x52   : > { %v369_v30 = vld [vmem:[%s4328_s29 + $0x2f0] sm:$0xf]  ;;  %366 = vst [vmem:[%s4332_s30 + $0x170] sm:$0xf] %v365_v28  ;;  %368 = vst [vmem:[%s4332_s30 + $0x174] sm:$0xf] %v367_v29 }
  0x53   : > { %370 = vst [vmem:[%s4332_s30 + $0x178] sm:$0xf] %v369_v30  ;;  %v371_v31 = vld [vmem:[%s4328_s29 + $0x2f8] sm:$0xf]  ;;  %v373_v32 = vld [vmem:[%s4328_s29 + $0x300] sm:$0xf] }
  0x54   : > { %v375_v33 = vld [vmem:[%s4328_s29 + $0x308] sm:$0xf]  ;;  %372 = vst [vmem:[%s4332_s30 + $0x17c] sm:$0xf] %v371_v31  ;;  %374 = vst [vmem:[%s4332_s30 + $0x180] sm:$0xf] %v373_v32 }
  0x55   : > { %376 = vst [vmem:[%s4332_s30 + $0x184] sm:$0xf] %v375_v33  ;;  %v377_v34 = vld [vmem:[%s4328_s29 + $0x310] sm:$0xf]  ;;  %v379_v35 = vld [vmem:[%s4328_s29 + $0x318] sm:$0xf] }
  0x56   : > { %v381_v36 = vld [vmem:[%s4328_s29 + $0x320] sm:$0xf]  ;;  %378 = vst [vmem:[%s4332_s30 + $0x188] sm:$0xf] %v377_v34  ;;  %380 = vst [vmem:[%s4332_s30 + $0x18c] sm:$0xf] %v379_v35 }
  0x57   : > { %382 = vst [vmem:[%s4332_s30 + $0x190] sm:$0xf] %v381_v36  ;;  %v383_v37 = vld [vmem:[%s4328_s29 + $0x328] sm:$0xf]  ;;  %v385_v38 = vld [vmem:[%s4328_s29 + $0x330] sm:$0xf] }
  0x58   : > { %v387_v39 = vld [vmem:[%s4328_s29 + $0x338] sm:$0xf]  ;;  %384 = vst [vmem:[%s4332_s30 + $0x194] sm:$0xf] %v383_v37  ;;  %386 = vst [vmem:[%s4332_s30 + $0x198] sm:$0xf] %v385_v38 }
  0x59   : > { %388 = vst [vmem:[%s4332_s30 + $0x19c] sm:$0xf] %v387_v39  ;;  %v389_v40 = vld [vmem:[%s4328_s29 + $0x340] sm:$0xf]  ;;  %v391_v41 = vld [vmem:[%s4328_s29 + $0x348] sm:$0xf] }
  0x5a   : > { %v393_v42 = vld [vmem:[%s4328_s29 + $0x350] sm:$0xf]  ;;  %390 = vst [vmem:[%s4332_s30 + $0x1a0] sm:$0xf] %v389_v40  ;;  %392 = vst [vmem:[%s4332_s30 + $0x1a4] sm:$0xf] %v391_v41 }
  0x5b   : > { %394 = vst [vmem:[%s4332_s30 + $0x1a8] sm:$0xf] %v393_v42  ;;  %v395_v43 = vld [vmem:[%s4328_s29 + $0x358] sm:$0xf]  ;;  %v397_v44 = vld [vmem:[%s4328_s29 + $0x360] sm:$0xf] }
  0x5c   : > { %v399_v45 = vld [vmem:[%s4328_s29 + $0x368] sm:$0xf]  ;;  %396 = vst [vmem:[%s4332_s30 + $0x1ac] sm:$0xf] %v395_v43  ;;  %398 = vst [vmem:[%s4332_s30 + $0x1b0] sm:$0xf] %v397_v44 }
  0x5d   : > { %400 = vst [vmem:[%s4332_s30 + $0x1b4] sm:$0xf] %v399_v45  ;;  %v401_v46 = vld [vmem:[%s4328_s29 + $0x370] sm:$0xf]  ;;  %v403_v47 = vld [vmem:[%s4328_s29 + $0x378] sm:$0xf] }
  0x5e   : > { %v405_v48 = vld [vmem:[%s4328_s29 + $0x380] sm:$0xf]  ;;  %402 = vst [vmem:[%s4332_s30 + $0x1b8] sm:$0xf] %v401_v46  ;;  %404 = vst [vmem:[%s4332_s30 + $0x1bc] sm:$0xf] %v403_v47 }
  0x5f   : > { %406 = vst [vmem:[%s4332_s30 + $0x1c0] sm:$0xf] %v405_v48  ;;  %v407_v49 = vld [vmem:[%s4328_s29 + $0x388] sm:$0xf]  ;;  %v409_v50 = vld [vmem:[%s4328_s29 + $0x390] sm:$0xf] }
  0x60   : > { %v411_v51 = vld [vmem:[%s4328_s29 + $0x398] sm:$0xf]  ;;  %408 = vst [vmem:[%s4332_s30 + $0x1c4] sm:$0xf] %v407_v49  ;;  %410 = vst [vmem:[%s4332_s30 + $0x1c8] sm:$0xf] %v409_v50 }
  0x61   : > { %412 = vst [vmem:[%s4332_s30 + $0x1cc] sm:$0xf] %v411_v51  ;;  %v413_v52 = vld [vmem:[%s4328_s29 + $0x3a0] sm:$0xf]  ;;  %v415_v53 = vld [vmem:[%s4328_s29 + $0x3a8] sm:$0xf] }
  0x62   : > { %v417_v54 = vld [vmem:[%s4328_s29 + $0x3b0] sm:$0xf]  ;;  %414 = vst [vmem:[%s4332_s30 + $0x1d0] sm:$0xf] %v413_v52  ;;  %416 = vst [vmem:[%s4332_s30 + $0x1d4] sm:$0xf] %v415_v53 }
  0x63   : > { %418 = vst [vmem:[%s4332_s30 + $0x1d8] sm:$0xf] %v417_v54  ;;  %v419_v55 = vld [vmem:[%s4328_s29 + $0x3b8] sm:$0xf]  ;;  %v421_v56 = vld [vmem:[%s4328_s29 + $0x3c0] sm:$0xf] }
  0x64   : > { %v423_v57 = vld [vmem:[%s4328_s29 + $0x3c8] sm:$0xf]  ;;  %420 = vst [vmem:[%s4332_s30 + $0x1dc] sm:$0xf] %v419_v55  ;;  %422 = vst [vmem:[%s4332_s30 + $0x1e0] sm:$0xf] %v421_v56 }
  0x65   : > { %424 = vst [vmem:[%s4332_s30 + $0x1e4] sm:$0xf] %v423_v57  ;;  %v425_v58 = vld [vmem:[%s4328_s29 + $0x3d0] sm:$0xf]  ;;  %v427_v59 = vld [vmem:[%s4328_s29 + $0x3d8] sm:$0xf] }
  0x66   : > { %v429_v60 = vld [vmem:[%s4328_s29 + $0x3e0] sm:$0xf]  ;;  %426 = vst [vmem:[%s4332_s30 + $0x1e8] sm:$0xf] %v425_v58  ;;  %428 = vst [vmem:[%s4332_s30 + $0x1ec] sm:$0xf] %v427_v59 }
  0x67   : > { %430 = vst [vmem:[%s4332_s30 + $0x1f0] sm:$0xf] %v429_v60  ;;  %v431_v61 = vld [vmem:[%s4328_s29 + $0x3e8] sm:$0xf]  ;;  %v433_v62 = vld [vmem:[%s4328_s29 + $0x3f0] sm:$0xf] }
  0x68   : > { %v435_v63 = vld [vmem:[%s4328_s29 + $0x3f8] sm:$0xf]  ;;  %432 = vst [vmem:[%s4332_s30 + $0x1f4] sm:$0xf] %v431_v61  ;;  %434 = vst [vmem:[%s4332_s30 + $0x1f8] sm:$0xf] %v433_v62 }
  0x69   : > { %436 = vst [vmem:[%s4332_s30 + $0x1fc] sm:$0xf] %v435_v63  ;;  %v437_v0 = vld [vmem:[%s4328_s29 + $0x400] sm:$0xf]  ;;  %v439_v1 = vld [vmem:[%s4328_s29 + $0x408] sm:$0xf] }
  0x6a   : > { %v441_v2 = vld [vmem:[%s4328_s29 + $0x410] sm:$0xf]  ;;  %438 = vst [vmem:[%s4332_s30 + $0x200] sm:$0xf] %v437_v0  ;;  %440 = vst [vmem:[%s4332_s30 + $0x204] sm:$0xf] %v439_v1 }
  0x6b   : > { %442 = vst [vmem:[%s4332_s30 + $0x208] sm:$0xf] %v441_v2  ;;  %v443_v3 = vld [vmem:[%s4328_s29 + $0x418] sm:$0xf]  ;;  %v445_v4 = vld [vmem:[%s4328_s29 + $0x420] sm:$0xf] }
  0x6c   : > { %v447_v5 = vld [vmem:[%s4328_s29 + $0x428] sm:$0xf]  ;;  %444 = vst [vmem:[%s4332_s30 + $0x20c] sm:$0xf] %v443_v3  ;;  %446 = vst [vmem:[%s4332_s30 + $0x210] sm:$0xf] %v445_v4 }
  0x6d   : > { %448 = vst [vmem:[%s4332_s30 + $0x214] sm:$0xf] %v447_v5  ;;  %v449_v6 = vld [vmem:[%s4328_s29 + $0x430] sm:$0xf]  ;;  %v451_v7 = vld [vmem:[%s4328_s29 + $0x438] sm:$0xf] }
  0x6e   : > { %v453_v8 = vld [vmem:[%s4328_s29 + $0x440] sm:$0xf]  ;;  %450 = vst [vmem:[%s4332_s30 + $0x218] sm:$0xf] %v449_v6  ;;  %452 = vst [vmem:[%s4332_s30 + $0x21c] sm:$0xf] %v451_v7 }
  0x6f   : > { %454 = vst [vmem:[%s4332_s30 + $0x220] sm:$0xf] %v453_v8  ;;  %v455_v9 = vld [vmem:[%s4328_s29 + $0x448] sm:$0xf]  ;;  %v457_v10 = vld [vmem:[%s4328_s29 + $0x450] sm:$0xf] }
  0x70   : > { %v459_v11 = vld [vmem:[%s4328_s29 + $0x458] sm:$0xf]  ;;  %456 = vst [vmem:[%s4332_s30 + $0x224] sm:$0xf] %v455_v9  ;;  %458 = vst [vmem:[%s4332_s30 + $0x228] sm:$0xf] %v457_v10 }
  0x71   : > { %460 = vst [vmem:[%s4332_s30 + $0x22c] sm:$0xf] %v459_v11  ;;  %v461_v12 = vld [vmem:[%s4328_s29 + $0x460] sm:$0xf]  ;;  %v463_v13 = vld [vmem:[%s4328_s29 + $0x468] sm:$0xf] }
  0x72   : > { %v465_v14 = vld [vmem:[%s4328_s29 + $0x470] sm:$0xf]  ;;  %462 = vst [vmem:[%s4332_s30 + $0x230] sm:$0xf] %v461_v12  ;;  %464 = vst [vmem:[%s4332_s30 + $0x234] sm:$0xf] %v463_v13 }
  0x73   : > { %466 = vst [vmem:[%s4332_s30 + $0x238] sm:$0xf] %v465_v14  ;;  %v467_v15 = vld [vmem:[%s4328_s29 + $0x478] sm:$0xf]  ;;  %v469_v16 = vld [vmem:[%s4328_s29 + $0x480] sm:$0xf] }
  0x74   : > { %v471_v17 = vld [vmem:[%s4328_s29 + $0x488] sm:$0xf]  ;;  %468 = vst [vmem:[%s4332_s30 + $0x23c] sm:$0xf] %v467_v15  ;;  %470 = vst [vmem:[%s4332_s30 + $0x240] sm:$0xf] %v469_v16 }
  0x75   : > { %472 = vst [vmem:[%s4332_s30 + $0x244] sm:$0xf] %v471_v17  ;;  %v473_v18 = vld [vmem:[%s4328_s29 + $0x490] sm:$0xf]  ;;  %v475_v19 = vld [vmem:[%s4328_s29 + $0x498] sm:$0xf] }
  0x76   : > { %v477_v20 = vld [vmem:[%s4328_s29 + $0x4a0] sm:$0xf]  ;;  %474 = vst [vmem:[%s4332_s30 + $0x248] sm:$0xf] %v473_v18  ;;  %476 = vst [vmem:[%s4332_s30 + $0x24c] sm:$0xf] %v475_v19 }
  0x77   : > { %478 = vst [vmem:[%s4332_s30 + $0x250] sm:$0xf] %v477_v20  ;;  %v479_v21 = vld [vmem:[%s4328_s29 + $0x4a8] sm:$0xf]  ;;  %v481_v22 = vld [vmem:[%s4328_s29 + $0x4b0] sm:$0xf] }
  0x78   : > { %v483_v23 = vld [vmem:[%s4328_s29 + $0x4b8] sm:$0xf]  ;;  %480 = vst [vmem:[%s4332_s30 + $0x254] sm:$0xf] %v479_v21  ;;  %482 = vst [vmem:[%s4332_s30 + $0x258] sm:$0xf] %v481_v22 }
  0x79   : > { %484 = vst [vmem:[%s4332_s30 + $0x25c] sm:$0xf] %v483_v23  ;;  %v485_v24 = vld [vmem:[%s4328_s29 + $0x4c0] sm:$0xf]  ;;  %v487_v25 = vld [vmem:[%s4328_s29 + $0x4c8] sm:$0xf] }
  0x7a   : > { %v489_v26 = vld [vmem:[%s4328_s29 + $0x4d0] sm:$0xf]  ;;  %486 = vst [vmem:[%s4332_s30 + $0x260] sm:$0xf] %v485_v24  ;;  %488 = vst [vmem:[%s4332_s30 + $0x264] sm:$0xf] %v487_v25 }
  0x7b   : > { %490 = vst [vmem:[%s4332_s30 + $0x268] sm:$0xf] %v489_v26  ;;  %v491_v27 = vld [vmem:[%s4328_s29 + $0x4d8] sm:$0xf]  ;;  %v493_v28 = vld [vmem:[%s4328_s29 + $0x4e0] sm:$0xf] }
  0x7c   : > { %v495_v29 = vld [vmem:[%s4328_s29 + $0x4e8] sm:$0xf]  ;;  %492 = vst [vmem:[%s4332_s30 + $0x26c] sm:$0xf] %v491_v27  ;;  %494 = vst [vmem:[%s4332_s30 + $0x270] sm:$0xf] %v493_v28 }
  0x7d   : > { %496 = vst [vmem:[%s4332_s30 + $0x274] sm:$0xf] %v495_v29  ;;  %v497_v30 = vld [vmem:[%s4328_s29 + $0x4f0] sm:$0xf]  ;;  %v499_v31 = vld [vmem:[%s4328_s29 + $0x4f8] sm:$0xf] }
  0x7e   : > { %v501_v32 = vld [vmem:[%s4328_s29 + $0x500] sm:$0xf]  ;;  %498 = vst [vmem:[%s4332_s30 + $0x278] sm:$0xf] %v497_v30  ;;  %500 = vst [vmem:[%s4332_s30 + $0x27c] sm:$0xf] %v499_v31 }
  0x7f   : > { %502 = vst [vmem:[%s4332_s30 + $0x280] sm:$0xf] %v501_v32  ;;  %v503_v33 = vld [vmem:[%s4328_s29 + $0x508] sm:$0xf]  ;;  %v505_v34 = vld [vmem:[%s4328_s29 + $0x510] sm:$0xf] }
  0x80   : > { %v507_v35 = vld [vmem:[%s4328_s29 + $0x518] sm:$0xf]  ;;  %504 = vst [vmem:[%s4332_s30 + $0x284] sm:$0xf] %v503_v33  ;;  %506 = vst [vmem:[%s4332_s30 + $0x288] sm:$0xf] %v505_v34 }
  0x81   : > { %508 = vst [vmem:[%s4332_s30 + $0x28c] sm:$0xf] %v507_v35  ;;  %v509_v36 = vld [vmem:[%s4328_s29 + $0x520] sm:$0xf]  ;;  %v511_v37 = vld [vmem:[%s4328_s29 + $0x528] sm:$0xf] }
  0x82   : > { %v513_v38 = vld [vmem:[%s4328_s29 + $0x530] sm:$0xf]  ;;  %510 = vst [vmem:[%s4332_s30 + $0x290] sm:$0xf] %v509_v36  ;;  %512 = vst [vmem:[%s4332_s30 + $0x294] sm:$0xf] %v511_v37 }
  0x83   : > { %514 = vst [vmem:[%s4332_s30 + $0x298] sm:$0xf] %v513_v38  ;;  %v515_v39 = vld [vmem:[%s4328_s29 + $0x538] sm:$0xf]  ;;  %v517_v40 = vld [vmem:[%s4328_s29 + $0x540] sm:$0xf] }
  0x84   : > { %v519_v41 = vld [vmem:[%s4328_s29 + $0x548] sm:$0xf]  ;;  %516 = vst [vmem:[%s4332_s30 + $0x29c] sm:$0xf] %v515_v39  ;;  %518 = vst [vmem:[%s4332_s30 + $0x2a0] sm:$0xf] %v517_v40 }
  0x85   : > { %520 = vst [vmem:[%s4332_s30 + $0x2a4] sm:$0xf] %v519_v41  ;;  %v521_v42 = vld [vmem:[%s4328_s29 + $0x550] sm:$0xf]  ;;  %v523_v43 = vld [vmem:[%s4328_s29 + $0x558] sm:$0xf] }
  0x86   : > { %v525_v44 = vld [vmem:[%s4328_s29 + $0x560] sm:$0xf]  ;;  %522 = vst [vmem:[%s4332_s30 + $0x2a8] sm:$0xf] %v521_v42  ;;  %524 = vst [vmem:[%s4332_s30 + $0x2ac] sm:$0xf] %v523_v43 }
  0x87   : > { %526 = vst [vmem:[%s4332_s30 + $0x2b0] sm:$0xf] %v525_v44  ;;  %v527_v45 = vld [vmem:[%s4328_s29 + $0x568] sm:$0xf]  ;;  %v529_v46 = vld [vmem:[%s4328_s29 + $0x570] sm:$0xf] }
  0x88   : > { %v531_v47 = vld [vmem:[%s4328_s29 + $0x578] sm:$0xf]  ;;  %528 = vst [vmem:[%s4332_s30 + $0x2b4] sm:$0xf] %v527_v45  ;;  %530 = vst [vmem:[%s4332_s30 + $0x2b8] sm:$0xf] %v529_v46 }
  0x89   : > { %532 = vst [vmem:[%s4332_s30 + $0x2bc] sm:$0xf] %v531_v47  ;;  %v533_v48 = vld [vmem:[%s4328_s29 + $0x580] sm:$0xf]  ;;  %v535_v49 = vld [vmem:[%s4328_s29 + $0x588] sm:$0xf] }
  0x8a   : > { %v537_v50 = vld [vmem:[%s4328_s29 + $0x590] sm:$0xf]  ;;  %534 = vst [vmem:[%s4332_s30 + $0x2c0] sm:$0xf] %v533_v48  ;;  %536 = vst [vmem:[%s4332_s30 + $0x2c4] sm:$0xf] %v535_v49 }
  0x8b   : > { %538 = vst [vmem:[%s4332_s30 + $0x2c8] sm:$0xf] %v537_v50  ;;  %v539_v51 = vld [vmem:[%s4328_s29 + $0x598] sm:$0xf]  ;;  %v541_v52 = vld [vmem:[%s4328_s29 + $0x5a0] sm:$0xf] }
  0x8c   : > { %v543_v53 = vld [vmem:[%s4328_s29 + $0x5a8] sm:$0xf]  ;;  %540 = vst [vmem:[%s4332_s30 + $0x2cc] sm:$0xf] %v539_v51  ;;  %542 = vst [vmem:[%s4332_s30 + $0x2d0] sm:$0xf] %v541_v52 }
  0x8d   : > { %544 = vst [vmem:[%s4332_s30 + $0x2d4] sm:$0xf] %v543_v53  ;;  %v545_v54 = vld [vmem:[%s4328_s29 + $0x5b0] sm:$0xf]  ;;  %v547_v55 = vld [vmem:[%s4328_s29 + $0x5b8] sm:$0xf] }
  0x8e   : > { %v549_v56 = vld [vmem:[%s4328_s29 + $0x5c0] sm:$0xf]  ;;  %546 = vst [vmem:[%s4332_s30 + $0x2d8] sm:$0xf] %v545_v54  ;;  %548 = vst [vmem:[%s4332_s30 + $0x2dc] sm:$0xf] %v547_v55 }
  0x8f   : > { %550 = vst [vmem:[%s4332_s30 + $0x2e0] sm:$0xf] %v549_v56  ;;  %v551_v57 = vld [vmem:[%s4328_s29 + $0x5c8] sm:$0xf]  ;;  %v553_v58 = vld [vmem:[%s4328_s29 + $0x5d0] sm:$0xf] }
  0x90   : > { %v555_v59 = vld [vmem:[%s4328_s29 + $0x5d8] sm:$0xf]  ;;  %552 = vst [vmem:[%s4332_s30 + $0x2e4] sm:$0xf] %v551_v57  ;;  %554 = vst [vmem:[%s4332_s30 + $0x2e8] sm:$0xf] %v553_v58 }
  0x91   : > { %556 = vst [vmem:[%s4332_s30 + $0x2ec] sm:$0xf] %v555_v59  ;;  %v557_v60 = vld [vmem:[%s4328_s29 + $0x5e0] sm:$0xf]  ;;  %v559_v61 = vld [vmem:[%s4328_s29 + $0x5e8] sm:$0xf] }
  0x92   : > { %v561_v62 = vld [vmem:[%s4328_s29 + $0x5f0] sm:$0xf]  ;;  %558 = vst [vmem:[%s4332_s30 + $0x2f0] sm:$0xf] %v557_v60  ;;  %560 = vst [vmem:[%s4332_s30 + $0x2f4] sm:$0xf] %v559_v61 }
  0x93   : > { %562 = vst [vmem:[%s4332_s30 + $0x2f8] sm:$0xf] %v561_v62  ;;  %v563_v63 = vld [vmem:[%s4328_s29 + $0x5f8] sm:$0xf]  ;;  %v565_v0 = vld [vmem:[%s4328_s29 + $0x600] sm:$0xf] }
  0x94   : > { %v567_v1 = vld [vmem:[%s4328_s29 + $0x608] sm:$0xf]  ;;  %564 = vst [vmem:[%s4332_s30 + $0x2fc] sm:$0xf] %v563_v63  ;;  %566 = vst [vmem:[%s4332_s30 + $0x300] sm:$0xf] %v565_v0 }
  0x95   : > { %568 = vst [vmem:[%s4332_s30 + $0x304] sm:$0xf] %v567_v1  ;;  %v569_v2 = vld [vmem:[%s4328_s29 + $0x610] sm:$0xf]  ;;  %v571_v3 = vld [vmem:[%s4328_s29 + $0x618] sm:$0xf] }
  0x96   : > { %v573_v4 = vld [vmem:[%s4328_s29 + $0x620] sm:$0xf]  ;;  %570 = vst [vmem:[%s4332_s30 + $0x308] sm:$0xf] %v569_v2  ;;  %572 = vst [vmem:[%s4332_s30 + $0x30c] sm:$0xf] %v571_v3 }
  0x97   : > { %574 = vst [vmem:[%s4332_s30 + $0x310] sm:$0xf] %v573_v4  ;;  %v575_v5 = vld [vmem:[%s4328_s29 + $0x628] sm:$0xf]  ;;  %v577_v6 = vld [vmem:[%s4328_s29 + $0x630] sm:$0xf] }
  0x98   : > { %v579_v7 = vld [vmem:[%s4328_s29 + $0x638] sm:$0xf]  ;;  %576 = vst [vmem:[%s4332_s30 + $0x314] sm:$0xf] %v575_v5  ;;  %578 = vst [vmem:[%s4332_s30 + $0x318] sm:$0xf] %v577_v6 }
  0x99   : > { %580 = vst [vmem:[%s4332_s30 + $0x31c] sm:$0xf] %v579_v7  ;;  %v581_v8 = vld [vmem:[%s4328_s29 + $0x640] sm:$0xf]  ;;  %v583_v9 = vld [vmem:[%s4328_s29 + $0x648] sm:$0xf] }
  0x9a   : > { %v585_v10 = vld [vmem:[%s4328_s29 + $0x650] sm:$0xf]  ;;  %582 = vst [vmem:[%s4332_s30 + $0x320] sm:$0xf] %v581_v8  ;;  %584 = vst [vmem:[%s4332_s30 + $0x324] sm:$0xf] %v583_v9 }
  0x9b   : > { %586 = vst [vmem:[%s4332_s30 + $0x328] sm:$0xf] %v585_v10  ;;  %v587_v11 = vld [vmem:[%s4328_s29 + $0x658] sm:$0xf]  ;;  %v589_v12 = vld [vmem:[%s4328_s29 + $0x660] sm:$0xf] }
  0x9c   : > { %v591_v13 = vld [vmem:[%s4328_s29 + $0x668] sm:$0xf]  ;;  %588 = vst [vmem:[%s4332_s30 + $0x32c] sm:$0xf] %v587_v11  ;;  %590 = vst [vmem:[%s4332_s30 + $0x330] sm:$0xf] %v589_v12 }
  0x9d   : > { %592 = vst [vmem:[%s4332_s30 + $0x334] sm:$0xf] %v591_v13  ;;  %v593_v14 = vld [vmem:[%s4328_s29 + $0x670] sm:$0xf]  ;;  %v595_v15 = vld [vmem:[%s4328_s29 + $0x678] sm:$0xf] }
  0x9e   : > { %v597_v16 = vld [vmem:[%s4328_s29 + $0x680] sm:$0xf]  ;;  %594 = vst [vmem:[%s4332_s30 + $0x338] sm:$0xf] %v593_v14  ;;  %596 = vst [vmem:[%s4332_s30 + $0x33c] sm:$0xf] %v595_v15 }
  0x9f   : > { %598 = vst [vmem:[%s4332_s30 + $0x340] sm:$0xf] %v597_v16  ;;  %v599_v17 = vld [vmem:[%s4328_s29 + $0x688] sm:$0xf]  ;;  %v601_v18 = vld [vmem:[%s4328_s29 + $0x690] sm:$0xf] }
  0xa0   : > { %v603_v19 = vld [vmem:[%s4328_s29 + $0x698] sm:$0xf]  ;;  %600 = vst [vmem:[%s4332_s30 + $0x344] sm:$0xf] %v599_v17  ;;  %602 = vst [vmem:[%s4332_s30 + $0x348] sm:$0xf] %v601_v18 }
  0xa1   : > { %604 = vst [vmem:[%s4332_s30 + $0x34c] sm:$0xf] %v603_v19  ;;  %v605_v20 = vld [vmem:[%s4328_s29 + $0x6a0] sm:$0xf]  ;;  %v607_v21 = vld [vmem:[%s4328_s29 + $0x6a8] sm:$0xf] }
  0xa2   : > { %v609_v22 = vld [vmem:[%s4328_s29 + $0x6b0] sm:$0xf]  ;;  %606 = vst [vmem:[%s4332_s30 + $0x350] sm:$0xf] %v605_v20  ;;  %608 = vst [vmem:[%s4332_s30 + $0x354] sm:$0xf] %v607_v21 }
  0xa3   : > { %610 = vst [vmem:[%s4332_s30 + $0x358] sm:$0xf] %v609_v22  ;;  %v611_v23 = vld [vmem:[%s4328_s29 + $0x6b8] sm:$0xf]  ;;  %v613_v24 = vld [vmem:[%s4328_s29 + $0x6c0] sm:$0xf] }
  0xa4   : > { %v615_v25 = vld [vmem:[%s4328_s29 + $0x6c8] sm:$0xf]  ;;  %612 = vst [vmem:[%s4332_s30 + $0x35c] sm:$0xf] %v611_v23  ;;  %614 = vst [vmem:[%s4332_s30 + $0x360] sm:$0xf] %v613_v24 }
  0xa5   : > { %616 = vst [vmem:[%s4332_s30 + $0x364] sm:$0xf] %v615_v25  ;;  %v617_v26 = vld [vmem:[%s4328_s29 + $0x6d0] sm:$0xf]  ;;  %v619_v27 = vld [vmem:[%s4328_s29 + $0x6d8] sm:$0xf] }
  0xa6   : > { %v621_v28 = vld [vmem:[%s4328_s29 + $0x6e0] sm:$0xf]  ;;  %618 = vst [vmem:[%s4332_s30 + $0x368] sm:$0xf] %v617_v26  ;;  %620 = vst [vmem:[%s4332_s30 + $0x36c] sm:$0xf] %v619_v27 }
  0xa7   : > { %622 = vst [vmem:[%s4332_s30 + $0x370] sm:$0xf] %v621_v28  ;;  %v623_v29 = vld [vmem:[%s4328_s29 + $0x6e8] sm:$0xf]  ;;  %v625_v30 = vld [vmem:[%s4328_s29 + $0x6f0] sm:$0xf] }
  0xa8   : > { %v627_v31 = vld [vmem:[%s4328_s29 + $0x6f8] sm:$0xf]  ;;  %624 = vst [vmem:[%s4332_s30 + $0x374] sm:$0xf] %v623_v29  ;;  %626 = vst [vmem:[%s4332_s30 + $0x378] sm:$0xf] %v625_v30 }
  0xa9   : > { %628 = vst [vmem:[%s4332_s30 + $0x37c] sm:$0xf] %v627_v31  ;;  %v629_v32 = vld [vmem:[%s4328_s29 + $0x700] sm:$0xf]  ;;  %v631_v33 = vld [vmem:[%s4328_s29 + $0x708] sm:$0xf] }
  0xaa   : > { %v633_v34 = vld [vmem:[%s4328_s29 + $0x710] sm:$0xf]  ;;  %630 = vst [vmem:[%s4332_s30 + $0x380] sm:$0xf] %v629_v32  ;;  %632 = vst [vmem:[%s4332_s30 + $0x384] sm:$0xf] %v631_v33 }
  0xab   : > { %634 = vst [vmem:[%s4332_s30 + $0x388] sm:$0xf] %v633_v34  ;;  %v635_v35 = vld [vmem:[%s4328_s29 + $0x718] sm:$0xf]  ;;  %v637_v36 = vld [vmem:[%s4328_s29 + $0x720] sm:$0xf] }
  0xac   : > { %v639_v37 = vld [vmem:[%s4328_s29 + $0x728] sm:$0xf]  ;;  %636 = vst [vmem:[%s4332_s30 + $0x38c] sm:$0xf] %v635_v35  ;;  %638 = vst [vmem:[%s4332_s30 + $0x390] sm:$0xf] %v637_v36 }
  0xad   : > { %640 = vst [vmem:[%s4332_s30 + $0x394] sm:$0xf] %v639_v37  ;;  %v641_v38 = vld [vmem:[%s4328_s29 + $0x730] sm:$0xf]  ;;  %v643_v39 = vld [vmem:[%s4328_s29 + $0x738] sm:$0xf] }
  0xae   : > { %v645_v40 = vld [vmem:[%s4328_s29 + $0x740] sm:$0xf]  ;;  %642 = vst [vmem:[%s4332_s30 + $0x398] sm:$0xf] %v641_v38  ;;  %644 = vst [vmem:[%s4332_s30 + $0x39c] sm:$0xf] %v643_v39 }
  0xaf   : > { %646 = vst [vmem:[%s4332_s30 + $0x3a0] sm:$0xf] %v645_v40  ;;  %v647_v41 = vld [vmem:[%s4328_s29 + $0x748] sm:$0xf]  ;;  %v649_v42 = vld [vmem:[%s4328_s29 + $0x750] sm:$0xf] }
  0xb0   : > { %v651_v43 = vld [vmem:[%s4328_s29 + $0x758] sm:$0xf]  ;;  %648 = vst [vmem:[%s4332_s30 + $0x3a4] sm:$0xf] %v647_v41  ;;  %650 = vst [vmem:[%s4332_s30 + $0x3a8] sm:$0xf] %v649_v42 }
  0xb1   : > { %652 = vst [vmem:[%s4332_s30 + $0x3ac] sm:$0xf] %v651_v43  ;;  %v653_v44 = vld [vmem:[%s4328_s29 + $0x760] sm:$0xf]  ;;  %v655_v45 = vld [vmem:[%s4328_s29 + $0x768] sm:$0xf] }
  0xb2   : > { %v657_v46 = vld [vmem:[%s4328_s29 + $0x770] sm:$0xf]  ;;  %654 = vst [vmem:[%s4332_s30 + $0x3b0] sm:$0xf] %v653_v44  ;;  %656 = vst [vmem:[%s4332_s30 + $0x3b4] sm:$0xf] %v655_v45 }
  0xb3   : > { %658 = vst [vmem:[%s4332_s30 + $0x3b8] sm:$0xf] %v657_v46  ;;  %v659_v47 = vld [vmem:[%s4328_s29 + $0x778] sm:$0xf]  ;;  %v661_v48 = vld [vmem:[%s4328_s29 + $0x780] sm:$0xf] }
  0xb4   : > { %v663_v49 = vld [vmem:[%s4328_s29 + $0x788] sm:$0xf]  ;;  %660 = vst [vmem:[%s4332_s30 + $0x3bc] sm:$0xf] %v659_v47  ;;  %662 = vst [vmem:[%s4332_s30 + $0x3c0] sm:$0xf] %v661_v48 }
  0xb5   : > { %664 = vst [vmem:[%s4332_s30 + $0x3c4] sm:$0xf] %v663_v49  ;;  %v665_v50 = vld [vmem:[%s4328_s29 + $0x790] sm:$0xf]  ;;  %v667_v51 = vld [vmem:[%s4328_s29 + $0x798] sm:$0xf] }
  0xb6   : > { %v669_v52 = vld [vmem:[%s4328_s29 + $0x7a0] sm:$0xf]  ;;  %666 = vst [vmem:[%s4332_s30 + $0x3c8] sm:$0xf] %v665_v50  ;;  %668 = vst [vmem:[%s4332_s30 + $0x3cc] sm:$0xf] %v667_v51 }
  0xb7   : > { %670 = vst [vmem:[%s4332_s30 + $0x3d0] sm:$0xf] %v669_v52  ;;  %v671_v53 = vld [vmem:[%s4328_s29 + $0x7a8] sm:$0xf]  ;;  %v673_v54 = vld [vmem:[%s4328_s29 + $0x7b0] sm:$0xf] }
  0xb8   : > { %v675_v55 = vld [vmem:[%s4328_s29 + $0x7b8] sm:$0xf]  ;;  %672 = vst [vmem:[%s4332_s30 + $0x3d4] sm:$0xf] %v671_v53  ;;  %674 = vst [vmem:[%s4332_s30 + $0x3d8] sm:$0xf] %v673_v54 }
  0xb9   : > { %676 = vst [vmem:[%s4332_s30 + $0x3dc] sm:$0xf] %v675_v55  ;;  %v677_v56 = vld [vmem:[%s4328_s29 + $0x7c0] sm:$0xf]  ;;  %v679_v57 = vld [vmem:[%s4328_s29 + $0x7c8] sm:$0xf] }
  0xba   : > { %v681_v58 = vld [vmem:[%s4328_s29 + $0x7d0] sm:$0xf]  ;;  %678 = vst [vmem:[%s4332_s30 + $0x3e0] sm:$0xf] %v677_v56  ;;  %680 = vst [vmem:[%s4332_s30 + $0x3e4] sm:$0xf] %v679_v57 }
  0xbb   : > { %682 = vst [vmem:[%s4332_s30 + $0x3e8] sm:$0xf] %v681_v58  ;;  %v683_v59 = vld [vmem:[%s4328_s29 + $0x7d8] sm:$0xf]  ;;  %v685_v60 = vld [vmem:[%s4328_s29 + $0x7e0] sm:$0xf] }
  0xbc   : > { %v687_v61 = vld [vmem:[%s4328_s29 + $0x7e8] sm:$0xf]  ;;  %684 = vst [vmem:[%s4332_s30 + $0x3ec] sm:$0xf] %v683_v59  ;;  %686 = vst [vmem:[%s4332_s30 + $0x3f0] sm:$0xf] %v685_v60 }
  0xbd   : > { %688 = vst [vmem:[%s4332_s30 + $0x3f4] sm:$0xf] %v687_v61  ;;  %v689_v62 = vld [vmem:[%s4328_s29 + $0x7f0] sm:$0xf]  ;;  %v691_v63 = vld [vmem:[%s4328_s29 + $0x7f8] sm:$0xf] }
  0xbe   : > { %690 = vst [vmem:[%s4332_s30 + $0x3f8] sm:$0xf] %v689_v62  ;;  %692 = vst [vmem:[%s4332_s30 + $0x3fc] sm:$0xf] %v691_v63 }
  0xbf PF: > { %p3526_p7 = scmp.ge.s32.totalorder %s4260_s17, 1  ;;  %p1238_p8 = scmp.lt.s32.totalorder %s4260_s17, 3 }
  0xc1   : > { %p1239_p9 = pnand %p3526_p7, %p1238_p8 }
  0xc2   : > { %s1245_s5 = sand.u32 (!%p1239_p9), 1, %s4252_s15   ;;  %v4850_v0 = vld [vmem:[%s5283_s0] sm:$0xff] (!%p1239_p9)  ;;  %v4860_v2 = vld [vmem:[%s5283_s0 + $0x8] sm:$0xff] (!%p1239_p9)  ;;  %p1275_p10 = scmp.lt.s32.totalorder (!%p1239_p9), %s4303_s18, 1 }
  0xc3   : > { %1242 = sbr.rel (%p1239_p9) target bundleno = 660 (0x294), region = 73  ;;  %v4855_v1 = vld [vmem:[%s5283_s0 + $0x40] sm:$0xff] (!%p1239_p9)  ;;  %s3527_s12 = sshll.u32 (!%p1239_p9), %s1245_s5, 10  ;;  %v4869_v4 = vld [vmem:[%s5283_s0 + $0x48] sm:$0xff] (!%p1239_p9) }
  0xc4   : > { %v3530_v3 = vcombine.high (!%p1239_p9), %v4850_v0, %v4855_v1  ;;  %v3532_v5 = vcombine.high (!%p1239_p9), %v4860_v2, %v4869_v4  ;;  %s4873_s17 = scalar_lea.vmem (!%p1239_p9), [#allocation2], %s3527_s12  ;;  %v1554_v35 = vld [vmem:[%s5283_s0 + $0x80] sm:$0xff] (!%p1239_p9)  ;;  %v1555_v38 = vld [vmem:[%s5283_s0 + $0x88] sm:$0xff] (!%p1239_p9)  ;;  %v3529_v42 = vcombine.low (!%p1239_p9), %v4850_v0, %v4855_v1  ;;  %v3531_v43 = vcombine.low (!%p1239_p9), %v4860_v2, %v4869_v4  ;;  %s3528_s14 = sshll.u32 (!%p1239_p9), %s1245_s5, 5 }
  0xc5   : > { %v4108_v6 = vld [vmem:[%s4873_s17 + $0x40] sm:$0xff] (!%p1239_p9)   ;;  %v4112_v10 = vld [vmem:[%s4873_s17 + $0x48] sm:$0xff] (!%p1239_p9)   ;;  %v4116_v14 = vld [vmem:[%s4873_s17 + $0x50] sm:$0xff] (!%p1239_p9)   ;;  %s1274_s15 = scalar_lea.vmem (!%p1239_p9), [#allocation3], %s3528_s14 }
  0xc6   : > { %2722 = vmatprep.mubr.bf16.mxu0 (!%p1239_p9), %v3530_v3  ;;  %v4109_v7 = vld [vmem:[%s4873_s17 + $0xc0] sm:$0xff] (!%p1239_p9)   ;;  %2787 = vmatprep.mubr.bf16.mxu1 (!%p1239_p9), %v3532_v5  ;;  %v4113_v11 = vld [vmem:[%s4873_s17 + $0xc8] sm:$0xff] (!%p1239_p9)   ;;  %v4117_v15 = vld [vmem:[%s4873_s17 + $0xd0] sm:$0xff] (!%p1239_p9)  }
  0xc7   : > { %3764 = vmatprep.subr.bf16.mxu0 (!%p1239_p9), %v4108_v6  ;;  %v4110_v8 = vld [vmem:[%s4873_s17] sm:$0xff] (!%p1239_p9)   ;;  %3804 = vmatprep.subr.bf16.mxu1 (!%p1239_p9), %v4109_v7  ;;  %v4114_v12 = vld [vmem:[%s4873_s17 + $0x8] sm:$0xff] (!%p1239_p9)   ;;  %v4118_v16 = vld [vmem:[%s4873_s17 + $0x10] sm:$0xff] (!%p1239_p9)  }
  0xc8   : > { %v4111_v9 = vld [vmem:[%s4873_s17 + $0x80] sm:$0xff] (!%p1239_p9)   ;;  %3765 = vmatpush3.bf16.msra.mxu0 (!%p1239_p9), %v4110_v8  ;;  %v4115_v13 = vld [vmem:[%s4873_s17 + $0x88] sm:$0xff] (!%p1239_p9)   ;;  %v4119_v17 = vld [vmem:[%s4873_s17 + $0x90] sm:$0xff] (!%p1239_p9)  }
  0xc9   : > { %3805 = vmatpush3.bf16.msra.mxu1 (!%p1239_p9), %v4111_v9  ;;  %3766 = vmatprep.subr.bf16.mxu0 (!%p1239_p9), %v4112_v10  ;;  %v4120_v18 = vld [vmem:[%s4873_s17 + $0x58] sm:$0xff] (!%p1239_p9)   ;;  %v4124_v22 = vld [vmem:[%s4873_s17 + $0x60] sm:$0xff] (!%p1239_p9)   ;;  %v4128_v26 = vld [vmem:[%s4873_s17 + $0x68] sm:$0xff] (!%p1239_p9)  }
  0xca   : > { %3806 = vmatprep.subr.bf16.mxu1 %v4113_v11  ;;  %v4121_v19 = vld [vmem:[%s4873_s17 + $0xd8] sm:$0xff]   ;;  %v4125_v23 = vld [vmem:[%s4873_s17 + $0xe0] sm:$0xff]   ;;  %v4129_v27 = vld [vmem:[%s4873_s17 + $0xe8] sm:$0xff]   ;;  %s1276_s7 = scalar_select %p1275_p10, %s4303_s18, 1 }
  0xcb   : > { %v4122_v20 = vld [vmem:[%s4873_s17 + $0x18] sm:$0xff]   ;;  %v4126_v24 = vld [vmem:[%s4873_s17 + $0x20] sm:$0xff]   ;;  %v4130_v28 = vld [vmem:[%s4873_s17 + $0x28] sm:$0xff]   ;;  %s3730_s5 = sshll.u32 (%p4318_p5), %s4303_s18, 2 }
  0xcc   : > { %3767 = vmatpush3.bf16.msra.mxu0 %v4114_v12  ;;  %v4123_v21 = vld [vmem:[%s4873_s17 + $0x98] sm:$0xff]   ;;  %v4127_v25 = vld [vmem:[%s4873_s17 + $0xa0] sm:$0xff]   ;;  %v4131_v29 = vld [vmem:[%s4873_s17 + $0xa8] sm:$0xff]   ;;  %s1277_s10 = scalar_lea.vmem %s5285_s2, %s1276_s7  ;;  %s1280_s13 = scalar_lea.vmem %s5286_s3, %s1276_s7 }
  0xcd   : > { %3807 = vmatpush3.bf16.msra.mxu1 %v4115_v13  ;;  %3768 = vmatprep.subr.bf16.mxu0 %v4116_v14  ;;  %v4132_v30 = vld [vmem:[%s4873_s17 + $0x70] sm:$0xff]   ;;  %v4136_v34 = vld [vmem:[%s4873_s17 + $0x78] sm:$0xff]   ;;  %v1562_v36 = vld [vmem:[%s5283_s0 + $0xc0] sm:$0xff]  ;;  %s3378_s24 = scalar_lea.vmem (%p4318_p5), %s5287_s4, %s3730_s5 }
  0xce   : > { %3808 = vmatprep.subr.bf16.mxu1 %v4117_v15  ;;  %v4133_v31 = vld [vmem:[%s4873_s17 + $0xf0] sm:$0xff]   ;;  %v4137_v37 = vld [vmem:[%s4873_s17 + $0xf8] sm:$0xff]   ;;  %v1563_v39 = vld [vmem:[%s5283_s0 + $0xc8] sm:$0xff]  ;;  %v3546_v46 = vcombine.high %v1554_v35, %v1562_v36  ;;  %v3545_v54 = vcombine.low %v1554_v35, %v1562_v36 }
  0xcf   : > { %v4134_v32 = vld [vmem:[%s4873_s17 + $0x30] sm:$0xff]   ;;  %v4138_v40 = vld [vmem:[%s4873_s17 + $0x38] sm:$0xff]   ;;  %v4140_v44 = vld [vmem:[%s4873_s17 + $0x140] sm:$0xff]   ;;  %v3548_v48 = vcombine.high %v1555_v38, %v1563_v39  ;;  %v3547_v55 = vcombine.low %v1555_v38, %v1563_v39 }
  0xd0   : > { %3769 = vmatpush3.bf16.msra.mxu0 %v4118_v16  ;;  %v4135_v33 = vld [vmem:[%s4873_s17 + $0xb0] sm:$0xff]   ;;  %v4139_v41 = vld [vmem:[%s4873_s17 + $0xb8] sm:$0xff]   ;;  %v4141_v45 = vld [vmem:[%s4873_s17 + $0x1c0] sm:$0xff]  }
  0xd1   : > { %3809 = vmatpush3.bf16.msra.mxu1 %v4119_v17  ;;  %3770 = vmatprep.subr.bf16.mxu0 %v4120_v18  ;;  %v4142_v47 = vld [vmem:[%s4873_s17 + $0x100] sm:$0xff]   ;;  %v4144_v50 = vld [vmem:[%s4873_s17 + $0x148] sm:$0xff]   ;;  %v4148_v56 = vld [vmem:[%s4873_s17 + $0x150] sm:$0xff]  }
  0xd2   : > { %3810 = vmatprep.subr.bf16.mxu1 %v4121_v19  ;;  %v4143_v49 = vld [vmem:[%s4873_s17 + $0x180] sm:$0xff]   ;;  %v4145_v51 = vld [vmem:[%s4873_s17 + $0x1c8] sm:$0xff]   ;;  %v4149_v57 = vld [vmem:[%s4873_s17 + $0x1d0] sm:$0xff]  }
  0xd3   : > { %v4146_v52 = vld [vmem:[%s4873_s17 + $0x108] sm:$0xff]   ;;  %v4150_v58 = vld [vmem:[%s4873_s17 + $0x110] sm:$0xff]   ;;  %v4152_v60 = vld [vmem:[%s4873_s17 + $0x158] sm:$0xff]  }
  0xd4   : > { %3771 = vmatpush3.bf16.msra.mxu0 %v4122_v20  ;;  %v4147_v53 = vld [vmem:[%s4873_s17 + $0x188] sm:$0xff]   ;;  %v4151_v59 = vld [vmem:[%s4873_s17 + $0x190] sm:$0xff]   ;;  %v1570_v61 = vld [vmem:[%s5283_s0 + $0x100] sm:$0xff] }
  0xd5   : > { %3811 = vmatpush3.bf16.msra.mxu1 %v4123_v21  ;;  %3772 = vmatprep.subr.bf16.mxu0 %v4124_v22  ;;  %v4153_v62 = vld [vmem:[%s4873_s17 + $0x1d8] sm:$0xff]   ;;  %v1578_v1 = vld [vmem:[%s5283_s0 + $0x140] sm:$0xff]  ;;  %v1571_v2 = vld [vmem:[%s5283_s0 + $0x108] sm:$0xff] }
  0xd6   : > { %3812 = vmatprep.subr.bf16.mxu1 %v4125_v23  ;;  %v4154_v63 = vld [vmem:[%s4873_s17 + $0x118] sm:$0xff]   ;;  %v1579_v3 = vld [vmem:[%s5283_s0 + $0x148] sm:$0xff]  ;;  %v3562_v4 = vcombine.high %v1570_v61, %v1578_v1  ;;  %v3561_v6 = vcombine.low %v1570_v61, %v1578_v1  ;;  %v4156_v8 = vld [vmem:[%s4873_s17 + $0x160] sm:$0xff]  }
  0xd7   : > { %v4155_v0 = vld [vmem:[%s4873_s17 + $0x198] sm:$0xff]   ;;  %v3564_v5 = vcombine.high %v1571_v2, %v1579_v3  ;;  %v3563_v7 = vcombine.low %v1571_v2, %v1579_v3  ;;  %v4157_v9 = vld [vmem:[%s4873_s17 + $0x1e0] sm:$0xff]   ;;  %v4160_v12 = vld [vmem:[%s4873_s17 + $0x168] sm:$0xff]  }
  0xd8   : > { %3773 = vmatpush3.bf16.msra.mxu0 %v4126_v24  ;;  %v4158_v10 = vld [vmem:[%s4873_s17 + $0x120] sm:$0xff]   ;;  %v4161_v13 = vld [vmem:[%s4873_s17 + $0x1e8] sm:$0xff]   ;;  %v4164_v24 = vld [vmem:[%s4873_s17 + $0x170] sm:$0xff]  }
  0xd9   : > { %3813 = vmatpush3.bf16.msra.mxu1 %v4127_v25  ;;  %3774 = vmatprep.subr.bf16.mxu0 %v4128_v26  ;;  %v4159_v11 = vld [vmem:[%s4873_s17 + $0x1a0] sm:$0xff]   ;;  %v4162_v14 = vld [vmem:[%s4873_s17 + $0x128] sm:$0xff]   ;;  %v4165_v25 = vld [vmem:[%s4873_s17 + $0x1f0] sm:$0xff]  }
  0xda   : > { %3814 = vmatprep.subr.bf16.mxu1 %v4129_v27  ;;  %v4163_v15 = vld [vmem:[%s4873_s17 + $0x1a8] sm:$0xff]   ;;  %v1586_v16 = vld [vmem:[%s5283_s0 + $0x180] sm:$0xff]  ;;  %v4166_v26 = vld [vmem:[%s4873_s17 + $0x130] sm:$0xff]  }
  0xdb   : > { %v1594_v17 = vld [vmem:[%s5283_s0 + $0x1c0] sm:$0xff]  ;;  %v1587_v18 = vld [vmem:[%s5283_s0 + $0x188] sm:$0xff]  ;;  %v4167_v27 = vld [vmem:[%s4873_s17 + $0x1b0] sm:$0xff]  }
  0xdc   : > { %3775 = vmatpush3.bf16.msra.mxu0 %v4130_v28  ;;  %v3578_v19 = vcombine.high %v1586_v16, %v1594_v17  ;;  %v1595_v20 = vld [vmem:[%s5283_s0 + $0x1c8] sm:$0xff]  ;;  %v3577_v21 = vcombine.low %v1586_v16, %v1594_v17  ;;  %v4168_v28 = vld [vmem:[%s4873_s17 + $0x178] sm:$0xff]   ;;  %v1580_v1 = vld [vmem:[%s5283_s0 + $0x150] sm:$0xff] }
  0xdd   : > { %3815 = vmatpush3.bf16.msra.mxu1 %v4131_v29  ;;  %3776 = vmatprep.subr.bf16.mxu0 %v4132_v30  ;;  %v3580_v22 = vcombine.high %v1587_v18, %v1595_v20  ;;  %v3579_v23 = vcombine.low %v1587_v18, %v1595_v20  ;;  %v4169_v29 = vld [vmem:[%s4873_s17 + $0x1f8] sm:$0xff]   ;;  %v1588_v16 = vld [vmem:[%s5283_s0 + $0x190] sm:$0xff] }
  0xde   : > { %3816 = vmatprep.subr.bf16.mxu1 %v4133_v31  ;;  %v4170_v30 = vld [vmem:[%s4873_s17 + $0x138] sm:$0xff]   ;;  %v1596_v17 = vld [vmem:[%s5283_s0 + $0x1d0] sm:$0xff] }
  0xdf   : > { %v4171_v31 = vld [vmem:[%s4873_s17 + $0x1b8] sm:$0xff]   ;;  %v3582_v18 = vcombine.high %v1588_v16, %v1596_v17 }
  0xe0   : > { %3777 = vmatpush3.bf16.msra.mxu0 %v4134_v32  ;;  %v1540_v32 = vld [vmem:[%s5283_s0 + $0x10] sm:$0xff]  ;;  %v1541_v36 = vld [vmem:[%s5283_s0 + $0x18] sm:$0xff] }
  0xe1   : > { %3817 = vmatpush3.bf16.msra.mxu1 %v4135_v33  ;;  %3778 = vmatprep.subr.bf16.mxu0 %v4136_v34  ;;  %v1548_v33 = vld [vmem:[%s5283_s0 + $0x50] sm:$0xff]  ;;  %v4185_v61 = vld [vmem:[%s4873_s17 + $0x2d8] sm:$0xff]  }
  0xe2   : > { %3818 = vmatprep.subr.bf16.mxu1 %v4137_v37  ;;  %v3533_v34 = vcombine.low %v1540_v32, %v1548_v33  ;;  %v3534_v35 = vcombine.high %v1540_v32, %v1548_v33  ;;  %v1549_v37 = vld [vmem:[%s5283_s0 + $0x58] sm:$0xff]  ;;  %v1542_v32 = vld [vmem:[%s5283_s0 + $0x20] sm:$0xff] }
  0xe3   : > { %v3535_v38 = vcombine.low %v1541_v36, %v1549_v37  ;;  %v3536_v39 = vcombine.high %v1541_v36, %v1549_v37  ;;  %v1573_v2 = vld [vmem:[%s5283_s0 + $0x118] sm:$0xff]  ;;  %v1550_v33 = vld [vmem:[%s5283_s0 + $0x60] sm:$0xff] }
  0xe4   : > { %3779 = vmatpush3.bf16.msra.mxu0 %v4138_v40  ;;  %v4172_v40 = vld [vmem:[%s4873_s17 + $0x240] sm:$0xff]   ;;  %v1597_v20 = vld [vmem:[%s5283_s0 + $0x1d8] sm:$0xff]  ;;  %v3537_v36 = vcombine.low %v1542_v32, %v1550_v33  ;;  %v3538_v37 = vcombine.high %v1542_v32, %v1550_v33  ;;  %v1544_v32 = vld [vmem:[%s5283_s0 + $0x30] sm:$0xff] }
  0xe5   : > { %3819 = vmatpush3.bf16.msra.mxu1 %v4139_v41  ;;  %3844 = vmatprep.subr.bf16.mxu0 %v4140_v44  ;;  %v4173_v41 = vld [vmem:[%s4873_s17 + $0x2c0] sm:$0xff]   ;;  %v4176_v44 = vld [vmem:[%s4873_s17 + $0x248] sm:$0xff]   ;;  %v1552_v33 = vld [vmem:[%s5283_s0 + $0x70] sm:$0xff] }
  0xe6   : > { %3884 = vmatprep.subr.bf16.mxu1 %v4141_v45  ;;  %v4177_v45 = vld [vmem:[%s4873_s17 + $0x2c8] sm:$0xff]  }
  0xe7   : > { %2723 = vmatmul.mubr.bf16.vlgmr.msra.gmra.mrb[0].mxu0 %v3529_v42  ;;  %v4174_v42 = vld [vmem:[%s4873_s17 + $0x200] sm:$0xff]  }
  0xe8   : > { %2788 = vmatmul.mubr.bf16.vlgmr.msra.gmra.mrb[0].mxu1 %v3531_v43  ;;  %3845 = vmatpush3.bf16.msra.mxu0 %v4142_v47  ;;  %v4175_v43 = vld [vmem:[%s4873_s17 + $0x280] sm:$0xff]   ;;  %v4179_v47 = vld [vmem:[%s4873_s17 + $0x288] sm:$0xff]  }
  0xe9   : > { %3885 = vmatpush3.bf16.msra.mxu1 %v4143_v49  ;;  %2730 = vmatprep.mubr.bf16.mxu0 %v3546_v46  ;;  %v4178_v46 = vld [vmem:[%s4873_s17 + $0x208] sm:$0xff]   ;;  %v1564_v49 = vld [vmem:[%s5283_s0 + $0xd0] sm:$0xff] }
  0xea   : > { %3846 = vmatprep.subr.bf16.mxu0 %v4144_v50  ;;  %2795 = vmatprep.mubr.bf16.mxu1 %v3548_v48  ;;  %v1556_v48 = vld [vmem:[%s5283_s0 + $0x90] sm:$0xff]  ;;  %v1557_v50 = vld [vmem:[%s5283_s0 + $0x98] sm:$0xff] }
  0xeb   : > { %3886 = vmatprep.subr.bf16.mxu1 %v4145_v51  ;;  %v1565_v51 = vld [vmem:[%s5283_s0 + $0xd8] sm:$0xff] }
  0xec   : > { %3847 = vmatpush3.bf16.msra.mxu0 %v4146_v52  ;;  %v3550_v52 = vcombine.high %v1556_v48, %v1564_v49 }
  0xed   : > { %3887 = vmatpush3.bf16.msra.mxu1 %v4147_v53  ;;  %3848 = vmatprep.subr.bf16.mxu0 %v4148_v56  ;;  %v3552_v53 = vcombine.high %v1557_v50, %v1565_v51  ;;  %v4180_v56 = vld [vmem:[%s4873_s17 + $0x250] sm:$0xff]  }
  0xee   : > { %3888 = vmatprep.subr.bf16.mxu1 %v4149_v57  ;;  %v4181_v57 = vld [vmem:[%s4873_s17 + $0x2d0] sm:$0xff]  }
  0xef   : > { %2731 = vmatmul.mubr.bf16.gmra.mrb[4].mxu0 %v3545_v54  ;;  %v3549_v54 = vcombine.low %v1556_v48, %v1564_v49  ;;  %v1558_v48 = vld [vmem:[%s5283_s0 + $0xa0] sm:$0xff] }
  0xf0   : > { %2796 = vmatmul.mubr.bf16.gmra.mrb[4].mxu1 %v3547_v55  ;;  %3849 = vmatpush3.bf16.msra.mxu0 %v4150_v58  ;;  %v3551_v55 = vcombine.low %v1557_v50, %v1565_v51  ;;  %v4182_v58 = vld [vmem:[%s4873_s17 + $0x210] sm:$0xff]   ;;  %v1566_v49 = vld [vmem:[%s5283_s0 + $0xe0] sm:$0xff]  ;;  %v1559_v50 = vld [vmem:[%s5283_s0 + $0xa8] sm:$0xff] }
  0xf1   : > { %3889 = vmatpush3.bf16.msra.mxu1 %v4151_v59  ;;  %3850 = vmatprep.subr.bf16.mxu0 %v4152_v60  ;;  %v4183_v59 = vld [vmem:[%s4873_s17 + $0x290] sm:$0xff]   ;;  %v4184_v60 = vld [vmem:[%s4873_s17 + $0x258] sm:$0xff]   ;;  %v3554_v51 = vcombine.high %v1558_v48, %v1566_v49 }
  0xf2   : > { %3890 = vmatprep.subr.bf16.mxu1 %v4153_v62  ;;  %2738 = vmatprep.mubr.bf16.mxu0 %v3562_v4  ;;  %v4186_v62 = vld [vmem:[%s4873_s17 + $0x218] sm:$0xff]  }
  0xf3   : > { %2803 = vmatprep.mubr.bf16.mxu1 %v3564_v5  ;;  %v1581_v4 = vld [vmem:[%s5283_s0 + $0x158] sm:$0xff] }
  0xf4   : > { %3851 = vmatpush3.bf16.msra.mxu0 %v4154_v63  ;;  %v4187_v63 = vld [vmem:[%s4873_s17 + $0x298] sm:$0xff]  }
  0xf5   : > { %3891 = vmatpush3.bf16.msra.mxu1 %v4155_v0  ;;  %3852 = vmatprep.subr.bf16.mxu0 %v4156_v8  ;;  %v1572_v0 = vld [vmem:[%s5283_s0 + $0x110] sm:$0xff]  ;;  %v4188_v8 = vld [vmem:[%s4873_s17 + $0x260] sm:$0xff]  }
  0xf6   : > { %3892 = vmatprep.subr.bf16.mxu1 %v4157_v9  ;;  %v3566_v3 = vcombine.high %v1572_v0, %v1580_v1  ;;  %v3565_v5 = vcombine.low %v1572_v0, %v1580_v1  ;;  %v4189_v9 = vld [vmem:[%s4873_s17 + $0x2e0] sm:$0xff]  }
  0xf7   : > { %2739 = vmatmul.mubr.bf16.gmra.mrb[8].mxu0 %v3561_v6  ;;  %v3568_v6 = vcombine.high %v1573_v2, %v1581_v4  ;;  %v1574_v0 = vld [vmem:[%s5283_s0 + $0x120] sm:$0xff] }
  0xf8   : > { %2804 = vmatmul.mubr.bf16.gmra.mrb[8].mxu1 %v3563_v7  ;;  %3853 = vmatpush3.bf16.msra.mxu0 %v4158_v10  ;;  %v3567_v7 = vcombine.low %v1573_v2, %v1581_v4  ;;  %v4190_v10 = vld [vmem:[%s4873_s17 + $0x220] sm:$0xff]   ;;  %v1583_v4 = vld [vmem:[%s5283_s0 + $0x168] sm:$0xff] }
  0xf9   : > { %3893 = vmatpush3.bf16.msra.mxu1 %v4159_v11  ;;  %3854 = vmatprep.subr.bf16.mxu0 %v4160_v12  ;;  %v4191_v11 = vld [vmem:[%s4873_s17 + $0x2a0] sm:$0xff]   ;;  %v4192_v12 = vld [vmem:[%s4873_s17 + $0x268] sm:$0xff]  }
  0xfa   : > { %3894 = vmatprep.subr.bf16.mxu1 %v4161_v13  ;;  %2746 = vmatprep.mubr.bf16.mxu0 %v3578_v19  ;;  %v4193_v13 = vld [vmem:[%s4873_s17 + $0x2e8] sm:$0xff]   ;;  %v1589_v19 = vld [vmem:[%s5283_s0 + $0x198] sm:$0xff]  ;;  %v1582_v1 = vld [vmem:[%s5283_s0 + $0x160] sm:$0xff] }
  0xfb   : > { %2811 = vmatprep.mubr.bf16.mxu1 %v3580_v22  ;;  %v3584_v22 = vcombine.high %v1589_v19, %v1597_v20  ;;  %v3570_v2 = vcombine.high %v1574_v0, %v1582_v1 }
  0xfc   : > { %3855 = vmatpush3.bf16.msra.mxu0 %v4162_v14  ;;  %v4194_v14 = vld [vmem:[%s4873_s17 + $0x228] sm:$0xff]  }
  0xfd   : > { %3895 = vmatpush3.bf16.msra.mxu1 %v4163_v15  ;;  %3856 = vmatprep.subr.bf16.mxu0 %v4164_v24  ;;  %v4195_v15 = vld [vmem:[%s4873_s17 + $0x2a8] sm:$0xff]   ;;  %v4196_v24 = vld [vmem:[%s4873_s17 + $0x270] sm:$0xff]  }
  0xfe   : > { %3896 = vmatprep.subr.bf16.mxu1 %v4165_v25  ;;  %v4197_v25 = vld [vmem:[%s4873_s17 + $0x2f0] sm:$0xff]  }
  0xff   : > { %2747 = vmatmul.mubr.bf16.gmra.mrb[12].mxu0 %v3577_v21  ;;  %v3581_v21 = vcombine.low %v1588_v16, %v1596_v17  ;;  %v1590_v16 = vld [vmem:[%s5283_s0 + $0x1a0] sm:$0xff] }
 0x100   : > { %2812 = vmatmul.mubr.bf16.gmra.mrb[12].mxu1 %v3579_v23  ;;  %3857 = vmatpush3.bf16.msra.mxu0 %v4166_v26  ;;  %v3583_v23 = vcombine.low %v1589_v19, %v1597_v20  ;;  %v4198_v26 = vld [vmem:[%s4873_s17 + $0x230] sm:$0xff]   ;;  %v1598_v17 = vld [vmem:[%s5283_s0 + $0x1e0] sm:$0xff]  ;;  %v1599_v19 = vld [vmem:[%s5283_s0 + $0x1e8] sm:$0xff] }
 0x101   : > { %3897 = vmatpush3.bf16.msra.mxu1 %v4167_v27  ;;  %3858 = vmatprep.subr.bf16.mxu0 %v4168_v28  ;;  %v4199_v27 = vld [vmem:[%s4873_s17 + $0x2b0] sm:$0xff]   ;;  %v4200_v28 = vld [vmem:[%s4873_s17 + $0x278] sm:$0xff]   ;;  %v3586_v20 = vcombine.high %v1590_v16, %v1598_v17 }
 0x102   : > { %3898 = vmatprep.subr.bf16.mxu1 %v4169_v29  ;;  %2852 = vmatprep.mubr.bf16.mxu0 %v3534_v35  ;;  %v4201_v29 = vld [vmem:[%s4873_s17 + $0x2f8] sm:$0xff]   ;;  %v1551_v35 = vld [vmem:[%s5283_s0 + $0x68] sm:$0xff] }
 0x103   : > { %2917 = vmatprep.mubr.bf16.mxu1 %v3536_v39 }
 0x104   : > { %3859 = vmatpush3.bf16.msra.mxu0 %v4170_v30  ;;  %v4202_v30 = vld [vmem:[%s4873_s17 + $0x238] sm:$0xff]  }
 0x105   : > { %3899 = vmatpush3.bf16.msra.mxu1 %v4171_v31  ;;  %3924 = vmatprep.subr.bf16.mxu0 %v4172_v40  ;;  %v4203_v31 = vld [vmem:[%s4873_s17 + $0x2b8] sm:$0xff]   ;;  %v4204_v40 = vld [vmem:[%s4873_s17 + $0x340] sm:$0xff]  }
 0x106   : > { %3964 = vmatprep.subr.bf16.mxu1 %v4173_v41  ;;  %v4205_v41 = vld [vmem:[%s4873_s17 + $0x3c0] sm:$0xff]  }
 0x107   : > { %2853 = vmatmul.mubr.bf16.vlgmr.msra.gmra.mrb[16].mxu0 %v3533_v34  ;;  %v1543_v34 = vld [vmem:[%s5283_s0 + $0x28] sm:$0xff] }
 0x108   : > { %2918 = vmatmul.mubr.bf16.vlgmr.msra.gmra.mrb[16].mxu1 %v3535_v38  ;;  %3925 = vmatpush3.bf16.msra.mxu0 %v4174_v42  ;;  %v3539_v38 = vcombine.low %v1543_v34, %v1551_v35  ;;  %v3540_v39 = vcombine.high %v1543_v34, %v1551_v35  ;;  %v4206_v42 = vld [vmem:[%s4873_s17 + $0x300] sm:$0xff]   ;;  %v1545_v34 = vld [vmem:[%s5283_s0 + $0x38] sm:$0xff]  ;;  %v3541_v35 = vcombine.low %v1544_v32, %v1552_v33 }
 0x109   : > { %3965 = vmatpush3.bf16.msra.mxu1 %v4175_v43  ;;  %3926 = vmatprep.subr.bf16.mxu0 %v4176_v44  ;;  %v4207_v43 = vld [vmem:[%s4873_s17 + $0x380] sm:$0xff]   ;;  %v4208_v44 = vld [vmem:[%s4873_s17 + $0x348] sm:$0xff]  }
 0x10a   : > { %3966 = vmatprep.subr.bf16.mxu1 %v4177_v45  ;;  %2860 = vmatprep.mubr.bf16.mxu0 %v3550_v52  ;;  %v4209_v45 = vld [vmem:[%s4873_s17 + $0x3c8] sm:$0xff]  }
 0x10b   : > { %2925 = vmatprep.mubr.bf16.mxu1 %v3552_v53  ;;  %v1567_v52 = vld [vmem:[%s5283_s0 + $0xe8] sm:$0xff]  ;;  %v3553_v53 = vcombine.low %v1558_v48, %v1566_v49  ;;  %v1577_v48 = vld [vmem:[%s5283_s0 + $0x138] sm:$0xff] }
 0x10c   : > { %3927 = vmatpush3.bf16.msra.mxu0 %v4178_v46  ;;  %v4210_v46 = vld [vmem:[%s4873_s17 + $0x308] sm:$0xff]   ;;  %v1585_v49 = vld [vmem:[%s5283_s0 + $0x178] sm:$0xff] }
 0x10d   : > { %3967 = vmatpush3.bf16.msra.mxu1 %v4179_v47  ;;  %3928 = vmatprep.subr.bf16.mxu0 %v4180_v56  ;;  %v4211_v47 = vld [vmem:[%s4873_s17 + $0x388] sm:$0xff]   ;;  %v4212_v56 = vld [vmem:[%s4873_s17 + $0x350] sm:$0xff]  }
 0x10e   : > { %3968 = vmatprep.subr.bf16.mxu1 %v4181_v57  ;;  %v4213_v57 = vld [vmem:[%s4873_s17 + $0x3d0] sm:$0xff]  }
 0x10f   : > { %2861 = vmatmul.mubr.bf16.gmra.mrb[20].mxu0 %v3549_v54  ;;  %v3556_v54 = vcombine.high %v1559_v50, %v1567_v52 }
 0x110   : > { %2926 = vmatmul.mubr.bf16.gmra.mrb[20].mxu1 %v3551_v55  ;;  %3929 = vmatpush3.bf16.msra.mxu0 %v4182_v58  ;;  %v3555_v55 = vcombine.low %v1559_v50, %v1567_v52  ;;  %v4214_v58 = vld [vmem:[%s4873_s17 + $0x310] sm:$0xff]  }
 0x111   : > { %3969 = vmatpush3.bf16.msra.mxu1 %v4183_v59  ;;  %3930 = vmatprep.subr.bf16.mxu0 %v4184_v60  ;;  %v4215_v59 = vld [vmem:[%s4873_s17 + $0x390] sm:$0xff]   ;;  %v4216_v60 = vld [vmem:[%s4873_s17 + $0x358] sm:$0xff]  }
 0x112   : > { %3970 = vmatprep.subr.bf16.mxu1 %v4185_v61  ;;  %2868 = vmatprep.mubr.bf16.mxu0 %v3566_v3  ;;  %v4217_v61 = vld [vmem:[%s4873_s17 + $0x3d8] sm:$0xff]   ;;  %v1575_v3 = vld [vmem:[%s5283_s0 + $0x128] sm:$0xff] }
 0x113   : > { %2933 = vmatprep.mubr.bf16.mxu1 %v3568_v6  ;;  %v3572_v6 = vcombine.high %v1575_v3, %v1583_v4 }
 0x114   : > { %3931 = vmatpush3.bf16.msra.mxu0 %v4186_v62  ;;  %v4218_v62 = vld [vmem:[%s4873_s17 + $0x318] sm:$0xff]  }
 0x115   : > { %3971 = vmatpush3.bf16.msra.mxu1 %v4187_v63  ;;  %3932 = vmatprep.subr.bf16.mxu0 %v4188_v8  ;;  %v4219_v63 = vld [vmem:[%s4873_s17 + $0x398] sm:$0xff]   ;;  %v4220_v8 = vld [vmem:[%s4873_s17 + $0x360] sm:$0xff]  }
 0x116   : > { %3972 = vmatprep.subr.bf16.mxu1 %v4189_v9  ;;  %v4221_v9 = vld [vmem:[%s4873_s17 + $0x3e0] sm:$0xff]  }
 0x117   : > { %2869 = vmatmul.mubr.bf16.gmra.mrb[24].mxu0 %v3565_v5  ;;  %v3569_v5 = vcombine.low %v1574_v0, %v1582_v1 }
 0x118   : > { %2934 = vmatmul.mubr.bf16.gmra.mrb[24].mxu1 %v3567_v7  ;;  %3933 = vmatpush3.bf16.msra.mxu0 %v4190_v10  ;;  %v3571_v7 = vcombine.low %v1575_v3, %v1583_v4  ;;  %v4222_v10 = vld [vmem:[%s4873_s17 + $0x320] sm:$0xff]  }
 0x119   : > { %3973 = vmatpush3.bf16.msra.mxu1 %v4191_v11  ;;  %3934 = vmatprep.subr.bf16.mxu0 %v4192_v12  ;;  %v4223_v11 = vld [vmem:[%s4873_s17 + $0x3a0] sm:$0xff]   ;;  %v4224_v12 = vld [vmem:[%s4873_s17 + $0x368] sm:$0xff]  }
 0x11a   : > { %3974 = vmatprep.subr.bf16.mxu1 %v4193_v13  ;;  %2876 = vmatprep.mubr.bf16.mxu0 %v3582_v18  ;;  %v4225_v13 = vld [vmem:[%s4873_s17 + $0x3e8] sm:$0xff]  }
 0x11b   : > { %2941 = vmatprep.mubr.bf16.mxu1 %v3584_v22  ;;  %v1591_v18 = vld [vmem:[%s5283_s0 + $0x1a8] sm:$0xff]  ;;  %v3585_v22 = vcombine.low %v1590_v16, %v1598_v17 }
 0x11c   : > { %3935 = vmatpush3.bf16.msra.mxu0 %v4194_v14  ;;  %v4226_v14 = vld [vmem:[%s4873_s17 + $0x328] sm:$0xff]  }
 0x11d   : > { %3975 = vmatpush3.bf16.msra.mxu1 %v4195_v15  ;;  %3936 = vmatprep.subr.bf16.mxu0 %v4196_v24  ;;  %v4227_v15 = vld [vmem:[%s4873_s17 + $0x3a8] sm:$0xff]   ;;  %v4228_v24 = vld [vmem:[%s4873_s17 + $0x370] sm:$0xff]  }
 0x11e   : > { %3976 = vmatprep.subr.bf16.mxu1 %v4197_v25  ;;  %v4229_v25 = vld [vmem:[%s4873_s17 + $0x3f0] sm:$0xff]  }
 0x11f   : > { %2877 = vmatmul.mubr.bf16.gmra.mrb[28].mxu0 %v3581_v21  ;;  %v3588_v21 = vcombine.high %v1591_v18, %v1599_v19 }
 0x120   : > { %2942 = vmatmul.mubr.bf16.gmra.mrb[28].mxu1 %v3583_v23  ;;  %3937 = vmatpush3.bf16.msra.mxu0 %v4198_v26  ;;  %v3587_v23 = vcombine.low %v1591_v18, %v1599_v19  ;;  %v4230_v26 = vld [vmem:[%s4873_s17 + $0x330] sm:$0xff]  }
 0x121   : > { %3977 = vmatpush3.bf16.msra.mxu1 %v4199_v27  ;;  %3938 = vmatprep.subr.bf16.mxu0 %v4200_v28  ;;  %v4231_v27 = vld [vmem:[%s4873_s17 + $0x3b0] sm:$0xff]   ;;  %v4232_v28 = vld [vmem:[%s4873_s17 + $0x378] sm:$0xff]  }
 0x122   : > { %3978 = vmatprep.subr.bf16.mxu1 %v4201_v29  ;;  %2982 = vmatprep.mubr.bf16.mxu0 %v3538_v37  ;;  %v4233_v29 = vld [vmem:[%s4873_s17 + $0x3f8] sm:$0xff]  }
 0x123   : > { %3047 = vmatprep.mubr.bf16.mxu1 %v3540_v39  ;;  %v1553_v37 = vld [vmem:[%s5283_s0 + $0x78] sm:$0xff]  ;;  %v1568_v39 = vld [vmem:[%s5283_s0 + $0xf0] sm:$0xff] }
 0x124   : > { %3939 = vmatpush3.bf16.msra.mxu0 %v4202_v30  ;;  %v4234_v30 = vld [vmem:[%s4873_s17 + $0x338] sm:$0xff]  }
 0x125   : > { %3979 = vmatpush3.bf16.msra.mxu1 %v4203_v31  ;;  %4004 = vmatprep.subr.bf16.mxu0 %v4204_v40  ;;  %v4235_v31 = vld [vmem:[%s4873_s17 + $0x3b8] sm:$0xff]   ;;  %v3543_v40 = vcombine.low %v1545_v34, %v1553_v37 }
 0x126   : > { %4044 = vmatprep.subr.bf16.mxu1 %v4205_v41  ;;  %v3544_v41 = vcombine.high %v1545_v34, %v1553_v37 }
 0x127   : > { %2983 = vmatmul.mubr.bf16.vlgmr.msra.gmra.mrb[32].mxu0 %v3537_v36  ;;  %v3542_v36 = vcombine.high %v1544_v32, %v1552_v33 }
 0x128   : > { %3048 = vmatmul.mubr.bf16.vlgmr.msra.gmra.mrb[32].mxu1 %v3539_v38  ;;  %4005 = vmatpush3.bf16.msra.mxu0 %v4206_v42  ;;  %v1560_v38 = vld [vmem:[%s5283_s0 + $0xb0] sm:$0xff] }
 0x129   : > { %4045 = vmatpush3.bf16.msra.mxu1 %v4207_v43  ;;  %4006 = vmatprep.subr.bf16.mxu0 %v4208_v44  ;;  %v3558_v42 = vcombine.high %v1560_v38, %v1568_v39  ;;  %v1561_v43 = vld [vmem:[%s5283_s0 + $0xb8] sm:$0xff]  ;;  %v3557_v50 = vcombine.low %v1560_v38, %v1568_v39 }
 0x12a   : > { %4046 = vmatprep.subr.bf16.mxu1 %v4209_v45  ;;  %2990 = vmatprep.mubr.bf16.mxu0 %v3554_v51  ;;  %v1569_v44 = vld [vmem:[%s5283_s0 + $0xf8] sm:$0xff] }
 0x12b   : > { %3055 = vmatprep.mubr.bf16.mxu1 %v3556_v54  ;;  %v3560_v45 = vcombine.high %v1561_v43, %v1569_v44  ;;  %v3559_v51 = vcombine.low %v1561_v43, %v1569_v44  ;;  %v1592_v54 = vld [vmem:[%s5283_s0 + $0x1b0] sm:$0xff] }
 0x12c   : > { %4007 = vmatpush3.bf16.msra.mxu0 %v4210_v46  ;;  %v1576_v46 = vld [vmem:[%s5283_s0 + $0x130] sm:$0xff] }
 0x12d   : > { %4047 = vmatpush3.bf16.msra.mxu1 %v4211_v47  ;;  %4008 = vmatprep.subr.bf16.mxu0 %v4212_v56  ;;  %v1584_v47 = vld [vmem:[%s5283_s0 + $0x170] sm:$0xff]  ;;  %v1593_v56 = vld [vmem:[%s5283_s0 + $0x1b8] sm:$0xff] }
 0x12e   : > { %4048 = vmatprep.subr.bf16.mxu1 %v4213_v57  ;;  %v3574_v52 = vcombine.high %v1576_v46, %v1584_v47  ;;  %v1601_v57 = vld [vmem:[%s5283_s0 + $0x1f8] sm:$0xff] }
 0x12f   : > { %2991 = vmatmul.mubr.bf16.gmra.mrb[36].mxu0 %v3553_v53  ;;  %v3576_v53 = vcombine.high %v1577_v48, %v1585_v49 }
 0x130   : > { %3056 = vmatmul.mubr.bf16.gmra.mrb[36].mxu1 %v3555_v55  ;;  %4009 = vmatpush3.bf16.msra.mxu0 %v4214_v58  ;;  %v1600_v55 = vld [vmem:[%s5283_s0 + $0x1f0] sm:$0xff]  ;;  %v3573_v58 = vcombine.low %v1576_v46, %v1584_v47 }
 0x131   : > { %4049 = vmatpush3.bf16.msra.mxu1 %v4215_v59  ;;  %4010 = vmatprep.subr.bf16.mxu0 %v4216_v60  ;;  %v3575_v59 = vcombine.low %v1577_v48, %v1585_v49  ;;  %v3590_v60 = vcombine.high %v1592_v54, %v1600_v55 }
 0x132   : > { %4050 = vmatprep.subr.bf16.mxu1 %v4217_v61  ;;  %2998 = vmatprep.mubr.bf16.mxu0 %v3570_v2  ;;  %v3592_v61 = vcombine.high %v1593_v56, %v1601_v57 }
 0x133   : > { %3063 = vmatprep.mubr.bf16.mxu1 %v3572_v6 }
 0x134   : > { %4011 = vmatpush3.bf16.msra.mxu0 %v4218_v62  ;;  %v3589_v62 = vcombine.low %v1592_v54, %v1600_v55 }
 0x135   : > { %4051 = vmatpush3.bf16.msra.mxu1 %v4219_v63  ;;  %4012 = vmatprep.subr.bf16.mxu0 %v4220_v8  ;;  %v3591_v63 = vcombine.low %v1593_v56, %v1601_v57 }
 0x136   : > { %4052 = vmatprep.subr.bf16.mxu1 %v4221_v9 }
 0x137   : > { %2999 = vmatmul.mubr.bf16.gmra.mrb[40].mxu0 %v3569_v5 }
 0x138   : > { %3064 = vmatmul.mubr.bf16.gmra.mrb[40].mxu1 %v3571_v7  ;;  %4013 = vmatpush3.bf16.msra.mxu0 %v4222_v10 }
 0x139   : > { %4053 = vmatpush3.bf16.msra.mxu1 %v4223_v11  ;;  %4014 = vmatprep.subr.bf16.mxu0 %v4224_v12 }
 0x13a   : > { %4054 = vmatprep.subr.bf16.mxu1 %v4225_v13  ;;  %3006 = vmatprep.mubr.bf16.mxu0 %v3586_v20 }
 0x13b   : > { %3071 = vmatprep.mubr.bf16.mxu1 %v3588_v21 }
 0x13c   : > { %4015 = vmatpush3.bf16.msra.mxu0 %v4226_v14 }
 0x13d   : > { %4055 = vmatpush3.bf16.msra.mxu1 %v4227_v15  ;;  %4016 = vmatprep.subr.bf16.mxu0 %v4228_v24 }
 0x13e   : > { %4056 = vmatprep.subr.bf16.mxu1 %v4229_v25 }
 0x13f   : > { %3007 = vmatmul.mubr.bf16.gmra.mrb[44].mxu0 %v3585_v22 }
 0x140   : > { %3072 = vmatmul.mubr.bf16.gmra.mrb[44].mxu1 %v3587_v23  ;;  %4017 = vmatpush3.bf16.msra.mxu0 %v4230_v26 }
 0x141   : > { %4057 = vmatpush3.bf16.msra.mxu1 %v4231_v27  ;;  %4018 = vmatprep.subr.bf16.mxu0 %v4232_v28 }
 0x142   : > { %4058 = vmatprep.subr.bf16.mxu1 %v4233_v29  ;;  %3112 = vmatprep.mubr.bf16.mxu0 %v3542_v36 }
 0x143   : > { %3177 = vmatprep.mubr.bf16.mxu1 %v3544_v41 }
 0x144   : > { %4019 = vmatpush3.bf16.msra.mxu0 %v4234_v30 }
 0x145   : > { %4059 = vmatpush3.bf16.msra.mxu1 %v4235_v31 }
 0x147   : > { %3113 = vmatmul.mubr.bf16.vlgmr.msra.gmra.mrb[48].mxu0 %v3541_v35 }
 0x148   : > { %3178 = vmatmul.mubr.bf16.vlgmr.msra.gmra.mrb[48].mxu1 %v3543_v40  ;;  %3120 = vmatprep.mubr.bf16.mxu0 %v3558_v42 }
 0x149   : > { %3185 = vmatprep.mubr.bf16.mxu1 %v3560_v45 }
 0x14f   : > { %3121 = vmatmul.mubr.bf16.gmra.mrb[52].mxu0 %v3557_v50 }
 0x150   : > { %3186 = vmatmul.mubr.bf16.gmra.mrb[52].mxu1 %v3559_v51  ;;  %3128 = vmatprep.mubr.bf16.mxu0 %v3574_v52 }
 0x151   : > { %3193 = vmatprep.mubr.bf16.mxu1 %v3576_v53 }
 0x157   : > { %3129 = vmatmul.mubr.bf16.gmra.mrb[56].mxu0 %v3573_v58 }
 0x158   : > { %3194 = vmatmul.mubr.bf16.gmra.mrb[56].mxu1 %v3575_v59  ;;  %3136 = vmatprep.mubr.bf16.mxu0 %v3590_v60 }
 0x159   : > { %3201 = vmatprep.mubr.bf16.mxu1 %v3592_v61 }
 0x15f   : > { %3137 = vmatmul.mubr.bf16.gmra.mrb[60].mxu0 %v3589_v62 }
 0x160   : > { %3202 = vmatmul.mubr.bf16.gmra.mrb[60].mxu1 %v3591_v63 }
 0x1ba   : > { %v3780_v0 = vpop.f32.mrb[0].mxu0 }
 0x1bb   : > { %v3820_v1 = vpop.f32.mrb[0].mxu1  ;;  %v3781_v2 = vpop.f32.mrb[1].mxu0 }
 0x1bc   : > { %v3782_v3 = vadd.f32 %v3781_v2, %v3780_v0  ;;  %v3821_v4 = vpop.f32.mrb[1].mxu1  ;;  %v3783_v5 = vpop.f32.mrb[2].mxu0 }
 0x1bd   : > { %v3822_v6 = vadd.f32 %v3821_v4, %v3820_v1  ;;  %v3823_v7 = vpop.f32.mrb[2].mxu1  ;;  %v3784_v8 = vpop.f32.mrb[3].mxu0 }
 0x1be   : > { %v3785_v9 = vadd.f32 %v3784_v8, %v3783_v5  ;;  %v3824_v10 = vpop.f32.mrb[3].mxu1 }
 0x1bf   : > { %v2790_v11 = vadd.f32 %v3822_v6, %v3782_v3  ;;  %v3825_v12 = vadd.f32 %v3824_v10, %v3823_v7 }
 0x1c1   : > { %v2793_v13 = vadd.f32 %v3825_v12, %v3785_v9 }
 0x1c2   : > { %v3786_v14 = vpop.f32.mrb[4].mxu0 }
 0x1c3   : > { %v3826_v15 = vpop.f32.mrb[4].mxu1  ;;  %v3787_v16 = vpop.f32.mrb[5].mxu0 }
 0x1c4   : > { %v3788_v17 = vadd.f32 %v3787_v16, %v3786_v14  ;;  %v3827_v18 = vpop.f32.mrb[5].mxu1  ;;  %v3789_v19 = vpop.f32.mrb[6].mxu0 }
 0x1c5   : > { %v3828_v20 = vadd.f32 %v3827_v18, %v3826_v15  ;;  %v3829_v21 = vpop.f32.mrb[6].mxu1  ;;  %v3790_v22 = vpop.f32.mrb[7].mxu0 }
 0x1c6   : > { %v3791_v23 = vadd.f32 %v3790_v22, %v3789_v19  ;;  %v3830_v24 = vpop.f32.mrb[7].mxu1 }
 0x1c7   : > { %v2798_v25 = vadd.f32 %v3828_v20, %v3788_v17  ;;  %v3831_v26 = vadd.f32 %v3830_v24, %v3829_v21 }
 0x1c9   : > { %v2801_v27 = vadd.f32 %v3831_v26, %v3791_v23 }
 0x1ca   : > { %v3792_v28 = vpop.f32.mrb[8].mxu0 }
 0x1cb   : > { %v3832_v29 = vpop.f32.mrb[8].mxu1  ;;  %v3793_v30 = vpop.f32.mrb[9].mxu0 }
 0x1cc   : > { %v3833_v31 = vpop.f32.mrb[9].mxu1  ;;  %v3794_v32 = vadd.f32 %v3793_v30, %v3792_v28  ;;  %v3795_v34 = vpop.f32.mrb[10].mxu0 }
 0x1cd   : > { %v3834_v33 = vadd.f32 %v3833_v31, %v3832_v29  ;;  %v3835_v35 = vpop.f32.mrb[10].mxu1  ;;  %v3796_v36 = vpop.f32.mrb[11].mxu0 }
 0x1ce   : > { %v3836_v37 = vpop.f32.mrb[11].mxu1  ;;  %v3797_v39 = vadd.f32 %v3796_v36, %v3795_v34 }
 0x1cf   : > { %v2806_v38 = vadd.f32 %v3834_v33, %v3794_v32  ;;  %v3837_v40 = vadd.f32 %v3836_v37, %v3835_v35 }
 0x1d1   : > { %v2809_v41 = vadd.f32 %v3837_v40, %v3797_v39 }
 0x1d2   : > { %v3798_v42 = vpop.f32.mrb[12].mxu0 }
 0x1d3   : > { %v3838_v43 = vpop.f32.mrb[12].mxu1  ;;  %v3799_v44 = vpop.f32.mrb[13].mxu0 }
 0x1d4   : > { %v3800_v45 = vadd.f32 %v3799_v44, %v3798_v42  ;;  %v3839_v46 = vpop.f32.mrb[13].mxu1  ;;  %v3801_v47 = vpop.f32.mrb[14].mxu0 }
 0x1d5   : > { %v3840_v48 = vadd.f32 %v3839_v46, %v3838_v43  ;;  %v3841_v49 = vpop.f32.mrb[14].mxu1  ;;  %v3802_v50 = vpop.f32.mrb[15].mxu0 }
 0x1d6   : > { %v3803_v51 = vadd.f32 %v3802_v50, %v3801_v47  ;;  %v3842_v52 = vpop.f32.mrb[15].mxu1 }
 0x1d7   : > { %v2814_v53 = vadd.f32 %v3840_v48, %v3800_v45  ;;  %v3843_v54 = vadd.f32 %v3842_v52, %v3841_v49 }
 0x1d9   : > { %v5187_v55 = vadd.f32 %v3843_v54, %v3803_v51 }
 0x1da   : > { %v3860_v56 = vpop.f32.mrb[16].mxu0 }
 0x1db   : > { %v3900_v57 = vpop.f32.mrb[16].mxu1  ;;  %v3861_v58 = vpop.f32.mrb[17].mxu0 }
 0x1dc   : > { %v3862_v59 = vadd.f32 %v3861_v58, %v3860_v56  ;;  %v3901_v60 = vpop.f32.mrb[17].mxu1  ;;  %v3863_v61 = vpop.f32.mrb[18].mxu0 }
 0x1dd   : > { %v3902_v62 = vadd.f32 %v3901_v60, %v3900_v57  ;;  %v3903_v63 = vpop.f32.mrb[18].mxu1  ;;  %v3864_v0 = vpop.f32.mrb[19].mxu0 }
 0x1de   : > { %v2855_v1 = vadd.f32 %v3862_v59, %v2790_v11  ;;  %v3865_v2 = vadd.f32 %v3864_v0, %v3863_v61  ;;  %v3904_v3 = vpop.f32.mrb[19].mxu1 }
 0x1df   : > { %v3905_v4 = vadd.f32 %v3904_v3, %v3903_v63 }
 0x1e0   : > { %v2920_v5 = vadd.f32 %v3902_v62, %v2855_v1  ;;  %v2858_v6 = vadd.f32 %v3865_v2, %v2793_v13 }
 0x1e2   : > { %v5189_v7 = vadd.f32 %v3905_v4, %v2858_v6  ;;  %v3866_v8 = vpop.f32.mrb[20].mxu0 }
 0x1e3   : > { %v3906_v9 = vpop.f32.mrb[20].mxu1  ;;  %v3867_v10 = vpop.f32.mrb[21].mxu0 }
 0x1e4   : > { %v3907_v12 = vpop.f32.mrb[21].mxu1  ;;  %v3868_v14 = vadd.f32 %v3867_v10, %v3866_v8  ;;  %v3869_v16 = vpop.f32.mrb[22].mxu0 }
 0x1e5   : > { %v3908_v15 = vadd.f32 %v3907_v12, %v3906_v9  ;;  %v3909_v17 = vpop.f32.mrb[22].mxu1  ;;  %v3870_v18 = vpop.f32.mrb[23].mxu0 }
 0x1e6   : > { %v3910_v19 = vpop.f32.mrb[23].mxu1  ;;  %v2863_v20 = vadd.f32 %v3868_v14, %v2798_v25  ;;  %v3871_v21 = vadd.f32 %v3870_v18, %v3869_v16 }
 0x1e7   : > { %v3911_v11 = vadd.f32 %v3910_v19, %v3909_v17 }
 0x1e8   : > { %v2928_v22 = vadd.f32 %v3908_v15, %v2863_v20  ;;  %v2866_v23 = vadd.f32 %v3871_v21, %v2801_v27 }
 0x1ea   : > { %v5191_v24 = vadd.f32 %v3911_v11, %v2866_v23  ;;  %v3872_v13 = vpop.f32.mrb[24].mxu0 }
 0x1eb   : > { %v3912_v26 = vpop.f32.mrb[24].mxu1  ;;  %v3873_v28 = vpop.f32.mrb[25].mxu0 }
 0x1ec   : > { %v3874_v29 = vadd.f32 %v3873_v28, %v3872_v13  ;;  %v3913_v30 = vpop.f32.mrb[25].mxu1  ;;  %v3875_v31 = vpop.f32.mrb[26].mxu0 }
 0x1ed   : > { %v3914_v32 = vadd.f32 %v3913_v30, %v3912_v26  ;;  %v3915_v33 = vpop.f32.mrb[26].mxu1  ;;  %v3876_v34 = vpop.f32.mrb[27].mxu0 }
 0x1ee   : > { %v2871_v35 = vadd.f32 %v3874_v29, %v2806_v38  ;;  %v3877_v36 = vadd.f32 %v3876_v34, %v3875_v31  ;;  %v3916_v37 = vpop.f32.mrb[27].mxu1 }
 0x1ef   : > { %v3917_v39 = vadd.f32 %v3916_v37, %v3915_v33 }
 0x1f0   : > { %v2936_v25 = vadd.f32 %v3914_v32, %v2871_v35  ;;  %v2874_v40 = vadd.f32 %v3877_v36, %v2809_v41 }
 0x1f2   : > { %v5193_v42 = vadd.f32 %v3917_v39, %v2874_v40  ;;  %v3878_v27 = vpop.f32.mrb[28].mxu0 }
 0x1f3   : > { %v3918_v43 = vpop.f32.mrb[28].mxu1  ;;  %v3879_v44 = vpop.f32.mrb[29].mxu0 }
 0x1f4   : > { %v3880_v45 = vadd.f32 %v3879_v44, %v3878_v27  ;;  %v3919_v46 = vpop.f32.mrb[29].mxu1  ;;  %v3881_v47 = vpop.f32.mrb[30].mxu0 }
 0x1f5   : > { %v3920_v48 = vadd.f32 %v3919_v46, %v3918_v43  ;;  %v3921_v49 = vpop.f32.mrb[30].mxu1  ;;  %v3882_v50 = vpop.f32.mrb[31].mxu0 }
 0x1f6   : > { %v2879_v51 = vadd.f32 %v3880_v45, %v2814_v53  ;;  %v3883_v52 = vadd.f32 %v3882_v50, %v3881_v47  ;;  %v3922_v54 = vpop.f32.mrb[31].mxu1 }
 0x1f7   : > { %v3923_v38 = vadd.f32 %v3922_v54, %v3921_v49 }
 0x1f8   : > { %v2944_v56 = vadd.f32 %v3920_v48, %v2879_v51  ;;  %v2882_v57 = vadd.f32 %v3883_v52, %v5187_v55 }
 0x1fa   : > { %v5196_v58 = vadd.f32 %v3923_v38, %v2882_v57  ;;  %v3940_v41 = vpop.f32.mrb[32].mxu0 }
 0x1fb   : > { %v3980_v59 = vpop.f32.mrb[32].mxu1  ;;  %v3941_v60 = vpop.f32.mrb[33].mxu0 }
 0x1fc   : > { %v3981_v61 = vpop.f32.mrb[33].mxu1  ;;  %v3942_v62 = vadd.f32 %v3941_v60, %v3940_v41  ;;  %v3943_v0 = vpop.f32.mrb[34].mxu0 }
 0x1fd   : > { %v3982_v63 = vadd.f32 %v3981_v61, %v3980_v59  ;;  %v3983_v1 = vpop.f32.mrb[34].mxu1  ;;  %v3944_v2 = vpop.f32.mrb[35].mxu0 }
 0x1fe   : > { %v3984_v3 = vpop.f32.mrb[35].mxu1  ;;  %v2985_v4 = vadd.f32 %v3942_v62, %v2920_v5  ;;  %v3945_v53 = vadd.f32 %v3944_v2, %v3943_v0 }
 0x1ff   : > { %v3985_v6 = vadd.f32 %v3984_v3, %v3983_v1 }
 0x200   : > { %v3050_v8 = vadd.f32 %v3982_v63, %v2985_v4  ;;  %v2988_v9 = vadd.f32 %v3945_v53, %v5189_v7 }
 0x202   : > { %v5199_v10 = vadd.f32 %v3985_v6, %v2988_v9  ;;  %v3946_v55 = vpop.f32.mrb[36].mxu0 }
 0x203   : > { %v3986_v12 = vpop.f32.mrb[36].mxu1  ;;  %v3947_v14 = vpop.f32.mrb[37].mxu0 }
 0x204   : > { %v3948_v15 = vadd.f32 %v3947_v14, %v3946_v55  ;;  %v3987_v16 = vpop.f32.mrb[37].mxu1  ;;  %v3949_v17 = vpop.f32.mrb[38].mxu0 }
 0x205   : > { %v3988_v18 = vadd.f32 %v3987_v16, %v3986_v12  ;;  %v3989_v19 = vpop.f32.mrb[38].mxu1  ;;  %v3950_v20 = vpop.f32.mrb[39].mxu0 }
 0x206   : > { %v2993_v21 = vadd.f32 %v3948_v15, %v2928_v22  ;;  %v3951_v11 = vadd.f32 %v3950_v20, %v3949_v17  ;;  %v3990_v23 = vpop.f32.mrb[39].mxu1 }
 0x207   : > { %v3991_v5 = vadd.f32 %v3990_v23, %v3989_v19 }
 0x208   : > { %v3058_v13 = vadd.f32 %v3988_v18, %v2993_v21  ;;  %v2996_v26 = vadd.f32 %v3951_v11, %v5191_v24 }
 0x20a   : > { %v5202_v28 = vadd.f32 %v3991_v5, %v2996_v26  ;;  %v3952_v7 = vpop.f32.mrb[40].mxu0 }
 0x20b   : > { %v3992_v29 = vpop.f32.mrb[40].mxu1  ;;  %v3953_v30 = vpop.f32.mrb[41].mxu0 }
 0x20c   : > { %v3954_v31 = vadd.f32 %v3953_v30, %v3952_v7  ;;  %v3993_v32 = vpop.f32.mrb[41].mxu1  ;;  %v3955_v33 = vpop.f32.mrb[42].mxu0 }
 0x20d   : > { %v3994_v34 = vadd.f32 %v3993_v32, %v3992_v29  ;;  %v3995_v35 = vpop.f32.mrb[42].mxu1  ;;  %v3956_v36 = vpop.f32.mrb[43].mxu0 }
 0x20e   : > { %v3001_v37 = vadd.f32 %v3954_v31, %v2936_v25  ;;  %v3957_v39 = vadd.f32 %v3956_v36, %v3955_v33  ;;  %v3996_v22 = vpop.f32.mrb[43].mxu1 }
 0x20f   : > { %v3997_v40 = vadd.f32 %v3996_v22, %v3995_v35 }
 0x210   : > { %v3066_v27 = vadd.f32 %v3994_v34, %v3001_v37  ;;  %v3004_v43 = vadd.f32 %v3957_v39, %v5193_v42 }
 0x212   : > { %v5205_v44 = vadd.f32 %v3997_v40, %v3004_v43  ;;  %v3958_v24 = vpop.f32.mrb[44].mxu0 }
 0x213   : > { %v3998_v45 = vpop.f32.mrb[44].mxu1  ;;  %v3959_v46 = vpop.f32.mrb[45].mxu0 }
 0x214   : > { %v3999_v47 = vpop.f32.mrb[45].mxu1  ;;  %v3960_v48 = vadd.f32 %v3959_v46, %v3958_v24  ;;  %v3961_v50 = vpop.f32.mrb[46].mxu0 }
 0x215   : > { %v4000_v49 = vadd.f32 %v3999_v47, %v3998_v45  ;;  %v4001_v51 = vpop.f32.mrb[46].mxu1  ;;  %v3962_v52 = vpop.f32.mrb[47].mxu0 }
 0x216   : > { %v4002_v54 = vpop.f32.mrb[47].mxu1  ;;  %v3009_v38 = vadd.f32 %v3960_v48, %v2944_v56  ;;  %v3963_v25 = vadd.f32 %v3962_v52, %v3961_v50 }
 0x217   : > { %v4003_v57 = vadd.f32 %v4002_v54, %v4001_v51 }
 0x218   : > { %v5207_v41 = vadd.f32 %v4000_v49, %v3009_v38  ;;  %v3012_v59 = vadd.f32 %v3963_v25, %v5196_v58 }
 0x21a   : > { %v5210_v42 = vadd.f32 %v4003_v57, %v3012_v59  ;;  %v4020_v60 = vpop.f32.mrb[48].mxu0 }
 0x21b   : > { %v4060_v61 = vpop.f32.mrb[48].mxu1  ;;  %v4021_v62 = vpop.f32.mrb[49].mxu0 }
 0x21c   : > { %v4022_v63 = vadd.f32 %v4021_v62, %v4020_v60  ;;  %v4061_v0 = vpop.f32.mrb[49].mxu1  ;;  %v4023_v1 = vpop.f32.mrb[50].mxu0 }
 0x21d   : > { %v4062_v2 = vadd.f32 %v4061_v0, %v4060_v61  ;;  %v4063_v3 = vpop.f32.mrb[50].mxu1  ;;  %v4024_v4 = vpop.f32.mrb[51].mxu0 }
 0x21e   : > { %v3115_v53 = vadd.f32 %v4022_v63, %v3050_v8  ;;  %v4025_v6 = vadd.f32 %v4024_v4, %v4023_v1  ;;  %v4064_v56 = vpop.f32.mrb[51].mxu1 }
 0x21f   : > { %v4065_v9 = vadd.f32 %v4064_v56, %v4063_v3 }
 0x220   : > { %v5212_v55 = vadd.f32 %v4062_v2, %v3115_v53  ;;  %v3118_v12 = vadd.f32 %v4025_v6, %v5199_v10 }
 0x222   : > { %v5215_v58 = vadd.f32 %v4065_v9, %v3118_v12  ;;  %v4026_v14 = vpop.f32.mrb[52].mxu0 }
 0x223   : > { %v4066_v15 = vpop.f32.mrb[52].mxu1  ;;  %v4027_v16 = vpop.f32.mrb[53].mxu0 }
 0x224   : > { %v4028_v17 = vadd.f32 %v4027_v16, %v4026_v14  ;;  %v4067_v18 = vpop.f32.mrb[53].mxu1  ;;  %v4029_v19 = vpop.f32.mrb[54].mxu0  ;;  %v3227_v33 = vadd.f32 %v5215_v58, %v5212_v55 }
 0x225   : > { %v4068_v20 = vadd.f32 %v4067_v18, %v4066_v15  ;;  %v4069_v21 = vpop.f32.mrb[54].mxu1  ;;  %v4030_v11 = vpop.f32.mrb[55].mxu0 }
 0x226   : > { %v3123_v23 = vadd.f32 %v4028_v17, %v3058_v13  ;;  %v4031_v8 = vadd.f32 %v4030_v11, %v4029_v19  ;;  %v4070_v5 = vpop.f32.mrb[55].mxu1 }
 0x227   : > { %v4071_v26 = vadd.f32 %v4070_v5, %v4069_v21 }
 0x228   : > { %v5217_v7 = vadd.f32 %v4068_v20, %v3123_v23  ;;  %v3126_v29 = vadd.f32 %v4031_v8, %v5202_v28 }
 0x22a   : > { %v5220_v10 = vadd.f32 %v4071_v26, %v3126_v29  ;;  %v4032_v30 = vpop.f32.mrb[56].mxu0  ;;  %v3228_v22 = vadd.f32 %v3227_v33, %v5217_v7 }
 0x22b   : > { %v4072_v31 = vpop.f32.mrb[56].mxu1  ;;  %v4033_v32 = vpop.f32.mrb[57].mxu0 }
 0x22c   : > { %v4034_v34 = vadd.f32 %v4033_v32, %v4032_v30  ;;  %v4073_v35 = vpop.f32.mrb[57].mxu1  ;;  %v4035_v36 = vpop.f32.mrb[58].mxu0  ;;  %v3229_v47 = vadd.f32 %v3228_v22, %v5220_v10 }
 0x22d   : > { %v4074_v37 = vadd.f32 %v4073_v35, %v4072_v31  ;;  %v4075_v13 = vpop.f32.mrb[58].mxu1  ;;  %v4036_v39 = vpop.f32.mrb[59].mxu0 }
 0x22e   : > { %v3131_v40 = vadd.f32 %v4034_v34, %v3066_v27  ;;  %v4037_v43 = vadd.f32 %v4036_v39, %v4035_v36  ;;  %v4076_v24 = vpop.f32.mrb[59].mxu1 }
 0x22f   : > { %v4077_v28 = vadd.f32 %v4076_v24, %v4075_v13 }
 0x230   : > { %v5225_v45 = vadd.f32 %v4074_v37, %v3131_v40  ;;  %v3134_v46 = vadd.f32 %v4037_v43, %v5205_v44 }
 0x232   : > { %v5229_v48 = vadd.f32 %v4077_v28, %v3134_v46  ;;  %v4038_v49 = vpop.f32.mrb[60].mxu0  ;;  %v3230_v52 = vadd.f32 %v3229_v47, %v5225_v45 }
 0x233   : > { %v4078_v50 = vpop.f32.mrb[60].mxu1  ;;  %v4039_v51 = vpop.f32.mrb[61].mxu0 }
 0x234   : > { %v4040_v54 = vadd.f32 %v4039_v51, %v4038_v49  ;;  %v4079_v38 = vpop.f32.mrb[61].mxu1  ;;  %v4041_v25 = vpop.f32.mrb[62].mxu0  ;;  %v3231_v63 = vadd.f32 %v3230_v52, %v5229_v48  ;;  %v3287_v49 = vlaneseq  ;;  %v3279_v51 = vld [vmem:[%s1277_s10] sm:$0x1] }
 0x235   : > { %v4080_v27 = vadd.f32 %v4079_v38, %v4078_v50  ;;  %v4081_v57 = vpop.f32.mrb[62].mxu1  ;;  %v4042_v59 = vpop.f32.mrb[63].mxu0 }
 0x236   : > { %v3139_v60 = vadd.f32 %v4040_v54, %v5207_v41  ;;  %v4043_v61 = vadd.f32 %v4042_v59, %v4041_v25  ;;  %v4082_v62 = vpop.f32.mrb[63].mxu1  ;;  %v3288_v50 = vshrl.u32 %v3287_v49, 7  ;;  %v3283_v25 = vld [vmem:[%s1280_s13] sm:$0x1] }
 0x237   : > { %v4083_v44 = vadd.f32 %v4082_v62, %v4081_v57 }
 0x238   : > { %v5234_v0 = vadd.f32 %v4080_v27, %v3139_v60  ;;  %v3142_v1 = vadd.f32 %v4043_v61, %v5210_v42  ;;  %v3289_v52 = vsub.s32 0, %v3288_v50 }
 0x23a   : > { %v3232_v2 = vadd.f32 %v3231_v63, %v5234_v0  ;;  %v5238_v3 = vadd.f32 %v4083_v44, %v3142_v1 }
 0x23c   : > { %v3233_v4 = vadd.f32 %v3232_v2, %v5238_v3 }
 0x23e   : > { %v3234_v53 = vrot.slane %v3233_v4, 4 }
 0x240   : > { %v3235_v6 = vadd.f32 %v3234_v53, %v3233_v4 }
 0x242   : > { %v3236_v56 = vrot.slane %v3235_v6, 2 }
 0x244   : > { %v3237_v9 = vadd.f32 %v3236_v56, %v3235_v6 }
 0x246   : > { %v3238_v41 = vrot.slane %v3237_v9, 1 }
 0x248   : > { %v3239_v12 = vadd.f32 %v3238_v41, %v3237_v9 }
 0x24a   : > { %v3240_v14 = vmul.f32 0.015625, %v3239_v12 }
 0x24c   : > { %v3241_v15 = vsub.f32 %v5212_v55, %v3240_v14  ;;  %v3242_v16 = vsub.f32 %v5215_v58, %v3240_v14  ;;  %v3243_v17 = vsub.f32 %v5217_v7, %v3240_v14  ;;  %v3244_v42 = vsub.f32 %v5220_v10, %v3240_v14 }
 0x24d   : > { %v3245_v20 = vsub.f32 %v5225_v45, %v3240_v14  ;;  %v3246_v23 = vsub.f32 %v5229_v48, %v3240_v14  ;;  %v3247_v26 = vsub.f32 %v5234_v0, %v3240_v14  ;;  %v3248_v31 = vsub.f32 %v5238_v3, %v3240_v14 }
 0x24e   : > { %v3257_v18 = vmul.f32 %v3241_v15, %v3241_v15  ;;  %v3258_v19 = vmul.f32 %v3242_v16, %v3242_v16  ;;  %v3259_v21 = vmul.f32 %v3243_v17, %v3243_v17  ;;  %v3260_v8 = vmul.f32 %v3244_v42, %v3244_v42 }
 0x24f   : > { %v3261_v29 = vmul.f32 %v3245_v20, %v3245_v20  ;;  %v3262_v32 = vmul.f32 %v3246_v23, %v3246_v23  ;;  %v3263_v34 = vmul.f32 %v3247_v26, %v3247_v26  ;;  %v3264_v36 = vmul.f32 %v3248_v31, %v3248_v31 }
 0x250   : > { %v3265_v11 = vadd.f32 %v3258_v19, %v3257_v18 }
 0x252   : > { %v3266_v5 = vadd.f32 %v3265_v11, %v3259_v21 }
 0x254   : > { %v3267_v30 = vadd.f32 %v3266_v5, %v3260_v8 }
 0x256   : > { %v3268_v33 = vadd.f32 %v3267_v30, %v3261_v29 }
 0x258   : > { %v3269_v35 = vadd.f32 %v3268_v33, %v3262_v32 }
 0x25a   : > { %v3270_v37 = vadd.f32 %v3269_v35, %v3263_v34 }
 0x25c   : > { %v3271_v13 = vadd.f32 %v3270_v37, %v3264_v36 }
 0x25e   : > { %v3272_v39 = vrot.slane %v3271_v13, 4 }
 0x260   : > { %v3273_v22 = vadd.f32 %v3272_v39, %v3271_v13 }
 0x262   : > { %v3274_v40 = vrot.slane %v3273_v22, 2 }
 0x264   : > { %v3275_v43 = vadd.f32 %v3274_v40, %v3273_v22 }
 0x266   : > { %v3276_v24 = vrot.slane %v3275_v43, 1 }
 0x268   : > { %v3277_v28 = vadd.f32 %v3276_v24, %v3275_v43 }
 0x26a   : > { %v3278_v46 = vmul.f32 0.015625, %v3277_v28 }
 0x26c   : > { %v3280_v47 = vadd.f32 1e-05, %v3278_v46 }
 0x26e   : > { %4236 = vrsqrt.f32 %v3280_v47 }
 0x278   : > { %v4237_v54 = vpop.eup %4236 }
 0x279   : > { %v3282_v38 = vmul.f32 %v4237_v54, %v3279_v51 }
 0x27b   : > { %v3284_v27 = vmul.f32 %v3282_v38, %v3240_v14  ;;  %v3290_v57 = vrot.slane %v3282_v38, %v3289_v52 }
 0x27d   : > { %v3285_v59 = vsub.f32 %v3283_v25, %v3284_v27  ;;  %v3292_v60 = vmul.f32 %v3290_v57, %v5212_v55  ;;  %v3293_v61 = vmul.f32 %v3290_v57, %v5215_v58  ;;  %v3294_v62 = vmul.f32 %v3290_v57, %v5217_v7 }
 0x27e   : > { %v3295_v44 = vmul.f32 %v3290_v57, %v5220_v10  ;;  %v3296_v1 = vmul.f32 %v3290_v57, %v5225_v45  ;;  %v3297_v2 = vmul.f32 %v3290_v57, %v5229_v48  ;;  %v3298_v4 = vmul.f32 %v3290_v57, %v5234_v0 }
 0x27f   : > { %v3304_v63 = vrot.slane %v3285_v59, %v3289_v52  ;;  %v3299_v53 = vmul.f32 %v3290_v57, %v5238_v3 }
 0x281   : > { %v3306_v6 = vadd.f32 %v3304_v63, %v3292_v60  ;;  %v3307_v56 = vadd.f32 %v3304_v63, %v3293_v61  ;;  %v3308_v55 = vadd.f32 %v3304_v63, %v3294_v62  ;;  %v3309_v9 = vadd.f32 %v3304_v63, %v3295_v44 }
 0x282   : > { %v3310_v58 = vadd.f32 %v3304_v63, %v3296_v1  ;;  %v3311_v41 = vadd.f32 %v3304_v63, %v3297_v2  ;;  %v3312_v7 = vadd.f32 %v3304_v63, %v3298_v4  ;;  %v3313_v12 = vadd.f32 %v3304_v63, %v3299_v53  ;;  %3376 = sbr.rel (!%p4318_p5) target bundleno = 660 (0x294), region = 81 }
 0x283   : > { %v3314_v10 = vmax.f32 %v3306_v6, 0.0  ;;  %v3315_v14 = vmax.f32 %v3307_v56, 0.0  ;;  %v3316_v15 = vmax.f32 %v3308_v55, 0.0  ;;  %v3317_v45 = vmax.f32 %v3309_v9, 0.0 }
 0x284   : > { %v3318_v16 = vmax.f32 %v3310_v58, 0.0  ;;  %v3319_v48 = vmax.f32 %v3311_v41, 0.0  ;;  %v3320_v17 = vmax.f32 %v3312_v7, 0.0  ;;  %v3321_v0 = vmax.f32 %v3313_v12, 0.0 }
 0x285   : > { %v3744_v42 = vpack.c.bf16 %v3315_v14, %v3314_v10  ;;  %v3749_v3 = vpack.c.bf16 %v3317_v45, %v3316_v15 }
 0x286   : > { %v3754_v18 = vpack.c.bf16 %v3319_v48, %v3318_v16  ;;  %v3759_v19 = vpack.c.bf16 %v3321_v0, %v3320_v17 }
 0x287   : > { %3745 = vst [vmem:[%s1274_s15] sm:$0xff] %v3744_v42   ;;  %3761 = vst [vmem:[%s1274_s15 + $0x8] sm:$0xff] %v3749_v3  }
 0x288   : > { %3762 = vst [vmem:[%s1274_s15 + $0x10] sm:$0xff] %v3754_v18   ;;  %3763 = vst [vmem:[%s1274_s15 + $0x18] sm:$0xff] %v3759_v19  }
 0x28e   : > { %v3394_v20 = vld [vmem:[%s1274_s15] sm:$0xf]  ;;  %v3396_v21 = vld [vmem:[%s1274_s15 + $0x4] sm:$0xf]  ;;  %v3398_v11 = vld [vmem:[%s1274_s15 + $0x8] sm:$0xf] }
 0x28f   : > { %v3400_v23 = vld [vmem:[%s1274_s15 + $0xc] sm:$0xf]  ;;  %v3402_v8 = vld [vmem:[%s1274_s15 + $0x10] sm:$0xf]  ;;  %3395 = vst [vmem:[%s3378_s24] sm:$0xf] %v3394_v20 }
 0x290   : > { %3397 = vst [vmem:[%s3378_s24 + $0x8] sm:$0xf] %v3396_v21  ;;  %3399 = vst [vmem:[%s3378_s24 + $0x10] sm:$0xf] %v3398_v11  ;;  %v3404_v5 = vld [vmem:[%s1274_s15 + $0x14] sm:$0xf] }
 0x291   : > { %3401 = vst [vmem:[%s3378_s24 + $0x18] sm:$0xf] %v3400_v23  ;;  %3403 = vst [vmem:[%s3378_s24 + $0x20] sm:$0xf] %v3402_v8  ;;  %v3406_v26 = vld [vmem:[%s1274_s15 + $0x18] sm:$0xf] }
 0x292   : > { %v3408_v29 = vld [vmem:[%s1274_s15 + $0x1c] sm:$0xf]  ;;  %3405 = vst [vmem:[%s3378_s24 + $0x28] sm:$0xf] %v3404_v5  ;;  %3407 = vst [vmem:[%s3378_s24 + $0x30] sm:$0xf] %v3406_v26 }
 0x293   : > { %3409 = vst [vmem:[%s3378_s24 + $0x38] sm:$0xf] %v3408_v29 }
 0x294 PF: > { %p11_p11 = scmp.ge.s32.totalorder %s4306_s19, 4   ;;  %s5289_s15 = smov %s4256_s16 }
 0x295   : > { %s5290_s16 = smov %s4316_s22  ;;  %s5291_s17 = smov %s4306_s19 }
 0x296   :  { %13 = sbr.rel (!%p11_p11) target bundleno = 2 (0x2), region = 159 }

// kernel: generator_fea_deconv_forward.7
= control target key start
LH: loop header
LB: loop body
LE: loop exit
PB: predicated region body
PF: predicated region fallthrough
CT: control target
= control target key end

     0   :  { %s2763_s1 = inlined_call_operand.vmem [shape: bf16[2304,128], index: 1, kind: input, shape index: {}]   ;;  %s2764_s0 = inlined_call_operand.vmem [shape: bf16[16,2304], index: 0, kind: input, shape index: {}]   ;;  %s2765_s2 = inlined_call_operand.vmem [shape: f32[1,128], index: 2, kind: input, shape index: {}]   ;;  %s2766_s3 = inlined_call_operand.vmem [shape: f32[1,128], index: 3, kind: input, shape index: {}]   ;;  %s2767_s4 = inlined_call_operand.vmem [shape: f32[16,128], index: 4, kind: output, shape index: {}]  }
   0x1   :  { %v2067_v0 = vld [vmem:[%s2763_s1 + $0x40] sm:$0xff]   ;;  %v2071_v4 = vld [vmem:[%s2763_s1 + $0x48] sm:$0xff]   ;;  %v2075_v8 = vld [vmem:[%s2763_s1 + $0x50] sm:$0xff]  }
   0x2   :  { %v2068_v1 = vld [vmem:[%s2763_s1 + $0xc0] sm:$0xff]   ;;  %1869 = vmatprep.subr.bf16.mxu0 %v2067_v0  ;;  %v2072_v5 = vld [vmem:[%s2763_s1 + $0xc8] sm:$0xff]   ;;  %v2076_v9 = vld [vmem:[%s2763_s1 + $0xd0] sm:$0xff]  }
   0x3   :  { %v2069_v2 = vld [vmem:[%s2763_s1] sm:$0xff]   ;;  %1891 = vmatprep.subr.bf16.mxu1 %v2068_v1  ;;  %v2073_v6 = vld [vmem:[%s2763_s1 + $0x8] sm:$0xff]   ;;  %v2077_v10 = vld [vmem:[%s2763_s1 + $0x10] sm:$0xff]  }
   0x4   :  { %v2070_v3 = vld [vmem:[%s2763_s1 + $0x80] sm:$0xff]   ;;  %1870 = vmatpush3.bf16.msra.mxu0 %v2069_v2  ;;  %v2074_v7 = vld [vmem:[%s2763_s1 + $0x88] sm:$0xff]   ;;  %v2078_v11 = vld [vmem:[%s2763_s1 + $0x90] sm:$0xff]  }
   0x5   :  { %1892 = vmatpush3.bf16.msra.mxu1 %v2070_v3  ;;  %1871 = vmatprep.subr.bf16.mxu0 %v2071_v4  ;;  %v2079_v12 = vld [vmem:[%s2763_s1 + $0x58] sm:$0xff]   ;;  %v2083_v16 = vld [vmem:[%s2763_s1 + $0x60] sm:$0xff]   ;;  %v2087_v20 = vld [vmem:[%s2763_s1 + $0x68] sm:$0xff]  }
   0x6   :  { %1893 = vmatprep.subr.bf16.mxu1 %v2072_v5  ;;  %v2080_v13 = vld [vmem:[%s2763_s1 + $0xd8] sm:$0xff]   ;;  %v2084_v17 = vld [vmem:[%s2763_s1 + $0xe0] sm:$0xff]   ;;  %v2088_v21 = vld [vmem:[%s2763_s1 + $0xe8] sm:$0xff]  }
   0x7   :  { %v2081_v14 = vld [vmem:[%s2763_s1 + $0x18] sm:$0xff]   ;;  %v2085_v18 = vld [vmem:[%s2763_s1 + $0x20] sm:$0xff]   ;;  %v2089_v22 = vld [vmem:[%s2763_s1 + $0x28] sm:$0xff]  }
   0x8   :  { %1872 = vmatpush3.bf16.msra.mxu0 %v2073_v6  ;;  %v2082_v15 = vld [vmem:[%s2763_s1 + $0x98] sm:$0xff]   ;;  %v2086_v19 = vld [vmem:[%s2763_s1 + $0xa0] sm:$0xff]   ;;  %v2090_v23 = vld [vmem:[%s2763_s1 + $0xa8] sm:$0xff]  }
   0x9   :  { %1894 = vmatpush3.bf16.msra.mxu1 %v2074_v7  ;;  %1873 = vmatprep.subr.bf16.mxu0 %v2075_v8  ;;  %v2091_v24 = vld [vmem:[%s2763_s1 + $0x70] sm:$0xff]   ;;  %v2095_v28 = vld [vmem:[%s2763_s1 + $0x78] sm:$0xff]   ;;  %v2099_v32 = vld [vmem:[%s2764_s0] ss:$72 sps:$4 sm:$0xff]  }
   0xa   :  { %1895 = vmatprep.subr.bf16.mxu1 %v2076_v9  ;;  %v2092_v25 = vld [vmem:[%s2763_s1 + $0xf0] sm:$0xff]   ;;  %v2096_v29 = vld [vmem:[%s2763_s1 + $0xf8] sm:$0xff]   ;;  %v2101_v33 = vld [vmem:[%s2764_s0 + $0x4] ss:$72 sps:$4 sm:$0xff]  }
   0xb   :  { %v2093_v26 = vld [vmem:[%s2763_s1 + $0x30] sm:$0xff]   ;;  %v2097_v30 = vld [vmem:[%s2763_s1 + $0x38] sm:$0xff]   ;;  %1310 = vmatprep.mubr.bf16.mxu0 %v2101_v33  ;;  %v2105_v36 = vld [vmem:[%s2763_s1 + $0x140] sm:$0xff]  }
   0xc   :  { %1874 = vmatpush3.bf16.msra.mxu0 %v2077_v10  ;;  %v2094_v27 = vld [vmem:[%s2763_s1 + $0xb0] sm:$0xff]   ;;  %v2098_v31 = vld [vmem:[%s2763_s1 + $0xb8] sm:$0xff]   ;;  %v2106_v37 = vld [vmem:[%s2763_s1 + $0x100] sm:$0xff]  }
   0xd   :  { %1896 = vmatpush3.bf16.msra.mxu1 %v2078_v11  ;;  %1875 = vmatprep.subr.bf16.mxu0 %v2079_v12  ;;  %v2102_v34 = vld [vmem:[%s2764_s0 + $0x8] ss:$72 sps:$4 sm:$0xff]   ;;  %v2104_v35 = vld [vmem:[%s2764_s0 + $0xc] ss:$72 sps:$4 sm:$0xff]   ;;  %v2107_v38 = vld [vmem:[%s2763_s1 + $0x1c0] sm:$0xff]  }
   0xe   :  { %1897 = vmatprep.subr.bf16.mxu1 %v2080_v13  ;;  %1351 = vmatprep.mubr.bf16.mxu1 %v2104_v35  ;;  %v2108_v39 = vld [vmem:[%s2763_s1 + $0x180] sm:$0xff]   ;;  %v2109_v40 = vld [vmem:[%s2763_s1 + $0x148] sm:$0xff]   ;;  %v2113_v44 = vld [vmem:[%s2763_s1 + $0x150] sm:$0xff]  }
   0xf   :  { %v2110_v41 = vld [vmem:[%s2763_s1 + $0x108] sm:$0xff]   ;;  %v2114_v45 = vld [vmem:[%s2763_s1 + $0x110] sm:$0xff]   ;;  %v2117_v48 = vld [vmem:[%s2763_s1 + $0x158] sm:$0xff]  }
  0x10   :  { %1876 = vmatpush3.bf16.msra.mxu0 %v2081_v14  ;;  %v2111_v42 = vld [vmem:[%s2763_s1 + $0x1c8] sm:$0xff]   ;;  %v2115_v46 = vld [vmem:[%s2763_s1 + $0x1d0] sm:$0xff]   ;;  %v2118_v49 = vld [vmem:[%s2763_s1 + $0x118] sm:$0xff]  }
  0x11   :  { %1898 = vmatpush3.bf16.msra.mxu1 %v2082_v15  ;;  %1877 = vmatprep.subr.bf16.mxu0 %v2083_v16  ;;  %v2112_v43 = vld [vmem:[%s2763_s1 + $0x188] sm:$0xff]   ;;  %v2116_v47 = vld [vmem:[%s2763_s1 + $0x190] sm:$0xff]   ;;  %v2119_v50 = vld [vmem:[%s2763_s1 + $0x1d8] sm:$0xff]  }
  0x12   :  { %1899 = vmatprep.subr.bf16.mxu1 %v2084_v17  ;;  %v2120_v51 = vld [vmem:[%s2763_s1 + $0x198] sm:$0xff]   ;;  %v2121_v52 = vld [vmem:[%s2763_s1 + $0x160] sm:$0xff]   ;;  %v2125_v56 = vld [vmem:[%s2763_s1 + $0x168] sm:$0xff]  }
  0x13   :  { %v2122_v53 = vld [vmem:[%s2763_s1 + $0x120] sm:$0xff]   ;;  %v2126_v57 = vld [vmem:[%s2763_s1 + $0x128] sm:$0xff]   ;;  %v2129_v60 = vld [vmem:[%s2763_s1 + $0x170] sm:$0xff]  }
  0x14   :  { %1878 = vmatpush3.bf16.msra.mxu0 %v2085_v18  ;;  %v2123_v54 = vld [vmem:[%s2763_s1 + $0x1e0] sm:$0xff]   ;;  %v2127_v58 = vld [vmem:[%s2763_s1 + $0x1e8] sm:$0xff]   ;;  %v2130_v61 = vld [vmem:[%s2763_s1 + $0x130] sm:$0xff]  }
  0x15   :  { %1900 = vmatpush3.bf16.msra.mxu1 %v2086_v19  ;;  %1879 = vmatprep.subr.bf16.mxu0 %v2087_v20  ;;  %v2124_v55 = vld [vmem:[%s2763_s1 + $0x1a0] sm:$0xff]   ;;  %v2128_v59 = vld [vmem:[%s2763_s1 + $0x1a8] sm:$0xff]   ;;  %v2131_v62 = vld [vmem:[%s2763_s1 + $0x1f0] sm:$0xff]  }
  0x16   :  { %1901 = vmatprep.subr.bf16.mxu1 %v2088_v21  ;;  %v2132_v63 = vld [vmem:[%s2763_s1 + $0x1b0] sm:$0xff]   ;;  %v2133_v0 = vld [vmem:[%s2763_s1 + $0x178] sm:$0xff]   ;;  %v2140_v6 = vld [vmem:[%s2763_s1 + $0x240] sm:$0xff]  }
  0x17   :  { %v2134_v1 = vld [vmem:[%s2763_s1 + $0x138] sm:$0xff]   ;;  %v2144_v9 = vld [vmem:[%s2763_s1 + $0x200] sm:$0xff]   ;;  %v2147_v12 = vld [vmem:[%s2763_s1 + $0x248] sm:$0xff]  }
  0x18   :  { %1880 = vmatpush3.bf16.msra.mxu0 %v2089_v22  ;;  %v2135_v2 = vld [vmem:[%s2763_s1 + $0x1f8] sm:$0xff]   ;;  %v2145_v10 = vld [vmem:[%s2763_s1 + $0x2c0] sm:$0xff]   ;;  %v2148_v13 = vld [vmem:[%s2763_s1 + $0x208] sm:$0xff]  }
  0x19   :  { %1902 = vmatpush3.bf16.msra.mxu1 %v2090_v23  ;;  %1881 = vmatprep.subr.bf16.mxu0 %v2091_v24  ;;  %v2136_v3 = vld [vmem:[%s2764_s0 + $0x10] ss:$72 sps:$4 sm:$0xff]   ;;  %v2138_v4 = vld [vmem:[%s2764_s0 + $0x14] ss:$72 sps:$4 sm:$0xff]   ;;  %v2146_v11 = vld [vmem:[%s2763_s1 + $0x280] sm:$0xff]  }
  0x1a   :  { %1903 = vmatprep.subr.bf16.mxu1 %v2092_v25  ;;  %v2139_v5 = vld [vmem:[%s2763_s1 + $0x1b8] sm:$0xff]   ;;  %v2149_v14 = vld [vmem:[%s2763_s1 + $0x2c8] sm:$0xff]   ;;  %v2151_v16 = vld [vmem:[%s2763_s1 + $0x250] sm:$0xff]  }
  0x1b   :  { %v2141_v7 = vld [vmem:[%s2764_s0 + $0x18] ss:$72 sps:$4 sm:$0xff]   ;;  %v2143_v8 = vld [vmem:[%s2764_s0 + $0x1c] ss:$72 sps:$4 sm:$0xff]   ;;  %v2150_v15 = vld [vmem:[%s2763_s1 + $0x288] sm:$0xff]  }
  0x1c   :  { %1882 = vmatpush3.bf16.msra.mxu0 %v2093_v26  ;;  %v2152_v17 = vld [vmem:[%s2763_s1 + $0x210] sm:$0xff]   ;;  %v2155_v20 = vld [vmem:[%s2763_s1 + $0x258] sm:$0xff]   ;;  %v2159_v24 = vld [vmem:[%s2763_s1 + $0x260] sm:$0xff]  }
  0x1d   :  { %1904 = vmatpush3.bf16.msra.mxu1 %v2094_v27  ;;  %1883 = vmatprep.subr.bf16.mxu0 %v2095_v28  ;;  %v2153_v18 = vld [vmem:[%s2763_s1 + $0x2d0] sm:$0xff]   ;;  %v2156_v21 = vld [vmem:[%s2763_s1 + $0x218] sm:$0xff]   ;;  %v2160_v25 = vld [vmem:[%s2763_s1 + $0x220] sm:$0xff]  }
  0x1e   :  { %1905 = vmatprep.subr.bf16.mxu1 %v2096_v29  ;;  %v2154_v19 = vld [vmem:[%s2763_s1 + $0x290] sm:$0xff]   ;;  %v2157_v22 = vld [vmem:[%s2763_s1 + $0x2d8] sm:$0xff]   ;;  %v2161_v26 = vld [vmem:[%s2763_s1 + $0x2e0] sm:$0xff]  }
  0x1f   :  { %v2158_v23 = vld [vmem:[%s2763_s1 + $0x298] sm:$0xff]   ;;  %v2162_v27 = vld [vmem:[%s2763_s1 + $0x2a0] sm:$0xff]   ;;  %v2163_v28 = vld [vmem:[%s2763_s1 + $0x268] sm:$0xff]  }
  0x20   :  { %1884 = vmatpush3.bf16.msra.mxu0 %v2097_v30  ;;  %v2164_v29 = vld [vmem:[%s2763_s1 + $0x228] sm:$0xff]   ;;  %v2168_v33 = vld [vmem:[%s2763_s1 + $0x230] sm:$0xff]  }
  0x21   :  { %1906 = vmatpush3.bf16.msra.mxu1 %v2098_v31  ;;  %1913 = vmatprep.subr.bf16.mxu0 %v2105_v36  ;;  %v2165_v30 = vld [vmem:[%s2763_s1 + $0x2e8] sm:$0xff]   ;;  %v2170_v35 = vld [vmem:[%s2763_s1 + $0x2b0] sm:$0xff]   ;;  %v2171_v36 = vld [vmem:[%s2763_s1 + $0x278] sm:$0xff]  }
  0x22   :  { %1935 = vmatprep.subr.bf16.mxu1 %v2107_v38  ;;  %v2166_v31 = vld [vmem:[%s2763_s1 + $0x2a8] sm:$0xff]   ;;  %v2173_v38 = vld [vmem:[%s2763_s1 + $0x2f8] sm:$0xff]  }
  0x23   :  { %1311 = vmatmul.mubr.bf16.vlgmr.msra.gmra.mrb[0].mxu0 %v2099_v32  ;;  %v2167_v32 = vld [vmem:[%s2763_s1 + $0x270] sm:$0xff]  }
  0x24   :  { %1352 = vmatmul.mubr.bf16.vlgmr.msra.gmra.mrb[0].mxu1 %v2102_v34  ;;  %1914 = vmatpush3.bf16.msra.mxu0 %v2106_v37  ;;  %v2169_v34 = vld [vmem:[%s2763_s1 + $0x2f0] sm:$0xff]   ;;  %v2172_v37 = vld [vmem:[%s2763_s1 + $0x238] sm:$0xff]  }
  0x25   :  { %1936 = vmatpush3.bf16.msra.mxu1 %v2108_v39  ;;  %1915 = vmatprep.subr.bf16.mxu0 %v2109_v40  ;;  %v2174_v39 = vld [vmem:[%s2764_s0 + $0x20] ss:$72 sps:$4 sm:$0xff]   ;;  %v2176_v40 = vld [vmem:[%s2764_s0 + $0x24] ss:$72 sps:$4 sm:$0xff]  }
  0x26   :  { %1937 = vmatprep.subr.bf16.mxu1 %v2111_v42  ;;  %1392 = vmatprep.mubr.bf16.mxu0 %v2138_v4  ;;  %v2178_v42 = vld [vmem:[%s2763_s1 + $0x340] sm:$0xff]   ;;  %v2205_v4 = vld [vmem:[%s2763_s1 + $0x370] sm:$0xff]  }
  0x27   :  { %1433 = vmatprep.mubr.bf16.mxu1 %v2143_v8  ;;  %v2209_v8 = vld [vmem:[%s2763_s1 + $0x378] sm:$0xff]  }
  0x28   :  { %1916 = vmatpush3.bf16.msra.mxu0 %v2110_v41  ;;  %v2177_v41 = vld [vmem:[%s2763_s1 + $0x2b8] sm:$0xff]  }
  0x29   :  { %1938 = vmatpush3.bf16.msra.mxu1 %v2112_v43  ;;  %1917 = vmatprep.subr.bf16.mxu0 %v2113_v44  ;;  %v2179_v43 = vld [vmem:[%s2764_s0 + $0x28] ss:$72 sps:$4 sm:$0xff]   ;;  %v2181_v44 = vld [vmem:[%s2764_s0 + $0x2c] ss:$72 sps:$4 sm:$0xff]  }
  0x2a   :  { %1939 = vmatprep.subr.bf16.mxu1 %v2115_v46  ;;  %v2183_v46 = vld [vmem:[%s2763_s1 + $0x3c0] sm:$0xff]  }
  0x2c   :  { %1918 = vmatpush3.bf16.msra.mxu0 %v2114_v45  ;;  %v2182_v45 = vld [vmem:[%s2763_s1 + $0x300] sm:$0xff]  }
  0x2d   :  { %1940 = vmatpush3.bf16.msra.mxu1 %v2116_v47  ;;  %1919 = vmatprep.subr.bf16.mxu0 %v2117_v48  ;;  %v2184_v47 = vld [vmem:[%s2763_s1 + $0x380] sm:$0xff]   ;;  %v2185_v48 = vld [vmem:[%s2763_s1 + $0x348] sm:$0xff]  }
  0x2e   :  { %1941 = vmatprep.subr.bf16.mxu1 %v2119_v50  ;;  %v2187_v50 = vld [vmem:[%s2763_s1 + $0x3c8] sm:$0xff]  }
  0x30   :  { %1920 = vmatpush3.bf16.msra.mxu0 %v2118_v49  ;;  %v2186_v49 = vld [vmem:[%s2763_s1 + $0x308] sm:$0xff]  }
  0x31   :  { %1942 = vmatpush3.bf16.msra.mxu1 %v2120_v51  ;;  %1921 = vmatprep.subr.bf16.mxu0 %v2121_v52  ;;  %v2188_v51 = vld [vmem:[%s2763_s1 + $0x388] sm:$0xff]   ;;  %v2189_v52 = vld [vmem:[%s2763_s1 + $0x350] sm:$0xff]  }
  0x32   :  { %1943 = vmatprep.subr.bf16.mxu1 %v2123_v54  ;;  %v2191_v54 = vld [vmem:[%s2763_s1 + $0x3d0] sm:$0xff]  }
  0x34   :  { %1922 = vmatpush3.bf16.msra.mxu0 %v2122_v53  ;;  %v2190_v53 = vld [vmem:[%s2763_s1 + $0x310] sm:$0xff]  }
  0x35   :  { %1944 = vmatpush3.bf16.msra.mxu1 %v2124_v55  ;;  %1923 = vmatprep.subr.bf16.mxu0 %v2125_v56  ;;  %v2192_v55 = vld [vmem:[%s2763_s1 + $0x390] sm:$0xff]   ;;  %v2193_v56 = vld [vmem:[%s2763_s1 + $0x358] sm:$0xff]  }
  0x36   :  { %1945 = vmatprep.subr.bf16.mxu1 %v2127_v58  ;;  %v2195_v58 = vld [vmem:[%s2763_s1 + $0x3d8] sm:$0xff]  }
  0x38   :  { %1924 = vmatpush3.bf16.msra.mxu0 %v2126_v57  ;;  %v2194_v57 = vld [vmem:[%s2763_s1 + $0x318] sm:$0xff]  }
  0x39   :  { %1946 = vmatpush3.bf16.msra.mxu1 %v2128_v59  ;;  %1925 = vmatprep.subr.bf16.mxu0 %v2129_v60  ;;  %v2196_v59 = vld [vmem:[%s2763_s1 + $0x398] sm:$0xff]   ;;  %v2197_v60 = vld [vmem:[%s2763_s1 + $0x360] sm:$0xff]  }
  0x3a   :  { %1947 = vmatprep.subr.bf16.mxu1 %v2131_v62  ;;  %v2199_v62 = vld [vmem:[%s2763_s1 + $0x3e0] sm:$0xff]  }
  0x3c   :  { %1926 = vmatpush3.bf16.msra.mxu0 %v2130_v61  ;;  %v2198_v61 = vld [vmem:[%s2763_s1 + $0x320] sm:$0xff]  }
  0x3d   :  { %1948 = vmatpush3.bf16.msra.mxu1 %v2132_v63  ;;  %1927 = vmatprep.subr.bf16.mxu0 %v2133_v0  ;;  %v2200_v63 = vld [vmem:[%s2763_s1 + $0x3a0] sm:$0xff]   ;;  %v2201_v0 = vld [vmem:[%s2763_s1 + $0x368] sm:$0xff]  }
  0x3e   :  { %1949 = vmatprep.subr.bf16.mxu1 %v2135_v2  ;;  %v2203_v2 = vld [vmem:[%s2763_s1 + $0x3e8] sm:$0xff]  }
  0x40   :  { %1928 = vmatpush3.bf16.msra.mxu0 %v2134_v1  ;;  %v2202_v1 = vld [vmem:[%s2763_s1 + $0x328] sm:$0xff]  }
  0x41   :  { %1950 = vmatpush3.bf16.msra.mxu1 %v2139_v5  ;;  %1957 = vmatprep.subr.bf16.mxu0 %v2140_v6  ;;  %v2206_v5 = vld [vmem:[%s2763_s1 + $0x330] sm:$0xff]  }
  0x42   :  { %1979 = vmatprep.subr.bf16.mxu1 %v2145_v10  ;;  %v2207_v6 = vld [vmem:[%s2763_s1 + $0x3f0] sm:$0xff]   ;;  %v2211_v10 = vld [vmem:[%s2763_s1 + $0x3f8] sm:$0xff]  }
  0x43   :  { %1393 = vmatmul.mubr.bf16.vlgmr.msra.gmra.mrb[4].mxu0 %v2136_v3  ;;  %v2204_v3 = vld [vmem:[%s2763_s1 + $0x3a8] sm:$0xff]  }
  0x44   :  { %1958 = vmatpush3.bf16.msra.mxu0 %v2144_v9  ;;  %1434 = vmatmul.mubr.bf16.vlgmr.msra.gmra.mrb[4].mxu1 %v2141_v7  ;;  %v2208_v7 = vld [vmem:[%s2763_s1 + $0x3b0] sm:$0xff]   ;;  %v2210_v9 = vld [vmem:[%s2763_s1 + $0x338] sm:$0xff]  }
  0x45   :  { %1980 = vmatpush3.bf16.msra.mxu1 %v2146_v11  ;;  %1959 = vmatprep.subr.bf16.mxu0 %v2147_v12  ;;  %v2212_v11 = vld [vmem:[%s2764_s0 + $0x30] ss:$72 sps:$4 sm:$0xff]   ;;  %v2214_v12 = vld [vmem:[%s2764_s0 + $0x34] ss:$72 sps:$4 sm:$0xff]  }
  0x46   :  { %1981 = vmatprep.subr.bf16.mxu1 %v2149_v14  ;;  %1474 = vmatprep.mubr.bf16.mxu0 %v2176_v40  ;;  %v2216_v14 = vld [vmem:[%s2763_s1 + $0x440] sm:$0xff]  }
  0x47   :  { %1515 = vmatprep.mubr.bf16.mxu1 %v2181_v44 }
  0x48   :  { %1960 = vmatpush3.bf16.msra.mxu0 %v2148_v13  ;;  %v2215_v13 = vld [vmem:[%s2763_s1 + $0x3b8] sm:$0xff]  }
  0x49   :  { %1982 = vmatpush3.bf16.msra.mxu1 %v2150_v15  ;;  %1961 = vmatprep.subr.bf16.mxu0 %v2151_v16  ;;  %v2217_v15 = vld [vmem:[%s2764_s0 + $0x38] ss:$72 sps:$4 sm:$0xff]   ;;  %v2219_v16 = vld [vmem:[%s2764_s0 + $0x3c] ss:$72 sps:$4 sm:$0xff]  }
  0x4a   :  { %1983 = vmatprep.subr.bf16.mxu1 %v2153_v18  ;;  %v2221_v18 = vld [vmem:[%s2763_s1 + $0x448] sm:$0xff]  }
  0x4c   :  { %1962 = vmatpush3.bf16.msra.mxu0 %v2152_v17  ;;  %v2220_v17 = vld [vmem:[%s2763_s1 + $0x400] sm:$0xff]  }
  0x4d   :  { %1984 = vmatpush3.bf16.msra.mxu1 %v2154_v19  ;;  %1963 = vmatprep.subr.bf16.mxu0 %v2155_v20  ;;  %v2222_v19 = vld [vmem:[%s2763_s1 + $0x408] sm:$0xff]   ;;  %v2223_v20 = vld [vmem:[%s2763_s1 + $0x450] sm:$0xff]  }
  0x4e   :  { %1985 = vmatprep.subr.bf16.mxu1 %v2157_v22  ;;  %v2225_v22 = vld [vmem:[%s2763_s1 + $0x458] sm:$0xff]  }
  0x50   :  { %1964 = vmatpush3.bf16.msra.mxu0 %v2156_v21  ;;  %v2224_v21 = vld [vmem:[%s2763_s1 + $0x410] sm:$0xff]  }
  0x51   :  { %1986 = vmatpush3.bf16.msra.mxu1 %v2158_v23  ;;  %1965 = vmatprep.subr.bf16.mxu0 %v2159_v24  ;;  %v2226_v23 = vld [vmem:[%s2763_s1 + $0x418] sm:$0xff]   ;;  %v2227_v24 = vld [vmem:[%s2763_s1 + $0x460] sm:$0xff]  }
  0x52   :  { %1987 = vmatprep.subr.bf16.mxu1 %v2161_v26  ;;  %v2229_v26 = vld [vmem:[%s2763_s1 + $0x468] sm:$0xff]  }
  0x54   :  { %1966 = vmatpush3.bf16.msra.mxu0 %v2160_v25  ;;  %v2228_v25 = vld [vmem:[%s2763_s1 + $0x420] sm:$0xff]  }
  0x55   :  { %1988 = vmatpush3.bf16.msra.mxu1 %v2162_v27  ;;  %1967 = vmatprep.subr.bf16.mxu0 %v2163_v28  ;;  %v2237_v27 = vld [vmem:[%s2764_s0 + $0x44] ss:$72 sps:$4 sm:$0xff]  }
  0x56   :  { %1989 = vmatprep.subr.bf16.mxu1 %v2165_v30  ;;  %v2230_v28 = vld [vmem:[%s2763_s1 + $0x428] sm:$0xff]   ;;  %v2232_v30 = vld [vmem:[%s2763_s1 + $0x430] sm:$0xff]  }
  0x58   :  { %1968 = vmatpush3.bf16.msra.mxu0 %v2164_v29  ;;  %v2231_v29 = vld [vmem:[%s2763_s1 + $0x470] sm:$0xff]  }
  0x59   :  { %1990 = vmatpush3.bf16.msra.mxu1 %v2166_v31  ;;  %1969 = vmatprep.subr.bf16.mxu0 %v2167_v32  ;;  %v2233_v31 = vld [vmem:[%s2763_s1 + $0x478] sm:$0xff]  }
  0x5a   :  { %1991 = vmatprep.subr.bf16.mxu1 %v2169_v34  ;;  %v2234_v32 = vld [vmem:[%s2763_s1 + $0x438] sm:$0xff]  }
  0x5c   :  { %1970 = vmatpush3.bf16.msra.mxu0 %v2168_v33  ;;  %v2235_v33 = vld [vmem:[%s2764_s0 + $0x40] ss:$72 sps:$4 sm:$0xff]  }
  0x5d   :  { %1992 = vmatpush3.bf16.msra.mxu1 %v2170_v35  ;;  %1971 = vmatprep.subr.bf16.mxu0 %v2171_v36 }
  0x5e   :  { %1993 = vmatprep.subr.bf16.mxu1 %v2173_v38 }
  0x60   :  { %1972 = vmatpush3.bf16.msra.mxu0 %v2172_v37 }
  0x61   :  { %1994 = vmatpush3.bf16.msra.mxu1 %v2177_v41  ;;  %2001 = vmatprep.subr.bf16.mxu0 %v2178_v42 }
  0x62   :  { %2023 = vmatprep.subr.bf16.mxu1 %v2183_v46 }
  0x63   :  { %1475 = vmatmul.mubr.bf16.vlgmr.msra.gmra.mrb[8].mxu0 %v2174_v39 }
  0x64   :  { %2002 = vmatpush3.bf16.msra.mxu0 %v2182_v45  ;;  %1516 = vmatmul.mubr.bf16.vlgmr.msra.gmra.mrb[8].mxu1 %v2179_v43 }
  0x65   :  { %2024 = vmatpush3.bf16.msra.mxu1 %v2184_v47  ;;  %2003 = vmatprep.subr.bf16.mxu0 %v2185_v48 }
  0x66   :  { %2025 = vmatprep.subr.bf16.mxu1 %v2187_v50  ;;  %1556 = vmatprep.mubr.bf16.mxu0 %v2214_v12 }
  0x67   :  { %1597 = vmatprep.mubr.bf16.mxu1 %v2219_v16 }
  0x68   :  { %2004 = vmatpush3.bf16.msra.mxu0 %v2186_v49 }
  0x69   :  { %2026 = vmatpush3.bf16.msra.mxu1 %v2188_v51  ;;  %2005 = vmatprep.subr.bf16.mxu0 %v2189_v52 }
  0x6a   :  { %2027 = vmatprep.subr.bf16.mxu1 %v2191_v54 }
  0x6c   :  { %2006 = vmatpush3.bf16.msra.mxu0 %v2190_v53 }
  0x6d   :  { %2028 = vmatpush3.bf16.msra.mxu1 %v2192_v55  ;;  %2007 = vmatprep.subr.bf16.mxu0 %v2193_v56 }
  0x6e   :  { %2029 = vmatprep.subr.bf16.mxu1 %v2195_v58 }
  0x70   :  { %2008 = vmatpush3.bf16.msra.mxu0 %v2194_v57 }
  0x71   :  { %2030 = vmatpush3.bf16.msra.mxu1 %v2196_v59  ;;  %2009 = vmatprep.subr.bf16.mxu0 %v2197_v60 }
  0x72   :  { %2031 = vmatprep.subr.bf16.mxu1 %v2199_v62 }
  0x74   :  { %2010 = vmatpush3.bf16.msra.mxu0 %v2198_v61 }
  0x75   :  { %2032 = vmatpush3.bf16.msra.mxu1 %v2200_v63  ;;  %2011 = vmatprep.subr.bf16.mxu0 %v2201_v0 }
  0x76   :  { %2033 = vmatprep.subr.bf16.mxu1 %v2203_v2 }
  0x78   :  { %2012 = vmatpush3.bf16.msra.mxu0 %v2202_v1 }
  0x79   :  { %2034 = vmatpush3.bf16.msra.mxu1 %v2204_v3  ;;  %2013 = vmatprep.subr.bf16.mxu0 %v2205_v4 }
  0x7a   :  { %2035 = vmatprep.subr.bf16.mxu1 %v2207_v6 }
  0x7c   :  { %2014 = vmatpush3.bf16.msra.mxu0 %v2206_v5 }
  0x7d   :  { %2036 = vmatpush3.bf16.msra.mxu1 %v2208_v7  ;;  %2015 = vmatprep.subr.bf16.mxu0 %v2209_v8 }
  0x7e   :  { %2037 = vmatprep.subr.bf16.mxu1 %v2211_v10 }
  0x80   :  { %2016 = vmatpush3.bf16.msra.mxu0 %v2210_v9 }
  0x81   :  { %2038 = vmatpush3.bf16.msra.mxu1 %v2215_v13  ;;  %2045 = vmatprep.subr.bf16.mxu0 %v2216_v14 }
  0x83   :  { %1557 = vmatmul.mubr.bf16.vlgmr.msra.gmra.mrb[12].mxu0 %v2212_v11 }
  0x84   :  { %2046 = vmatpush3.bf16.msra.mxu0 %v2220_v17  ;;  %1598 = vmatmul.mubr.bf16.vlgmr.msra.gmra.mrb[12].mxu1 %v2217_v15 }
  0x85   :  { %2047 = vmatprep.subr.bf16.mxu0 %v2221_v18  ;;  %1638 = vmatprep.mubr.bf16.mxu0 %v2237_v27 }
  0x88   :  { %2048 = vmatpush3.bf16.msra.mxu0 %v2222_v19 }
  0x89   :  { %2049 = vmatprep.subr.bf16.mxu0 %v2223_v20 }
  0x8c   :  { %2050 = vmatpush3.bf16.msra.mxu0 %v2224_v21 }
  0x8d   :  { %2051 = vmatprep.subr.bf16.mxu0 %v2225_v22 }
  0x90   :  { %2052 = vmatpush3.bf16.msra.mxu0 %v2226_v23 }
  0x91   :  { %2053 = vmatprep.subr.bf16.mxu0 %v2227_v24 }
  0x94   :  { %2054 = vmatpush3.bf16.msra.mxu0 %v2228_v25 }
  0x95   :  { %2055 = vmatprep.subr.bf16.mxu0 %v2229_v26 }
  0x98   :  { %2056 = vmatpush3.bf16.msra.mxu0 %v2230_v28 }
  0x99   :  { %2057 = vmatprep.subr.bf16.mxu0 %v2231_v29 }
  0x9c   :  { %2058 = vmatpush3.bf16.msra.mxu0 %v2232_v30 }
  0x9d   :  { %2059 = vmatprep.subr.bf16.mxu0 %v2233_v31 }
  0xa0   :  { %2060 = vmatpush3.bf16.msra.mxu0 %v2234_v32 }
  0xa3   :  { %1639 = vmatmul.mubr.bf16.vlgmr.msra.gmra.mrb[16].mxu0 %v2235_v33 }
  0xf6   :  { %v1885_v34 = vpop.f32.mrb[0].mxu0 }
  0xf7   :  { %v1907_v35 = vpop.f32.mrb[0].mxu1  ;;  %v1886_v36 = vpop.f32.mrb[1].mxu0 }
  0xf8   :  { %v1887_v37 = vadd.f32 %v1886_v36, %v1885_v34  ;;  %v1908_v38 = vpop.f32.mrb[1].mxu1  ;;  %v1888_v39 = vpop.f32.mrb[2].mxu0 }
  0xf9   :  { %v1909_v40 = vadd.f32 %v1908_v38, %v1907_v35  ;;  %v1910_v41 = vpop.f32.mrb[2].mxu1  ;;  %v1889_v42 = vpop.f32.mrb[3].mxu0 }
  0xfa   :  { %v1890_v43 = vadd.f32 %v1889_v42, %v1888_v39  ;;  %v1911_v44 = vpop.f32.mrb[3].mxu1 }
  0xfb   :  { %v1354_v45 = vadd.f32 %v1909_v40, %v1887_v37  ;;  %v1912_v46 = vadd.f32 %v1911_v44, %v1910_v41 }
  0xfd   :  { %v1357_v47 = vadd.f32 %v1912_v46, %v1890_v43 }
 0x116   :  { %v1929_v48 = vpop.f32.mrb[4].mxu0 }
 0x117   :  { %v1930_v49 = vpop.f32.mrb[5].mxu0  ;;  %v1951_v54 = vpop.f32.mrb[4].mxu1 }
 0x118   :  { %v1931_v50 = vadd.f32 %v1930_v49, %v1929_v48  ;;  %v1932_v51 = vpop.f32.mrb[6].mxu0  ;;  %v1952_v56 = vpop.f32.mrb[5].mxu1 }
 0x119   :  { %v1933_v52 = vpop.f32.mrb[7].mxu0  ;;  %v1953_v58 = vadd.f32 %v1952_v56, %v1951_v54  ;;  %v1954_v59 = vpop.f32.mrb[6].mxu1 }
 0x11a   :  { %v1395_v53 = vadd.f32 %v1931_v50, %v1354_v45  ;;  %v1934_v55 = vadd.f32 %v1933_v52, %v1932_v51  ;;  %v1955_v60 = vpop.f32.mrb[7].mxu1 }
 0x11b   :  { %v1956_v62 = vadd.f32 %v1955_v60, %v1954_v59 }
 0x11c   :  { %v1398_v57 = vadd.f32 %v1934_v55, %v1357_v47  ;;  %v1436_v61 = vadd.f32 %v1953_v58, %v1395_v53 }
 0x11e   :  { %v1439_v63 = vadd.f32 %v1956_v62, %v1398_v57 }
 0x136   :  { %v1973_v0 = vpop.f32.mrb[8].mxu0 }
 0x137   :  { %v1974_v1 = vpop.f32.mrb[9].mxu0  ;;  %v1995_v4 = vpop.f32.mrb[8].mxu1 }
 0x138   :  { %v1975_v2 = vadd.f32 %v1974_v1, %v1973_v0  ;;  %v1976_v3 = vpop.f32.mrb[10].mxu0  ;;  %v1996_v8 = vpop.f32.mrb[9].mxu1 }
 0x139   :  { %v1977_v5 = vpop.f32.mrb[11].mxu0  ;;  %v1997_v9 = vadd.f32 %v1996_v8, %v1995_v4  ;;  %v1998_v10 = vpop.f32.mrb[10].mxu1 }
 0x13a   :  { %v1477_v6 = vadd.f32 %v1975_v2, %v1436_v61  ;;  %v1978_v7 = vadd.f32 %v1977_v5, %v1976_v3  ;;  %v1999_v12 = vpop.f32.mrb[11].mxu1  ;;  %v1682_v61 = vlaneseq  ;;  %v1678_v3 = vld [vmem:[%s2766_s3] sm:$0x1] }
 0x13b   :  { %v2000_v14 = vadd.f32 %v1999_v12, %v1998_v10 }
 0x13c   :  { %v1480_v11 = vadd.f32 %v1978_v7, %v1439_v63  ;;  %v1518_v13 = vadd.f32 %v1997_v9, %v1477_v6  ;;  %v1683_v62 = vshrl.u32 %v1682_v61, 7  ;;  %v1674_v63 = vld [vmem:[%s2765_s2] sm:$0x1] }
 0x13e   :  { %v1521_v15 = vadd.f32 %v2000_v14, %v1480_v11  ;;  %v1684_v0 = vsub.s32 0, %v1683_v62 }
 0x156   :  { %v2017_v16 = vpop.f32.mrb[12].mxu0 }
 0x157   :  { %v2018_v17 = vpop.f32.mrb[13].mxu0  ;;  %v2039_v20 = vpop.f32.mrb[12].mxu1 }
 0x158   :  { %v2019_v18 = vadd.f32 %v2018_v17, %v2017_v16  ;;  %v2020_v19 = vpop.f32.mrb[14].mxu0  ;;  %v2040_v24 = vpop.f32.mrb[13].mxu1 }
 0x159   :  { %v2021_v21 = vpop.f32.mrb[15].mxu0  ;;  %v2041_v25 = vadd.f32 %v2040_v24, %v2039_v20  ;;  %v2042_v26 = vpop.f32.mrb[14].mxu1 }
 0x15a   :  { %v1559_v22 = vadd.f32 %v2019_v18, %v1518_v13  ;;  %v2022_v23 = vadd.f32 %v2021_v21, %v2020_v19  ;;  %v2043_v28 = vpop.f32.mrb[15].mxu1 }
 0x15b   :  { %v2044_v30 = vadd.f32 %v2043_v28, %v2042_v26 }
 0x15c   :  { %v1562_v27 = vadd.f32 %v2022_v23, %v1521_v15  ;;  %v1600_v29 = vadd.f32 %v2041_v25, %v1559_v22 }
 0x15e   :  { %v1603_v31 = vadd.f32 %v2044_v30, %v1562_v27 }
 0x176   :  { %v2061_v32 = vpop.f32.mrb[16].mxu0 }
 0x177   :  { %v2062_v33 = vpop.f32.mrb[17].mxu0 }
 0x178   :  { %v2063_v34 = vadd.f32 %v2062_v33, %v2061_v32  ;;  %v2064_v35 = vpop.f32.mrb[18].mxu0 }
 0x179   :  { %v2065_v36 = vpop.f32.mrb[19].mxu0 }
 0x17a   :  { %v1641_v37 = vadd.f32 %v2063_v34, %v1600_v29  ;;  %v2066_v38 = vadd.f32 %v2065_v36, %v2064_v35 }
 0x17c   :  { %v1644_v39 = vadd.f32 %v2066_v38, %v1603_v31 }
 0x17e   :  { %v1652_v40 = vadd.f32 %v1644_v39, %v1641_v37 }
 0x180   :  { %v1653_v41 = vrot.slane %v1652_v40, 4 }
 0x182   :  { %v1654_v42 = vadd.f32 %v1653_v41, %v1652_v40 }
 0x184   :  { %v1655_v43 = vrot.slane %v1654_v42, 2 }
 0x186   :  { %v1656_v44 = vadd.f32 %v1655_v43, %v1654_v42 }
 0x188   :  { %v1657_v45 = vrot.slane %v1656_v44, 1 }
 0x18a   :  { %v1658_v46 = vadd.f32 %v1657_v45, %v1656_v44 }
 0x18c   :  { %v1659_v47 = vmul.f32 0.0625, %v1658_v46 }
 0x18e   :  { %v1660_v48 = vsub.f32 %v1641_v37, %v1659_v47  ;;  %v1661_v49 = vsub.f32 %v1644_v39, %v1659_v47 }
 0x190   :  { %v1664_v50 = vmul.f32 %v1660_v48, %v1660_v48  ;;  %v1665_v51 = vmul.f32 %v1661_v49, %v1661_v49 }
 0x192   :  { %v1666_v52 = vadd.f32 %v1665_v51, %v1664_v50 }
 0x194   :  { %v1667_v53 = vrot.slane %v1666_v52, 4 }
 0x196   :  { %v1668_v54 = vadd.f32 %v1667_v53, %v1666_v52 }
 0x198   :  { %v1669_v55 = vrot.slane %v1668_v54, 2 }
 0x19a   :  { %v1670_v56 = vadd.f32 %v1669_v55, %v1668_v54 }
 0x19c   :  { %v1671_v57 = vrot.slane %v1670_v56, 1 }
 0x19e   :  { %v1672_v58 = vadd.f32 %v1671_v57, %v1670_v56 }
 0x1a0   :  { %v1673_v59 = vmul.f32 0.0625, %v1672_v58 }
 0x1a2   :  { %v1675_v60 = vadd.f32 1e-05, %v1673_v59 }
 0x1a4   :  { %2238 = vrsqrt.f32 %v1675_v60 }
 0x1ae   :  { %v2239_v1 = vpop.eup %2238 }
 0x1af   :  { %v1677_v2 = vmul.f32 %v2239_v1, %v1674_v63 }
 0x1b1   :  { %v1679_v4 = vmul.f32 %v1677_v2, %v1659_v47  ;;  %v1685_v5 = vrot.slane %v1677_v2, %v1684_v0 }
 0x1b3   :  { %v1680_v6 = vsub.f32 %v1678_v3, %v1679_v4  ;;  %v1687_v7 = vmul.f32 %v1685_v5, %v1641_v37  ;;  %v1688_v8 = vmul.f32 %v1685_v5, %v1644_v39 }
 0x1b5   :  { %v1693_v9 = vrot.slane %v1680_v6, %v1684_v0 }
 0x1b7   :  { %v1695_v10 = vadd.f32 %v1693_v9, %v1687_v7  ;;  %v1696_v11 = vadd.f32 %v1693_v9, %v1688_v8 }
 0x1b9   :  { %v1697_v12 = vmax.f32 %v1695_v10, 0.0  ;;  %v1698_v13 = vmax.f32 %v1696_v11, 0.0 }
 0x1bb   :  { %1701 = vst [vmem:[%s2767_s4] sm:$0xff] %v1697_v12  ;;  %1702 = vst [vmem:[%s2767_s4 + $0x8] sm:$0xff] %v1698_v13 }

</bundles_post_ra>
